<compile_context>
chip_gen: v6e
topology: v6e:2x2x1
jax: 0.10.0
libtpu: 0.0.40
codegen_flags: <defaults>
</compile_context>

<pallas_src>
import numpy as np
import jax
import jax.numpy as jnp
from jax.experimental import pallas as pl
from jax.experimental.pallas import tpu as pltpu


PADS = [(2, 3), (2, 3, 4, 5), (2, 3, 4, 5, 6, 7)]
MODES = ("constant", "reflect", "replicate", "circular")


def _axis_index_map(W, p_l, p_r, mode):
    """Static torch-F.pad source-index map along one axis (length W+p_l+p_r)."""
    o = np.arange(W + p_l + p_r)
    i = o - p_l
    if mode in ("constant", "replicate"):
        idx = np.clip(i, 0, W - 1)
    elif mode == "circular":
        idx = np.mod(i, W)
    elif mode == "reflect":
        j = np.mod(i, 2 * (W - 1)) if W > 1 else np.zeros_like(i)
        idx = np.where(j >= W, 2 * (W - 1) - j, j)
    else:
        raise ValueError(mode)
    return idx.astype(np.int64)


def _pad_plan(x_shape, pad, mode, value):
    """Returns (out_shape, emit) where emit(x_ref, o_ref) writes the padded output
    using only static slice loads/stores (all indices resolved at trace time)."""
    ndim = len(x_shape)
    n = len(pad) // 2
    pads = [(0, 0)] * ndim
    for k in range(n):
        pads[ndim - 1 - k] = (int(pad[2 * k]), int(pad[2 * k + 1]))
    out_shape = tuple(d + a + b for d, (a, b) in zip(x_shape, pads))
    # center block of the output = where the original input lands
    center = tuple(slice(pads[a][0], pads[a][0] + x_shape[a]) for a in range(ndim))

    def emit(x_ref, o_ref):
        if mode == "constant":
            o_ref[...] = jnp.full(out_shape, value, o_ref.dtype)
            o_ref[center] = x_ref[...]
            return

        # step 0: place the input in the center block
        o_ref[center] = x_ref[...]

        # pad each axis, minor-most padded axis first (== torch sequential F.pad)
        for k in range(n):
            axis = ndim - 1 - k
            p_l, p_r = pads[axis]
            if p_l == 0 and p_r == 0:
                continue
            W = x_shape[axis]
            idx = _axis_index_map(W, p_l, p_r, mode)

            # slice template for the non-`axis` dims:
            #  - axes already padded (more minor): full output extent
            #  - padded axes not yet processed: center slice
            #  - never-padded leading axes: full extent
            base = []
            for a in range(ndim):
                if a == axis:
                    base.append(None)
                elif a > axis:
                    base.append(slice(0, out_shape[a]))
                elif pads[a] != (0, 0):
                    base.append(center[a])
                else:
                    base.append(slice(0, out_shape[a]))

            Wo = W + p_l + p_r
            for o in range(Wo):
                if p_l <= o < p_l + W:
                    continue  # center already in place
                src = p_l + int(idx[o])  # source position in OUTPUT coordinates
                dst = tuple(slice(o, o + 1) if a == axis else base[a]
                            for a in range(ndim))
                srs = tuple(slice(src, src + 1) if a == axis else base[a]
                            for a in range(ndim))
                o_ref[dst] = o_ref[srs]

    return out_shape, emit


def _build_fused_call(in_shapes, dtype):
    """Single pallas_call: 4 VMEM inputs (x1, x1d, x2d, x3d) -> 12 VMEM outputs."""
    plans = []
    out_shapes = []
    for x_idx, padt in zip((1, 2, 3), PADS):
        for mode in MODES:
            src = 0 if mode == "constant" else x_idx  # constant pads the GLOBAL x1
            value = 42.0 if mode == "constant" else 0.0
            oshape, emit = _pad_plan(in_shapes[src], padt, mode, value)
            plans.append((src, emit))
            out_shapes.append(jax.ShapeDtypeStruct(oshape, dtype))

    def kernel(*refs):
        x_refs = refs[:4]
        out_refs = refs[4:]
        for (src, emit), o_ref in zip(plans, out_refs):
            emit(x_refs[src], o_ref)

    vmem = pltpu.MemorySpace.VMEM
    return pl.pallas_call(
        kernel,
        out_shape=tuple(out_shapes),
        in_specs=[pl.BlockSpec(memory_space=vmem)] * 4,
        out_specs=tuple(pl.BlockSpec(memory_space=vmem) for _ in out_shapes),
    )


@jax.jit
def my_module_forward(x1, x1d, x2d, x3d):
    call = _build_fused_call(
        (x1.shape, x1d.shape, x2d.shape, x3d.shape), x1.dtype)
    return list(call(x1, x1d, x2d, x3d))


# ---------------------------------------------------------------------------
# Pure-JAX reference (for the runtime correctness check only).
def _ref_pad(x, pad, mode, value=0.0):
    pw = [(0, 0)] * x.ndim
    for k in range(len(pad) // 2):
        pw[x.ndim - 1 - k] = (pad[2 * k], pad[2 * k + 1])
    if mode == "constant":
        return jnp.pad(x, pw, mode="constant", constant_values=value)
    m = {"reflect": "reflect", "replicate": "edge", "circular": "wrap"}[mode]
    return jnp.pad(x, pw, mode=m)


if __name__ == "__main__":
    key = jax.random.PRNGKey(0)
    k1, k2, k3, k4 = jax.random.split(key, 4)
    # global tensor from the module file (torch.normal(0,1,(1,3,128)))
    x1 = jax.random.normal(k1, (1, 3, 128), jnp.float32)
    # small channel-first inputs consistent with the forward (3D / 4D / 5D)
    x1d = jax.random.normal(k2, (1, 3, 16), jnp.float32)
    x2d = jax.random.normal(k3, (1, 3, 8, 16), jnp.float32)
    x3d = jax.random.normal(k4, (1, 2, 8, 8, 8), jnp.float32)

    outs = my_module_forward(x1, x1d, x2d, x3d)
    jax.block_until_ready(outs)

    # correctness check against jnp.pad references
    i_out = 0
    for x, pad in zip([x1d, x2d, x3d], PADS):
        refs = [
            _ref_pad(x1, pad, "constant", 42.0),
            _ref_pad(x, pad, "reflect"),
            _ref_pad(x, pad, "replicate"),
            _ref_pad(x, pad, "circular"),
        ]
        for r in refs:
            np.testing.assert_allclose(
                np.asarray(outs[i_out]), np.asarray(r), atol=1e-6)
            i_out += 1

    print("KERNEL_OK")
</pallas_src>

<mosaic_0001>
module attributes {stable_mosaic.version = 11 : i64} {
  func.func @kernel(%arg0: memref<1x3x128xf32, #tpu.memory_space<vmem>>, %arg1: memref<1x3x16xf32, #tpu.memory_space<vmem>>, %arg2: memref<1x3x8x16xf32, #tpu.memory_space<vmem>>, %arg3: memref<1x2x8x8x8xf32, #tpu.memory_space<vmem>>, %arg4: memref<1x3x133xf32, #tpu.memory_space<vmem>>, %arg5: memref<1x3x21xf32, #tpu.memory_space<vmem>>, %arg6: memref<1x3x21xf32, #tpu.memory_space<vmem>>, %arg7: memref<1x3x21xf32, #tpu.memory_space<vmem>>, %arg8: memref<1x12x133xf32, #tpu.memory_space<vmem>>, %arg9: memref<1x3x17x21xf32, #tpu.memory_space<vmem>>, %arg10: memref<1x3x17x21xf32, #tpu.memory_space<vmem>>, %arg11: memref<1x3x17x21xf32, #tpu.memory_space<vmem>>, %arg12: memref<14x12x133xf32, #tpu.memory_space<vmem>>, %arg13: memref<1x2x21x17x13xf32, #tpu.memory_space<vmem>>, %arg14: memref<1x2x21x17x13xf32, #tpu.memory_space<vmem>>, %arg15: memref<1x2x21x17x13xf32, #tpu.memory_space<vmem>>) attributes {dimension_semantics = [], scalar_prefetch = 0 : i64, scratch_operands = 0 : i64, tpu.core_type = #tpu.core_type<tc>} {
    %cst = arith.constant 4.200000e+01 : f32
    %0 = vector.broadcast %cst : f32 to vector<1x3x133xf32>
    %c0 = arith.constant 0 : index
    %c0_0 = arith.constant 0 : index
    %c0_1 = arith.constant 0 : index
    %1 = vector.load %arg4[%c0, %c0_0, %c0_1] : memref<1x3x133xf32, #tpu.memory_space<vmem>>, vector<1x3x133xf32>
    tpu.vector_store %arg4[%c0, %c0_0, %c0_1], %0 {strides = array<i32>} : memref<1x3x133xf32, #tpu.memory_space<vmem>>, vector<1x3x133xf32>,
    %c0_2 = arith.constant 0 : index
    %c0_3 = arith.constant 0 : index
    %c0_4 = arith.constant 0 : index
    %2 = vector.load %arg0[%c0_2, %c0_3, %c0_4] : memref<1x3x128xf32, #tpu.memory_space<vmem>>, vector<1x3x128xf32>
    %c0_5 = arith.constant 0 : index
    %c0_6 = arith.constant 0 : index
    %c2 = arith.constant 2 : index
    %3 = vector.load %arg4[%c0_5, %c0_6, %c2] : memref<1x3x133xf32, #tpu.memory_space<vmem>>, vector<1x3x128xf32>
    tpu.vector_store %arg4[%c0_5, %c0_6, %c2], %2 {strides = array<i32>} : memref<1x3x133xf32, #tpu.memory_space<vmem>>, vector<1x3x128xf32>,
    %c0_7 = arith.constant 0 : index
    %c0_8 = arith.constant 0 : index
    %c0_9 = arith.constant 0 : index
    %4 = vector.load %arg1[%c0_7, %c0_8, %c0_9] : memref<1x3x16xf32, #tpu.memory_space<vmem>>, vector<1x3x16xf32>
    %c0_10 = arith.constant 0 : index
    %c0_11 = arith.constant 0 : index
    %c2_12 = arith.constant 2 : index
    %5 = vector.load %arg5[%c0_10, %c0_11, %c2_12] : memref<1x3x21xf32, #tpu.memory_space<vmem>>, vector<1x3x16xf32>
    tpu.vector_store %arg5[%c0_10, %c0_11, %c2_12], %4 {strides = array<i32>} : memref<1x3x21xf32, #tpu.memory_space<vmem>>, vector<1x3x16xf32>,
    %c0_13 = arith.constant 0 : index
    %c0_14 = arith.constant 0 : index
    %c4 = arith.constant 4 : index
    %6 = vector.load %arg5[%c0_13, %c0_14, %c4] : memref<1x3x21xf32, #tpu.memory_space<vmem>>, vector<1x3x1xf32>
    %c0_15 = arith.constant 0 : index
    %c0_16 = arith.constant 0 : index
    %c0_17 = arith.constant 0 : index
    %7 = vector.load %arg5[%c0_15, %c0_16, %c0_17] : memref<1x3x21xf32, #tpu.memory_space<vmem>>, vector<1x3x1xf32>
    tpu.vector_store %arg5[%c0_15, %c0_16, %c0_17], %6 {strides = array<i32>} : memref<1x3x21xf32, #tpu.memory_space<vmem>>, vector<1x3x1xf32>,
    %c0_18 = arith.constant 0 : index
    %c0_19 = arith.constant 0 : index
    %c3 = arith.constant 3 : index
    %8 = vector.load %arg5[%c0_18, %c0_19, %c3] : memref<1x3x21xf32, #tpu.memory_space<vmem>>, vector<1x3x1xf32>
    %c0_20 = arith.constant 0 : index
    %c0_21 = arith.constant 0 : index
    %c1 = arith.constant 1 : index
    %9 = vector.load %arg5[%c0_20, %c0_21, %c1] : memref<1x3x21xf32, #tpu.memory_space<vmem>>, vector<1x3x1xf32>
    tpu.vector_store %arg5[%c0_20, %c0_21, %c1], %8 {strides = array<i32>} : memref<1x3x21xf32, #tpu.memory_space<vmem>>, vector<1x3x1xf32>,
    %c0_22 = arith.constant 0 : index
    %c0_23 = arith.constant 0 : index
    %c16 = arith.constant 16 : index
    %10 = vector.load %arg5[%c0_22, %c0_23, %c16] : memref<1x3x21xf32, #tpu.memory_space<vmem>>, vector<1x3x1xf32>
    %c0_24 = arith.constant 0 : index
    %c0_25 = arith.constant 0 : index
    %c18 = arith.constant 18 : index
    %11 = vector.load %arg5[%c0_24, %c0_25, %c18] : memref<1x3x21xf32, #tpu.memory_space<vmem>>, vector<1x3x1xf32>
    tpu.vector_store %arg5[%c0_24, %c0_25, %c18], %10 {strides = array<i32>} : memref<1x3x21xf32, #tpu.memory_space<vmem>>, vector<1x3x1xf32>,
    %c0_26 = arith.constant 0 : index
    %c0_27 = arith.constant 0 : index
    %c15 = arith.constant 15 : index
    %12 = vector.load %arg5[%c0_26, %c0_27, %c15] : memref<1x3x21xf32, #tpu.memory_space<vmem>>, vector<1x3x1xf32>
    %c0_28 = arith.constant 0 : index
    %c0_29 = arith.constant 0 : index
    %c19 = arith.constant 19 : index
    %13 = vector.load %arg5[%c0_28, %c0_29, %c19] : memref<1x3x21xf32, #tpu.memory_space<vmem>>, vector<1x3x1xf32>
    tpu.vector_store %arg5[%c0_28, %c0_29, %c19], %12 {strides = array<i32>} : memref<1x3x21xf32, #tpu.memory_space<vmem>>, vector<1x3x1xf32>,
    %c0_30 = arith.constant 0 : index
    %c0_31 = arith.constant 0 : index
    %c14 = arith.constant 14 : index
    %14 = vector.load %arg5[%c0_30, %c0_31, %c14] : memref<1x3x21xf32, #tpu.memory_space<vmem>>, vector<1x3x1xf32>
    %c0_32 = arith.constant 0 : index
    %c0_33 = arith.constant 0 : index
    %c20 = arith.constant 20 : index
    %15 = vector.load %arg5[%c0_32, %c0_33, %c20] : memref<1x3x21xf32, #tpu.memory_space<vmem>>, vector<1x3x1xf32>
    tpu.vector_store %arg5[%c0_32, %c0_33, %c20], %14 {strides = array<i32>} : memref<1x3x21xf32, #tpu.memory_space<vmem>>, vector<1x3x1xf32>,
    %c0_34 = arith.constant 0 : index
    %c0_35 = arith.constant 0 : index
    %c0_36 = arith.constant 0 : index
    %16 = vector.load %arg1[%c0_34, %c0_35, %c0_36] : memref<1x3x16xf32, #tpu.memory_space<vmem>>, vector<1x3x16xf32>
    %c0_37 = arith.constant 0 : index
    %c0_38 = arith.constant 0 : index
    %c2_39 = arith.constant 2 : index
    %17 = vector.load %arg6[%c0_37, %c0_38, %c2_39] : memref<1x3x21xf32, #tpu.memory_space<vmem>>, vector<1x3x16xf32>
    tpu.vector_store %arg6[%c0_37, %c0_38, %c2_39], %16 {strides = array<i32>} : memref<1x3x21xf32, #tpu.memory_space<vmem>>, vector<1x3x16xf32>,
    %c0_40 = arith.constant 0 : index
    %c0_41 = arith.constant 0 : index
    %c2_42 = arith.constant 2 : index
    %18 = vector.load %arg6[%c0_40, %c0_41, %c2_42] : memref<1x3x21xf32, #tpu.memory_space<vmem>>, vector<1x3x1xf32>
    %c0_43 = arith.constant 0 : index
    %c0_44 = arith.constant 0 : index
    %c0_45 = arith.constant 0 : index
    %19 = vector.load %arg6[%c0_43, %c0_44, %c0_45] : memref<1x3x21xf32, #tpu.memory_space<vmem>>, vector<1x3x1xf32>
    tpu.vector_store %arg6[%c0_43, %c0_44, %c0_45], %18 {strides = array<i32>} : memref<1x3x21xf32, #tpu.memory_space<vmem>>, vector<1x3x1xf32>,
    %c0_46 = arith.constant 0 : index
    %c0_47 = arith.constant 0 : index
    %c2_48 = arith.constant 2 : index
    %20 = vector.load %arg6[%c0_46, %c0_47, %c2_48] : memref<1x3x21xf32, #tpu.memory_space<vmem>>, vector<1x3x1xf32>
    %c0_49 = arith.constant 0 : index
    %c0_50 = arith.constant 0 : index
    %c1_51 = arith.constant 1 : index
    %21 = vector.load %arg6[%c0_49, %c0_50, %c1_51] : memref<1x3x21xf32, #tpu.memory_space<vmem>>, vector<1x3x1xf32>
    tpu.vector_store %arg6[%c0_49, %c0_50, %c1_51], %20 {strides = array<i32>} : memref<1x3x21xf32, #tpu.memory_space<vmem>>, vector<1x3x1xf32>,
    %c0_52 = arith.constant 0 : index
    %c0_53 = arith.constant 0 : index
    %c17 = arith.constant 17 : index
    %22 = vector.load %arg6[%c0_52, %c0_53, %c17] : memref<1x3x21xf32, #tpu.memory_space<vmem>>, vector<1x3x1xf32>
    %c0_54 = arith.constant 0 : index
    %c0_55 = arith.constant 0 : index
    %c18_56 = arith.constant 18 : index
    %23 = vector.load %arg6[%c0_54, %c0_55, %c18_56] : memref<1x3x21xf32, #tpu.memory_space<vmem>>, vector<1x3x1xf32>
    tpu.vector_store %arg6[%c0_54, %c0_55, %c18_56], %22 {strides = array<i32>} : memref<1x3x21xf32, #tpu.memory_space<vmem>>, vector<1x3x1xf32>,
    %c0_57 = arith.constant 0 : index
    %c0_58 = arith.constant 0 : index
    %c17_59 = arith.constant 17 : index
    %24 = vector.load %arg6[%c0_57, %c0_58, %c17_59] : memref<1x3x21xf32, #tpu.memory_space<vmem>>, vector<1x3x1xf32>
    %c0_60 = arith.constant 0 : index
    %c0_61 = arith.constant 0 : index
    %c19_62 = arith.constant 19 : index
    %25 = vector.load %arg6[%c0_60, %c0_61, %c19_62] : memref<1x3x21xf32, #tpu.memory_space<vmem>>, vector<1x3x1xf32>
    tpu.vector_store %arg6[%c0_60, %c0_61, %c19_62], %24 {strides = array<i32>} : memref<1x3x21xf32, #tpu.memory_space<vmem>>, vector<1x3x1xf32>,
    %c0_63 = arith.constant 0 : index
    %c0_64 = arith.constant 0 : index
    %c17_65 = arith.constant 17 : index
    %26 = vector.load %arg6[%c0_63, %c0_64, %c17_65] : memref<1x3x21xf32, #tpu.memory_space<vmem>>, vector<1x3x1xf32>
    %c0_66 = arith.constant 0 : index
    %c0_67 = arith.constant 0 : index
    %c20_68 = arith.constant 20 : index
    %27 = vector.load %arg6[%c0_66, %c0_67, %c20_68] : memref<1x3x21xf32, #tpu.memory_space<vmem>>, vector<1x3x1xf32>
    tpu.vector_store %arg6[%c0_66, %c0_67, %c20_68], %26 {strides = array<i32>} : memref<1x3x21xf32, #tpu.memory_space<vmem>>, vector<1x3x1xf32>,
    %c0_69 = arith.constant 0 : index
    %c0_70 = arith.constant 0 : index
    %c0_71 = arith.constant 0 : index
    %28 = vector.load %arg1[%c0_69, %c0_70, %c0_71] : memref<1x3x16xf32, #tpu.memory_space<vmem>>, vector<1x3x16xf32>
    %c0_72 = arith.constant 0 : index
    %c0_73 = arith.constant 0 : index
    %c2_74 = arith.constant 2 : index
    %29 = vector.load %arg7[%c0_72, %c0_73, %c2_74] : memref<1x3x21xf32, #tpu.memory_space<vmem>>, vector<1x3x16xf32>
    tpu.vector_store %arg7[%c0_72, %c0_73, %c2_74], %28 {strides = array<i32>} : memref<1x3x21xf32, #tpu.memory_space<vmem>>, vector<1x3x16xf32>,
    %c0_75 = arith.constant 0 : index
    %c0_76 = arith.constant 0 : index
    %c16_77 = arith.constant 16 : index
    %30 = vector.load %arg7[%c0_75, %c0_76, %c16_77] : memref<1x3x21xf32, #tpu.memory_space<vmem>>, vector<1x3x1xf32>
    %c0_78 = arith.constant 0 : index
    %c0_79 = arith.constant 0 : index
    %c0_80 = arith.constant 0 : index
    %31 = vector.load %arg7[%c0_78, %c0_79, %c0_80] : memref<1x3x21xf32, #tpu.memory_space<vmem>>, vector<1x3x1xf32>
    tpu.vector_store %arg7[%c0_78, %c0_79, %c0_80], %30 {strides = array<i32>} : memref<1x3x21xf32, #tpu.memory_space<vmem>>, vector<1x3x1xf32>,
    %c0_81 = arith.constant 0 : index
    %c0_82 = arith.constant 0 : index
    %c17_83 = arith.constant 17 : index
    %32 = vector.load %arg7[%c0_81, %c0_82, %c17_83] : memref<1x3x21xf32, #tpu.memory_space<vmem>>, vector<1x3x1xf32>
    %c0_84 = arith.constant 0 : index
    %c0_85 = arith.constant 0 : index
    %c1_86 = arith.constant 1 : index
    %33 = vector.load %arg7[%c0_84, %c0_85, %c1_86] : memref<1x3x21xf32, #tpu.memory_space<vmem>>, vector<1x3x1xf32>
    tpu.vector_store %arg7[%c0_84, %c0_85, %c1_86], %32 {strides = array<i32>} : memref<1x3x21xf32, #tpu.memory_space<vmem>>, vector<1x3x1xf32>,
    %c0_87 = arith.constant 0 : index
    %c0_88 = arith.constant 0 : index
    %c2_89 = arith.constant 2 : index
    %34 = vector.load %arg7[%c0_87, %c0_88, %c2_89] : memref<1x3x21xf32, #tpu.memory_space<vmem>>, vector<1x3x1xf32>
    %c0_90 = arith.constant 0 : index
    %c0_91 = arith.constant 0 : index
    %c18_92 = arith.constant 18 : index
    %35 = vector.load %arg7[%c0_90, %c0_91, %c18_92] : memref<1x3x21xf32, #tpu.memory_space<vmem>>, vector<1x3x1xf32>
    tpu.vector_store %arg7[%c0_90, %c0_91, %c18_92], %34 {strides = array<i32>} : memref<1x3x21xf32, #tpu.memory_space<vmem>>, vector<1x3x1xf32>,
    %c0_93 = arith.constant 0 : index
    %c0_94 = arith.constant 0 : index
    %c3_95 = arith.constant 3 : index
    %36 = vector.load %arg7[%c0_93, %c0_94, %c3_95] : memref<1x3x21xf32, #tpu.memory_space<vmem>>, vector<1x3x1xf32>
    %c0_96 = arith.constant 0 : index
    %c0_97 = arith.constant 0 : index
    %c19_98 = arith.constant 19 : index
    %37 = vector.load %arg7[%c0_96, %c0_97, %c19_98] : memref<1x3x21xf32, #tpu.memory_space<vmem>>, vector<1x3x1xf32>
    tpu.vector_store %arg7[%c0_96, %c0_97, %c19_98], %36 {strides = array<i32>} : memref<1x3x21xf32, #tpu.memory_space<vmem>>, vector<1x3x1xf32>,
    %c0_99 = arith.constant 0 : index
    %c0_100 = arith.constant 0 : index
    %c4_101 = arith.constant 4 : index
    %38 = vector.load %arg7[%c0_99, %c0_100, %c4_101] : memref<1x3x21xf32, #tpu.memory_space<vmem>>, vector<1x3x1xf32>
    %c0_102 = arith.constant 0 : index
    %c0_103 = arith.constant 0 : index
    %c20_104 = arith.constant 20 : index
    %39 = vector.load %arg7[%c0_102, %c0_103, %c20_104] : memref<1x3x21xf32, #tpu.memory_space<vmem>>, vector<1x3x1xf32>
    tpu.vector_store %arg7[%c0_102, %c0_103, %c20_104], %38 {strides = array<i32>} : memref<1x3x21xf32, #tpu.memory_space<vmem>>, vector<1x3x1xf32>,
    %cst_105 = arith.constant 4.200000e+01 : f32
    %40 = vector.broadcast %cst_105 : f32 to vector<1x12x133xf32>
    %c0_106 = arith.constant 0 : index
    %c0_107 = arith.constant 0 : index
    %c0_108 = arith.constant 0 : index
    %41 = vector.load %arg8[%c0_106, %c0_107, %c0_108] : memref<1x12x133xf32, #tpu.memory_space<vmem>>, vector<1x12x133xf32>
    tpu.vector_store %arg8[%c0_106, %c0_107, %c0_108], %40 {strides = array<i32>} : memref<1x12x133xf32, #tpu.memory_space<vmem>>, vector<1x12x133xf32>,
    %c0_109 = arith.constant 0 : index
    %c0_110 = arith.constant 0 : index
    %c0_111 = arith.constant 0 : index
    %42 = vector.load %arg0[%c0_109, %c0_110, %c0_111] : memref<1x3x128xf32, #tpu.memory_space<vmem>>, vector<1x3x128xf32>
    %c0_112 = arith.constant 0 : index
    %c4_113 = arith.constant 4 : index
    %c2_114 = arith.constant 2 : index
    %43 = vector.load %arg8[%c0_112, %c4_113, %c2_114] : memref<1x12x133xf32, #tpu.memory_space<vmem>>, vector<1x3x128xf32>
    tpu.vector_store %arg8[%c0_112, %c4_113, %c2_114], %42 {strides = array<i32>} : memref<1x12x133xf32, #tpu.memory_space<vmem>>, vector<1x3x128xf32>,
    %c0_115 = arith.constant 0 : index
    %c0_116 = arith.constant 0 : index
    %c0_117 = arith.constant 0 : index
    %c0_118 = arith.constant 0 : index
    %44 = vector.load %arg2[%c0_115, %c0_116, %c0_117, %c0_118] : memref<1x3x8x16xf32, #tpu.memory_space<vmem>>, vector<1x3x8x16xf32>
    %c0_119 = arith.constant 0 : index
    %c0_120 = arith.constant 0 : index
    %c4_121 = arith.constant 4 : index
    %c2_122 = arith.constant 2 : index
    %45 = vector.load %arg9[%c0_119, %c0_120, %c4_121, %c2_122] : memref<1x3x17x21xf32, #tpu.memory_space<vmem>>, vector<1x3x8x16xf32>
    tpu.vector_store %arg9[%c0_119, %c0_120, %c4_121, %c2_122], %44 {strides = array<i32>} : memref<1x3x17x21xf32, #tpu.memory_space<vmem>>, vector<1x3x8x16xf32>,
    %c0_123 = arith.constant 0 : index
    %c0_124 = arith.constant 0 : index
    %c4_125 = arith.constant 4 : index
    %c4_126 = arith.constant 4 : index
    %46 = vector.load %arg9[%c0_123, %c0_124, %c4_125, %c4_126] : memref<1x3x17x21xf32, #tpu.memory_space<vmem>>, vector<1x3x8x1xf32>
    %c0_127 = arith.constant 0 : index
    %c0_128 = arith.constant 0 : index
    %c4_129 = arith.constant 4 : index
    %c0_130 = arith.constant 0 : index
    %47 = vector.load %arg9[%c0_127, %c0_128, %c4_129, %c0_130] : memref<1x3x17x21xf32, #tpu.memory_space<vmem>>, vector<1x3x8x1xf32>
    tpu.vector_store %arg9[%c0_127, %c0_128, %c4_129, %c0_130], %46 {strides = array<i32>} : memref<1x3x17x21xf32, #tpu.memory_space<vmem>>, vector<1x3x8x1xf32>,
    %c0_131 = arith.constant 0 : index
    %c0_132 = arith.constant 0 : index
    %c4_133 = arith.constant 4 : index
    %c3_134 = arith.constant 3 : index
    %48 = vector.load %arg9[%c0_131, %c0_132, %c4_133, %c3_134] : memref<1x3x17x21xf32, #tpu.memory_space<vmem>>, vector<1x3x8x1xf32>
    %c0_135 = arith.constant 0 : index
    %c0_136 = arith.constant 0 : index
    %c4_137 = arith.constant 4 : index
    %c1_138 = arith.constant 1 : index
    %49 = vector.load %arg9[%c0_135, %c0_136, %c4_137, %c1_138] : memref<1x3x17x21xf32, #tpu.memory_space<vmem>>, vector<1x3x8x1xf32>
    tpu.vector_store %arg9[%c0_135, %c0_136, %c4_137, %c1_138], %48 {strides = array<i32>} : memref<1x3x17x21xf32, #tpu.memory_space<vmem>>, vector<1x3x8x1xf32>,
    %c0_139 = arith.constant 0 : index
    %c0_140 = arith.constant 0 : index
    %c4_141 = arith.constant 4 : index
    %c16_142 = arith.constant 16 : index
    %50 = vector.load %arg9[%c0_139, %c0_140, %c4_141, %c16_142] : memref<1x3x17x21xf32, #tpu.memory_space<vmem>>, vector<1x3x8x1xf32>
    %c0_143 = arith.constant 0 : index
    %c0_144 = arith.constant 0 : index
    %c4_145 = arith.constant 4 : index
    %c18_146 = arith.constant 18 : index
    %51 = vector.load %arg9[%c0_143, %c0_144, %c4_145, %c18_146] : memref<1x3x17x21xf32, #tpu.memory_space<vmem>>, vector<1x3x8x1xf32>
    tpu.vector_store %arg9[%c0_143, %c0_144, %c4_145, %c18_146], %50 {strides = array<i32>} : memref<1x3x17x21xf32, #tpu.memory_space<vmem>>, vector<1x3x8x1xf32>,
    %c0_147 = arith.constant 0 : index
    %c0_148 = arith.constant 0 : index
    %c4_149 = arith.constant 4 : index
    %c15_150 = arith.constant 15 : index
    %52 = vector.load %arg9[%c0_147, %c0_148, %c4_149, %c15_150] : memref<1x3x17x21xf32, #tpu.memory_space<vmem>>, vector<1x3x8x1xf32>
    %c0_151 = arith.constant 0 : index
    %c0_152 = arith.constant 0 : index
    %c4_153 = arith.constant 4 : index
    %c19_154 = arith.constant 19 : index
    %53 = vector.load %arg9[%c0_151, %c0_152, %c4_153, %c19_154] : memref<1x3x17x21xf32, #tpu.memory_space<vmem>>, vector<1x3x8x1xf32>
    tpu.vector_store %arg9[%c0_151, %c0_152, %c4_153, %c19_154], %52 {strides = array<i32>} : memref<1x3x17x21xf32, #tpu.memory_space<vmem>>, vector<1x3x8x1xf32>,
    %c0_155 = arith.constant 0 : index
    %c0_156 = arith.constant 0 : index
    %c4_157 = arith.constant 4 : index
    %c14_158 = arith.constant 14 : index
    %54 = vector.load %arg9[%c0_155, %c0_156, %c4_157, %c14_158] : memref<1x3x17x21xf32, #tpu.memory_space<vmem>>, vector<1x3x8x1xf32>
    %c0_159 = arith.constant 0 : index
    %c0_160 = arith.constant 0 : index
    %c4_161 = arith.constant 4 : index
    %c20_162 = arith.constant 20 : index
    %55 = vector.load %arg9[%c0_159, %c0_160, %c4_161, %c20_162] : memref<1x3x17x21xf32, #tpu.memory_space<vmem>>, vector<1x3x8x1xf32>
    tpu.vector_store %arg9[%c0_159, %c0_160, %c4_161, %c20_162], %54 {strides = array<i32>} : memref<1x3x17x21xf32, #tpu.memory_space<vmem>>, vector<1x3x8x1xf32>,
    %c0_163 = arith.constant 0 : index
    %c0_164 = arith.constant 0 : index
    %c8 = arith.constant 8 : index
    %c0_165 = arith.constant 0 : index
    %56 = vector.load %arg9[%c0_163, %c0_164, %c8, %c0_165] : memref<1x3x17x21xf32, #tpu.memory_space<vmem>>, vector<1x3x1x21xf32>
    %c0_166 = arith.constant 0 : index
    %c0_167 = arith.constant 0 : index
    %c0_168 = arith.constant 0 : index
    %c0_169 = arith.constant 0 : index
    %57 = vector.load %arg9[%c0_166, %c0_167, %c0_168, %c0_169] : memref<1x3x17x21xf32, #tpu.memory_space<vmem>>, vector<1x3x1x21xf32>
    tpu.vector_store %arg9[%c0_166, %c0_167, %c0_168, %c0_169], %56 {strides = array<i32>} : memref<1x3x17x21xf32, #tpu.memory_space<vmem>>, vector<1x3x1x21xf32>,
    %c0_170 = arith.constant 0 : index
    %c0_171 = arith.constant 0 : index
    %c7 = arith.constant 7 : index
    %c0_172 = arith.constant 0 : index
    %58 = vector.load %arg9[%c0_170, %c0_171, %c7, %c0_172] : memref<1x3x17x21xf32, #tpu.memory_space<vmem>>, vector<1x3x1x21xf32>
    %c0_173 = arith.constant 0 : index
    %c0_174 = arith.constant 0 : index
    %c1_175 = arith.constant 1 : index
    %c0_176 = arith.constant 0 : index
    %59 = vector.load %arg9[%c0_173, %c0_174, %c1_175, %c0_176] : memref<1x3x17x21xf32, #tpu.memory_space<vmem>>, vector<1x3x1x21xf32>
    tpu.vector_store %arg9[%c0_173, %c0_174, %c1_175, %c0_176], %58 {strides = array<i32>} : memref<1x3x17x21xf32, #tpu.memory_space<vmem>>, vector<1x3x1x21xf32>,
    %c0_177 = arith.constant 0 : index
    %c0_178 = arith.constant 0 : index
    %c6 = arith.constant 6 : index
    %c0_179 = arith.constant 0 : index
    %60 = vector.load %arg9[%c0_177, %c0_178, %c6, %c0_179] : memref<1x3x17x21xf32, #tpu.memory_space<vmem>>, vector<1x3x1x21xf32>
    %c0_180 = arith.constant 0 : index
    %c0_181 = arith.constant 0 : index
    %c2_182 = arith.constant 2 : index
    %c0_183 = arith.constant 0 : index
    %61 = vector.load %arg9[%c0_180, %c0_181, %c2_182, %c0_183] : memref<1x3x17x21xf32, #tpu.memory_space<vmem>>, vector<1x3x1x21xf32>
    tpu.vector_store %arg9[%c0_180, %c0_181, %c2_182, %c0_183], %60 {strides = array<i32>} : memref<1x3x17x21xf32, #tpu.memory_space<vmem>>, vector<1x3x1x21xf32>,
    %c0_184 = arith.constant 0 : index
    %c0_185 = arith.constant 0 : index
    %c5 = arith.constant 5 : index
    %c0_186 = arith.constant 0 : index
    %62 = vector.load %arg9[%c0_184, %c0_185, %c5, %c0_186] : memref<1x3x17x21xf32, #tpu.memory_space<vmem>>, vector<1x3x1x21xf32>
    %c0_187 = arith.constant 0 : index
    %c0_188 = arith.constant 0 : index
    %c3_189 = arith.constant 3 : index
    %c0_190 = arith.constant 0 : index
    %63 = vector.load %arg9[%c0_187, %c0_188, %c3_189, %c0_190] : memref<1x3x17x21xf32, #tpu.memory_space<vmem>>, vector<1x3x1x21xf32>
    tpu.vector_store %arg9[%c0_187, %c0_188, %c3_189, %c0_190], %62 {strides = array<i32>} : memref<1x3x17x21xf32, #tpu.memory_space<vmem>>, vector<1x3x1x21xf32>,
    %c0_191 = arith.constant 0 : index
    %c0_192 = arith.constant 0 : index
    %c10 = arith.constant 10 : index
    %c0_193 = arith.constant 0 : index
    %64 = vector.load %arg9[%c0_191, %c0_192, %c10, %c0_193] : memref<1x3x17x21xf32, #tpu.memory_space<vmem>>, vector<1x3x1x21xf32>
    %c0_194 = arith.constant 0 : index
    %c0_195 = arith.constant 0 : index
    %c12 = arith.constant 12 : index
    %c0_196 = arith.constant 0 : index
    %65 = vector.load %arg9[%c0_194, %c0_195, %c12, %c0_196] : memref<1x3x17x21xf32, #tpu.memory_space<vmem>>, vector<1x3x1x21xf32>
    tpu.vector_store %arg9[%c0_194, %c0_195, %c12, %c0_196], %64 {strides = array<i32>} : memref<1x3x17x21xf32, #tpu.memory_space<vmem>>, vector<1x3x1x21xf32>,
    %c0_197 = arith.constant 0 : index
    %c0_198 = arith.constant 0 : index
    %c9 = arith.constant 9 : index
    %c0_199 = arith.constant 0 : index
    %66 = vector.load %arg9[%c0_197, %c0_198, %c9, %c0_199] : memref<1x3x17x21xf32, #tpu.memory_space<vmem>>, vector<1x3x1x21xf32>
    %c0_200 = arith.constant 0 : index
    %c0_201 = arith.constant 0 : index
    %c13 = arith.constant 13 : index
    %c0_202 = arith.constant 0 : index
    %67 = vector.load %arg9[%c0_200, %c0_201, %c13, %c0_202] : memref<1x3x17x21xf32, #tpu.memory_space<vmem>>, vector<1x3x1x21xf32>
    tpu.vector_store %arg9[%c0_200, %c0_201, %c13, %c0_202], %66 {strides = array<i32>} : memref<1x3x17x21xf32, #tpu.memory_space<vmem>>, vector<1x3x1x21xf32>,
    %c0_203 = arith.constant 0 : index
    %c0_204 = arith.constant 0 : index
    %c8_205 = arith.constant 8 : index
    %c0_206 = arith.constant 0 : index
    %68 = vector.load %arg9[%c0_203, %c0_204, %c8_205, %c0_206] : memref<1x3x17x21xf32, #tpu.memory_space<vmem>>, vector<1x3x1x21xf32>
    %c0_207 = arith.constant 0 : index
    %c0_208 = arith.constant 0 : index
    %c14_209 = arith.constant 14 : index
    %c0_210 = arith.constant 0 : index
    %69 = vector.load %arg9[%c0_207, %c0_208, %c14_209, %c0_210] : memref<1x3x17x21xf32, #tpu.memory_space<vmem>>, vector<1x3x1x21xf32>
    tpu.vector_store %arg9[%c0_207, %c0_208, %c14_209, %c0_210], %68 {strides = array<i32>} : memref<1x3x17x21xf32, #tpu.memory_space<vmem>>, vector<1x3x1x21xf32>,
    %c0_211 = arith.constant 0 : index
    %c0_212 = arith.constant 0 : index
    %c7_213 = arith.constant 7 : index
    %c0_214 = arith.constant 0 : index
    %70 = vector.load %arg9[%c0_211, %c0_212, %c7_213, %c0_214] : memref<1x3x17x21xf32, #tpu.memory_space<vmem>>, vector<1x3x1x21xf32>
    %c0_215 = arith.constant 0 : index
    %c0_216 = arith.constant 0 : index
    %c15_217 = arith.constant 15 : index
    %c0_218 = arith.constant 0 : index
    %71 = vector.load %arg9[%c0_215, %c0_216, %c15_217, %c0_218] : memref<1x3x17x21xf32, #tpu.memory_space<vmem>>, vector<1x3x1x21xf32>
    tpu.vector_store %arg9[%c0_215, %c0_216, %c15_217, %c0_218], %70 {strides = array<i32>} : memref<1x3x17x21xf32, #tpu.memory_space<vmem>>, vector<1x3x1x21xf32>,
    %c0_219 = arith.constant 0 : index
    %c0_220 = arith.constant 0 : index
    %c6_221 = arith.constant 6 : index
    %c0_222 = arith.constant 0 : index
    %72 = vector.load %arg9[%c0_219, %c0_220, %c6_221, %c0_222] : memref<1x3x17x21xf32, #tpu.memory_space<vmem>>, vector<1x3x1x21xf32>
    %c0_223 = arith.constant 0 : index
    %c0_224 = arith.constant 0 : index
    %c16_225 = arith.constant 16 : index
    %c0_226 = arith.constant 0 : index
    %73 = vector.load %arg9[%c0_223, %c0_224, %c16_225, %c0_226] : memref<1x3x17x21xf32, #tpu.memory_space<vmem>>, vector<1x3x1x21xf32>
    tpu.vector_store %arg9[%c0_223, %c0_224, %c16_225, %c0_226], %72 {strides = array<i32>} : memref<1x3x17x21xf32, #tpu.memory_space<vmem>>, vector<1x3x1x21xf32>,
    %c0_227 = arith.constant 0 : index
    %c0_228 = arith.constant 0 : index
    %c0_229 = arith.constant 0 : index
    %c0_230 = arith.constant 0 : index
    %74 = vector.load %arg2[%c0_227, %c0_228, %c0_229, %c0_230] : memref<1x3x8x16xf32, #tpu.memory_space<vmem>>, vector<1x3x8x16xf32>
    %c0_231 = arith.constant 0 : index
    %c0_232 = arith.constant 0 : index
    %c4_233 = arith.constant 4 : index
    %c2_234 = arith.constant 2 : index
    %75 = vector.load %arg10[%c0_231, %c0_232, %c4_233, %c2_234] : memref<1x3x17x21xf32, #tpu.memory_space<vmem>>, vector<1x3x8x16xf32>
    tpu.vector_store %arg10[%c0_231, %c0_232, %c4_233, %c2_234], %74 {strides = array<i32>} : memref<1x3x17x21xf32, #tpu.memory_space<vmem>>, vector<1x3x8x16xf32>,
    %c0_235 = arith.constant 0 : index
    %c0_236 = arith.constant 0 : index
    %c4_237 = arith.constant 4 : index
    %c2_238 = arith.constant 2 : index
    %76 = vector.load %arg10[%c0_235, %c0_236, %c4_237, %c2_238] : memref<1x3x17x21xf32, #tpu.memory_space<vmem>>, vector<1x3x8x1xf32>
    %c0_239 = arith.constant 0 : index
    %c0_240 = arith.constant 0 : index
    %c4_241 = arith.constant 4 : index
    %c0_242 = arith.constant 0 : index
    %77 = vector.load %arg10[%c0_239, %c0_240, %c4_241, %c0_242] : memref<1x3x17x21xf32, #tpu.memory_space<vmem>>, vector<1x3x8x1xf32>
    tpu.vector_store %arg10[%c0_239, %c0_240, %c4_241, %c0_242], %76 {strides = array<i32>} : memref<1x3x17x21xf32, #tpu.memory_space<vmem>>, vector<1x3x8x1xf32>,
    %c0_243 = arith.constant 0 : index
    %c0_244 = arith.constant 0 : index
    %c4_245 = arith.constant 4 : index
    %c2_246 = arith.constant 2 : index
    %78 = vector.load %arg10[%c0_243, %c0_244, %c4_245, %c2_246] : memref<1x3x17x21xf32, #tpu.memory_space<vmem>>, vector<1x3x8x1xf32>
    %c0_247 = arith.constant 0 : index
    %c0_248 = arith.constant 0 : index
    %c4_249 = arith.constant 4 : index
    %c1_250 = arith.constant 1 : index
    %79 = vector.load %arg10[%c0_247, %c0_248, %c4_249, %c1_250] : memref<1x3x17x21xf32, #tpu.memory_space<vmem>>, vector<1x3x8x1xf32>
    tpu.vector_store %arg10[%c0_247, %c0_248, %c4_249, %c1_250], %78 {strides = array<i32>} : memref<1x3x17x21xf32, #tpu.memory_space<vmem>>, vector<1x3x8x1xf32>,
    %c0_251 = arith.constant 0 : index
    %c0_252 = arith.constant 0 : index
    %c4_253 = arith.constant 4 : index
    %c17_254 = arith.constant 17 : index
    %80 = vector.load %arg10[%c0_251, %c0_252, %c4_253, %c17_254] : memref<1x3x17x21xf32, #tpu.memory_space<vmem>>, vector<1x3x8x1xf32>
    %c0_255 = arith.constant 0 : index
    %c0_256 = arith.constant 0 : index
    %c4_257 = arith.constant 4 : index
    %c18_258 = arith.constant 18 : index
    %81 = vector.load %arg10[%c0_255, %c0_256, %c4_257, %c18_258] : memref<1x3x17x21xf32, #tpu.memory_space<vmem>>, vector<1x3x8x1xf32>
    tpu.vector_store %arg10[%c0_255, %c0_256, %c4_257, %c18_258], %80 {strides = array<i32>} : memref<1x3x17x21xf32, #tpu.memory_space<vmem>>, vector<1x3x8x1xf32>,
    %c0_259 = arith.constant 0 : index
    %c0_260 = arith.constant 0 : index
    %c4_261 = arith.constant 4 : index
    %c17_262 = arith.constant 17 : index
    %82 = vector.load %arg10[%c0_259, %c0_260, %c4_261, %c17_262] : memref<1x3x17x21xf32, #tpu.memory_space<vmem>>, vector<1x3x8x1xf32>
    %c0_263 = arith.constant 0 : index
    %c0_264 = arith.constant 0 : index
    %c4_265 = arith.constant 4 : index
    %c19_266 = arith.constant 19 : index
    %83 = vector.load %arg10[%c0_263, %c0_264, %c4_265, %c19_266] : memref<1x3x17x21xf32, #tpu.memory_space<vmem>>, vector<1x3x8x1xf32>
    tpu.vector_store %arg10[%c0_263, %c0_264, %c4_265, %c19_266], %82 {strides = array<i32>} : memref<1x3x17x21xf32, #tpu.memory_space<vmem>>, vector<1x3x8x1xf32>,
    %c0_267 = arith.constant 0 : index
    %c0_268 = arith.constant 0 : index
    %c4_269 = arith.constant 4 : index
    %c17_270 = arith.constant 17 : index
    %84 = vector.load %arg10[%c0_267, %c0_268, %c4_269, %c17_270] : memref<1x3x17x21xf32, #tpu.memory_space<vmem>>, vector<1x3x8x1xf32>
    %c0_271 = arith.constant 0 : index
    %c0_272 = arith.constant 0 : index
    %c4_273 = arith.constant 4 : index
    %c20_274 = arith.constant 20 : index
    %85 = vector.load %arg10[%c0_271, %c0_272, %c4_273, %c20_274] : memref<1x3x17x21xf32, #tpu.memory_space<vmem>>, vector<1x3x8x1xf32>
    tpu.vector_store %arg10[%c0_271, %c0_272, %c4_273, %c20_274], %84 {strides = array<i32>} : memref<1x3x17x21xf32, #tpu.memory_space<vmem>>, vector<1x3x8x1xf32>,
    %c0_275 = arith.constant 0 : index
    %c0_276 = arith.constant 0 : index
    %c4_277 = arith.constant 4 : index
    %c0_278 = arith.constant 0 : index
    %86 = vector.load %arg10[%c0_275, %c0_276, %c4_277, %c0_278] : memref<1x3x17x21xf32, #tpu.memory_space<vmem>>, vector<1x3x1x21xf32>
    %c0_279 = arith.constant 0 : index
    %c0_280 = arith.constant 0 : index
    %c0_281 = arith.constant 0 : index
    %c0_282 = arith.constant 0 : index
    %87 = vector.load %arg10[%c0_279, %c0_280, %c0_281, %c0_282] : memref<1x3x17x21xf32, #tpu.memory_space<vmem>>, vector<1x3x1x21xf32>
    tpu.vector_store %arg10[%c0_279, %c0_280, %c0_281, %c0_282], %86 {strides = array<i32>} : memref<1x3x17x21xf32, #tpu.memory_space<vmem>>, vector<1x3x1x21xf32>,
    %c0_283 = arith.constant 0 : index
    %c0_284 = arith.constant 0 : index
    %c4_285 = arith.constant 4 : index
    %c0_286 = arith.constant 0 : index
    %88 = vector.load %arg10[%c0_283, %c0_284, %c4_285, %c0_286] : memref<1x3x17x21xf32, #tpu.memory_space<vmem>>, vector<1x3x1x21xf32>
    %c0_287 = arith.constant 0 : index
    %c0_288 = arith.constant 0 : index
    %c1_289 = arith.constant 1 : index
    %c0_290 = arith.constant 0 : index
    %89 = vector.load %arg10[%c0_287, %c0_288, %c1_289, %c0_290] : memref<1x3x17x21xf32, #tpu.memory_space<vmem>>, vector<1x3x1x21xf32>
    tpu.vector_store %arg10[%c0_287, %c0_288, %c1_289, %c0_290], %88 {strides = array<i32>} : memref<1x3x17x21xf32, #tpu.memory_space<vmem>>, vector<1x3x1x21xf32>,
    %c0_291 = arith.constant 0 : index
    %c0_292 = arith.constant 0 : index
    %c4_293 = arith.constant 4 : index
    %c0_294 = arith.constant 0 : index
    %90 = vector.load %arg10[%c0_291, %c0_292, %c4_293, %c0_294] : memref<1x3x17x21xf32, #tpu.memory_space<vmem>>, vector<1x3x1x21xf32>
    %c0_295 = arith.constant 0 : index
    %c0_296 = arith.constant 0 : index
    %c2_297 = arith.constant 2 : index
    %c0_298 = arith.constant 0 : index
    %91 = vector.load %arg10[%c0_295, %c0_296, %c2_297, %c0_298] : memref<1x3x17x21xf32, #tpu.memory_space<vmem>>, vector<1x3x1x21xf32>
    tpu.vector_store %arg10[%c0_295, %c0_296, %c2_297, %c0_298], %90 {strides = array<i32>} : memref<1x3x17x21xf32, #tpu.memory_space<vmem>>, vector<1x3x1x21xf32>,
    %c0_299 = arith.constant 0 : index
    %c0_300 = arith.constant 0 : index
    %c4_301 = arith.constant 4 : index
    %c0_302 = arith.constant 0 : index
    %92 = vector.load %arg10[%c0_299, %c0_300, %c4_301, %c0_302] : memref<1x3x17x21xf32, #tpu.memory_space<vmem>>, vector<1x3x1x21xf32>
    %c0_303 = arith.constant 0 : index
    %c0_304 = arith.constant 0 : index
    %c3_305 = arith.constant 3 : index
    %c0_306 = arith.constant 0 : index
    %93 = vector.load %arg10[%c0_303, %c0_304, %c3_305, %c0_306] : memref<1x3x17x21xf32, #tpu.memory_space<vmem>>, vector<1x3x1x21xf32>
    tpu.vector_store %arg10[%c0_303, %c0_304, %c3_305, %c0_306], %92 {strides = array<i32>} : memref<1x3x17x21xf32, #tpu.memory_space<vmem>>, vector<1x3x1x21xf32>,
    %c0_307 = arith.constant 0 : index
    %c0_308 = arith.constant 0 : index
    %c11 = arith.constant 11 : index
    %c0_309 = arith.constant 0 : index
    %94 = vector.load %arg10[%c0_307, %c0_308, %c11, %c0_309] : memref<1x3x17x21xf32, #tpu.memory_space<vmem>>, vector<1x3x1x21xf32>
    %c0_310 = arith.constant 0 : index
    %c0_311 = arith.constant 0 : index
    %c12_312 = arith.constant 12 : index
    %c0_313 = arith.constant 0 : index
    %95 = vector.load %arg10[%c0_310, %c0_311, %c12_312, %c0_313] : memref<1x3x17x21xf32, #tpu.memory_space<vmem>>, vector<1x3x1x21xf32>
    tpu.vector_store %arg10[%c0_310, %c0_311, %c12_312, %c0_313], %94 {strides = array<i32>} : memref<1x3x17x21xf32, #tpu.memory_space<vmem>>, vector<1x3x1x21xf32>,
    %c0_314 = arith.constant 0 : index
    %c0_315 = arith.constant 0 : index
    %c11_316 = arith.constant 11 : index
    %c0_317 = arith.constant 0 : index
    %96 = vector.load %arg10[%c0_314, %c0_315, %c11_316, %c0_317] : memref<1x3x17x21xf32, #tpu.memory_space<vmem>>, vector<1x3x1x21xf32>
    %c0_318 = arith.constant 0 : index
    %c0_319 = arith.constant 0 : index
    %c13_320 = arith.constant 13 : index
    %c0_321 = arith.constant 0 : index
    %97 = vector.load %arg10[%c0_318, %c0_319, %c13_320, %c0_321] : memref<1x3x17x21xf32, #tpu.memory_space<vmem>>, vector<1x3x1x21xf32>
    tpu.vector_store %arg10[%c0_318, %c0_319, %c13_320, %c0_321], %96 {strides = array<i32>} : memref<1x3x17x21xf32, #tpu.memory_space<vmem>>, vector<1x3x1x21xf32>,
    %c0_322 = arith.constant 0 : index
    %c0_323 = arith.constant 0 : index
    %c11_324 = arith.constant 11 : index
    %c0_325 = arith.constant 0 : index
    %98 = vector.load %arg10[%c0_322, %c0_323, %c11_324, %c0_325] : memref<1x3x17x21xf32, #tpu.memory_space<vmem>>, vector<1x3x1x21xf32>
    %c0_326 = arith.constant 0 : index
    %c0_327 = arith.constant 0 : index
    %c14_328 = arith.constant 14 : index
    %c0_329 = arith.constant 0 : index
    %99 = vector.load %arg10[%c0_326, %c0_327, %c14_328, %c0_329] : memref<1x3x17x21xf32, #tpu.memory_space<vmem>>, vector<1x3x1x21xf32>
    tpu.vector_store %arg10[%c0_326, %c0_327, %c14_328, %c0_329], %98 {strides = array<i32>} : memref<1x3x17x21xf32, #tpu.memory_space<vmem>>, vector<1x3x1x21xf32>,
    %c0_330 = arith.constant 0 : index
    %c0_331 = arith.constant 0 : index
    %c11_332 = arith.constant 11 : index
    %c0_333 = arith.constant 0 : index
    %100 = vector.load %arg10[%c0_330, %c0_331, %c11_332, %c0_333] : memref<1x3x17x21xf32, #tpu.memory_space<vmem>>, vector<1x3x1x21xf32>
    %c0_334 = arith.constant 0 : index
    %c0_335 = arith.constant 0 : index
    %c15_336 = arith.constant 15 : index
    %c0_337 = arith.constant 0 : index
    %101 = vector.load %arg10[%c0_334, %c0_335, %c15_336, %c0_337] : memref<1x3x17x21xf32, #tpu.memory_space<vmem>>, vector<1x3x1x21xf32>
    tpu.vector_store %arg10[%c0_334, %c0_335, %c15_336, %c0_337], %100 {strides = array<i32>} : memref<1x3x17x21xf32, #tpu.memory_space<vmem>>, vector<1x3x1x21xf32>,
    %c0_338 = arith.constant 0 : index
    %c0_339 = arith.constant 0 : index
    %c11_340 = arith.constant 11 : index
    %c0_341 = arith.constant 0 : index
    %102 = vector.load %arg10[%c0_338, %c0_339, %c11_340, %c0_341] : memref<1x3x17x21xf32, #tpu.memory_space<vmem>>, vector<1x3x1x21xf32>
    %c0_342 = arith.constant 0 : index
    %c0_343 = arith.constant 0 : index
    %c16_344 = arith.constant 16 : index
    %c0_345 = arith.constant 0 : index
    %103 = vector.load %arg10[%c0_342, %c0_343, %c16_344, %c0_345] : memref<1x3x17x21xf32, #tpu.memory_space<vmem>>, vector<1x3x1x21xf32>
    tpu.vector_store %arg10[%c0_342, %c0_343, %c16_344, %c0_345], %102 {strides = array<i32>} : memref<1x3x17x21xf32, #tpu.memory_space<vmem>>, vector<1x3x1x21xf32>,
    %c0_346 = arith.constant 0 : index
    %c0_347 = arith.constant 0 : index
    %c0_348 = arith.constant 0 : index
    %c0_349 = arith.constant 0 : index
    %104 = vector.load %arg2[%c0_346, %c0_347, %c0_348, %c0_349] : memref<1x3x8x16xf32, #tpu.memory_space<vmem>>, vector<1x3x8x16xf32>
    %c0_350 = arith.constant 0 : index
    %c0_351 = arith.constant 0 : index
    %c4_352 = arith.constant 4 : index
    %c2_353 = arith.constant 2 : index
    %105 = vector.load %arg11[%c0_350, %c0_351, %c4_352, %c2_353] : memref<1x3x17x21xf32, #tpu.memory_space<vmem>>, vector<1x3x8x16xf32>
    tpu.vector_store %arg11[%c0_350, %c0_351, %c4_352, %c2_353], %104 {strides = array<i32>} : memref<1x3x17x21xf32, #tpu.memory_space<vmem>>, vector<1x3x8x16xf32>,
    %c0_354 = arith.constant 0 : index
    %c0_355 = arith.constant 0 : index
    %c4_356 = arith.constant 4 : index
    %c16_357 = arith.constant 16 : index
    %106 = vector.load %arg11[%c0_354, %c0_355, %c4_356, %c16_357] : memref<1x3x17x21xf32, #tpu.memory_space<vmem>>, vector<1x3x8x1xf32>
    %c0_358 = arith.constant 0 : index
    %c0_359 = arith.constant 0 : index
    %c4_360 = arith.constant 4 : index
    %c0_361 = arith.constant 0 : index
    %107 = vector.load %arg11[%c0_358, %c0_359, %c4_360, %c0_361] : memref<1x3x17x21xf32, #tpu.memory_space<vmem>>, vector<1x3x8x1xf32>
    tpu.vector_store %arg11[%c0_358, %c0_359, %c4_360, %c0_361], %106 {strides = array<i32>} : memref<1x3x17x21xf32, #tpu.memory_space<vmem>>, vector<1x3x8x1xf32>,
    %c0_362 = arith.constant 0 : index
    %c0_363 = arith.constant 0 : index
    %c4_364 = arith.constant 4 : index
    %c17_365 = arith.constant 17 : index
    %108 = vector.load %arg11[%c0_362, %c0_363, %c4_364, %c17_365] : memref<1x3x17x21xf32, #tpu.memory_space<vmem>>, vector<1x3x8x1xf32>
    %c0_366 = arith.constant 0 : index
    %c0_367 = arith.constant 0 : index
    %c4_368 = arith.constant 4 : index
    %c1_369 = arith.constant 1 : index
    %109 = vector.load %arg11[%c0_366, %c0_367, %c4_368, %c1_369] : memref<1x3x17x21xf32, #tpu.memory_space<vmem>>, vector<1x3x8x1xf32>
    tpu.vector_store %arg11[%c0_366, %c0_367, %c4_368, %c1_369], %108 {strides = array<i32>} : memref<1x3x17x21xf32, #tpu.memory_space<vmem>>, vector<1x3x8x1xf32>,
    %c0_370 = arith.constant 0 : index
    %c0_371 = arith.constant 0 : index
    %c4_372 = arith.constant 4 : index
    %c2_373 = arith.constant 2 : index
    %110 = vector.load %arg11[%c0_370, %c0_371, %c4_372, %c2_373] : memref<1x3x17x21xf32, #tpu.memory_space<vmem>>, vector<1x3x8x1xf32>
    %c0_374 = arith.constant 0 : index
    %c0_375 = arith.constant 0 : index
    %c4_376 = arith.constant 4 : index
    %c18_377 = arith.constant 18 : index
    %111 = vector.load %arg11[%c0_374, %c0_375, %c4_376, %c18_377] : memref<1x3x17x21xf32, #tpu.memory_space<vmem>>, vector<1x3x8x1xf32>
    tpu.vector_store %arg11[%c0_374, %c0_375, %c4_376, %c18_377], %110 {strides = array<i32>} : memref<1x3x17x21xf32, #tpu.memory_space<vmem>>, vector<1x3x8x1xf32>,
    %c0_378 = arith.constant 0 : index
    %c0_379 = arith.constant 0 : index
    %c4_380 = arith.constant 4 : index
    %c3_381 = arith.constant 3 : index
    %112 = vector.load %arg11[%c0_378, %c0_379, %c4_380, %c3_381] : memref<1x3x17x21xf32, #tpu.memory_space<vmem>>, vector<1x3x8x1xf32>
    %c0_382 = arith.constant 0 : index
    %c0_383 = arith.constant 0 : index
    %c4_384 = arith.constant 4 : index
    %c19_385 = arith.constant 19 : index
    %113 = vector.load %arg11[%c0_382, %c0_383, %c4_384, %c19_385] : memref<1x3x17x21xf32, #tpu.memory_space<vmem>>, vector<1x3x8x1xf32>
    tpu.vector_store %arg11[%c0_382, %c0_383, %c4_384, %c19_385], %112 {strides = array<i32>} : memref<1x3x17x21xf32, #tpu.memory_space<vmem>>, vector<1x3x8x1xf32>,
    %c0_386 = arith.constant 0 : index
    %c0_387 = arith.constant 0 : index
    %c4_388 = arith.constant 4 : index
    %c4_389 = arith.constant 4 : index
    %114 = vector.load %arg11[%c0_386, %c0_387, %c4_388, %c4_389] : memref<1x3x17x21xf32, #tpu.memory_space<vmem>>, vector<1x3x8x1xf32>
    %c0_390 = arith.constant 0 : index
    %c0_391 = arith.constant 0 : index
    %c4_392 = arith.constant 4 : index
    %c20_393 = arith.constant 20 : index
    %115 = vector.load %arg11[%c0_390, %c0_391, %c4_392, %c20_393] : memref<1x3x17x21xf32, #tpu.memory_space<vmem>>, vector<1x3x8x1xf32>
    tpu.vector_store %arg11[%c0_390, %c0_391, %c4_392, %c20_393], %114 {strides = array<i32>} : memref<1x3x17x21xf32, #tpu.memory_space<vmem>>, vector<1x3x8x1xf32>,
    %c0_394 = arith.constant 0 : index
    %c0_395 = arith.constant 0 : index
    %c8_396 = arith.constant 8 : index
    %c0_397 = arith.constant 0 : index
    %116 = vector.load %arg11[%c0_394, %c0_395, %c8_396, %c0_397] : memref<1x3x17x21xf32, #tpu.memory_space<vmem>>, vector<1x3x1x21xf32>
    %c0_398 = arith.constant 0 : index
    %c0_399 = arith.constant 0 : index
    %c0_400 = arith.constant 0 : index
    %c0_401 = arith.constant 0 : index
    %117 = vector.load %arg11[%c0_398, %c0_399, %c0_400, %c0_401] : memref<1x3x17x21xf32, #tpu.memory_space<vmem>>, vector<1x3x1x21xf32>
    tpu.vector_store %arg11[%c0_398, %c0_399, %c0_400, %c0_401], %116 {strides = array<i32>} : memref<1x3x17x21xf32, #tpu.memory_space<vmem>>, vector<1x3x1x21xf32>,
    %c0_402 = arith.constant 0 : index
    %c0_403 = arith.constant 0 : index
    %c9_404 = arith.constant 9 : index
    %c0_405 = arith.constant 0 : index
    %118 = vector.load %arg11[%c0_402, %c0_403, %c9_404, %c0_405] : memref<1x3x17x21xf32, #tpu.memory_space<vmem>>, vector<1x3x1x21xf32>
    %c0_406 = arith.constant 0 : index
    %c0_407 = arith.constant 0 : index
    %c1_408 = arith.constant 1 : index
    %c0_409 = arith.constant 0 : index
    %119 = vector.load %arg11[%c0_406, %c0_407, %c1_408, %c0_409] : memref<1x3x17x21xf32, #tpu.memory_space<vmem>>, vector<1x3x1x21xf32>
    tpu.vector_store %arg11[%c0_406, %c0_407, %c1_408, %c0_409], %118 {strides = array<i32>} : memref<1x3x17x21xf32, #tpu.memory_space<vmem>>, vector<1x3x1x21xf32>,
    %c0_410 = arith.constant 0 : index
    %c0_411 = arith.constant 0 : index
    %c10_412 = arith.constant 10 : index
    %c0_413 = arith.constant 0 : index
    %120 = vector.load %arg11[%c0_410, %c0_411, %c10_412, %c0_413] : memref<1x3x17x21xf32, #tpu.memory_space<vmem>>, vector<1x3x1x21xf32>
    %c0_414 = arith.constant 0 : index
    %c0_415 = arith.constant 0 : index
    %c2_416 = arith.constant 2 : index
    %c0_417 = arith.constant 0 : index
    %121 = vector.load %arg11[%c0_414, %c0_415, %c2_416, %c0_417] : memref<1x3x17x21xf32, #tpu.memory_space<vmem>>, vector<1x3x1x21xf32>
    tpu.vector_store %arg11[%c0_414, %c0_415, %c2_416, %c0_417], %120 {strides = array<i32>} : memref<1x3x17x21xf32, #tpu.memory_space<vmem>>, vector<1x3x1x21xf32>,
    %c0_418 = arith.constant 0 : index
    %c0_419 = arith.constant 0 : index
    %c11_420 = arith.constant 11 : index
    %c0_421 = arith.constant 0 : index
    %122 = vector.load %arg11[%c0_418, %c0_419, %c11_420, %c0_421] : memref<1x3x17x21xf32, #tpu.memory_space<vmem>>, vector<1x3x1x21xf32>
    %c0_422 = arith.constant 0 : index
    %c0_423 = arith.constant 0 : index
    %c3_424 = arith.constant 3 : index
    %c0_425 = arith.constant 0 : index
    %123 = vector.load %arg11[%c0_422, %c0_423, %c3_424, %c0_425] : memref<1x3x17x21xf32, #tpu.memory_space<vmem>>, vector<1x3x1x21xf32>
    tpu.vector_store %arg11[%c0_422, %c0_423, %c3_424, %c0_425], %122 {strides = array<i32>} : memref<1x3x17x21xf32, #tpu.memory_space<vmem>>, vector<1x3x1x21xf32>,
    %c0_426 = arith.constant 0 : index
    %c0_427 = arith.constant 0 : index
    %c4_428 = arith.constant 4 : index
    %c0_429 = arith.constant 0 : index
    %124 = vector.load %arg11[%c0_426, %c0_427, %c4_428, %c0_429] : memref<1x3x17x21xf32, #tpu.memory_space<vmem>>, vector<1x3x1x21xf32>
    %c0_430 = arith.constant 0 : index
    %c0_431 = arith.constant 0 : index
    %c12_432 = arith.constant 12 : index
    %c0_433 = arith.constant 0 : index
    %125 = vector.load %arg11[%c0_430, %c0_431, %c12_432, %c0_433] : memref<1x3x17x21xf32, #tpu.memory_space<vmem>>, vector<1x3x1x21xf32>
    tpu.vector_store %arg11[%c0_430, %c0_431, %c12_432, %c0_433], %124 {strides = array<i32>} : memref<1x3x17x21xf32, #tpu.memory_space<vmem>>, vector<1x3x1x21xf32>,
    %c0_434 = arith.constant 0 : index
    %c0_435 = arith.constant 0 : index
    %c5_436 = arith.constant 5 : index
    %c0_437 = arith.constant 0 : index
    %126 = vector.load %arg11[%c0_434, %c0_435, %c5_436, %c0_437] : memref<1x3x17x21xf32, #tpu.memory_space<vmem>>, vector<1x3x1x21xf32>
    %c0_438 = arith.constant 0 : index
    %c0_439 = arith.constant 0 : index
    %c13_440 = arith.constant 13 : index
    %c0_441 = arith.constant 0 : index
    %127 = vector.load %arg11[%c0_438, %c0_439, %c13_440, %c0_441] : memref<1x3x17x21xf32, #tpu.memory_space<vmem>>, vector<1x3x1x21xf32>
    tpu.vector_store %arg11[%c0_438, %c0_439, %c13_440, %c0_441], %126 {strides = array<i32>} : memref<1x3x17x21xf32, #tpu.memory_space<vmem>>, vector<1x3x1x21xf32>,
    %c0_442 = arith.constant 0 : index
    %c0_443 = arith.constant 0 : index
    %c6_444 = arith.constant 6 : index
    %c0_445 = arith.constant 0 : index
    %128 = vector.load %arg11[%c0_442, %c0_443, %c6_444, %c0_445] : memref<1x3x17x21xf32, #tpu.memory_space<vmem>>, vector<1x3x1x21xf32>
    %c0_446 = arith.constant 0 : index
    %c0_447 = arith.constant 0 : index
    %c14_448 = arith.constant 14 : index
    %c0_449 = arith.constant 0 : index
    %129 = vector.load %arg11[%c0_446, %c0_447, %c14_448, %c0_449] : memref<1x3x17x21xf32, #tpu.memory_space<vmem>>, vector<1x3x1x21xf32>
    tpu.vector_store %arg11[%c0_446, %c0_447, %c14_448, %c0_449], %128 {strides = array<i32>} : memref<1x3x17x21xf32, #tpu.memory_space<vmem>>, vector<1x3x1x21xf32>,
    %c0_450 = arith.constant 0 : index
    %c0_451 = arith.constant 0 : index
    %c7_452 = arith.constant 7 : index
    %c0_453 = arith.constant 0 : index
    %130 = vector.load %arg11[%c0_450, %c0_451, %c7_452, %c0_453] : memref<1x3x17x21xf32, #tpu.memory_space<vmem>>, vector<1x3x1x21xf32>
    %c0_454 = arith.constant 0 : index
    %c0_455 = arith.constant 0 : index
    %c15_456 = arith.constant 15 : index
    %c0_457 = arith.constant 0 : index
    %131 = vector.load %arg11[%c0_454, %c0_455, %c15_456, %c0_457] : memref<1x3x17x21xf32, #tpu.memory_space<vmem>>, vector<1x3x1x21xf32>
    tpu.vector_store %arg11[%c0_454, %c0_455, %c15_456, %c0_457], %130 {strides = array<i32>} : memref<1x3x17x21xf32, #tpu.memory_space<vmem>>, vector<1x3x1x21xf32>,
    %c0_458 = arith.constant 0 : index
    %c0_459 = arith.constant 0 : index
    %c8_460 = arith.constant 8 : index
    %c0_461 = arith.constant 0 : index
    %132 = vector.load %arg11[%c0_458, %c0_459, %c8_460, %c0_461] : memref<1x3x17x21xf32, #tpu.memory_space<vmem>>, vector<1x3x1x21xf32>
    %c0_462 = arith.constant 0 : index
    %c0_463 = arith.constant 0 : index
    %c16_464 = arith.constant 16 : index
    %c0_465 = arith.constant 0 : index
    %133 = vector.load %arg11[%c0_462, %c0_463, %c16_464, %c0_465] : memref<1x3x17x21xf32, #tpu.memory_space<vmem>>, vector<1x3x1x21xf32>
    tpu.vector_store %arg11[%c0_462, %c0_463, %c16_464, %c0_465], %132 {strides = array<i32>} : memref<1x3x17x21xf32, #tpu.memory_space<vmem>>, vector<1x3x1x21xf32>,
    %cst_466 = arith.constant 4.200000e+01 : f32
    %134 = vector.broadcast %cst_466 : f32 to vector<14x12x133xf32>
    %c0_467 = arith.constant 0 : index
    %c0_468 = arith.constant 0 : index
    %c0_469 = arith.constant 0 : index
    %135 = vector.load %arg12[%c0_467, %c0_468, %c0_469] : memref<14x12x133xf32, #tpu.memory_space<vmem>>, vector<14x12x133xf32>
    tpu.vector_store %arg12[%c0_467, %c0_468, %c0_469], %134 {strides = array<i32>} : memref<14x12x133xf32, #tpu.memory_space<vmem>>, vector<14x12x133xf32>,
    %c0_470 = arith.constant 0 : index
    %c0_471 = arith.constant 0 : index
    %c0_472 = arith.constant 0 : index
    %136 = vector.load %arg0[%c0_470, %c0_471, %c0_472] : memref<1x3x128xf32, #tpu.memory_space<vmem>>, vector<1x3x128xf32>
    %c6_473 = arith.constant 6 : index
    %c4_474 = arith.constant 4 : index
    %c2_475 = arith.constant 2 : index
    %137 = vector.load %arg12[%c6_473, %c4_474, %c2_475] : memref<14x12x133xf32, #tpu.memory_space<vmem>>, vector<1x3x128xf32>
    tpu.vector_store %arg12[%c6_473, %c4_474, %c2_475], %136 {strides = array<i32>} : memref<14x12x133xf32, #tpu.memory_space<vmem>>, vector<1x3x128xf32>,
    %c0_476 = arith.constant 0 : index
    %c0_477 = arith.constant 0 : index
    %c0_478 = arith.constant 0 : index
    %c0_479 = arith.constant 0 : index
    %c0_480 = arith.constant 0 : index
    %138 = vector.load %arg3[%c0_476, %c0_477, %c0_478, %c0_479, %c0_480] : memref<1x2x8x8x8xf32, #tpu.memory_space<vmem>>, vector<1x2x8x8x8xf32>
    %c0_481 = arith.constant 0 : index
    %c0_482 = arith.constant 0 : index
    %c6_483 = arith.constant 6 : index
    %c4_484 = arith.constant 4 : index
    %c2_485 = arith.constant 2 : index
    %139 = vector.load %arg13[%c0_481, %c0_482, %c6_483, %c4_484, %c2_485] : memref<1x2x21x17x13xf32, #tpu.memory_space<vmem>>, vector<1x2x8x8x8xf32>
    tpu.vector_store %arg13[%c0_481, %c0_482, %c6_483, %c4_484, %c2_485], %138 {strides = array<i32>} : memref<1x2x21x17x13xf32, #tpu.memory_space<vmem>>, vector<1x2x8x8x8xf32>,
    %c0_486 = arith.constant 0 : index
    %c0_487 = arith.constant 0 : index
    %c6_488 = arith.constant 6 : index
    %c4_489 = arith.constant 4 : index
    %c4_490 = arith.constant 4 : index
    %140 = vector.load %arg13[%c0_486, %c0_487, %c6_488, %c4_489, %c4_490] : memref<1x2x21x17x13xf32, #tpu.memory_space<vmem>>, vector<1x2x8x8x1xf32>
    %c0_491 = arith.constant 0 : index
    %c0_492 = arith.constant 0 : index
    %c6_493 = arith.constant 6 : index
    %c4_494 = arith.constant 4 : index
    %c0_495 = arith.constant 0 : index
    %141 = vector.load %arg13[%c0_491, %c0_492, %c6_493, %c4_494, %c0_495] : memref<1x2x21x17x13xf32, #tpu.memory_space<vmem>>, vector<1x2x8x8x1xf32>
    tpu.vector_store %arg13[%c0_491, %c0_492, %c6_493, %c4_494, %c0_495], %140 {strides = array<i32>} : memref<1x2x21x17x13xf32, #tpu.memory_space<vmem>>, vector<1x2x8x8x1xf32>,
    %c0_496 = arith.constant 0 : index
    %c0_497 = arith.constant 0 : index
    %c6_498 = arith.constant 6 : index
    %c4_499 = arith.constant 4 : index
    %c3_500 = arith.constant 3 : index
    %142 = vector.load %arg13[%c0_496, %c0_497, %c6_498, %c4_499, %c3_500] : memref<1x2x21x17x13xf32, #tpu.memory_space<vmem>>, vector<1x2x8x8x1xf32>
    %c0_501 = arith.constant 0 : index
    %c0_502 = arith.constant 0 : index
    %c6_503 = arith.constant 6 : index
    %c4_504 = arith.constant 4 : index
    %c1_505 = arith.constant 1 : index
    %143 = vector.load %arg13[%c0_501, %c0_502, %c6_503, %c4_504, %c1_505] : memref<1x2x21x17x13xf32, #tpu.memory_space<vmem>>, vector<1x2x8x8x1xf32>
    tpu.vector_store %arg13[%c0_501, %c0_502, %c6_503, %c4_504, %c1_505], %142 {strides = array<i32>} : memref<1x2x21x17x13xf32, #tpu.memory_space<vmem>>, vector<1x2x8x8x1xf32>,
    %c0_506 = arith.constant 0 : index
    %c0_507 = arith.constant 0 : index
    %c6_508 = arith.constant 6 : index
    %c4_509 = arith.constant 4 : index
    %c8_510 = arith.constant 8 : index
    %144 = vector.load %arg13[%c0_506, %c0_507, %c6_508, %c4_509, %c8_510] : memref<1x2x21x17x13xf32, #tpu.memory_space<vmem>>, vector<1x2x8x8x1xf32>
    %c0_511 = arith.constant 0 : index
    %c0_512 = arith.constant 0 : index
    %c6_513 = arith.constant 6 : index
    %c4_514 = arith.constant 4 : index
    %c10_515 = arith.constant 10 : index
    %145 = vector.load %arg13[%c0_511, %c0_512, %c6_513, %c4_514, %c10_515] : memref<1x2x21x17x13xf32, #tpu.memory_space<vmem>>, vector<1x2x8x8x1xf32>
    tpu.vector_store %arg13[%c0_511, %c0_512, %c6_513, %c4_514, %c10_515], %144 {strides = array<i32>} : memref<1x2x21x17x13xf32, #tpu.memory_space<vmem>>, vector<1x2x8x8x1xf32>,
    %c0_516 = arith.constant 0 : index
    %c0_517 = arith.constant 0 : index
    %c6_518 = arith.constant 6 : index
    %c4_519 = arith.constant 4 : index
    %c7_520 = arith.constant 7 : index
    %146 = vector.load %arg13[%c0_516, %c0_517, %c6_518, %c4_519, %c7_520] : memref<1x2x21x17x13xf32, #tpu.memory_space<vmem>>, vector<1x2x8x8x1xf32>
    %c0_521 = arith.constant 0 : index
    %c0_522 = arith.constant 0 : index
    %c6_523 = arith.constant 6 : index
    %c4_524 = arith.constant 4 : index
    %c11_525 = arith.constant 11 : index
    %147 = vector.load %arg13[%c0_521, %c0_522, %c6_523, %c4_524, %c11_525] : memref<1x2x21x17x13xf32, #tpu.memory_space<vmem>>, vector<1x2x8x8x1xf32>
    tpu.vector_store %arg13[%c0_521, %c0_522, %c6_523, %c4_524, %c11_525], %146 {strides = array<i32>} : memref<1x2x21x17x13xf32, #tpu.memory_space<vmem>>, vector<1x2x8x8x1xf32>,
    %c0_526 = arith.constant 0 : index
    %c0_527 = arith.constant 0 : index
    %c6_528 = arith.constant 6 : index
    %c4_529 = arith.constant 4 : index
    %c6_530 = arith.constant 6 : index
    %148 = vector.load %arg13[%c0_526, %c0_527, %c6_528, %c4_529, %c6_530] : memref<1x2x21x17x13xf32, #tpu.memory_space<vmem>>, vector<1x2x8x8x1xf32>
    %c0_531 = arith.constant 0 : index
    %c0_532 = arith.constant 0 : index
    %c6_533 = arith.constant 6 : index
    %c4_534 = arith.constant 4 : index
    %c12_535 = arith.constant 12 : index
    %149 = vector.load %arg13[%c0_531, %c0_532, %c6_533, %c4_534, %c12_535] : memref<1x2x21x17x13xf32, #tpu.memory_space<vmem>>, vector<1x2x8x8x1xf32>
    tpu.vector_store %arg13[%c0_531, %c0_532, %c6_533, %c4_534, %c12_535], %148 {strides = array<i32>} : memref<1x2x21x17x13xf32, #tpu.memory_space<vmem>>, vector<1x2x8x8x1xf32>,
    %c0_536 = arith.constant 0 : index
    %c0_537 = arith.constant 0 : index
    %c6_538 = arith.constant 6 : index
    %c8_539 = arith.constant 8 : index
    %c0_540 = arith.constant 0 : index
    %150 = vector.load %arg13[%c0_536, %c0_537, %c6_538, %c8_539, %c0_540] : memref<1x2x21x17x13xf32, #tpu.memory_space<vmem>>, vector<1x2x8x1x13xf32>
    %c0_541 = arith.constant 0 : index
    %c0_542 = arith.constant 0 : index
    %c6_543 = arith.constant 6 : index
    %c0_544 = arith.constant 0 : index
    %c0_545 = arith.constant 0 : index
    %151 = vector.load %arg13[%c0_541, %c0_542, %c6_543, %c0_544, %c0_545] : memref<1x2x21x17x13xf32, #tpu.memory_space<vmem>>, vector<1x2x8x1x13xf32>
    tpu.vector_store %arg13[%c0_541, %c0_542, %c6_543, %c0_544, %c0_545], %150 {strides = array<i32>} : memref<1x2x21x17x13xf32, #tpu.memory_space<vmem>>, vector<1x2x8x1x13xf32>,
    %c0_546 = arith.constant 0 : index
    %c0_547 = arith.constant 0 : index
    %c6_548 = arith.constant 6 : index
    %c7_549 = arith.constant 7 : index
    %c0_550 = arith.constant 0 : index
    %152 = vector.load %arg13[%c0_546, %c0_547, %c6_548, %c7_549, %c0_550] : memref<1x2x21x17x13xf32, #tpu.memory_space<vmem>>, vector<1x2x8x1x13xf32>
    %c0_551 = arith.constant 0 : index
    %c0_552 = arith.constant 0 : index
    %c6_553 = arith.constant 6 : index
    %c1_554 = arith.constant 1 : index
    %c0_555 = arith.constant 0 : index
    %153 = vector.load %arg13[%c0_551, %c0_552, %c6_553, %c1_554, %c0_555] : memref<1x2x21x17x13xf32, #tpu.memory_space<vmem>>, vector<1x2x8x1x13xf32>
    tpu.vector_store %arg13[%c0_551, %c0_552, %c6_553, %c1_554, %c0_555], %152 {strides = array<i32>} : memref<1x2x21x17x13xf32, #tpu.memory_space<vmem>>, vector<1x2x8x1x13xf32>,
    %c0_556 = arith.constant 0 : index
    %c0_557 = arith.constant 0 : index
    %c6_558 = arith.constant 6 : index
    %c6_559 = arith.constant 6 : index
    %c0_560 = arith.constant 0 : index
    %154 = vector.load %arg13[%c0_556, %c0_557, %c6_558, %c6_559, %c0_560] : memref<1x2x21x17x13xf32, #tpu.memory_space<vmem>>, vector<1x2x8x1x13xf32>
    %c0_561 = arith.constant 0 : index
    %c0_562 = arith.constant 0 : index
    %c6_563 = arith.constant 6 : index
    %c2_564 = arith.constant 2 : index
    %c0_565 = arith.constant 0 : index
    %155 = vector.load %arg13[%c0_561, %c0_562, %c6_563, %c2_564, %c0_565] : memref<1x2x21x17x13xf32, #tpu.memory_space<vmem>>, vector<1x2x8x1x13xf32>
    tpu.vector_store %arg13[%c0_561, %c0_562, %c6_563, %c2_564, %c0_565], %154 {strides = array<i32>} : memref<1x2x21x17x13xf32, #tpu.memory_space<vmem>>, vector<1x2x8x1x13xf32>,
    %c0_566 = arith.constant 0 : index
    %c0_567 = arith.constant 0 : index
    %c6_568 = arith.constant 6 : index
    %c5_569 = arith.constant 5 : index
    %c0_570 = arith.constant 0 : index
    %156 = vector.load %arg13[%c0_566, %c0_567, %c6_568, %c5_569, %c0_570] : memref<1x2x21x17x13xf32, #tpu.memory_space<vmem>>, vector<1x2x8x1x13xf32>
    %c0_571 = arith.constant 0 : index
    %c0_572 = arith.constant 0 : index
    %c6_573 = arith.constant 6 : index
    %c3_574 = arith.constant 3 : index
    %c0_575 = arith.constant 0 : index
    %157 = vector.load %arg13[%c0_571, %c0_572, %c6_573, %c3_574, %c0_575] : memref<1x2x21x17x13xf32, #tpu.memory_space<vmem>>, vector<1x2x8x1x13xf32>
    tpu.vector_store %arg13[%c0_571, %c0_572, %c6_573, %c3_574, %c0_575], %156 {strides = array<i32>} : memref<1x2x21x17x13xf32, #tpu.memory_space<vmem>>, vector<1x2x8x1x13xf32>,
    %c0_576 = arith.constant 0 : index
    %c0_577 = arith.constant 0 : index
    %c6_578 = arith.constant 6 : index
    %c10_579 = arith.constant 10 : index
    %c0_580 = arith.constant 0 : index
    %158 = vector.load %arg13[%c0_576, %c0_577, %c6_578, %c10_579, %c0_580] : memref<1x2x21x17x13xf32, #tpu.memory_space<vmem>>, vector<1x2x8x1x13xf32>
    %c0_581 = arith.constant 0 : index
    %c0_582 = arith.constant 0 : index
    %c6_583 = arith.constant 6 : index
    %c12_584 = arith.constant 12 : index
    %c0_585 = arith.constant 0 : index
    %159 = vector.load %arg13[%c0_581, %c0_582, %c6_583, %c12_584, %c0_585] : memref<1x2x21x17x13xf32, #tpu.memory_space<vmem>>, vector<1x2x8x1x13xf32>
    tpu.vector_store %arg13[%c0_581, %c0_582, %c6_583, %c12_584, %c0_585], %158 {strides = array<i32>} : memref<1x2x21x17x13xf32, #tpu.memory_space<vmem>>, vector<1x2x8x1x13xf32>,
    %c0_586 = arith.constant 0 : index
    %c0_587 = arith.constant 0 : index
    %c6_588 = arith.constant 6 : index
    %c9_589 = arith.constant 9 : index
    %c0_590 = arith.constant 0 : index
    %160 = vector.load %arg13[%c0_586, %c0_587, %c6_588, %c9_589, %c0_590] : memref<1x2x21x17x13xf32, #tpu.memory_space<vmem>>, vector<1x2x8x1x13xf32>
    %c0_591 = arith.constant 0 : index
    %c0_592 = arith.constant 0 : index
    %c6_593 = arith.constant 6 : index
    %c13_594 = arith.constant 13 : index
    %c0_595 = arith.constant 0 : index
    %161 = vector.load %arg13[%c0_591, %c0_592, %c6_593, %c13_594, %c0_595] : memref<1x2x21x17x13xf32, #tpu.memory_space<vmem>>, vector<1x2x8x1x13xf32>
    tpu.vector_store %arg13[%c0_591, %c0_592, %c6_593, %c13_594, %c0_595], %160 {strides = array<i32>} : memref<1x2x21x17x13xf32, #tpu.memory_space<vmem>>, vector<1x2x8x1x13xf32>,
    %c0_596 = arith.constant 0 : index
    %c0_597 = arith.constant 0 : index
    %c6_598 = arith.constant 6 : index
    %c8_599 = arith.constant 8 : index
    %c0_600 = arith.constant 0 : index
    %162 = vector.load %arg13[%c0_596, %c0_597, %c6_598, %c8_599, %c0_600] : memref<1x2x21x17x13xf32, #tpu.memory_space<vmem>>, vector<1x2x8x1x13xf32>
    %c0_601 = arith.constant 0 : index
    %c0_602 = arith.constant 0 : index
    %c6_603 = arith.constant 6 : index
    %c14_604 = arith.constant 14 : index
    %c0_605 = arith.constant 0 : index
    %163 = vector.load %arg13[%c0_601, %c0_602, %c6_603, %c14_604, %c0_605] : memref<1x2x21x17x13xf32, #tpu.memory_space<vmem>>, vector<1x2x8x1x13xf32>
    tpu.vector_store %arg13[%c0_601, %c0_602, %c6_603, %c14_604, %c0_605], %162 {strides = array<i32>} : memref<1x2x21x17x13xf32, #tpu.memory_space<vmem>>, vector<1x2x8x1x13xf32>,
    %c0_606 = arith.constant 0 : index
    %c0_607 = arith.constant 0 : index
    %c6_608 = arith.constant 6 : index
    %c7_609 = arith.constant 7 : index
    %c0_610 = arith.constant 0 : index
    %164 = vector.load %arg13[%c0_606, %c0_607, %c6_608, %c7_609, %c0_610] : memref<1x2x21x17x13xf32, #tpu.memory_space<vmem>>, vector<1x2x8x1x13xf32>
    %c0_611 = arith.constant 0 : index
    %c0_612 = arith.constant 0 : index
    %c6_613 = arith.constant 6 : index
    %c15_614 = arith.constant 15 : index
    %c0_615 = arith.constant 0 : index
    %165 = vector.load %arg13[%c0_611, %c0_612, %c6_613, %c15_614, %c0_615] : memref<1x2x21x17x13xf32, #tpu.memory_space<vmem>>, vector<1x2x8x1x13xf32>
    tpu.vector_store %arg13[%c0_611, %c0_612, %c6_613, %c15_614, %c0_615], %164 {strides = array<i32>} : memref<1x2x21x17x13xf32, #tpu.memory_space<vmem>>, vector<1x2x8x1x13xf32>,
    %c0_616 = arith.constant 0 : index
    %c0_617 = arith.constant 0 : index
    %c6_618 = arith.constant 6 : index
    %c6_619 = arith.constant 6 : index
    %c0_620 = arith.constant 0 : index
    %166 = vector.load %arg13[%c0_616, %c0_617, %c6_618, %c6_619, %c0_620] : memref<1x2x21x17x13xf32, #tpu.memory_space<vmem>>, vector<1x2x8x1x13xf32>
    %c0_621 = arith.constant 0 : index
    %c0_622 = arith.constant 0 : index
    %c6_623 = arith.constant 6 : index
    %c16_624 = arith.constant 16 : index
    %c0_625 = arith.constant 0 : index
    %167 = vector.load %arg13[%c0_621, %c0_622, %c6_623, %c16_624, %c0_625] : memref<1x2x21x17x13xf32, #tpu.memory_space<vmem>>, vector<1x2x8x1x13xf32>
    tpu.vector_store %arg13[%c0_621, %c0_622, %c6_623, %c16_624, %c0_625], %166 {strides = array<i32>} : memref<1x2x21x17x13xf32, #tpu.memory_space<vmem>>, vector<1x2x8x1x13xf32>,
    %c0_626 = arith.constant 0 : index
    %c0_627 = arith.constant 0 : index
    %c12_628 = arith.constant 12 : index
    %c0_629 = arith.constant 0 : index
    %c0_630 = arith.constant 0 : index
    %168 = vector.load %arg13[%c0_626, %c0_627, %c12_628, %c0_629, %c0_630] : memref<1x2x21x17x13xf32, #tpu.memory_space<vmem>>, vector<1x2x1x17x13xf32>
    %c0_631 = arith.constant 0 : index
    %c0_632 = arith.constant 0 : index
    %c0_633 = arith.constant 0 : index
    %c0_634 = arith.constant 0 : index
    %c0_635 = arith.constant 0 : index
    %169 = vector.load %arg13[%c0_631, %c0_632, %c0_633, %c0_634, %c0_635] : memref<1x2x21x17x13xf32, #tpu.memory_space<vmem>>, vector<1x2x1x17x13xf32>
    tpu.vector_store %arg13[%c0_631, %c0_632, %c0_633, %c0_634, %c0_635], %168 {strides = array<i32>} : memref<1x2x21x17x13xf32, #tpu.memory_space<vmem>>, vector<1x2x1x17x13xf32>,
    %c0_636 = arith.constant 0 : index
    %c0_637 = arith.constant 0 : index
    %c11_638 = arith.constant 11 : index
    %c0_639 = arith.constant 0 : index
    %c0_640 = arith.constant 0 : index
    %170 = vector.load %arg13[%c0_636, %c0_637, %c11_638, %c0_639, %c0_640] : memref<1x2x21x17x13xf32, #tpu.memory_space<vmem>>, vector<1x2x1x17x13xf32>
    %c0_641 = arith.constant 0 : index
    %c0_642 = arith.constant 0 : index
    %c1_643 = arith.constant 1 : index
    %c0_644 = arith.constant 0 : index
    %c0_645 = arith.constant 0 : index
    %171 = vector.load %arg13[%c0_641, %c0_642, %c1_643, %c0_644, %c0_645] : memref<1x2x21x17x13xf32, #tpu.memory_space<vmem>>, vector<1x2x1x17x13xf32>
    tpu.vector_store %arg13[%c0_641, %c0_642, %c1_643, %c0_644, %c0_645], %170 {strides = array<i32>} : memref<1x2x21x17x13xf32, #tpu.memory_space<vmem>>, vector<1x2x1x17x13xf32>,
    %c0_646 = arith.constant 0 : index
    %c0_647 = arith.constant 0 : index
    %c10_648 = arith.constant 10 : index
    %c0_649 = arith.constant 0 : index
    %c0_650 = arith.constant 0 : index
    %172 = vector.load %arg13[%c0_646, %c0_647, %c10_648, %c0_649, %c0_650] : memref<1x2x21x17x13xf32, #tpu.memory_space<vmem>>, vector<1x2x1x17x13xf32>
    %c0_651 = arith.constant 0 : index
    %c0_652 = arith.constant 0 : index
    %c2_653 = arith.constant 2 : index
    %c0_654 = arith.constant 0 : index
    %c0_655 = arith.constant 0 : index
    %173 = vector.load %arg13[%c0_651, %c0_652, %c2_653, %c0_654, %c0_655] : memref<1x2x21x17x13xf32, #tpu.memory_space<vmem>>, vector<1x2x1x17x13xf32>
    tpu.vector_store %arg13[%c0_651, %c0_652, %c2_653, %c0_654, %c0_655], %172 {strides = array<i32>} : memref<1x2x21x17x13xf32, #tpu.memory_space<vmem>>, vector<1x2x1x17x13xf32>,
    %c0_656 = arith.constant 0 : index
    %c0_657 = arith.constant 0 : index
    %c9_658 = arith.constant 9 : index
    %c0_659 = arith.constant 0 : index
    %c0_660 = arith.constant 0 : index
    %174 = vector.load %arg13[%c0_656, %c0_657, %c9_658, %c0_659, %c0_660] : memref<1x2x21x17x13xf32, #tpu.memory_space<vmem>>, vector<1x2x1x17x13xf32>
    %c0_661 = arith.constant 0 : index
    %c0_662 = arith.constant 0 : index
    %c3_663 = arith.constant 3 : index
    %c0_664 = arith.constant 0 : index
    %c0_665 = arith.constant 0 : index
    %175 = vector.load %arg13[%c0_661, %c0_662, %c3_663, %c0_664, %c0_665] : memref<1x2x21x17x13xf32, #tpu.memory_space<vmem>>, vector<1x2x1x17x13xf32>
    tpu.vector_store %arg13[%c0_661, %c0_662, %c3_663, %c0_664, %c0_665], %174 {strides = array<i32>} : memref<1x2x21x17x13xf32, #tpu.memory_space<vmem>>, vector<1x2x1x17x13xf32>,
    %c0_666 = arith.constant 0 : index
    %c0_667 = arith.constant 0 : index
    %c8_668 = arith.constant 8 : index
    %c0_669 = arith.constant 0 : index
    %c0_670 = arith.constant 0 : index
    %176 = vector.load %arg13[%c0_666, %c0_667, %c8_668, %c0_669, %c0_670] : memref<1x2x21x17x13xf32, #tpu.memory_space<vmem>>, vector<1x2x1x17x13xf32>
    %c0_671 = arith.constant 0 : index
    %c0_672 = arith.constant 0 : index
    %c4_673 = arith.constant 4 : index
    %c0_674 = arith.constant 0 : index
    %c0_675 = arith.constant 0 : index
    %177 = vector.load %arg13[%c0_671, %c0_672, %c4_673, %c0_674, %c0_675] : memref<1x2x21x17x13xf32, #tpu.memory_space<vmem>>, vector<1x2x1x17x13xf32>
    tpu.vector_store %arg13[%c0_671, %c0_672, %c4_673, %c0_674, %c0_675], %176 {strides = array<i32>} : memref<1x2x21x17x13xf32, #tpu.memory_space<vmem>>, vector<1x2x1x17x13xf32>,
    %c0_676 = arith.constant 0 : index
    %c0_677 = arith.constant 0 : index
    %c7_678 = arith.constant 7 : index
    %c0_679 = arith.constant 0 : index
    %c0_680 = arith.constant 0 : index
    %178 = vector.load %arg13[%c0_676, %c0_677, %c7_678, %c0_679, %c0_680] : memref<1x2x21x17x13xf32, #tpu.memory_space<vmem>>, vector<1x2x1x17x13xf32>
    %c0_681 = arith.constant 0 : index
    %c0_682 = arith.constant 0 : index
    %c5_683 = arith.constant 5 : index
    %c0_684 = arith.constant 0 : index
    %c0_685 = arith.constant 0 : index
    %179 = vector.load %arg13[%c0_681, %c0_682, %c5_683, %c0_684, %c0_685] : memref<1x2x21x17x13xf32, #tpu.memory_space<vmem>>, vector<1x2x1x17x13xf32>
    tpu.vector_store %arg13[%c0_681, %c0_682, %c5_683, %c0_684, %c0_685], %178 {strides = array<i32>} : memref<1x2x21x17x13xf32, #tpu.memory_space<vmem>>, vector<1x2x1x17x13xf32>,
    %c0_686 = arith.constant 0 : index
    %c0_687 = arith.constant 0 : index
    %c12_688 = arith.constant 12 : index
    %c0_689 = arith.constant 0 : index
    %c0_690 = arith.constant 0 : index
    %180 = vector.load %arg13[%c0_686, %c0_687, %c12_688, %c0_689, %c0_690] : memref<1x2x21x17x13xf32, #tpu.memory_space<vmem>>, vector<1x2x1x17x13xf32>
    %c0_691 = arith.constant 0 : index
    %c0_692 = arith.constant 0 : index
    %c14_693 = arith.constant 14 : index
    %c0_694 = arith.constant 0 : index
    %c0_695 = arith.constant 0 : index
    %181 = vector.load %arg13[%c0_691, %c0_692, %c14_693, %c0_694, %c0_695] : memref<1x2x21x17x13xf32, #tpu.memory_space<vmem>>, vector<1x2x1x17x13xf32>
    tpu.vector_store %arg13[%c0_691, %c0_692, %c14_693, %c0_694, %c0_695], %180 {strides = array<i32>} : memref<1x2x21x17x13xf32, #tpu.memory_space<vmem>>, vector<1x2x1x17x13xf32>,
    %c0_696 = arith.constant 0 : index
    %c0_697 = arith.constant 0 : index
    %c11_698 = arith.constant 11 : index
    %c0_699 = arith.constant 0 : index
    %c0_700 = arith.constant 0 : index
    %182 = vector.load %arg13[%c0_696, %c0_697, %c11_698, %c0_699, %c0_700] : memref<1x2x21x17x13xf32, #tpu.memory_space<vmem>>, vector<1x2x1x17x13xf32>
    %c0_701 = arith.constant 0 : index
    %c0_702 = arith.constant 0 : index
    %c15_703 = arith.constant 15 : index
    %c0_704 = arith.constant 0 : index
    %c0_705 = arith.constant 0 : index
    %183 = vector.load %arg13[%c0_701, %c0_702, %c15_703, %c0_704, %c0_705] : memref<1x2x21x17x13xf32, #tpu.memory_space<vmem>>, vector<1x2x1x17x13xf32>
    tpu.vector_store %arg13[%c0_701, %c0_702, %c15_703, %c0_704, %c0_705], %182 {strides = array<i32>} : memref<1x2x21x17x13xf32, #tpu.memory_space<vmem>>, vector<1x2x1x17x13xf32>,
    %c0_706 = arith.constant 0 : index
    %c0_707 = arith.constant 0 : index
    %c10_708 = arith.constant 10 : index
    %c0_709 = arith.constant 0 : index
    %c0_710 = arith.constant 0 : index
    %184 = vector.load %arg13[%c0_706, %c0_707, %c10_708, %c0_709, %c0_710] : memref<1x2x21x17x13xf32, #tpu.memory_space<vmem>>, vector<1x2x1x17x13xf32>
    %c0_711 = arith.constant 0 : index
    %c0_712 = arith.constant 0 : index
    %c16_713 = arith.constant 16 : index
    %c0_714 = arith.constant 0 : index
    %c0_715 = arith.constant 0 : index
    %185 = vector.load %arg13[%c0_711, %c0_712, %c16_713, %c0_714, %c0_715] : memref<1x2x21x17x13xf32, #tpu.memory_space<vmem>>, vector<1x2x1x17x13xf32>
    tpu.vector_store %arg13[%c0_711, %c0_712, %c16_713, %c0_714, %c0_715], %184 {strides = array<i32>} : memref<1x2x21x17x13xf32, #tpu.memory_space<vmem>>, vector<1x2x1x17x13xf32>,
    %c0_716 = arith.constant 0 : index
    %c0_717 = arith.constant 0 : index
    %c9_718 = arith.constant 9 : index
    %c0_719 = arith.constant 0 : index
    %c0_720 = arith.constant 0 : index
    %186 = vector.load %arg13[%c0_716, %c0_717, %c9_718, %c0_719, %c0_720] : memref<1x2x21x17x13xf32, #tpu.memory_space<vmem>>, vector<1x2x1x17x13xf32>
    %c0_721 = arith.constant 0 : index
    %c0_722 = arith.constant 0 : index
    %c17_723 = arith.constant 17 : index
    %c0_724 = arith.constant 0 : index
    %c0_725 = arith.constant 0 : index
    %187 = vector.load %arg13[%c0_721, %c0_722, %c17_723, %c0_724, %c0_725] : memref<1x2x21x17x13xf32, #tpu.memory_space<vmem>>, vector<1x2x1x17x13xf32>
    tpu.vector_store %arg13[%c0_721, %c0_722, %c17_723, %c0_724, %c0_725], %186 {strides = array<i32>} : memref<1x2x21x17x13xf32, #tpu.memory_space<vmem>>, vector<1x2x1x17x13xf32>,
    %c0_726 = arith.constant 0 : index
    %c0_727 = arith.constant 0 : index
    %c8_728 = arith.constant 8 : index
    %c0_729 = arith.constant 0 : index
    %c0_730 = arith.constant 0 : index
    %188 = vector.load %arg13[%c0_726, %c0_727, %c8_728, %c0_729, %c0_730] : memref<1x2x21x17x13xf32, #tpu.memory_space<vmem>>, vector<1x2x1x17x13xf32>
    %c0_731 = arith.constant 0 : index
    %c0_732 = arith.constant 0 : index
    %c18_733 = arith.constant 18 : index
    %c0_734 = arith.constant 0 : index
    %c0_735 = arith.constant 0 : index
    %189 = vector.load %arg13[%c0_731, %c0_732, %c18_733, %c0_734, %c0_735] : memref<1x2x21x17x13xf32, #tpu.memory_space<vmem>>, vector<1x2x1x17x13xf32>
    tpu.vector_store %arg13[%c0_731, %c0_732, %c18_733, %c0_734, %c0_735], %188 {strides = array<i32>} : memref<1x2x21x17x13xf32, #tpu.memory_space<vmem>>, vector<1x2x1x17x13xf32>,
    %c0_736 = arith.constant 0 : index
    %c0_737 = arith.constant 0 : index
    %c7_738 = arith.constant 7 : index
    %c0_739 = arith.constant 0 : index
    %c0_740 = arith.constant 0 : index
    %190 = vector.load %arg13[%c0_736, %c0_737, %c7_738, %c0_739, %c0_740] : memref<1x2x21x17x13xf32, #tpu.memory_space<vmem>>, vector<1x2x1x17x13xf32>
    %c0_741 = arith.constant 0 : index
    %c0_742 = arith.constant 0 : index
    %c19_743 = arith.constant 19 : index
    %c0_744 = arith.constant 0 : index
    %c0_745 = arith.constant 0 : index
    %191 = vector.load %arg13[%c0_741, %c0_742, %c19_743, %c0_744, %c0_745] : memref<1x2x21x17x13xf32, #tpu.memory_space<vmem>>, vector<1x2x1x17x13xf32>
    tpu.vector_store %arg13[%c0_741, %c0_742, %c19_743, %c0_744, %c0_745], %190 {strides = array<i32>} : memref<1x2x21x17x13xf32, #tpu.memory_space<vmem>>, vector<1x2x1x17x13xf32>,
    %c0_746 = arith.constant 0 : index
    %c0_747 = arith.constant 0 : index
    %c6_748 = arith.constant 6 : index
    %c0_749 = arith.constant 0 : index
    %c0_750 = arith.constant 0 : index
    %192 = vector.load %arg13[%c0_746, %c0_747, %c6_748, %c0_749, %c0_750] : memref<1x2x21x17x13xf32, #tpu.memory_space<vmem>>, vector<1x2x1x17x13xf32>
    %c0_751 = arith.constant 0 : index
    %c0_752 = arith.constant 0 : index
    %c20_753 = arith.constant 20 : index
    %c0_754 = arith.constant 0 : index
    %c0_755 = arith.constant 0 : index
    %193 = vector.load %arg13[%c0_751, %c0_752, %c20_753, %c0_754, %c0_755] : memref<1x2x21x17x13xf32, #tpu.memory_space<vmem>>, vector<1x2x1x17x13xf32>
    tpu.vector_store %arg13[%c0_751, %c0_752, %c20_753, %c0_754, %c0_755], %192 {strides = array<i32>} : memref<1x2x21x17x13xf32, #tpu.memory_space<vmem>>, vector<1x2x1x17x13xf32>,
    %c0_756 = arith.constant 0 : index
    %c0_757 = arith.constant 0 : index
    %c0_758 = arith.constant 0 : index
    %c0_759 = arith.constant 0 : index
    %c0_760 = arith.constant 0 : index
    %194 = vector.load %arg3[%c0_756, %c0_757, %c0_758, %c0_759, %c0_760] : memref<1x2x8x8x8xf32, #tpu.memory_space<vmem>>, vector<1x2x8x8x8xf32>
    %c0_761 = arith.constant 0 : index
    %c0_762 = arith.constant 0 : index
    %c6_763 = arith.constant 6 : index
    %c4_764 = arith.constant 4 : index
    %c2_765 = arith.constant 2 : index
    %195 = vector.load %arg14[%c0_761, %c0_762, %c6_763, %c4_764, %c2_765] : memref<1x2x21x17x13xf32, #tpu.memory_space<vmem>>, vector<1x2x8x8x8xf32>
    tpu.vector_store %arg14[%c0_761, %c0_762, %c6_763, %c4_764, %c2_765], %194 {strides = array<i32>} : memref<1x2x21x17x13xf32, #tpu.memory_space<vmem>>, vector<1x2x8x8x8xf32>,
    %c0_766 = arith.constant 0 : index
    %c0_767 = arith.constant 0 : index
    %c6_768 = arith.constant 6 : index
    %c4_769 = arith.constant 4 : index
    %c2_770 = arith.constant 2 : index
    %196 = vector.load %arg14[%c0_766, %c0_767, %c6_768, %c4_769, %c2_770] : memref<1x2x21x17x13xf32, #tpu.memory_space<vmem>>, vector<1x2x8x8x1xf32>
    %c0_771 = arith.constant 0 : index
    %c0_772 = arith.constant 0 : index
    %c6_773 = arith.constant 6 : index
    %c4_774 = arith.constant 4 : index
    %c0_775 = arith.constant 0 : index
    %197 = vector.load %arg14[%c0_771, %c0_772, %c6_773, %c4_774, %c0_775] : memref<1x2x21x17x13xf32, #tpu.memory_space<vmem>>, vector<1x2x8x8x1xf32>
    tpu.vector_store %arg14[%c0_771, %c0_772, %c6_773, %c4_774, %c0_775], %196 {strides = array<i32>} : memref<1x2x21x17x13xf32, #tpu.memory_space<vmem>>, vector<1x2x8x8x1xf32>,
    %c0_776 = arith.constant 0 : index
    %c0_777 = arith.constant 0 : index
    %c6_778 = arith.constant 6 : index
    %c4_779 = arith.constant 4 : index
    %c2_780 = arith.constant 2 : index
    %198 = vector.load %arg14[%c0_776, %c0_777, %c6_778, %c4_779, %c2_780] : memref<1x2x21x17x13xf32, #tpu.memory_space<vmem>>, vector<1x2x8x8x1xf32>
    %c0_781 = arith.constant 0 : index
    %c0_782 = arith.constant 0 : index
    %c6_783 = arith.constant 6 : index
    %c4_784 = arith.constant 4 : index
    %c1_785 = arith.constant 1 : index
    %199 = vector.load %arg14[%c0_781, %c0_782, %c6_783, %c4_784, %c1_785] : memref<1x2x21x17x13xf32, #tpu.memory_space<vmem>>, vector<1x2x8x8x1xf32>
    tpu.vector_store %arg14[%c0_781, %c0_782, %c6_783, %c4_784, %c1_785], %198 {strides = array<i32>} : memref<1x2x21x17x13xf32, #tpu.memory_space<vmem>>, vector<1x2x8x8x1xf32>,
    %c0_786 = arith.constant 0 : index
    %c0_787 = arith.constant 0 : index
    %c6_788 = arith.constant 6 : index
    %c4_789 = arith.constant 4 : index
    %c9_790 = arith.constant 9 : index
    %200 = vector.load %arg14[%c0_786, %c0_787, %c6_788, %c4_789, %c9_790] : memref<1x2x21x17x13xf32, #tpu.memory_space<vmem>>, vector<1x2x8x8x1xf32>
    %c0_791 = arith.constant 0 : index
    %c0_792 = arith.constant 0 : index
    %c6_793 = arith.constant 6 : index
    %c4_794 = arith.constant 4 : index
    %c10_795 = arith.constant 10 : index
    %201 = vector.load %arg14[%c0_791, %c0_792, %c6_793, %c4_794, %c10_795] : memref<1x2x21x17x13xf32, #tpu.memory_space<vmem>>, vector<1x2x8x8x1xf32>
    tpu.vector_store %arg14[%c0_791, %c0_792, %c6_793, %c4_794, %c10_795], %200 {strides = array<i32>} : memref<1x2x21x17x13xf32, #tpu.memory_space<vmem>>, vector<1x2x8x8x1xf32>,
    %c0_796 = arith.constant 0 : index
    %c0_797 = arith.constant 0 : index
    %c6_798 = arith.constant 6 : index
    %c4_799 = arith.constant 4 : index
    %c9_800 = arith.constant 9 : index
    %202 = vector.load %arg14[%c0_796, %c0_797, %c6_798, %c4_799, %c9_800] : memref<1x2x21x17x13xf32, #tpu.memory_space<vmem>>, vector<1x2x8x8x1xf32>
    %c0_801 = arith.constant 0 : index
    %c0_802 = arith.constant 0 : index
    %c6_803 = arith.constant 6 : index
    %c4_804 = arith.constant 4 : index
    %c11_805 = arith.constant 11 : index
    %203 = vector.load %arg14[%c0_801, %c0_802, %c6_803, %c4_804, %c11_805] : memref<1x2x21x17x13xf32, #tpu.memory_space<vmem>>, vector<1x2x8x8x1xf32>
    tpu.vector_store %arg14[%c0_801, %c0_802, %c6_803, %c4_804, %c11_805], %202 {strides = array<i32>} : memref<1x2x21x17x13xf32, #tpu.memory_space<vmem>>, vector<1x2x8x8x1xf32>,
    %c0_806 = arith.constant 0 : index
    %c0_807 = arith.constant 0 : index
    %c6_808 = arith.constant 6 : index
    %c4_809 = arith.constant 4 : index
    %c9_810 = arith.constant 9 : index
    %204 = vector.load %arg14[%c0_806, %c0_807, %c6_808, %c4_809, %c9_810] : memref<1x2x21x17x13xf32, #tpu.memory_space<vmem>>, vector<1x2x8x8x1xf32>
    %c0_811 = arith.constant 0 : index
    %c0_812 = arith.constant 0 : index
    %c6_813 = arith.constant 6 : index
    %c4_814 = arith.constant 4 : index
    %c12_815 = arith.constant 12 : index
    %205 = vector.load %arg14[%c0_811, %c0_812, %c6_813, %c4_814, %c12_815] : memref<1x2x21x17x13xf32, #tpu.memory_space<vmem>>, vector<1x2x8x8x1xf32>
    tpu.vector_store %arg14[%c0_811, %c0_812, %c6_813, %c4_814, %c12_815], %204 {strides = array<i32>} : memref<1x2x21x17x13xf32, #tpu.memory_space<vmem>>, vector<1x2x8x8x1xf32>,
    %c0_816 = arith.constant 0 : index
    %c0_817 = arith.constant 0 : index
    %c6_818 = arith.constant 6 : index
    %c4_819 = arith.constant 4 : index
    %c0_820 = arith.constant 0 : index
    %206 = vector.load %arg14[%c0_816, %c0_817, %c6_818, %c4_819, %c0_820] : memref<1x2x21x17x13xf32, #tpu.memory_space<vmem>>, vector<1x2x8x1x13xf32>
    %c0_821 = arith.constant 0 : index
    %c0_822 = arith.constant 0 : index
    %c6_823 = arith.constant 6 : index
    %c0_824 = arith.constant 0 : index
    %c0_825 = arith.constant 0 : index
    %207 = vector.load %arg14[%c0_821, %c0_822, %c6_823, %c0_824, %c0_825] : memref<1x2x21x17x13xf32, #tpu.memory_space<vmem>>, vector<1x2x8x1x13xf32>
    tpu.vector_store %arg14[%c0_821, %c0_822, %c6_823, %c0_824, %c0_825], %206 {strides = array<i32>} : memref<1x2x21x17x13xf32, #tpu.memory_space<vmem>>, vector<1x2x8x1x13xf32>,
    %c0_826 = arith.constant 0 : index
    %c0_827 = arith.constant 0 : index
    %c6_828 = arith.constant 6 : index
    %c4_829 = arith.constant 4 : index
    %c0_830 = arith.constant 0 : index
    %208 = vector.load %arg14[%c0_826, %c0_827, %c6_828, %c4_829, %c0_830] : memref<1x2x21x17x13xf32, #tpu.memory_space<vmem>>, vector<1x2x8x1x13xf32>
    %c0_831 = arith.constant 0 : index
    %c0_832 = arith.constant 0 : index
    %c6_833 = arith.constant 6 : index
    %c1_834 = arith.constant 1 : index
    %c0_835 = arith.constant 0 : index
    %209 = vector.load %arg14[%c0_831, %c0_832, %c6_833, %c1_834, %c0_835] : memref<1x2x21x17x13xf32, #tpu.memory_space<vmem>>, vector<1x2x8x1x13xf32>
    tpu.vector_store %arg14[%c0_831, %c0_832, %c6_833, %c1_834, %c0_835], %208 {strides = array<i32>} : memref<1x2x21x17x13xf32, #tpu.memory_space<vmem>>, vector<1x2x8x1x13xf32>,
    %c0_836 = arith.constant 0 : index
    %c0_837 = arith.constant 0 : index
    %c6_838 = arith.constant 6 : index
    %c4_839 = arith.constant 4 : index
    %c0_840 = arith.constant 0 : index
    %210 = vector.load %arg14[%c0_836, %c0_837, %c6_838, %c4_839, %c0_840] : memref<1x2x21x17x13xf32, #tpu.memory_space<vmem>>, vector<1x2x8x1x13xf32>
    %c0_841 = arith.constant 0 : index
    %c0_842 = arith.constant 0 : index
    %c6_843 = arith.constant 6 : index
    %c2_844 = arith.constant 2 : index
    %c0_845 = arith.constant 0 : index
    %211 = vector.load %arg14[%c0_841, %c0_842, %c6_843, %c2_844, %c0_845] : memref<1x2x21x17x13xf32, #tpu.memory_space<vmem>>, vector<1x2x8x1x13xf32>
    tpu.vector_store %arg14[%c0_841, %c0_842, %c6_843, %c2_844, %c0_845], %210 {strides = array<i32>} : memref<1x2x21x17x13xf32, #tpu.memory_space<vmem>>, vector<1x2x8x1x13xf32>,
    %c0_846 = arith.constant 0 : index
    %c0_847 = arith.constant 0 : index
    %c6_848 = arith.constant 6 : index
    %c4_849 = arith.constant 4 : index
    %c0_850 = arith.constant 0 : index
    %212 = vector.load %arg14[%c0_846, %c0_847, %c6_848, %c4_849, %c0_850] : memref<1x2x21x17x13xf32, #tpu.memory_space<vmem>>, vector<1x2x8x1x13xf32>
    %c0_851 = arith.constant 0 : index
    %c0_852 = arith.constant 0 : index
    %c6_853 = arith.constant 6 : index
    %c3_854 = arith.constant 3 : index
    %c0_855 = arith.constant 0 : index
    %213 = vector.load %arg14[%c0_851, %c0_852, %c6_853, %c3_854, %c0_855] : memref<1x2x21x17x13xf32, #tpu.memory_space<vmem>>, vector<1x2x8x1x13xf32>
    tpu.vector_store %arg14[%c0_851, %c0_852, %c6_853, %c3_854, %c0_855], %212 {strides = array<i32>} : memref<1x2x21x17x13xf32, #tpu.memory_space<vmem>>, vector<1x2x8x1x13xf32>,
    %c0_856 = arith.constant 0 : index
    %c0_857 = arith.constant 0 : index
    %c6_858 = arith.constant 6 : index
    %c11_859 = arith.constant 11 : index
    %c0_860 = arith.constant 0 : index
    %214 = vector.load %arg14[%c0_856, %c0_857, %c6_858, %c11_859, %c0_860] : memref<1x2x21x17x13xf32, #tpu.memory_space<vmem>>, vector<1x2x8x1x13xf32>
    %c0_861 = arith.constant 0 : index
    %c0_862 = arith.constant 0 : index
    %c6_863 = arith.constant 6 : index
    %c12_864 = arith.constant 12 : index
    %c0_865 = arith.constant 0 : index
    %215 = vector.load %arg14[%c0_861, %c0_862, %c6_863, %c12_864, %c0_865] : memref<1x2x21x17x13xf32, #tpu.memory_space<vmem>>, vector<1x2x8x1x13xf32>
    tpu.vector_store %arg14[%c0_861, %c0_862, %c6_863, %c12_864, %c0_865], %214 {strides = array<i32>} : memref<1x2x21x17x13xf32, #tpu.memory_space<vmem>>, vector<1x2x8x1x13xf32>,
    %c0_866 = arith.constant 0 : index
    %c0_867 = arith.constant 0 : index
    %c6_868 = arith.constant 6 : index
    %c11_869 = arith.constant 11 : index
    %c0_870 = arith.constant 0 : index
    %216 = vector.load %arg14[%c0_866, %c0_867, %c6_868, %c11_869, %c0_870] : memref<1x2x21x17x13xf32, #tpu.memory_space<vmem>>, vector<1x2x8x1x13xf32>
    %c0_871 = arith.constant 0 : index
    %c0_872 = arith.constant 0 : index
    %c6_873 = arith.constant 6 : index
    %c13_874 = arith.constant 13 : index
    %c0_875 = arith.constant 0 : index
    %217 = vector.load %arg14[%c0_871, %c0_872, %c6_873, %c13_874, %c0_875] : memref<1x2x21x17x13xf32, #tpu.memory_space<vmem>>, vector<1x2x8x1x13xf32>
    tpu.vector_store %arg14[%c0_871, %c0_872, %c6_873, %c13_874, %c0_875], %216 {strides = array<i32>} : memref<1x2x21x17x13xf32, #tpu.memory_space<vmem>>, vector<1x2x8x1x13xf32>,
    %c0_876 = arith.constant 0 : index
    %c0_877 = arith.constant 0 : index
    %c6_878 = arith.constant 6 : index
    %c11_879 = arith.constant 11 : index
    %c0_880 = arith.constant 0 : index
    %218 = vector.load %arg14[%c0_876, %c0_877, %c6_878, %c11_879, %c0_880] : memref<1x2x21x17x13xf32, #tpu.memory_space<vmem>>, vector<1x2x8x1x13xf32>
    %c0_881 = arith.constant 0 : index
    %c0_882 = arith.constant 0 : index
    %c6_883 = arith.constant 6 : index
    %c14_884 = arith.constant 14 : index
    %c0_885 = arith.constant 0 : index
    %219 = vector.load %arg14[%c0_881, %c0_882, %c6_883, %c14_884, %c0_885] : memref<1x2x21x17x13xf32, #tpu.memory_space<vmem>>, vector<1x2x8x1x13xf32>
    tpu.vector_store %arg14[%c0_881, %c0_882, %c6_883, %c14_884, %c0_885], %218 {strides = array<i32>} : memref<1x2x21x17x13xf32, #tpu.memory_space<vmem>>, vector<1x2x8x1x13xf32>,
    %c0_886 = arith.constant 0 : index
    %c0_887 = arith.constant 0 : index
    %c6_888 = arith.constant 6 : index
    %c11_889 = arith.constant 11 : index
    %c0_890 = arith.constant 0 : index
    %220 = vector.load %arg14[%c0_886, %c0_887, %c6_888, %c11_889, %c0_890] : memref<1x2x21x17x13xf32, #tpu.memory_space<vmem>>, vector<1x2x8x1x13xf32>
    %c0_891 = arith.constant 0 : index
    %c0_892 = arith.constant 0 : index
    %c6_893 = arith.constant 6 : index
    %c15_894 = arith.constant 15 : index
    %c0_895 = arith.constant 0 : index
    %221 = vector.load %arg14[%c0_891, %c0_892, %c6_893, %c15_894, %c0_895] : memref<1x2x21x17x13xf32, #tpu.memory_space<vmem>>, vector<1x2x8x1x13xf32>
    tpu.vector_store %arg14[%c0_891, %c0_892, %c6_893, %c15_894, %c0_895], %220 {strides = array<i32>} : memref<1x2x21x17x13xf32, #tpu.memory_space<vmem>>, vector<1x2x8x1x13xf32>,
    %c0_896 = arith.constant 0 : index
    %c0_897 = arith.constant 0 : index
    %c6_898 = arith.constant 6 : index
    %c11_899 = arith.constant 11 : index
    %c0_900 = arith.constant 0 : index
    %222 = vector.load %arg14[%c0_896, %c0_897, %c6_898, %c11_899, %c0_900] : memref<1x2x21x17x13xf32, #tpu.memory_space<vmem>>, vector<1x2x8x1x13xf32>
    %c0_901 = arith.constant 0 : index
    %c0_902 = arith.constant 0 : index
    %c6_903 = arith.constant 6 : index
    %c16_904 = arith.constant 16 : index
    %c0_905 = arith.constant 0 : index
    %223 = vector.load %arg14[%c0_901, %c0_902, %c6_903, %c16_904, %c0_905] : memref<1x2x21x17x13xf32, #tpu.memory_space<vmem>>, vector<1x2x8x1x13xf32>
    tpu.vector_store %arg14[%c0_901, %c0_902, %c6_903, %c16_904, %c0_905], %222 {strides = array<i32>} : memref<1x2x21x17x13xf32, #tpu.memory_space<vmem>>, vector<1x2x8x1x13xf32>,
    %c0_906 = arith.constant 0 : index
    %c0_907 = arith.constant 0 : index
    %c6_908 = arith.constant 6 : index
    %c0_909 = arith.constant 0 : index
    %c0_910 = arith.constant 0 : index
    %224 = vector.load %arg14[%c0_906, %c0_907, %c6_908, %c0_909, %c0_910] : memref<1x2x21x17x13xf32, #tpu.memory_space<vmem>>, vector<1x2x1x17x13xf32>
    %c0_911 = arith.constant 0 : index
    %c0_912 = arith.constant 0 : index
    %c0_913 = arith.constant 0 : index
    %c0_914 = arith.constant 0 : index
    %c0_915 = arith.constant 0 : index
    %225 = vector.load %arg14[%c0_911, %c0_912, %c0_913, %c0_914, %c0_915] : memref<1x2x21x17x13xf32, #tpu.memory_space<vmem>>, vector<1x2x1x17x13xf32>
    tpu.vector_store %arg14[%c0_911, %c0_912, %c0_913, %c0_914, %c0_915], %224 {strides = array<i32>} : memref<1x2x21x17x13xf32, #tpu.memory_space<vmem>>, vector<1x2x1x17x13xf32>,
    %c0_916 = arith.constant 0 : index
    %c0_917 = arith.constant 0 : index
    %c6_918 = arith.constant 6 : index
    %c0_919 = arith.constant 0 : index
    %c0_920 = arith.constant 0 : index
    %226 = vector.load %arg14[%c0_916, %c0_917, %c6_918, %c0_919, %c0_920] : memref<1x2x21x17x13xf32, #tpu.memory_space<vmem>>, vector<1x2x1x17x13xf32>
    %c0_921 = arith.constant 0 : index
    %c0_922 = arith.constant 0 : index
    %c1_923 = arith.constant 1 : index
    %c0_924 = arith.constant 0 : index
    %c0_925 = arith.constant 0 : index
    %227 = vector.load %arg14[%c0_921, %c0_922, %c1_923, %c0_924, %c0_925] : memref<1x2x21x17x13xf32, #tpu.memory_space<vmem>>, vector<1x2x1x17x13xf32>
    tpu.vector_store %arg14[%c0_921, %c0_922, %c1_923, %c0_924, %c0_925], %226 {strides = array<i32>} : memref<1x2x21x17x13xf32, #tpu.memory_space<vmem>>, vector<1x2x1x17x13xf32>,
    %c0_926 = arith.constant 0 : index
    %c0_927 = arith.constant 0 : index
    %c6_928 = arith.constant 6 : index
    %c0_929 = arith.constant 0 : index
    %c0_930 = arith.constant 0 : index
    %228 = vector.load %arg14[%c0_926, %c0_927, %c6_928, %c0_929, %c0_930] : memref<1x2x21x17x13xf32, #tpu.memory_space<vmem>>, vector<1x2x1x17x13xf32>
    %c0_931 = arith.constant 0 : index
    %c0_932 = arith.constant 0 : index
    %c2_933 = arith.constant 2 : index
    %c0_934 = arith.constant 0 : index
    %c0_935 = arith.constant 0 : index
    %229 = vector.load %arg14[%c0_931, %c0_932, %c2_933, %c0_934, %c0_935] : memref<1x2x21x17x13xf32, #tpu.memory_space<vmem>>, vector<1x2x1x17x13xf32>
    tpu.vector_store %arg14[%c0_931, %c0_932, %c2_933, %c0_934, %c0_935], %228 {strides = array<i32>} : memref<1x2x21x17x13xf32, #tpu.memory_space<vmem>>, vector<1x2x1x17x13xf32>,
    %c0_936 = arith.constant 0 : index
    %c0_937 = arith.constant 0 : index
    %c6_938 = arith.constant 6 : index
    %c0_939 = arith.constant 0 : index
    %c0_940 = arith.constant 0 : index
    %230 = vector.load %arg14[%c0_936, %c0_937, %c6_938, %c0_939, %c0_940] : memref<1x2x21x17x13xf32, #tpu.memory_space<vmem>>, vector<1x2x1x17x13xf32>
    %c0_941 = arith.constant 0 : index
    %c0_942 = arith.constant 0 : index
    %c3_943 = arith.constant 3 : index
    %c0_944 = arith.constant 0 : index
    %c0_945 = arith.constant 0 : index
    %231 = vector.load %arg14[%c0_941, %c0_942, %c3_943, %c0_944, %c0_945] : memref<1x2x21x17x13xf32, #tpu.memory_space<vmem>>, vector<1x2x1x17x13xf32>
    tpu.vector_store %arg14[%c0_941, %c0_942, %c3_943, %c0_944, %c0_945], %230 {strides = array<i32>} : memref<1x2x21x17x13xf32, #tpu.memory_space<vmem>>, vector<1x2x1x17x13xf32>,
    %c0_946 = arith.constant 0 : index
    %c0_947 = arith.constant 0 : index
    %c6_948 = arith.constant 6 : index
    %c0_949 = arith.constant 0 : index
    %c0_950 = arith.constant 0 : index
    %232 = vector.load %arg14[%c0_946, %c0_947, %c6_948, %c0_949, %c0_950] : memref<1x2x21x17x13xf32, #tpu.memory_space<vmem>>, vector<1x2x1x17x13xf32>
    %c0_951 = arith.constant 0 : index
    %c0_952 = arith.constant 0 : index
    %c4_953 = arith.constant 4 : index
    %c0_954 = arith.constant 0 : index
    %c0_955 = arith.constant 0 : index
    %233 = vector.load %arg14[%c0_951, %c0_952, %c4_953, %c0_954, %c0_955] : memref<1x2x21x17x13xf32, #tpu.memory_space<vmem>>, vector<1x2x1x17x13xf32>
    tpu.vector_store %arg14[%c0_951, %c0_952, %c4_953, %c0_954, %c0_955], %232 {strides = array<i32>} : memref<1x2x21x17x13xf32, #tpu.memory_space<vmem>>, vector<1x2x1x17x13xf32>,
    %c0_956 = arith.constant 0 : index
    %c0_957 = arith.constant 0 : index
    %c6_958 = arith.constant 6 : index
    %c0_959 = arith.constant 0 : index
    %c0_960 = arith.constant 0 : index
    %234 = vector.load %arg14[%c0_956, %c0_957, %c6_958, %c0_959, %c0_960] : memref<1x2x21x17x13xf32, #tpu.memory_space<vmem>>, vector<1x2x1x17x13xf32>
    %c0_961 = arith.constant 0 : index
    %c0_962 = arith.constant 0 : index
    %c5_963 = arith.constant 5 : index
    %c0_964 = arith.constant 0 : index
    %c0_965 = arith.constant 0 : index
    %235 = vector.load %arg14[%c0_961, %c0_962, %c5_963, %c0_964, %c0_965] : memref<1x2x21x17x13xf32, #tpu.memory_space<vmem>>, vector<1x2x1x17x13xf32>
    tpu.vector_store %arg14[%c0_961, %c0_962, %c5_963, %c0_964, %c0_965], %234 {strides = array<i32>} : memref<1x2x21x17x13xf32, #tpu.memory_space<vmem>>, vector<1x2x1x17x13xf32>,
    %c0_966 = arith.constant 0 : index
    %c0_967 = arith.constant 0 : index
    %c13_968 = arith.constant 13 : index
    %c0_969 = arith.constant 0 : index
    %c0_970 = arith.constant 0 : index
    %236 = vector.load %arg14[%c0_966, %c0_967, %c13_968, %c0_969, %c0_970] : memref<1x2x21x17x13xf32, #tpu.memory_space<vmem>>, vector<1x2x1x17x13xf32>
    %c0_971 = arith.constant 0 : index
    %c0_972 = arith.constant 0 : index
    %c14_973 = arith.constant 14 : index
    %c0_974 = arith.constant 0 : index
    %c0_975 = arith.constant 0 : index
    %237 = vector.load %arg14[%c0_971, %c0_972, %c14_973, %c0_974, %c0_975] : memref<1x2x21x17x13xf32, #tpu.memory_space<vmem>>, vector<1x2x1x17x13xf32>
    tpu.vector_store %arg14[%c0_971, %c0_972, %c14_973, %c0_974, %c0_975], %236 {strides = array<i32>} : memref<1x2x21x17x13xf32, #tpu.memory_space<vmem>>, vector<1x2x1x17x13xf32>,
    %c0_976 = arith.constant 0 : index
    %c0_977 = arith.constant 0 : index
    %c13_978 = arith.constant 13 : index
    %c0_979 = arith.constant 0 : index
    %c0_980 = arith.constant 0 : index
    %238 = vector.load %arg14[%c0_976, %c0_977, %c13_978, %c0_979, %c0_980] : memref<1x2x21x17x13xf32, #tpu.memory_space<vmem>>, vector<1x2x1x17x13xf32>
    %c0_981 = arith.constant 0 : index
    %c0_982 = arith.constant 0 : index
    %c15_983 = arith.constant 15 : index
    %c0_984 = arith.constant 0 : index
    %c0_985 = arith.constant 0 : index
    %239 = vector.load %arg14[%c0_981, %c0_982, %c15_983, %c0_984, %c0_985] : memref<1x2x21x17x13xf32, #tpu.memory_space<vmem>>, vector<1x2x1x17x13xf32>
    tpu.vector_store %arg14[%c0_981, %c0_982, %c15_983, %c0_984, %c0_985], %238 {strides = array<i32>} : memref<1x2x21x17x13xf32, #tpu.memory_space<vmem>>, vector<1x2x1x17x13xf32>,
    %c0_986 = arith.constant 0 : index
    %c0_987 = arith.constant 0 : index
    %c13_988 = arith.constant 13 : index
    %c0_989 = arith.constant 0 : index
    %c0_990 = arith.constant 0 : index
    %240 = vector.load %arg14[%c0_986, %c0_987, %c13_988, %c0_989, %c0_990] : memref<1x2x21x17x13xf32, #tpu.memory_space<vmem>>, vector<1x2x1x17x13xf32>
    %c0_991 = arith.constant 0 : index
    %c0_992 = arith.constant 0 : index
    %c16_993 = arith.constant 16 : index
    %c0_994 = arith.constant 0 : index
    %c0_995 = arith.constant 0 : index
    %241 = vector.load %arg14[%c0_991, %c0_992, %c16_993, %c0_994, %c0_995] : memref<1x2x21x17x13xf32, #tpu.memory_space<vmem>>, vector<1x2x1x17x13xf32>
    tpu.vector_store %arg14[%c0_991, %c0_992, %c16_993, %c0_994, %c0_995], %240 {strides = array<i32>} : memref<1x2x21x17x13xf32, #tpu.memory_space<vmem>>, vector<1x2x1x17x13xf32>,
    %c0_996 = arith.constant 0 : index
    %c0_997 = arith.constant 0 : index
    %c13_998 = arith.constant 13 : index
    %c0_999 = arith.constant 0 : index
    %c0_1000 = arith.constant 0 : index
    %242 = vector.load %arg14[%c0_996, %c0_997, %c13_998, %c0_999, %c0_1000] : memref<1x2x21x17x13xf32, #tpu.memory_space<vmem>>, vector<1x2x1x17x13xf32>
    %c0_1001 = arith.constant 0 : index
    %c0_1002 = arith.constant 0 : index
    %c17_1003 = arith.constant 17 : index
    %c0_1004 = arith.constant 0 : index
    %c0_1005 = arith.constant 0 : index
    %243 = vector.load %arg14[%c0_1001, %c0_1002, %c17_1003, %c0_1004, %c0_1005] : memref<1x2x21x17x13xf32, #tpu.memory_space<vmem>>, vector<1x2x1x17x13xf32>
    tpu.vector_store %arg14[%c0_1001, %c0_1002, %c17_1003, %c0_1004, %c0_1005], %242 {strides = array<i32>} : memref<1x2x21x17x13xf32, #tpu.memory_space<vmem>>, vector<1x2x1x17x13xf32>,
    %c0_1006 = arith.constant 0 : index
    %c0_1007 = arith.constant 0 : index
    %c13_1008 = arith.constant 13 : index
    %c0_1009 = arith.constant 0 : index
    %c0_1010 = arith.constant 0 : index
    %244 = vector.load %arg14[%c0_1006, %c0_1007, %c13_1008, %c0_1009, %c0_1010] : memref<1x2x21x17x13xf32, #tpu.memory_space<vmem>>, vector<1x2x1x17x13xf32>
    %c0_1011 = arith.constant 0 : index
    %c0_1012 = arith.constant 0 : index
    %c18_1013 = arith.constant 18 : index
    %c0_1014 = arith.constant 0 : index
    %c0_1015 = arith.constant 0 : index
    %245 = vector.load %arg14[%c0_1011, %c0_1012, %c18_1013, %c0_1014, %c0_1015] : memref<1x2x21x17x13xf32, #tpu.memory_space<vmem>>, vector<1x2x1x17x13xf32>
    tpu.vector_store %arg14[%c0_1011, %c0_1012, %c18_1013, %c0_1014, %c0_1015], %244 {strides = array<i32>} : memref<1x2x21x17x13xf32, #tpu.memory_space<vmem>>, vector<1x2x1x17x13xf32>,
    %c0_1016 = arith.constant 0 : index
    %c0_1017 = arith.constant 0 : index
    %c13_1018 = arith.constant 13 : index
    %c0_1019 = arith.constant 0 : index
    %c0_1020 = arith.constant 0 : index
    %246 = vector.load %arg14[%c0_1016, %c0_1017, %c13_1018, %c0_1019, %c0_1020] : memref<1x2x21x17x13xf32, #tpu.memory_space<vmem>>, vector<1x2x1x17x13xf32>
    %c0_1021 = arith.constant 0 : index
    %c0_1022 = arith.constant 0 : index
    %c19_1023 = arith.constant 19 : index
    %c0_1024 = arith.constant 0 : index
    %c0_1025 = arith.constant 0 : index
    %247 = vector.load %arg14[%c0_1021, %c0_1022, %c19_1023, %c0_1024, %c0_1025] : memref<1x2x21x17x13xf32, #tpu.memory_space<vmem>>, vector<1x2x1x17x13xf32>
    tpu.vector_store %arg14[%c0_1021, %c0_1022, %c19_1023, %c0_1024, %c0_1025], %246 {strides = array<i32>} : memref<1x2x21x17x13xf32, #tpu.memory_space<vmem>>, vector<1x2x1x17x13xf32>,
    %c0_1026 = arith.constant 0 : index
    %c0_1027 = arith.constant 0 : index
    %c13_1028 = arith.constant 13 : index
    %c0_1029 = arith.constant 0 : index
    %c0_1030 = arith.constant 0 : index
    %248 = vector.load %arg14[%c0_1026, %c0_1027, %c13_1028, %c0_1029, %c0_1030] : memref<1x2x21x17x13xf32, #tpu.memory_space<vmem>>, vector<1x2x1x17x13xf32>
    %c0_1031 = arith.constant 0 : index
    %c0_1032 = arith.constant 0 : index
    %c20_1033 = arith.constant 20 : index
    %c0_1034 = arith.constant 0 : index
    %c0_1035 = arith.constant 0 : index
    %249 = vector.load %arg14[%c0_1031, %c0_1032, %c20_1033, %c0_1034, %c0_1035] : memref<1x2x21x17x13xf32, #tpu.memory_space<vmem>>, vector<1x2x1x17x13xf32>
    tpu.vector_store %arg14[%c0_1031, %c0_1032, %c20_1033, %c0_1034, %c0_1035], %248 {strides = array<i32>} : memref<1x2x21x17x13xf32, #tpu.memory_space<vmem>>, vector<1x2x1x17x13xf32>,
    %c0_1036 = arith.constant 0 : index
    %c0_1037 = arith.constant 0 : index
    %c0_1038 = arith.constant 0 : index
    %c0_1039 = arith.constant 0 : index
    %c0_1040 = arith.constant 0 : index
    %250 = vector.load %arg3[%c0_1036, %c0_1037, %c0_1038, %c0_1039, %c0_1040] : memref<1x2x8x8x8xf32, #tpu.memory_space<vmem>>, vector<1x2x8x8x8xf32>
    %c0_1041 = arith.constant 0 : index
    %c0_1042 = arith.constant 0 : index
    %c6_1043 = arith.constant 6 : index
    %c4_1044 = arith.constant 4 : index
    %c2_1045 = arith.constant 2 : index
    %251 = vector.load %arg15[%c0_1041, %c0_1042, %c6_1043, %c4_1044, %c2_1045] : memref<1x2x21x17x13xf32, #tpu.memory_space<vmem>>, vector<1x2x8x8x8xf32>
    tpu.vector_store %arg15[%c0_1041, %c0_1042, %c6_1043, %c4_1044, %c2_1045], %250 {strides = array<i32>} : memref<1x2x21x17x13xf32, #tpu.memory_space<vmem>>, vector<1x2x8x8x8xf32>,
    %c0_1046 = arith.constant 0 : index
    %c0_1047 = arith.constant 0 : index
    %c6_1048 = arith.constant 6 : index
    %c4_1049 = arith.constant 4 : index
    %c8_1050 = arith.constant 8 : index
    %252 = vector.load %arg15[%c0_1046, %c0_1047, %c6_1048, %c4_1049, %c8_1050] : memref<1x2x21x17x13xf32, #tpu.memory_space<vmem>>, vector<1x2x8x8x1xf32>
    %c0_1051 = arith.constant 0 : index
    %c0_1052 = arith.constant 0 : index
    %c6_1053 = arith.constant 6 : index
    %c4_1054 = arith.constant 4 : index
    %c0_1055 = arith.constant 0 : index
    %253 = vector.load %arg15[%c0_1051, %c0_1052, %c6_1053, %c4_1054, %c0_1055] : memref<1x2x21x17x13xf32, #tpu.memory_space<vmem>>, vector<1x2x8x8x1xf32>
    tpu.vector_store %arg15[%c0_1051, %c0_1052, %c6_1053, %c4_1054, %c0_1055], %252 {strides = array<i32>} : memref<1x2x21x17x13xf32, #tpu.memory_space<vmem>>, vector<1x2x8x8x1xf32>,
    %c0_1056 = arith.constant 0 : index
    %c0_1057 = arith.constant 0 : index
    %c6_1058 = arith.constant 6 : index
    %c4_1059 = arith.constant 4 : index
    %c9_1060 = arith.constant 9 : index
    %254 = vector.load %arg15[%c0_1056, %c0_1057, %c6_1058, %c4_1059, %c9_1060] : memref<1x2x21x17x13xf32, #tpu.memory_space<vmem>>, vector<1x2x8x8x1xf32>
    %c0_1061 = arith.constant 0 : index
    %c0_1062 = arith.constant 0 : index
    %c6_1063 = arith.constant 6 : index
    %c4_1064 = arith.constant 4 : index
    %c1_1065 = arith.constant 1 : index
    %255 = vector.load %arg15[%c0_1061, %c0_1062, %c6_1063, %c4_1064, %c1_1065] : memref<1x2x21x17x13xf32, #tpu.memory_space<vmem>>, vector<1x2x8x8x1xf32>
    tpu.vector_store %arg15[%c0_1061, %c0_1062, %c6_1063, %c4_1064, %c1_1065], %254 {strides = array<i32>} : memref<1x2x21x17x13xf32, #tpu.memory_space<vmem>>, vector<1x2x8x8x1xf32>,
    %c0_1066 = arith.constant 0 : index
    %c0_1067 = arith.constant 0 : index
    %c6_1068 = arith.constant 6 : index
    %c4_1069 = arith.constant 4 : index
    %c2_1070 = arith.constant 2 : index
    %256 = vector.load %arg15[%c0_1066, %c0_1067, %c6_1068, %c4_1069, %c2_1070] : memref<1x2x21x17x13xf32, #tpu.memory_space<vmem>>, vector<1x2x8x8x1xf32>
    %c0_1071 = arith.constant 0 : index
    %c0_1072 = arith.constant 0 : index
    %c6_1073 = arith.constant 6 : index
    %c4_1074 = arith.constant 4 : index
    %c10_1075 = arith.constant 10 : index
    %257 = vector.load %arg15[%c0_1071, %c0_1072, %c6_1073, %c4_1074, %c10_1075] : memref<1x2x21x17x13xf32, #tpu.memory_space<vmem>>, vector<1x2x8x8x1xf32>
    tpu.vector_store %arg15[%c0_1071, %c0_1072, %c6_1073, %c4_1074, %c10_1075], %256 {strides = array<i32>} : memref<1x2x21x17x13xf32, #tpu.memory_space<vmem>>, vector<1x2x8x8x1xf32>,
    %c0_1076 = arith.constant 0 : index
    %c0_1077 = arith.constant 0 : index
    %c6_1078 = arith.constant 6 : index
    %c4_1079 = arith.constant 4 : index
    %c3_1080 = arith.constant 3 : index
    %258 = vector.load %arg15[%c0_1076, %c0_1077, %c6_1078, %c4_1079, %c3_1080] : memref<1x2x21x17x13xf32, #tpu.memory_space<vmem>>, vector<1x2x8x8x1xf32>
    %c0_1081 = arith.constant 0 : index
    %c0_1082 = arith.constant 0 : index
    %c6_1083 = arith.constant 6 : index
    %c4_1084 = arith.constant 4 : index
    %c11_1085 = arith.constant 11 : index
    %259 = vector.load %arg15[%c0_1081, %c0_1082, %c6_1083, %c4_1084, %c11_1085] : memref<1x2x21x17x13xf32, #tpu.memory_space<vmem>>, vector<1x2x8x8x1xf32>
    tpu.vector_store %arg15[%c0_1081, %c0_1082, %c6_1083, %c4_1084, %c11_1085], %258 {strides = array<i32>} : memref<1x2x21x17x13xf32, #tpu.memory_space<vmem>>, vector<1x2x8x8x1xf32>,
    %c0_1086 = arith.constant 0 : index
    %c0_1087 = arith.constant 0 : index
    %c6_1088 = arith.constant 6 : index
    %c4_1089 = arith.constant 4 : index
    %c4_1090 = arith.constant 4 : index
    %260 = vector.load %arg15[%c0_1086, %c0_1087, %c6_1088, %c4_1089, %c4_1090] : memref<1x2x21x17x13xf32, #tpu.memory_space<vmem>>, vector<1x2x8x8x1xf32>
    %c0_1091 = arith.constant 0 : index
    %c0_1092 = arith.constant 0 : index
    %c6_1093 = arith.constant 6 : index
    %c4_1094 = arith.constant 4 : index
    %c12_1095 = arith.constant 12 : index
    %261 = vector.load %arg15[%c0_1091, %c0_1092, %c6_1093, %c4_1094, %c12_1095] : memref<1x2x21x17x13xf32, #tpu.memory_space<vmem>>, vector<1x2x8x8x1xf32>
    tpu.vector_store %arg15[%c0_1091, %c0_1092, %c6_1093, %c4_1094, %c12_1095], %260 {strides = array<i32>} : memref<1x2x21x17x13xf32, #tpu.memory_space<vmem>>, vector<1x2x8x8x1xf32>,
    %c0_1096 = arith.constant 0 : index
    %c0_1097 = arith.constant 0 : index
    %c6_1098 = arith.constant 6 : index
    %c8_1099 = arith.constant 8 : index
    %c0_1100 = arith.constant 0 : index
    %262 = vector.load %arg15[%c0_1096, %c0_1097, %c6_1098, %c8_1099, %c0_1100] : memref<1x2x21x17x13xf32, #tpu.memory_space<vmem>>, vector<1x2x8x1x13xf32>
    %c0_1101 = arith.constant 0 : index
    %c0_1102 = arith.constant 0 : index
    %c6_1103 = arith.constant 6 : index
    %c0_1104 = arith.constant 0 : index
    %c0_1105 = arith.constant 0 : index
    %263 = vector.load %arg15[%c0_1101, %c0_1102, %c6_1103, %c0_1104, %c0_1105] : memref<1x2x21x17x13xf32, #tpu.memory_space<vmem>>, vector<1x2x8x1x13xf32>
    tpu.vector_store %arg15[%c0_1101, %c0_1102, %c6_1103, %c0_1104, %c0_1105], %262 {strides = array<i32>} : memref<1x2x21x17x13xf32, #tpu.memory_space<vmem>>, vector<1x2x8x1x13xf32>,
    %c0_1106 = arith.constant 0 : index
    %c0_1107 = arith.constant 0 : index
    %c6_1108 = arith.constant 6 : index
    %c9_1109 = arith.constant 9 : index
    %c0_1110 = arith.constant 0 : index
    %264 = vector.load %arg15[%c0_1106, %c0_1107, %c6_1108, %c9_1109, %c0_1110] : memref<1x2x21x17x13xf32, #tpu.memory_space<vmem>>, vector<1x2x8x1x13xf32>
    %c0_1111 = arith.constant 0 : index
    %c0_1112 = arith.constant 0 : index
    %c6_1113 = arith.constant 6 : index
    %c1_1114 = arith.constant 1 : index
    %c0_1115 = arith.constant 0 : index
    %265 = vector.load %arg15[%c0_1111, %c0_1112, %c6_1113, %c1_1114, %c0_1115] : memref<1x2x21x17x13xf32, #tpu.memory_space<vmem>>, vector<1x2x8x1x13xf32>
    tpu.vector_store %arg15[%c0_1111, %c0_1112, %c6_1113, %c1_1114, %c0_1115], %264 {strides = array<i32>} : memref<1x2x21x17x13xf32, #tpu.memory_space<vmem>>, vector<1x2x8x1x13xf32>,
    %c0_1116 = arith.constant 0 : index
    %c0_1117 = arith.constant 0 : index
    %c6_1118 = arith.constant 6 : index
    %c10_1119 = arith.constant 10 : index
    %c0_1120 = arith.constant 0 : index
    %266 = vector.load %arg15[%c0_1116, %c0_1117, %c6_1118, %c10_1119, %c0_1120] : memref<1x2x21x17x13xf32, #tpu.memory_space<vmem>>, vector<1x2x8x1x13xf32>
    %c0_1121 = arith.constant 0 : index
    %c0_1122 = arith.constant 0 : index
    %c6_1123 = arith.constant 6 : index
    %c2_1124 = arith.constant 2 : index
    %c0_1125 = arith.constant 0 : index
    %267 = vector.load %arg15[%c0_1121, %c0_1122, %c6_1123, %c2_1124, %c0_1125] : memref<1x2x21x17x13xf32, #tpu.memory_space<vmem>>, vector<1x2x8x1x13xf32>
    tpu.vector_store %arg15[%c0_1121, %c0_1122, %c6_1123, %c2_1124, %c0_1125], %266 {strides = array<i32>} : memref<1x2x21x17x13xf32, #tpu.memory_space<vmem>>, vector<1x2x8x1x13xf32>,
    %c0_1126 = arith.constant 0 : index
    %c0_1127 = arith.constant 0 : index
    %c6_1128 = arith.constant 6 : index
    %c11_1129 = arith.constant 11 : index
    %c0_1130 = arith.constant 0 : index
    %268 = vector.load %arg15[%c0_1126, %c0_1127, %c6_1128, %c11_1129, %c0_1130] : memref<1x2x21x17x13xf32, #tpu.memory_space<vmem>>, vector<1x2x8x1x13xf32>
    %c0_1131 = arith.constant 0 : index
    %c0_1132 = arith.constant 0 : index
    %c6_1133 = arith.constant 6 : index
    %c3_1134 = arith.constant 3 : index
    %c0_1135 = arith.constant 0 : index
    %269 = vector.load %arg15[%c0_1131, %c0_1132, %c6_1133, %c3_1134, %c0_1135] : memref<1x2x21x17x13xf32, #tpu.memory_space<vmem>>, vector<1x2x8x1x13xf32>
    tpu.vector_store %arg15[%c0_1131, %c0_1132, %c6_1133, %c3_1134, %c0_1135], %268 {strides = array<i32>} : memref<1x2x21x17x13xf32, #tpu.memory_space<vmem>>, vector<1x2x8x1x13xf32>,
    %c0_1136 = arith.constant 0 : index
    %c0_1137 = arith.constant 0 : index
    %c6_1138 = arith.constant 6 : index
    %c4_1139 = arith.constant 4 : index
    %c0_1140 = arith.constant 0 : index
    %270 = vector.load %arg15[%c0_1136, %c0_1137, %c6_1138, %c4_1139, %c0_1140] : memref<1x2x21x17x13xf32, #tpu.memory_space<vmem>>, vector<1x2x8x1x13xf32>
    %c0_1141 = arith.constant 0 : index
    %c0_1142 = arith.constant 0 : index
    %c6_1143 = arith.constant 6 : index
    %c12_1144 = arith.constant 12 : index
    %c0_1145 = arith.constant 0 : index
    %271 = vector.load %arg15[%c0_1141, %c0_1142, %c6_1143, %c12_1144, %c0_1145] : memref<1x2x21x17x13xf32, #tpu.memory_space<vmem>>, vector<1x2x8x1x13xf32>
    tpu.vector_store %arg15[%c0_1141, %c0_1142, %c6_1143, %c12_1144, %c0_1145], %270 {strides = array<i32>} : memref<1x2x21x17x13xf32, #tpu.memory_space<vmem>>, vector<1x2x8x1x13xf32>,
    %c0_1146 = arith.constant 0 : index
    %c0_1147 = arith.constant 0 : index
    %c6_1148 = arith.constant 6 : index
    %c5_1149 = arith.constant 5 : index
    %c0_1150 = arith.constant 0 : index
    %272 = vector.load %arg15[%c0_1146, %c0_1147, %c6_1148, %c5_1149, %c0_1150] : memref<1x2x21x17x13xf32, #tpu.memory_space<vmem>>, vector<1x2x8x1x13xf32>
    %c0_1151 = arith.constant 0 : index
    %c0_1152 = arith.constant 0 : index
    %c6_1153 = arith.constant 6 : index
    %c13_1154 = arith.constant 13 : index
    %c0_1155 = arith.constant 0 : index
    %273 = vector.load %arg15[%c0_1151, %c0_1152, %c6_1153, %c13_1154, %c0_1155] : memref<1x2x21x17x13xf32, #tpu.memory_space<vmem>>, vector<1x2x8x1x13xf32>
    tpu.vector_store %arg15[%c0_1151, %c0_1152, %c6_1153, %c13_1154, %c0_1155], %272 {strides = array<i32>} : memref<1x2x21x17x13xf32, #tpu.memory_space<vmem>>, vector<1x2x8x1x13xf32>,
    %c0_1156 = arith.constant 0 : index
    %c0_1157 = arith.constant 0 : index
    %c6_1158 = arith.constant 6 : index
    %c6_1159 = arith.constant 6 : index
    %c0_1160 = arith.constant 0 : index
    %274 = vector.load %arg15[%c0_1156, %c0_1157, %c6_1158, %c6_1159, %c0_1160] : memref<1x2x21x17x13xf32, #tpu.memory_space<vmem>>, vector<1x2x8x1x13xf32>
    %c0_1161 = arith.constant 0 : index
    %c0_1162 = arith.constant 0 : index
    %c6_1163 = arith.constant 6 : index
    %c14_1164 = arith.constant 14 : index
    %c0_1165 = arith.constant 0 : index
    %275 = vector.load %arg15[%c0_1161, %c0_1162, %c6_1163, %c14_1164, %c0_1165] : memref<1x2x21x17x13xf32, #tpu.memory_space<vmem>>, vector<1x2x8x1x13xf32>
    tpu.vector_store %arg15[%c0_1161, %c0_1162, %c6_1163, %c14_1164, %c0_1165], %274 {strides = array<i32>} : memref<1x2x21x17x13xf32, #tpu.memory_space<vmem>>, vector<1x2x8x1x13xf32>,
    %c0_1166 = arith.constant 0 : index
    %c0_1167 = arith.constant 0 : index
    %c6_1168 = arith.constant 6 : index
    %c7_1169 = arith.constant 7 : index
    %c0_1170 = arith.constant 0 : index
    %276 = vector.load %arg15[%c0_1166, %c0_1167, %c6_1168, %c7_1169, %c0_1170] : memref<1x2x21x17x13xf32, #tpu.memory_space<vmem>>, vector<1x2x8x1x13xf32>
    %c0_1171 = arith.constant 0 : index
    %c0_1172 = arith.constant 0 : index
    %c6_1173 = arith.constant 6 : index
    %c15_1174 = arith.constant 15 : index
    %c0_1175 = arith.constant 0 : index
    %277 = vector.load %arg15[%c0_1171, %c0_1172, %c6_1173, %c15_1174, %c0_1175] : memref<1x2x21x17x13xf32, #tpu.memory_space<vmem>>, vector<1x2x8x1x13xf32>
    tpu.vector_store %arg15[%c0_1171, %c0_1172, %c6_1173, %c15_1174, %c0_1175], %276 {strides = array<i32>} : memref<1x2x21x17x13xf32, #tpu.memory_space<vmem>>, vector<1x2x8x1x13xf32>,
    %c0_1176 = arith.constant 0 : index
    %c0_1177 = arith.constant 0 : index
    %c6_1178 = arith.constant 6 : index
    %c8_1179 = arith.constant 8 : index
    %c0_1180 = arith.constant 0 : index
    %278 = vector.load %arg15[%c0_1176, %c0_1177, %c6_1178, %c8_1179, %c0_1180] : memref<1x2x21x17x13xf32, #tpu.memory_space<vmem>>, vector<1x2x8x1x13xf32>
    %c0_1181 = arith.constant 0 : index
    %c0_1182 = arith.constant 0 : index
    %c6_1183 = arith.constant 6 : index
    %c16_1184 = arith.constant 16 : index
    %c0_1185 = arith.constant 0 : index
    %279 = vector.load %arg15[%c0_1181, %c0_1182, %c6_1183, %c16_1184, %c0_1185] : memref<1x2x21x17x13xf32, #tpu.memory_space<vmem>>, vector<1x2x8x1x13xf32>
    tpu.vector_store %arg15[%c0_1181, %c0_1182, %c6_1183, %c16_1184, %c0_1185], %278 {strides = array<i32>} : memref<1x2x21x17x13xf32, #tpu.memory_space<vmem>>, vector<1x2x8x1x13xf32>,
    %c0_1186 = arith.constant 0 : index
    %c0_1187 = arith.constant 0 : index
    %c8_1188 = arith.constant 8 : index
    %c0_1189 = arith.constant 0 : index
    %c0_1190 = arith.constant 0 : index
    %280 = vector.load %arg15[%c0_1186, %c0_1187, %c8_1188, %c0_1189, %c0_1190] : memref<1x2x21x17x13xf32, #tpu.memory_space<vmem>>, vector<1x2x1x17x13xf32>
    %c0_1191 = arith.constant 0 : index
    %c0_1192 = arith.constant 0 : index
    %c0_1193 = arith.constant 0 : index
    %c0_1194 = arith.constant 0 : index
    %c0_1195 = arith.constant 0 : index
    %281 = vector.load %arg15[%c0_1191, %c0_1192, %c0_1193, %c0_1194, %c0_1195] : memref<1x2x21x17x13xf32, #tpu.memory_space<vmem>>, vector<1x2x1x17x13xf32>
    tpu.vector_store %arg15[%c0_1191, %c0_1192, %c0_1193, %c0_1194, %c0_1195], %280 {strides = array<i32>} : memref<1x2x21x17x13xf32, #tpu.memory_space<vmem>>, vector<1x2x1x17x13xf32>,
    %c0_1196 = arith.constant 0 : index
    %c0_1197 = arith.constant 0 : index
    %c9_1198 = arith.constant 9 : index
    %c0_1199 = arith.constant 0 : index
    %c0_1200 = arith.constant 0 : index
    %282 = vector.load %arg15[%c0_1196, %c0_1197, %c9_1198, %c0_1199, %c0_1200] : memref<1x2x21x17x13xf32, #tpu.memory_space<vmem>>, vector<1x2x1x17x13xf32>
    %c0_1201 = arith.constant 0 : index
    %c0_1202 = arith.constant 0 : index
    %c1_1203 = arith.constant 1 : index
    %c0_1204 = arith.constant 0 : index
    %c0_1205 = arith.constant 0 : index
    %283 = vector.load %arg15[%c0_1201, %c0_1202, %c1_1203, %c0_1204, %c0_1205] : memref<1x2x21x17x13xf32, #tpu.memory_space<vmem>>, vector<1x2x1x17x13xf32>
    tpu.vector_store %arg15[%c0_1201, %c0_1202, %c1_1203, %c0_1204, %c0_1205], %282 {strides = array<i32>} : memref<1x2x21x17x13xf32, #tpu.memory_space<vmem>>, vector<1x2x1x17x13xf32>,
    %c0_1206 = arith.constant 0 : index
    %c0_1207 = arith.constant 0 : index
    %c10_1208 = arith.constant 10 : index
    %c0_1209 = arith.constant 0 : index
    %c0_1210 = arith.constant 0 : index
    %284 = vector.load %arg15[%c0_1206, %c0_1207, %c10_1208, %c0_1209, %c0_1210] : memref<1x2x21x17x13xf32, #tpu.memory_space<vmem>>, vector<1x2x1x17x13xf32>
    %c0_1211 = arith.constant 0 : index
    %c0_1212 = arith.constant 0 : index
    %c2_1213 = arith.constant 2 : index
    %c0_1214 = arith.constant 0 : index
    %c0_1215 = arith.constant 0 : index
    %285 = vector.load %arg15[%c0_1211, %c0_1212, %c2_1213, %c0_1214, %c0_1215] : memref<1x2x21x17x13xf32, #tpu.memory_space<vmem>>, vector<1x2x1x17x13xf32>
    tpu.vector_store %arg15[%c0_1211, %c0_1212, %c2_1213, %c0_1214, %c0_1215], %284 {strides = array<i32>} : memref<1x2x21x17x13xf32, #tpu.memory_space<vmem>>, vector<1x2x1x17x13xf32>,
    %c0_1216 = arith.constant 0 : index
    %c0_1217 = arith.constant 0 : index
    %c11_1218 = arith.constant 11 : index
    %c0_1219 = arith.constant 0 : index
    %c0_1220 = arith.constant 0 : index
    %286 = vector.load %arg15[%c0_1216, %c0_1217, %c11_1218, %c0_1219, %c0_1220] : memref<1x2x21x17x13xf32, #tpu.memory_space<vmem>>, vector<1x2x1x17x13xf32>
    %c0_1221 = arith.constant 0 : index
    %c0_1222 = arith.constant 0 : index
    %c3_1223 = arith.constant 3 : index
    %c0_1224 = arith.constant 0 : index
    %c0_1225 = arith.constant 0 : index
    %287 = vector.load %arg15[%c0_1221, %c0_1222, %c3_1223, %c0_1224, %c0_1225] : memref<1x2x21x17x13xf32, #tpu.memory_space<vmem>>, vector<1x2x1x17x13xf32>
    tpu.vector_store %arg15[%c0_1221, %c0_1222, %c3_1223, %c0_1224, %c0_1225], %286 {strides = array<i32>} : memref<1x2x21x17x13xf32, #tpu.memory_space<vmem>>, vector<1x2x1x17x13xf32>,
    %c0_1226 = arith.constant 0 : index
    %c0_1227 = arith.constant 0 : index
    %c12_1228 = arith.constant 12 : index
    %c0_1229 = arith.constant 0 : index
    %c0_1230 = arith.constant 0 : index
    %288 = vector.load %arg15[%c0_1226, %c0_1227, %c12_1228, %c0_1229, %c0_1230] : memref<1x2x21x17x13xf32, #tpu.memory_space<vmem>>, vector<1x2x1x17x13xf32>
    %c0_1231 = arith.constant 0 : index
    %c0_1232 = arith.constant 0 : index
    %c4_1233 = arith.constant 4 : index
    %c0_1234 = arith.constant 0 : index
    %c0_1235 = arith.constant 0 : index
    %289 = vector.load %arg15[%c0_1231, %c0_1232, %c4_1233, %c0_1234, %c0_1235] : memref<1x2x21x17x13xf32, #tpu.memory_space<vmem>>, vector<1x2x1x17x13xf32>
    tpu.vector_store %arg15[%c0_1231, %c0_1232, %c4_1233, %c0_1234, %c0_1235], %288 {strides = array<i32>} : memref<1x2x21x17x13xf32, #tpu.memory_space<vmem>>, vector<1x2x1x17x13xf32>,
    %c0_1236 = arith.constant 0 : index
    %c0_1237 = arith.constant 0 : index
    %c13_1238 = arith.constant 13 : index
    %c0_1239 = arith.constant 0 : index
    %c0_1240 = arith.constant 0 : index
    %290 = vector.load %arg15[%c0_1236, %c0_1237, %c13_1238, %c0_1239, %c0_1240] : memref<1x2x21x17x13xf32, #tpu.memory_space<vmem>>, vector<1x2x1x17x13xf32>
    %c0_1241 = arith.constant 0 : index
    %c0_1242 = arith.constant 0 : index
    %c5_1243 = arith.constant 5 : index
    %c0_1244 = arith.constant 0 : index
    %c0_1245 = arith.constant 0 : index
    %291 = vector.load %arg15[%c0_1241, %c0_1242, %c5_1243, %c0_1244, %c0_1245] : memref<1x2x21x17x13xf32, #tpu.memory_space<vmem>>, vector<1x2x1x17x13xf32>
    tpu.vector_store %arg15[%c0_1241, %c0_1242, %c5_1243, %c0_1244, %c0_1245], %290 {strides = array<i32>} : memref<1x2x21x17x13xf32, #tpu.memory_space<vmem>>, vector<1x2x1x17x13xf32>,
    %c0_1246 = arith.constant 0 : index
    %c0_1247 = arith.constant 0 : index
    %c6_1248 = arith.constant 6 : index
    %c0_1249 = arith.constant 0 : index
    %c0_1250 = arith.constant 0 : index
    %292 = vector.load %arg15[%c0_1246, %c0_1247, %c6_1248, %c0_1249, %c0_1250] : memref<1x2x21x17x13xf32, #tpu.memory_space<vmem>>, vector<1x2x1x17x13xf32>
    %c0_1251 = arith.constant 0 : index
    %c0_1252 = arith.constant 0 : index
    %c14_1253 = arith.constant 14 : index
    %c0_1254 = arith.constant 0 : index
    %c0_1255 = arith.constant 0 : index
    %293 = vector.load %arg15[%c0_1251, %c0_1252, %c14_1253, %c0_1254, %c0_1255] : memref<1x2x21x17x13xf32, #tpu.memory_space<vmem>>, vector<1x2x1x17x13xf32>
    tpu.vector_store %arg15[%c0_1251, %c0_1252, %c14_1253, %c0_1254, %c0_1255], %292 {strides = array<i32>} : memref<1x2x21x17x13xf32, #tpu.memory_space<vmem>>, vector<1x2x1x17x13xf32>,
    %c0_1256 = arith.constant 0 : index
    %c0_1257 = arith.constant 0 : index
    %c7_1258 = arith.constant 7 : index
    %c0_1259 = arith.constant 0 : index
    %c0_1260 = arith.constant 0 : index
    %294 = vector.load %arg15[%c0_1256, %c0_1257, %c7_1258, %c0_1259, %c0_1260] : memref<1x2x21x17x13xf32, #tpu.memory_space<vmem>>, vector<1x2x1x17x13xf32>
    %c0_1261 = arith.constant 0 : index
    %c0_1262 = arith.constant 0 : index
    %c15_1263 = arith.constant 15 : index
    %c0_1264 = arith.constant 0 : index
    %c0_1265 = arith.constant 0 : index
    %295 = vector.load %arg15[%c0_1261, %c0_1262, %c15_1263, %c0_1264, %c0_1265] : memref<1x2x21x17x13xf32, #tpu.memory_space<vmem>>, vector<1x2x1x17x13xf32>
    tpu.vector_store %arg15[%c0_1261, %c0_1262, %c15_1263, %c0_1264, %c0_1265], %294 {strides = array<i32>} : memref<1x2x21x17x13xf32, #tpu.memory_space<vmem>>, vector<1x2x1x17x13xf32>,
    %c0_1266 = arith.constant 0 : index
    %c0_1267 = arith.constant 0 : index
    %c8_1268 = arith.constant 8 : index
    %c0_1269 = arith.constant 0 : index
    %c0_1270 = arith.constant 0 : index
    %296 = vector.load %arg15[%c0_1266, %c0_1267, %c8_1268, %c0_1269, %c0_1270] : memref<1x2x21x17x13xf32, #tpu.memory_space<vmem>>, vector<1x2x1x17x13xf32>
    %c0_1271 = arith.constant 0 : index
    %c0_1272 = arith.constant 0 : index
    %c16_1273 = arith.constant 16 : index
    %c0_1274 = arith.constant 0 : index
    %c0_1275 = arith.constant 0 : index
    %297 = vector.load %arg15[%c0_1271, %c0_1272, %c16_1273, %c0_1274, %c0_1275] : memref<1x2x21x17x13xf32, #tpu.memory_space<vmem>>, vector<1x2x1x17x13xf32>
    tpu.vector_store %arg15[%c0_1271, %c0_1272, %c16_1273, %c0_1274, %c0_1275], %296 {strides = array<i32>} : memref<1x2x21x17x13xf32, #tpu.memory_space<vmem>>, vector<1x2x1x17x13xf32>,
    %c0_1276 = arith.constant 0 : index
    %c0_1277 = arith.constant 0 : index
    %c9_1278 = arith.constant 9 : index
    %c0_1279 = arith.constant 0 : index
    %c0_1280 = arith.constant 0 : index
    %298 = vector.load %arg15[%c0_1276, %c0_1277, %c9_1278, %c0_1279, %c0_1280] : memref<1x2x21x17x13xf32, #tpu.memory_space<vmem>>, vector<1x2x1x17x13xf32>
    %c0_1281 = arith.constant 0 : index
    %c0_1282 = arith.constant 0 : index
    %c17_1283 = arith.constant 17 : index
    %c0_1284 = arith.constant 0 : index
    %c0_1285 = arith.constant 0 : index
    %299 = vector.load %arg15[%c0_1281, %c0_1282, %c17_1283, %c0_1284, %c0_1285] : memref<1x2x21x17x13xf32, #tpu.memory_space<vmem>>, vector<1x2x1x17x13xf32>
    tpu.vector_store %arg15[%c0_1281, %c0_1282, %c17_1283, %c0_1284, %c0_1285], %298 {strides = array<i32>} : memref<1x2x21x17x13xf32, #tpu.memory_space<vmem>>, vector<1x2x1x17x13xf32>,
    %c0_1286 = arith.constant 0 : index
    %c0_1287 = arith.constant 0 : index
    %c10_1288 = arith.constant 10 : index
    %c0_1289 = arith.constant 0 : index
    %c0_1290 = arith.constant 0 : index
    %300 = vector.load %arg15[%c0_1286, %c0_1287, %c10_1288, %c0_1289, %c0_1290] : memref<1x2x21x17x13xf32, #tpu.memory_space<vmem>>, vector<1x2x1x17x13xf32>
    %c0_1291 = arith.constant 0 : index
    %c0_1292 = arith.constant 0 : index
    %c18_1293 = arith.constant 18 : index
    %c0_1294 = arith.constant 0 : index
    %c0_1295 = arith.constant 0 : index
    %301 = vector.load %arg15[%c0_1291, %c0_1292, %c18_1293, %c0_1294, %c0_1295] : memref<1x2x21x17x13xf32, #tpu.memory_space<vmem>>, vector<1x2x1x17x13xf32>
    tpu.vector_store %arg15[%c0_1291, %c0_1292, %c18_1293, %c0_1294, %c0_1295], %300 {strides = array<i32>} : memref<1x2x21x17x13xf32, #tpu.memory_space<vmem>>, vector<1x2x1x17x13xf32>,
    %c0_1296 = arith.constant 0 : index
    %c0_1297 = arith.constant 0 : index
    %c11_1298 = arith.constant 11 : index
    %c0_1299 = arith.constant 0 : index
    %c0_1300 = arith.constant 0 : index
    %302 = vector.load %arg15[%c0_1296, %c0_1297, %c11_1298, %c0_1299, %c0_1300] : memref<1x2x21x17x13xf32, #tpu.memory_space<vmem>>, vector<1x2x1x17x13xf32>
    %c0_1301 = arith.constant 0 : index
    %c0_1302 = arith.constant 0 : index
    %c19_1303 = arith.constant 19 : index
    %c0_1304 = arith.constant 0 : index
    %c0_1305 = arith.constant 0 : index
    %303 = vector.load %arg15[%c0_1301, %c0_1302, %c19_1303, %c0_1304, %c0_1305] : memref<1x2x21x17x13xf32, #tpu.memory_space<vmem>>, vector<1x2x1x17x13xf32>
    tpu.vector_store %arg15[%c0_1301, %c0_1302, %c19_1303, %c0_1304, %c0_1305], %302 {strides = array<i32>} : memref<1x2x21x17x13xf32, #tpu.memory_space<vmem>>, vector<1x2x1x17x13xf32>,
    %c0_1306 = arith.constant 0 : index
    %c0_1307 = arith.constant 0 : index
    %c12_1308 = arith.constant 12 : index
    %c0_1309 = arith.constant 0 : index
    %c0_1310 = arith.constant 0 : index
    %304 = vector.load %arg15[%c0_1306, %c0_1307, %c12_1308, %c0_1309, %c0_1310] : memref<1x2x21x17x13xf32, #tpu.memory_space<vmem>>, vector<1x2x1x17x13xf32>
    %c0_1311 = arith.constant 0 : index
    %c0_1312 = arith.constant 0 : index
    %c20_1313 = arith.constant 20 : index
    %c0_1314 = arith.constant 0 : index
    %c0_1315 = arith.constant 0 : index
    %305 = vector.load %arg15[%c0_1311, %c0_1312, %c20_1313, %c0_1314, %c0_1315] : memref<1x2x21x17x13xf32, #tpu.memory_space<vmem>>, vector<1x2x1x17x13xf32>
    tpu.vector_store %arg15[%c0_1311, %c0_1312, %c20_1313, %c0_1314, %c0_1315], %304 {strides = array<i32>} : memref<1x2x21x17x13xf32, #tpu.memory_space<vmem>>, vector<1x2x1x17x13xf32>,
    return
  }
}

</mosaic_0001>

<bundles_post_ra>
// kernel: my_module_forward.1
= control target key start
LH: loop header
LB: loop body
LE: loop exit
PB: predicated region body
PF: predicated region fallthrough
CT: control target
= control target key end

     0   :  { %21 = vsyncpa [#allocation3], 0  ;;  %s13992_s0 = inlined_call_operand.vmem [shape: f32[1,3,128], index: 0, kind: input, shape index: {}]   ;;  %s13993_s1 = inlined_call_operand.vmem [shape: f32[1,3,16], index: 1, kind: input, shape index: {}]   ;;  %s13994_s2 = inlined_call_operand.hbm [shape: f32[1,3,8,16], index: 2, kind: input, shape index: {}]   ;;  %s13995_s3 = inlined_call_operand.hbm [shape: f32[1,2,8,8,8], index: 3, kind: input, shape index: {}]   ;;  %s13996_s4 = inlined_call_operand.vmem [shape: f32[1,3,133], index: 4, kind: output, shape index: {0}]   ;;  %s13997_s5 = inlined_call_operand.vmem [shape: f32[1,3,21], index: 5, kind: output, shape index: {1}]   ;;  %s13998_s6 = inlined_call_operand.vmem [shape: f32[1,3,21], index: 6, kind: output, shape index: {2}]   ;;  %s13999_s7 = inlined_call_operand.vmem [shape: f32[1,3,21], index: 7, kind: output, shape index: {3}]   ;;  %s14000_s8 = inlined_call_operand.vmem [shape: f32[1,12,133], index: 8, kind: output, shape index: {4}]   ;;  %s14001_s9 = inlined_call_operand.vmem [shape: f32[1,3,17,21], index: 9, kind: output, shape index: {5}]   ;;  %s14002_s10 = inlined_call_operand.vmem [shape: f32[1,3,17,21], index: 10, kind: output, shape index: {6}]   ;;  %s14003_s11 = inlined_call_operand.vmem [shape: f32[1,3,17,21], index: 11, kind: output, shape index: {7}]   ;;  %s14004_s12 = inlined_call_operand.vmem [shape: f32[14,12,133], index: 12, kind: output, shape index: {8}]   ;;  %s14005_s13 = inlined_call_operand.vmem [shape: f32[1,2,21,17,13], index: 13, kind: output, shape index: {9}]   ;;  %s14006_s14 = inlined_call_operand.vmem [shape: f32[1,2,21,17,13], index: 14, kind: output, shape index: {10}]   ;;  %s14007_s15 = inlined_call_operand.vmem [shape: f32[1,2,21,17,13], index: 15, kind: output, shape index: {11}]  }
   0x1   :  { %22 = vsyncpa [#allocation5], 0  ;;  %s5833_s18 = smov [#allocation2]  }
   0x2   :  { %s32_s19 = sshll.u32 %s5833_s18, 4  ;;  %s33_s19 = int_to_ptr.vmem [resolvable:$true] %s32_s19 }
   0x3   :  { %s5797_s20 = scalar_lea.vmem %s33_s19, 384  ;;  %p5802_p1 = scmp.lt.s32.totalorder %s33_s19, %s33_s19 }
   0x4   :  { %p5798_p0 = scmp.ne.s32.totalorder %s33_s19, %s5797_s20  ;;  %p5803_p2 = scmp.lt.s32.totalorder %s5797_s20, %s5797_s20 }
   0x6   :  { %p5804_p3 = por %p5803_p2, %p5802_p1 }
   0x8   :  { %p5805_p4 = pnand %p5804_p3, %p5798_p0 }
   0xa   :  { %5808 = shalt.err (!%p5805_p4)
}
   0xb   :  { %s5834_s21 = smov 128   ;;  %s5835_s22 = smov 8  }
   0xc   :  { %38 = dma.hbm_to_vmem [thread:$0]  %s13994_s2, 384, %s33_s19, [#allocation3], %s5834_s21, %s5834_s21, %s5835_s22  }
   0xd   :  { %s5836_s25 = smov [#allocation4]  }
   0xe   :  { %s44_s26 = sshll.u32 %s5836_s25, 4  ;;  %s45_s26 = int_to_ptr.vmem [resolvable:$true] %s44_s26 }
   0xf   :  { %s5817_s27 = scalar_lea.vmem %s45_s26, 2048  ;;  %p5822_p6 = scmp.lt.s32.totalorder %s45_s26, %s45_s26 }
  0x10   :  { %p5818_p5 = scmp.ne.s32.totalorder %s45_s26, %s5817_s27  ;;  %p5823_p7 = scmp.lt.s32.totalorder %s5817_s27, %s5817_s27 }
  0x12   :  { %p5824_p8 = por %p5823_p7, %p5822_p6 }
  0x14   :  { %p5825_p9 = pnand %p5824_p8, %p5818_p5 }
  0x16   :  { %5828 = shalt.err (!%p5825_p9)
}
  0x17   :  { %50 = dma.hbm_to_vmem [thread:$0]  %s13995_s3, 2048, %s45_s26, [#allocation5], %s5834_s21, %s5834_s21, %s5835_s22  }
  0x18   :  { %5829 = dma.done.wait [#allocation3], 384  }
  0x19   :  { %5830 = vsyncadd [#allocation3], 4294966912 }
  0x1a   :  { %5831 = dma.done.wait [#allocation5], 2048  }
  0x1b   :  { %5832 = vsyncadd [#allocation5], 4294965248  ;;  %vm57_vm0 = vcmask 1042432   ;;  %vm58_vm1 = vcmask 38916   ;;  %v5837_v1 = vmov 42.0   ;;  %vm191_vm3 = vcmask 35840  }
  0x1c   :  { %vm5937_vm2 = vmor %vm58_vm1, %vm57_vm0  ;;  %190 = vst [vmem:[%s14000_s8 + $0x10] sm:$0xf] %v5837_v1  ;;  %v61_v2 = vld [vmem:[%s13992_s0] sm:$0x7]  ;;  %s5838_s28 = smov 2   ;;  %vm188_vm4 = vcmask 39936  }
  0x1d   :  { %695 = vst [vmem:[%s14004_s12] sm:$0xff] %v5837_v1  ;;  %697 = vst [vmem:[%s14004_s12 + $0x10] sm:$0xf] %v5837_v1  ;;  %63 = vrot.lane.b32.xlu0 %v61_v2, %s5838_s28  ;;  %v115_v3 = vld [vmem:[%s13993_s1] sm:$0x7]  ;;  %v204_v9 = vld [vmem:[#allocation2 + $0x10] sm:$0xff]  ;;  %vm69_vm5 = vcmask 1042448  }
  0x1e   :  { %699 = vst [vmem:[%s14004_s12 + $0x20] sm:$0xff] %v5837_v1  ;;  %701 = vst [vmem:[%s14004_s12 + $0x30] sm:$0xf] %v5837_v1  ;;  %v73_v4 = vld [vmem:[%s13993_s1] sm:$0x7]  ;;  %117 = vrot.lane.b32.xlu1 %v115_v3, %s5838_s28  ;;  %v203_v10 = vld [vmem:[#allocation2 + $0x8] sm:$0xff] }
  0x1f   :  { %703 = vst [vmem:[%s14004_s12 + $0x40] sm:$0xff] %v5837_v1  ;;  %705 = vst [vmem:[%s14004_s12 + $0x50] sm:$0xf] %v5837_v1  ;;  %v151_v5 = vld [vmem:[%s13993_s1] sm:$0x7]  ;;  %v760_v11 = vld [vmem:[#allocation4] sm:$0xff] }
  0x20   :  { %707 = vst [vmem:[%s14004_s12 + $0x60] sm:$0xff] %v5837_v1  ;;  %709 = vst [vmem:[%s14004_s12 + $0x70] sm:$0xf] %v5837_v1  ;;  %v193_v6 = vld [vmem:[%s13992_s0] sm:$0x7]  ;;  %v6249_v13 = vld [vmem:[#allocation4 + $0x10] sm:$0xff] }
  0x21   :  { %711 = vst [vmem:[%s14004_s12 + $0x80] sm:$0xff] %v5837_v1  ;;  %713 = vst [vmem:[%s14004_s12 + $0x90] sm:$0xf] %v5837_v1  ;;  %75 = vrot.lane.b32.xlu0 %v73_v4, %s5838_s28  ;;  %v202_v7 = vld [vmem:[#allocation2] sm:$0xff]  ;;  %v195_v8 = vrot.slane %v193_v6, 4  ;;  %v6254_v15 = vld [vmem:[#allocation4 + $0x20] sm:$0xff] }
  0x22   :  { %715 = vst [vmem:[%s14004_s12 + $0xa0] sm:$0xff] %v5837_v1  ;;  %717 = vst [vmem:[%s14004_s12 + $0xb0] sm:$0xf] %v5837_v1  ;;  %153 = vrot.lane.b32.xlu1 %v151_v5, %s5838_s28  ;;  %v751_v12 = vld [vmem:[%s13992_s0] sm:$0x7]  ;;  %v6261_v17 = vld [vmem:[#allocation4 + $0x30] sm:$0xff] }
  0x23   :  { %721 = vst [vmem:[%s14004_s12 + $0xd0] sm:$0xf] %v5837_v1  ;;  %723 = vst [vmem:[%s14004_s12 + $0xe0] sm:$0xff] %v5837_v1  ;;  %v753_v14 = vrot.slane %v751_v12, 4  ;;  %v6257_v16 = vld [vmem:[#allocation4 + $0x8] sm:$0xff]  ;;  %v6265_v18 = vld [vmem:[#allocation4 + $0x18] sm:$0xff] }
  0x24   :  { %725 = vst [vmem:[%s14004_s12 + $0xf0] sm:$0xf] %v5837_v1  ;;  %727 = vst [vmem:[%s14004_s12 + $0x100] sm:$0xff] %v5837_v1  ;;  %v6269_v19 = vld [vmem:[#allocation4 + $0x40] sm:$0xff]  ;;  %v6273_v20 = vld [vmem:[#allocation4 + $0x28] sm:$0xff]  ;;  %vm70_vm6 = vcmask 14340  }
  0x25   :  { %729 = vst [vmem:[%s14004_s12 + $0x110] sm:$0xf] %v5837_v1  ;;  %731 = vst [vmem:[%s14004_s12 + $0x120] sm:$0xff] %v5837_v1  ;;  %208 = vrot.lane.b32.xlu0 %v202_v7, %s5838_s28  ;;  %v6277_v21 = vld [vmem:[#allocation4 + $0x50] sm:$0xff]  ;;  %v6281_v22 = vld [vmem:[#allocation4 + $0x38] sm:$0xff]  ;;  %vm66_vm7 = vcmask 15360  }
  0x26   :  { %733 = vst [vmem:[%s14004_s12 + $0x130] sm:$0xf] %v5837_v1  ;;  %735 = vst [vmem:[%s14004_s12 + $0x140] sm:$0xff] %v5837_v1  ;;  %196 = vrot.lane.b32.xlu1 %v195_v8, %s5838_s28  ;;  %v6285_v23 = vld [vmem:[#allocation4 + $0x60] sm:$0xff]  ;;  %v6289_v24 = vld [vmem:[#allocation4 + $0x48] sm:$0xff]  ;;  %vm78_vm9 = vcmask 141328  }
  0x27   :  { %737 = vst [vmem:[%s14004_s12 + $0x150] sm:$0xf] %v5837_v1  ;;  %739 = vst [vmem:[%s14004_s12 + $0x160] sm:$0xff] %v5837_v1  ;;  %v6293_v25 = vld [vmem:[#allocation4 + $0x70] sm:$0xff]  ;;  %v6297_v26 = vld [vmem:[#allocation4 + $0x58] sm:$0xff]  ;;  %vm217_vm10 = vcmask 146448  }
  0x28   :  { %741 = vst [vmem:[%s14004_s12 + $0x170] sm:$0xf] %v5837_v1  ;;  %743 = vst [vmem:[%s14004_s12 + $0x180] sm:$0xff] %v5837_v1  ;;  %v6303_v27 = vld [vmem:[#allocation4 + $0x68] sm:$0xff]  ;;  %v6308_v28 = vld [vmem:[#allocation4 + $0x78] sm:$0xff]  ;;  %vm199_vm11 = vcmask 1046548  }
  0x29   :  { %745 = vst [vmem:[%s14004_s12 + $0x190] sm:$0xf] %v5837_v1  ;;  %747 = vst [vmem:[%s14004_s12 + $0x1a0] sm:$0xff] %v5837_v1  ;;  %212 = vrot.lane.b32.xlu0 %v204_v9, %s5838_s28  ;;  %s5839_s18 = smov 126   ;;  %s5840_s23 = smov 124   ;;  %vm841_vm12 = vcmask 80912  }
  0x2a   :  { %749 = vst [vmem:[%s14004_s12 + $0x1b0] sm:$0xf] %v5837_v1  ;;  %187 = vst [vmem:[%s14000_s8] sm:$0xff] %v5837_v1  ;;  %210 = vrot.lane.b32.xlu1 %v203_v10, %s5838_s28  ;;  %s5841_s26 = smov 112   ;;  %vm85_vm13 = vcmask 2048   ;;  %vm236_vm14 = vcmask 7168   ;;  %s5842_s19 = smov 120  }
  0x2b   :  { %719 = vst [vmem:[%s14004_s12 + $0xc0] sm:$0xff] %v5837_v1  ;;  %192 = vst.msk [vmem:[%s14000_s8 + $0x18] sm:$0xf] %vm191_vm3, %v5837_v1  ;;  %s5843_s30 = smov 127   ;;  %vm255_vm15 = vcmask 15368   ;;  %vm92_vm0 = vcmask 10248  }
  0x2c   :  { %698 = vst.msk [vmem:[%s14004_s12 + $0x18] sm:$0xf] %vm191_vm3, %v5837_v1  ;;  %702 = vst.msk [vmem:[%s14004_s12 + $0x38] sm:$0xf] %vm191_vm3, %v5837_v1  ;;  %s5844_s24 = smov 1   ;;  %s5845_s0 = smov 16  }
  0x2d   :  { %706 = vst.msk [vmem:[%s14004_s12 + $0x58] sm:$0xf] %vm191_vm3, %v5837_v1  ;;  %710 = vst.msk [vmem:[%s14004_s12 + $0x78] sm:$0xf] %vm191_vm3, %v5837_v1  ;;  %377 = vrot.lane.b32.xlu0 %v202_v7, %s5838_s28  ;;  %vm274_vm1 = vcmask 154768   ;;  %s5846_s25 = smov 4  }
  0x2e   :  { %714 = vst.msk [vmem:[%s14004_s12 + $0x98] sm:$0xf] %vm191_vm3, %v5837_v1  ;;  %718 = vst.msk [vmem:[%s14004_s12 + $0xb8] sm:$0xf] %vm191_vm3, %v5837_v1  ;;  %379 = vrot.lane.b32.xlu1 %v203_v10, %s5838_s28  ;;  %s5847_s29 = smov 6   ;;  %s5848_s1 = smov 3  }
  0x2f   :  { %722 = vst.msk [vmem:[%s14004_s12 + $0xd8] sm:$0xf] %vm191_vm3, %v5837_v1  ;;  %726 = vst.msk [vmem:[%s14004_s12 + $0xf8] sm:$0xf] %vm191_vm3, %v5837_v1 }
  0x30   :  { %730 = vst.msk [vmem:[%s14004_s12 + $0x118] sm:$0xf] %vm191_vm3, %v5837_v1  ;;  %734 = vst.msk [vmem:[%s14004_s12 + $0x138] sm:$0xf] %vm191_vm3, %v5837_v1 }
  0x31   :  { %738 = vst.msk [vmem:[%s14004_s12 + $0x158] sm:$0xf] %vm191_vm3, %v5837_v1  ;;  %742 = vst.msk [vmem:[%s14004_s12 + $0x178] sm:$0xf] %vm191_vm3, %v5837_v1  ;;  %381 = vrot.lane.b32.xlu0 %v204_v9, %s5838_s28 }
  0x32   :  { %746 = vst.msk [vmem:[%s14004_s12 + $0x198] sm:$0xf] %vm191_vm3, %v5837_v1  ;;  %750 = vst.msk [vmem:[%s14004_s12 + $0x1b8] sm:$0xf] %vm191_vm3, %v5837_v1  ;;  %541 = vrot.lane.b32.xlu1 %v203_v10, %s5838_s28  ;;  %vm99_vm3 = vcmask 149648  }
  0x33   :  { %60 = vst.msk [vmem:[%s13996_s4] sm:$0x77] %vm5937_vm2, %v5837_v1  ;;  %vm71_vm8 = vmor %vm70_vm6, %vm69_vm5  ;;  %vm1130_vm2 = vcmask 89168   ;;  %vm1227_vm5 = vcmask 97368  }
  0x34   :  { %189 = vst.msk [vmem:[%s14000_s8 + $0x8] sm:$0xff] %vm188_vm4, %v5837_v1  ;;  %696 = vst.msk [vmem:[%s14004_s12 + $0x8] sm:$0xff] %vm188_vm4, %v5837_v1 }
  0x35   :  { %700 = vst.msk [vmem:[%s14004_s12 + $0x28] sm:$0xff] %vm188_vm4, %v5837_v1  ;;  %704 = vst.msk [vmem:[%s14004_s12 + $0x48] sm:$0xff] %vm188_vm4, %v5837_v1  ;;  %539 = vrot.lane.b32.xlu0 %v202_v7, %s5838_s28 }
  0x36   :  { %708 = vst.msk [vmem:[%s14004_s12 + $0x68] sm:$0xff] %vm188_vm4, %v5837_v1  ;;  %712 = vst.msk [vmem:[%s14004_s12 + $0x88] sm:$0xff] %vm188_vm4, %v5837_v1  ;;  %792 = vrot.lane.b32.xlu1 %v760_v11, %s5838_s28 }
  0x37   :  { %716 = vst.msk [vmem:[%s14004_s12 + $0xa8] sm:$0xff] %vm188_vm4, %v5837_v1  ;;  %724 = vst.msk [vmem:[%s14004_s12 + $0xe8] sm:$0xff] %vm188_vm4, %v5837_v1 }
  0x38   :  { %728 = vst.msk [vmem:[%s14004_s12 + $0x108] sm:$0xff] %vm188_vm4, %v5837_v1  ;;  %732 = vst.msk [vmem:[%s14004_s12 + $0x128] sm:$0xff] %vm188_vm4, %v5837_v1 }
  0x39   :  { %736 = vst.msk [vmem:[%s14004_s12 + $0x148] sm:$0xff] %vm188_vm4, %v5837_v1  ;;  %740 = vst.msk [vmem:[%s14004_s12 + $0x168] sm:$0xff] %vm188_vm4, %v5837_v1  ;;  %543 = vrot.lane.b32.xlu0 %v204_v9, %s5838_s28 }
  0x3a   :  { %744 = vst.msk [vmem:[%s14004_s12 + $0x188] sm:$0xff] %vm188_vm4, %v5837_v1  ;;  %748 = vst.msk [vmem:[%s14004_s12 + $0x1a8] sm:$0xff] %vm188_vm4, %v5837_v1  ;;  %796 = vrot.lane.b32.xlu1 %v6249_v13, %s5838_s28 }
  0x3b   :  { %720 = vst.msk [vmem:[%s14004_s12 + $0xc8] sm:$0xff] %vm188_vm4, %v5837_v1  ;;  %vm293_vm4 = vcmask 162968  }
  0x3d   :  { %754 = vrot.lane.b32.xlu0 %v753_v14, %s5838_s28 }
  0x3e   :  { %800 = vrot.lane.b32.xlu1 %v6254_v15, %s5838_s28 }
  0x41   :  { %794 = vrot.lane.b32.xlu0 %v6257_v16, %s5838_s28 }
  0x42   :  { %804 = vrot.lane.b32.xlu1 %v6261_v17, %s5838_s28 }
  0x45   :  { %798 = vrot.lane.b32.xlu0 %v6265_v18, %s5838_s28 }
  0x46   :  { %808 = vrot.lane.b32.xlu1 %v6269_v19, %s5838_s28 }
  0x49   :  { %802 = vrot.lane.b32.xlu0 %v6273_v20, %s5838_s28 }
  0x4a   :  { %812 = vrot.lane.b32.xlu1 %v6277_v21, %s5838_s28 }
  0x4d   :  { %806 = vrot.lane.b32.xlu0 %v6281_v22, %s5838_s28 }
  0x4e   :  { %816 = vrot.lane.b32.xlu1 %v6285_v23, %s5838_s28 }
  0x51   :  { %810 = vrot.lane.b32.xlu0 %v6289_v24, %s5838_s28 }
  0x52   :  { %820 = vrot.lane.b32.xlu1 %v6293_v25, %s5838_s28 }
  0x55   :  { %814 = vrot.lane.b32.xlu0 %v6297_v26, %s5838_s28 }
  0x56   :  { %1837 = vrot.lane.b32.xlu1 %v760_v11, %s5838_s28 }
  0x59   :  { %818 = vrot.lane.b32.xlu0 %v6303_v27, %s5838_s28 }
  0x5a   :  { %1853 = vrot.lane.b32.xlu1 %v6269_v19, %s5838_s28 }
  0x5d   :  { %822 = vrot.lane.b32.xlu0 %v6308_v28, %s5838_s28 }
  0x5e   :  { %2871 = vrot.lane.b32.xlu1 %v760_v11, %s5838_s28 }
  0x61   :  { %1851 = vrot.lane.b32.xlu0 %v6281_v22, %s5838_s28 }
  0x62   :  { %2875 = vrot.lane.b32.xlu1 %v6249_v13, %s5838_s28 }
  0x65   :  { %1867 = vrot.lane.b32.xlu0 %v6308_v28, %s5838_s28 }
  0x69   :  { %2873 = vrot.lane.b32.xlu0 %v6257_v16, %s5838_s28 }
  0x8f   :  { %v64_v29 = vpop.permute.xlu0 %63 }
  0x90   :  { %v65_v30 = vrot.slane %v64_v29, 4  ;;  %v118_v31 = vpop.permute.xlu1 %117 }
  0x91   :  { %120 = vst.msk [vmem:[%s13998_s6] sm:$0x7] %vm78_vm9, %v118_v31 }
  0x92   :  { %v67_v32 = vsel %vm66_vm7, %v65_v30, %v64_v29  ;;  %vm312_vm7 = vcmask 171168  }
  0x93   :  { %72 = vst.msk [vmem:[%s13996_s4] sm:$0x77] %vm71_vm8, %v67_v32  ;;  %v76_v33 = vpop.permute.xlu0 %75  ;;  %vm319_vm8 = vcmask 163840  }
  0x94   :  { %79 = vst.msk [vmem:[%s13997_s5] sm:$0x7] %vm78_vm9, %v76_v33  ;;  %v154_v34 = vpop.permute.xlu1 %153 }
  0x95   :  { %156 = vst.msk [vmem:[%s13999_s7] sm:$0x7] %vm78_vm9, %v154_v34  ;;  %vm1324_vm9 = vcmask 105568  }
  0x97   :  { %v209_v35 = vpop.permute.xlu0 %208 }
  0x98   :  { %218 = vst.msk [vmem:[%s14001_s9 + $0x4] sm:$0xff] %vm217_vm10, %v209_v35  ;;  %v197_v36 = vpop.permute.xlu1 %196  ;;  %v121_v37 = vld [vmem:[%s13998_s6] sm:$0x7] }
  0x99   :  { %200 = vst.msk [vmem:[%s14000_s8] sm:$0x70] %vm199_vm11, %v197_v36  ;;  %123 = vrot.lane.b32.xlu0 %v121_v37, %s5839_s18 }
  0x9a   :  { %201 = vst.msk [vmem:[%s14000_s8 + $0x8] sm:$0x70] %vm70_vm6, %v197_v36 }
  0x9b   :  { %v213_v38 = vpop.permute.xlu0 %212  ;;  %v80_v39 = vld [vmem:[%s13997_s5] sm:$0x7] }
  0x9c   :  { %220 = vst.msk [vmem:[%s14001_s9 + $0x34] sm:$0xff] %vm217_vm10, %v213_v38  ;;  %82 = vrot.lane.b32.xlu1 %v80_v39, %s5840_s23  ;;  %v211_v40 = vpop.permute.xlu1 %210  ;;  %v157_v41 = vld [vmem:[%s13999_s7] sm:$0x7] }
  0x9d   :  { %219 = vst.msk [vmem:[%s14001_s9 + $0x1c] sm:$0xff] %vm217_vm10, %v211_v40  ;;  %159 = vrot.lane.b32.xlu0 %v157_v41, %s5841_s26 }
  0x9f   :  { %v378_v42 = vpop.permute.xlu0 %377  ;;  %v221_v43 = vld [vmem:[%s14001_s9 + $0x4] sm:$0xff] }
  0xa0   :  { %386 = vst.msk [vmem:[%s14002_s10 + $0x4] sm:$0xff] %vm217_vm10, %v378_v42  ;;  %227 = vrot.lane.b32.xlu1 %v221_v43, %s5840_s23  ;;  %v380_v44 = vpop.permute.xlu1 %379 }
  0xa1   :  { %387 = vst.msk [vmem:[%s14002_s10 + $0x1c] sm:$0xff] %vm217_vm10, %v380_v44 }
  0xa3   :  { %v382_v45 = vpop.permute.xlu0 %381  ;;  %v223_v46 = vld [vmem:[%s14001_s9 + $0x34] sm:$0xff] }
  0xa4   :  { %388 = vst.msk [vmem:[%s14002_s10 + $0x34] sm:$0xff] %vm217_vm10, %v382_v45  ;;  %231 = vrot.lane.b32.xlu1 %v223_v46, %s5840_s23  ;;  %v542_v47 = vpop.permute.xlu1 %541  ;;  %v222_v48 = vld [vmem:[%s14001_s9 + $0x1c] sm:$0xff] }
  0xa5   :  { %549 = vst.msk [vmem:[%s14003_s11 + $0x1c] sm:$0xff] %vm217_vm10, %v542_v47  ;;  %229 = vrot.lane.b32.xlu0 %v222_v48, %s5840_s23 }
  0xa7   :  { %v540_v49 = vpop.permute.xlu0 %539  ;;  %v389_v50 = vld [vmem:[%s14002_s10 + $0x4] sm:$0xff] }
  0xa8   :  { %548 = vst.msk [vmem:[%s14003_s11 + $0x4] sm:$0xff] %vm217_vm10, %v540_v49  ;;  %395 = vrot.lane.b32.xlu1 %v389_v50, %s5839_s18  ;;  %v793_v51 = vpop.permute.xlu1 %792  ;;  %v390_v52 = vld [vmem:[%s14002_s10 + $0x1c] sm:$0xff] }
  0xa9   :  { %3931 = vst.msk [vmem:[%s14005_s13 + $0x94] sm:$0xff] %vm841_vm12, %v793_v51  ;;  %397 = vrot.lane.b32.xlu0 %v390_v52, %s5839_s18 }
  0xab   :  { %v544_v53 = vpop.permute.xlu0 %543  ;;  %v391_v54 = vld [vmem:[%s14002_s10 + $0x34] sm:$0xff] }
  0xac   :  { %550 = vst.msk [vmem:[%s14003_s11 + $0x34] sm:$0xff] %vm217_vm10, %v544_v53  ;;  %399 = vrot.lane.b32.xlu1 %v391_v54, %s5839_s18  ;;  %v797_v55 = vpop.permute.xlu1 %796  ;;  %v552_v56 = vld [vmem:[%s14003_s11 + $0x1c] sm:$0xff]  ;;  %vm1357_vm10 = vcmask 98304  }
  0xad   :  { %3933 = vst.msk [vmem:[%s14005_s13 + $0xc4] sm:$0xff] %vm841_vm12, %v797_v55  ;;  %559 = vrot.lane.b32.xlu0 %v552_v56, %s5841_s26 }
  0xaf   :  { %v755_v57 = vpop.permute.xlu0 %754  ;;  %v551_v58 = vld [vmem:[%s14003_s11 + $0x4] sm:$0xff] }
  0xb0   :  { %3929 = vst.msk [vmem:[%s14004_s12 + $0xc0] sm:$0x70] %vm199_vm11, %v755_v57  ;;  %557 = vrot.lane.b32.xlu1 %v551_v58, %s5841_s26  ;;  %v801_v59 = vpop.permute.xlu1 %800  ;;  %v3947_v63 = vld [vmem:[%s14005_s13 + $0x94] sm:$0xff]  ;;  %vm1637_vm11 = vcmask 105472  }
  0xb1   :  { %3930 = vst.msk [vmem:[%s14004_s12 + $0xc8] sm:$0x70] %vm70_vm6, %v755_v57  ;;  %vm106_vm6 = vcmask 157848  }
  0xb2   :  { %3935 = vst.msk [vmem:[%s14005_s13 + $0xf4] sm:$0xff] %vm841_vm12, %v801_v59 }
  0xb3   :  { %v795_v60 = vpop.permute.xlu0 %794  ;;  %v553_v61 = vld [vmem:[%s14003_s11 + $0x34] sm:$0xff] }
  0xb4   :  { %3932 = vst.msk [vmem:[%s14005_s13 + $0xac] sm:$0xff] %vm841_vm12, %v795_v60  ;;  %561 = vrot.lane.b32.xlu1 %v553_v61, %s5841_s26  ;;  %v805_v62 = vpop.permute.xlu1 %804  ;;  %v3949_v2 = vld [vmem:[%s14005_s13 + $0xc4] sm:$0xff] }
  0xb5   :  { %3937 = vst.msk [vmem:[%s14005_s13 + $0x124] sm:$0xff] %vm841_vm12, %v805_v62 }
  0xb7   :  { %v799_v0 = vpop.permute.xlu0 %798 }
  0xb8   :  { %3934 = vst.msk [vmem:[%s14005_s13 + $0xdc] sm:$0xff] %vm841_vm12, %v799_v0  ;;  %890 = vrot.lane.b32.xlu1 %v3947_v63, %s5840_s23  ;;  %v809_v1 = vpop.permute.xlu1 %808 }
  0xb9   :  { %3939 = vst.msk [vmem:[%s14005_s13 + $0x28c] sm:$0xff] %vm841_vm12, %v809_v1  ;;  %v3951_v6 = vld [vmem:[%s14005_s13 + $0xf4] sm:$0xff] }
  0xbb   :  { %v803_v3 = vpop.permute.xlu0 %802  ;;  %v3948_v4 = vld [vmem:[%s14005_s13 + $0xac] sm:$0xff] }
  0xbc   :  { %3936 = vst.msk [vmem:[%s14005_s13 + $0x10c] sm:$0xff] %vm841_vm12, %v803_v3  ;;  %892 = vrot.lane.b32.xlu0 %v3948_v4, %s5840_s23  ;;  %894 = vrot.lane.b32.xlu1 %v3949_v2, %s5840_s23  ;;  %v813_v5 = vpop.permute.xlu1 %812  ;;  %v3953_v10 = vld [vmem:[%s14005_s13 + $0x124] sm:$0xff] }
  0xbd   :  { %3941 = vst.msk [vmem:[%s14005_s13 + $0x2bc] sm:$0xff] %vm841_vm12, %v813_v5 }
  0xbf   :  { %v807_v7 = vpop.permute.xlu0 %806  ;;  %v3950_v8 = vld [vmem:[%s14005_s13 + $0xdc] sm:$0xff] }
  0xc0   :  { %3938 = vst.msk [vmem:[%s14005_s13 + $0x13c] sm:$0xff] %vm841_vm12, %v807_v7  ;;  %896 = vrot.lane.b32.xlu0 %v3950_v8, %s5840_s23  ;;  %898 = vrot.lane.b32.xlu1 %v3951_v6, %s5840_s23  ;;  %v817_v9 = vpop.permute.xlu1 %816  ;;  %v3955_v29 = vld [vmem:[%s14005_s13 + $0x28c] sm:$0xff] }
  0xc1   :  { %3943 = vst.msk [vmem:[%s14005_s13 + $0x2ec] sm:$0xff] %vm841_vm12, %v817_v9 }
  0xc3   :  { %v811_v11 = vpop.permute.xlu0 %810  ;;  %v3952_v12 = vld [vmem:[%s14005_s13 + $0x10c] sm:$0xff] }
  0xc4   :  { %3940 = vst.msk [vmem:[%s14005_s13 + $0x2a4] sm:$0xff] %vm841_vm12, %v811_v11  ;;  %900 = vrot.lane.b32.xlu0 %v3952_v12, %s5840_s23  ;;  %902 = vrot.lane.b32.xlu1 %v3953_v10, %s5840_s23  ;;  %v821_v14 = vpop.permute.xlu1 %820  ;;  %v3957_v33 = vld [vmem:[%s14005_s13 + $0x2bc] sm:$0xff] }
  0xc5   :  { %3945 = vst.msk [vmem:[%s14005_s13 + $0x31c] sm:$0xff] %vm841_vm12, %v821_v14 }
  0xc7   :  { %v815_v30 = vpop.permute.xlu0 %814  ;;  %v3954_v31 = vld [vmem:[%s14005_s13 + $0x13c] sm:$0xff] }
  0xc8   :  { %3942 = vst.msk [vmem:[%s14005_s13 + $0x2d4] sm:$0xff] %vm841_vm12, %v815_v30  ;;  %904 = vrot.lane.b32.xlu0 %v3954_v31, %s5840_s23  ;;  %906 = vrot.lane.b32.xlu1 %v3955_v29, %s5840_s23  ;;  %v1838_v32 = vpop.permute.xlu1 %1837  ;;  %v3959_v37 = vld [vmem:[%s14005_s13 + $0x2ec] sm:$0xff] }
  0xc9   :  { %4545 = vst.msk [vmem:[%s14006_s14 + $0x94] sm:$0xff] %vm841_vm12, %v1838_v32 }
  0xcb   :  { %v819_v34 = vpop.permute.xlu0 %818  ;;  %v3956_v35 = vld [vmem:[%s14005_s13 + $0x2a4] sm:$0xff] }
  0xcc   :  { %3944 = vst.msk [vmem:[%s14005_s13 + $0x304] sm:$0xff] %vm841_vm12, %v819_v34  ;;  %908 = vrot.lane.b32.xlu0 %v3956_v35, %s5840_s23  ;;  %910 = vrot.lane.b32.xlu1 %v3957_v33, %s5840_s23  ;;  %v1854_v36 = vpop.permute.xlu1 %1853  ;;  %v3961_v41 = vld [vmem:[%s14005_s13 + $0x31c] sm:$0xff] }
  0xcd   :  { %4553 = vst.msk [vmem:[%s14006_s14 + $0x28c] sm:$0xff] %vm841_vm12, %v1854_v36 }
  0xcf   :  { %v823_v38 = vpop.permute.xlu0 %822  ;;  %v3958_v39 = vld [vmem:[%s14005_s13 + $0x2d4] sm:$0xff] }
  0xd0   :  { %3946 = vst.msk [vmem:[%s14005_s13 + $0x334] sm:$0xff] %vm841_vm12, %v823_v38  ;;  %912 = vrot.lane.b32.xlu0 %v3958_v39, %s5840_s23  ;;  %914 = vrot.lane.b32.xlu1 %v3959_v37, %s5840_s23  ;;  %v2872_v40 = vpop.permute.xlu1 %2871 }
  0xd1   :  { %5159 = vst.msk [vmem:[%s14007_s15 + $0x94] sm:$0xff] %vm841_vm12, %v2872_v40 }
  0xd3   :  { %v3960_v42 = vld [vmem:[%s14005_s13 + $0x304] sm:$0xff]  ;;  %v1852_v43 = vpop.permute.xlu0 %1851 }
  0xd4   :  { %916 = vrot.lane.b32.xlu0 %v3960_v42, %s5840_s23  ;;  %918 = vrot.lane.b32.xlu1 %v3961_v41, %s5840_s23  ;;  %v2876_v44 = vpop.permute.xlu1 %2875  ;;  %4552 = vst.msk [vmem:[%s14006_s14 + $0x13c] sm:$0xff] %vm841_vm12, %v1852_v43 }
  0xd5   :  { %5161 = vst.msk [vmem:[%s14007_s15 + $0xc4] sm:$0xff] %vm841_vm12, %v2876_v44 }
  0xd7   :  { %v3962_v45 = vld [vmem:[%s14005_s13 + $0x334] sm:$0xff]  ;;  %v1868_v46 = vpop.permute.xlu0 %1867 }
  0xd8   :  { %920 = vrot.lane.b32.xlu0 %v3962_v45, %s5840_s23  ;;  %2879 = vrot.lane.b32.xlu1 %v6254_v15, %s5838_s28  ;;  %4560 = vst.msk [vmem:[%s14006_s14 + $0x334] sm:$0xff] %vm841_vm12, %v1868_v46 }
  0xdb   :  { %v2874_v47 = vpop.permute.xlu0 %2873 }
  0xdc   :  { %2877 = vrot.lane.b32.xlu0 %v6265_v18, %s5838_s28  ;;  %2883 = vrot.lane.b32.xlu1 %v6261_v17, %s5838_s28  ;;  %5160 = vst.msk [vmem:[%s14007_s15 + $0xac] sm:$0xff] %vm841_vm12, %v2874_v47 }
  0xe0   :  { %2881 = vrot.lane.b32.xlu0 %v6273_v20, %s5838_s28  ;;  %2887 = vrot.lane.b32.xlu1 %v6269_v19, %s5838_s28 }
  0xe4   :  { %2885 = vrot.lane.b32.xlu0 %v6281_v22, %s5838_s28  ;;  %2891 = vrot.lane.b32.xlu1 %v6277_v21, %s5838_s28 }
  0xe8   :  { %2889 = vrot.lane.b32.xlu0 %v6289_v24, %s5838_s28  ;;  %2895 = vrot.lane.b32.xlu1 %v6285_v23, %s5838_s28 }
  0xec   :  { %2893 = vrot.lane.b32.xlu0 %v6297_v26, %s5838_s28  ;;  %2899 = vrot.lane.b32.xlu1 %v6293_v25, %s5838_s28 }
  0xf0   :  { %2897 = vrot.lane.b32.xlu0 %v6303_v27, %s5838_s28  ;;  %1839 = vrot.lane.b32.xlu1 %v6257_v16, %s5838_s28 }
  0xf4   :  { %2901 = vrot.lane.b32.xlu0 %v6308_v28, %s5838_s28  ;;  %1843 = vrot.lane.b32.xlu1 %v6265_v18, %s5838_s28  ;;  %v5176_v18 = vld [vmem:[%s14007_s15 + $0xac] sm:$0xff] }
  0xf8   :  { %1841 = vrot.lane.b32.xlu0 %v6249_v13, %s5838_s28  ;;  %1847 = vrot.lane.b32.xlu1 %v6273_v20, %s5838_s28  ;;  %v4568_v13 = vld [vmem:[%s14006_s14 + $0x13c] sm:$0xff] }
  0xfc   :  { %1845 = vrot.lane.b32.xlu0 %v6254_v15, %s5838_s28  ;;  %1855 = vrot.lane.b32.xlu1 %v6289_v24, %s5838_s28  ;;  %v4576_v15 = vld [vmem:[%s14006_s14 + $0x334] sm:$0xff] }
 0x100   :  { %1849 = vrot.lane.b32.xlu0 %v6261_v17, %s5838_s28  ;;  %1859 = vrot.lane.b32.xlu1 %v6297_v26, %s5838_s28  ;;  %v4561_v17 = vld [vmem:[%s14006_s14 + $0x94] sm:$0xff]  ;;  %v5177_v26 = vld [vmem:[%s14007_s15 + $0xc4] sm:$0xff] }
 0x104   :  { %1857 = vrot.lane.b32.xlu0 %v6277_v21, %s5838_s28  ;;  %1863 = vrot.lane.b32.xlu1 %v6303_v27, %s5838_s28  ;;  %v4569_v21 = vld [vmem:[%s14006_s14 + $0x28c] sm:$0xff] }
 0x108   :  { %1861 = vrot.lane.b32.xlu0 %v6285_v23, %s5838_s28  ;;  %1948 = vrot.lane.b32.xlu1 %v4568_v13, %s5839_s18  ;;  %v5175_v23 = vld [vmem:[%s14007_s15 + $0x94] sm:$0xff] }
 0x10b   :  { %v124_v16 = vpop.permute.xlu0 %123 }
 0x10c   :  { %1865 = vrot.lane.b32.xlu0 %v6293_v25, %s5838_s28  ;;  %126 = vst.msk [vmem:[%s13998_s6] sm:$0x7] %vm85_vm13, %v124_v16  ;;  %1964 = vrot.lane.b32.xlu1 %v4576_v15, %s5839_s18 }
 0x10e   :  { %v83_v19 = vpop.permute.xlu1 %82 }
 0x10f   :  { %86 = vst.msk [vmem:[%s13997_s5] sm:$0x7] %vm85_vm13, %v83_v19  ;;  %v160_v20 = vpop.permute.xlu0 %159 }
 0x110   :  { %1934 = vrot.lane.b32.xlu0 %v4561_v17, %s5839_s18  ;;  %162 = vst.msk [vmem:[%s13999_s7] sm:$0x7] %vm85_vm13, %v160_v20  ;;  %2970 = vrot.lane.b32.xlu1 %v5176_v18, %s5842_s19 }
 0x112   :  { %v228_v22 = vpop.permute.xlu1 %227 }
 0x113   :  { %237 = vst.msk [vmem:[%s14001_s9 + $0x4] sm:$0xff] %vm236_vm14, %v228_v22  ;;  %v127_v13 = vld [vmem:[%s13998_s6] sm:$0x7] }
 0x114   :  { %1950 = vrot.lane.b32.xlu0 %v4569_v21, %s5839_s18 }
 0x116   :  { %v232_v24 = vpop.permute.xlu1 %231  ;;  %v87_v44 = vld [vmem:[%s13997_s5] sm:$0x7] }
 0x117   :  { %239 = vst.msk [vmem:[%s14001_s9 + $0x34] sm:$0xff] %vm236_vm14, %v232_v24  ;;  %v230_v25 = vpop.permute.xlu0 %229  ;;  %v163_v18 = vld [vmem:[%s13999_s7] sm:$0x7] }
 0x118   :  { %2968 = vrot.lane.b32.xlu0 %v5175_v23, %s5842_s19  ;;  %238 = vst.msk [vmem:[%s14001_s9 + $0x1c] sm:$0xff] %vm236_vm14, %v230_v25 }
 0x11a   :  { %v396_v27 = vpop.permute.xlu1 %395  ;;  %v240_v49 = vld [vmem:[%s14001_s9 + $0x4] sm:$0xff] }
 0x11b   :  { %404 = vst.msk [vmem:[%s14002_s10 + $0x4] sm:$0xff] %vm236_vm14, %v396_v27  ;;  %v398_v28 = vpop.permute.xlu0 %397 }
 0x11c   :  { %2972 = vrot.lane.b32.xlu0 %v5177_v26, %s5842_s19  ;;  %405 = vst.msk [vmem:[%s14002_s10 + $0x1c] sm:$0xff] %vm236_vm14, %v398_v28 }
 0x11e   :  { %v400_v48 = vpop.permute.xlu1 %399  ;;  %v242_v52 = vld [vmem:[%s14001_s9 + $0x34] sm:$0xff] }
 0x11f   :  { %406 = vst.msk [vmem:[%s14002_s10 + $0x34] sm:$0xff] %vm236_vm14, %v400_v48  ;;  %v560_v50 = vpop.permute.xlu0 %559  ;;  %v241_v22 = vld [vmem:[%s14001_s9 + $0x1c] sm:$0xff] }
 0x120   :  { %246 = vrot.lane.b32.xlu0 %v240_v49, %s5839_s18  ;;  %567 = vst.msk [vmem:[%s14003_s11 + $0x1c] sm:$0xff] %vm236_vm14, %v560_v50 }
 0x122   :  { %v558_v51 = vpop.permute.xlu1 %557  ;;  %v407_v54 = vld [vmem:[%s14002_s10 + $0x4] sm:$0xff] }
 0x123   :  { %566 = vst.msk [vmem:[%s14003_s11 + $0x4] sm:$0xff] %vm236_vm14, %v558_v51  ;;  %v408_v26 = vld [vmem:[%s14002_s10 + $0x1c] sm:$0xff] }
 0x124   :  { %250 = vrot.lane.b32.xlu0 %v242_v52, %s5839_s18 }
 0x126   :  { %v562_v53 = vpop.permute.xlu1 %561  ;;  %v409_v56 = vld [vmem:[%s14002_s10 + $0x34] sm:$0xff] }
 0x127   :  { %568 = vst.msk [vmem:[%s14003_s11 + $0x34] sm:$0xff] %vm236_vm14, %v562_v53  ;;  %v570_v49 = vld [vmem:[%s14003_s11 + $0x1c] sm:$0xff] }
 0x128   :  { %413 = vrot.lane.b32.xlu0 %v407_v54, %s5843_s30 }
 0x12a   :  { %v891_v55 = vpop.permute.xlu1 %890  ;;  %v569_v59 = vld [vmem:[%s14003_s11 + $0x4] sm:$0xff] }
 0x12b   :  { %3963 = vst.msk [vmem:[%s14005_s13 + $0x94] sm:$0xff] %vm236_vm14, %v891_v55 }
 0x12c   :  { %417 = vrot.lane.b32.xlu0 %v409_v56, %s5843_s30 }
 0x12e   :  { %v893_v57 = vpop.permute.xlu0 %892  ;;  %v895_v58 = vpop.permute.xlu1 %894  ;;  %v571_v62 = vld [vmem:[%s14003_s11 + $0x34] sm:$0xff] }
 0x12f   :  { %3964 = vst.msk [vmem:[%s14005_s13 + $0xac] sm:$0xff] %vm236_vm14, %v893_v57  ;;  %3965 = vst.msk [vmem:[%s14005_s13 + $0xc4] sm:$0xff] %vm236_vm14, %v895_v58 }
 0x130   :  { %575 = vrot.lane.b32.xlu0 %v569_v59, %s5841_s26 }
 0x132   :  { %v897_v60 = vpop.permute.xlu0 %896  ;;  %v899_v61 = vpop.permute.xlu1 %898  ;;  %v3979_v51 = vld [vmem:[%s14005_s13 + $0x94] sm:$0xff] }
 0x133   :  { %3966 = vst.msk [vmem:[%s14005_s13 + $0xdc] sm:$0xff] %vm236_vm14, %v897_v60  ;;  %3967 = vst.msk [vmem:[%s14005_s13 + $0xf4] sm:$0xff] %vm236_vm14, %v899_v61 }
 0x134   :  { %579 = vrot.lane.b32.xlu0 %v571_v62, %s5841_s26 }
 0x136   :  { %v901_v63 = vpop.permute.xlu0 %900  ;;  %v3980_v0 = vld [vmem:[%s14005_s13 + $0xac] sm:$0xff]  ;;  %v903_v1 = vpop.permute.xlu1 %902  ;;  %v3981_v55 = vld [vmem:[%s14005_s13 + $0xc4] sm:$0xff] }
 0x137   :  { %3968 = vst.msk [vmem:[%s14005_s13 + $0x10c] sm:$0xff] %vm236_vm14, %v901_v63  ;;  %3969 = vst.msk [vmem:[%s14005_s13 + $0x124] sm:$0xff] %vm236_vm14, %v903_v1 }
 0x138   :  { %988 = vrot.lane.b32.xlu0 %v3980_v0, %s5839_s18 }
 0x13a   :  { %v905_v2 = vpop.permute.xlu0 %904  ;;  %v3982_v3 = vld [vmem:[%s14005_s13 + $0xdc] sm:$0xff]  ;;  %v907_v4 = vpop.permute.xlu1 %906  ;;  %v3983_v59 = vld [vmem:[%s14005_s13 + $0xf4] sm:$0xff] }
 0x13b   :  { %3970 = vst.msk [vmem:[%s14005_s13 + $0x13c] sm:$0xff] %vm236_vm14, %v905_v2  ;;  %3971 = vst.msk [vmem:[%s14005_s13 + $0x28c] sm:$0xff] %vm236_vm14, %v907_v4 }
 0x13c   :  { %992 = vrot.lane.b32.xlu0 %v3982_v3, %s5839_s18 }
 0x13e   :  { %v909_v5 = vpop.permute.xlu0 %908  ;;  %v3984_v6 = vld [vmem:[%s14005_s13 + $0x10c] sm:$0xff]  ;;  %v911_v7 = vpop.permute.xlu1 %910  ;;  %v3985_v63 = vld [vmem:[%s14005_s13 + $0x124] sm:$0xff] }
 0x13f   :  { %3972 = vst.msk [vmem:[%s14005_s13 + $0x2a4] sm:$0xff] %vm236_vm14, %v909_v5  ;;  %3973 = vst.msk [vmem:[%s14005_s13 + $0x2bc] sm:$0xff] %vm236_vm14, %v911_v7 }
 0x140   :  { %996 = vrot.lane.b32.xlu0 %v3984_v6, %s5839_s18 }
 0x142   :  { %v913_v8 = vpop.permute.xlu0 %912  ;;  %v3986_v9 = vld [vmem:[%s14005_s13 + $0x13c] sm:$0xff]  ;;  %v915_v10 = vpop.permute.xlu1 %914  ;;  %v3987_v3 = vld [vmem:[%s14005_s13 + $0x28c] sm:$0xff] }
 0x143   :  { %3974 = vst.msk [vmem:[%s14005_s13 + $0x2d4] sm:$0xff] %vm236_vm14, %v913_v8  ;;  %3975 = vst.msk [vmem:[%s14005_s13 + $0x2ec] sm:$0xff] %vm236_vm14, %v915_v10 }
 0x144   :  { %1000 = vrot.lane.b32.xlu0 %v3986_v9, %s5839_s18 }
 0x146   :  { %v917_v11 = vpop.permute.xlu0 %916  ;;  %v3988_v12 = vld [vmem:[%s14005_s13 + $0x2a4] sm:$0xff]  ;;  %v919_v14 = vpop.permute.xlu1 %918  ;;  %v3989_v7 = vld [vmem:[%s14005_s13 + $0x2bc] sm:$0xff] }
 0x147   :  { %3976 = vst.msk [vmem:[%s14005_s13 + $0x304] sm:$0xff] %vm236_vm14, %v917_v11  ;;  %3977 = vst.msk [vmem:[%s14005_s13 + $0x31c] sm:$0xff] %vm236_vm14, %v919_v14 }
 0x148   :  { %1004 = vrot.lane.b32.xlu0 %v3988_v12, %s5839_s18 }
 0x14a   :  { %v921_v29 = vpop.permute.xlu0 %920  ;;  %v3990_v30 = vld [vmem:[%s14005_s13 + $0x2d4] sm:$0xff]  ;;  %v2880_v31 = vpop.permute.xlu1 %2879  ;;  %v3991_v10 = vld [vmem:[%s14005_s13 + $0x2ec] sm:$0xff] }
 0x14b   :  { %3978 = vst.msk [vmem:[%s14005_s13 + $0x334] sm:$0xff] %vm236_vm14, %v921_v29 }
 0x14c   :  { %5163 = vst.msk [vmem:[%s14007_s15 + $0xf4] sm:$0xff] %vm841_vm12, %v2880_v31  ;;  %1008 = vrot.lane.b32.xlu0 %v3990_v30, %s5839_s18 }
 0x14e   :  { %v2878_v32 = vpop.permute.xlu0 %2877  ;;  %v3992_v33 = vld [vmem:[%s14005_s13 + $0x304] sm:$0xff]  ;;  %v2884_v34 = vpop.permute.xlu1 %2883  ;;  %v3993_v14 = vld [vmem:[%s14005_s13 + $0x31c] sm:$0xff] }
 0x14f   :  { %5162 = vst.msk [vmem:[%s14007_s15 + $0xdc] sm:$0xff] %vm841_vm12, %v2878_v32  ;;  %5165 = vst.msk [vmem:[%s14007_s15 + $0x124] sm:$0xff] %vm841_vm12, %v2884_v34 }
 0x150   :  { %1012 = vrot.lane.b32.xlu0 %v3992_v33, %s5839_s18 }
 0x152   :  { %v2882_v35 = vpop.permute.xlu0 %2881  ;;  %v3994_v36 = vld [vmem:[%s14005_s13 + $0x334] sm:$0xff]  ;;  %v2888_v37 = vpop.permute.xlu1 %2887 }
 0x153   :  { %5164 = vst.msk [vmem:[%s14007_s15 + $0x10c] sm:$0xff] %vm841_vm12, %v2882_v35  ;;  %5167 = vst.msk [vmem:[%s14007_s15 + $0x28c] sm:$0xff] %vm841_vm12, %v2888_v37  ;;  %v5179_v38 = vld [vmem:[%s14007_s15 + $0xf4] sm:$0xff] }
 0x154   :  { %1016 = vrot.lane.b32.xlu0 %v3994_v36, %s5839_s18 }
 0x156   :  { %v2886_v39 = vpop.permute.xlu0 %2885  ;;  %v5178_v40 = vld [vmem:[%s14007_s15 + $0xdc] sm:$0xff]  ;;  %v2892_v41 = vpop.permute.xlu1 %2891  ;;  %v5181_v42 = vld [vmem:[%s14007_s15 + $0x124] sm:$0xff] }
 0x157   :  { %5166 = vst.msk [vmem:[%s14007_s15 + $0x13c] sm:$0xff] %vm841_vm12, %v2886_v39  ;;  %2974 = vrot.lane.b32.xlu1 %v5178_v40, %s5842_s19  ;;  %5169 = vst.msk [vmem:[%s14007_s15 + $0x2bc] sm:$0xff] %vm841_vm12, %v2892_v41 }
 0x158   :  { %2976 = vrot.lane.b32.xlu0 %v5179_v38, %s5842_s19 }
 0x15a   :  { %v2890_v43 = vpop.permute.xlu0 %2889  ;;  %v2896_v45 = vpop.permute.xlu1 %2895  ;;  %v5183_v46 = vld [vmem:[%s14007_s15 + $0x28c] sm:$0xff] }
 0x15b   :  { %5168 = vst.msk [vmem:[%s14007_s15 + $0x2a4] sm:$0xff] %vm841_vm12, %v2890_v43  ;;  %89 = vrot.lane.b32.xlu1 %v87_v44, %s5839_s18  ;;  %5171 = vst.msk [vmem:[%s14007_s15 + $0x2ec] sm:$0xff] %vm841_vm12, %v2896_v45  ;;  %v5180_v31 = vld [vmem:[%s14007_s15 + $0x10c] sm:$0xff] }
 0x15c   :  { %2980 = vrot.lane.b32.xlu0 %v5181_v42, %s5842_s19 }
 0x15e   :  { %v2894_v47 = vpop.permute.xlu0 %2893  ;;  %v2900_v15 = vpop.permute.xlu1 %2899  ;;  %v5185_v16 = vld [vmem:[%s14007_s15 + $0x2bc] sm:$0xff] }
 0x15f   :  { %5170 = vst.msk [vmem:[%s14007_s15 + $0x2d4] sm:$0xff] %vm841_vm12, %v2894_v47  ;;  %129 = vrot.lane.b32.xlu1 %v127_v13, %s5843_s30  ;;  %5173 = vst.msk [vmem:[%s14007_s15 + $0x31c] sm:$0xff] %vm841_vm12, %v2900_v15  ;;  %v5182_v33 = vld [vmem:[%s14007_s15 + $0x13c] sm:$0xff] }
 0x160   :  { %2984 = vrot.lane.b32.xlu0 %v5183_v46, %s5842_s19 }
 0x162   :  { %v2898_v17 = vpop.permute.xlu0 %2897  ;;  %v1840_v19 = vpop.permute.xlu1 %1839  ;;  %v5187_v20 = vld [vmem:[%s14007_s15 + $0x2ec] sm:$0xff]  ;;  %v5184_v35 = vld [vmem:[%s14007_s15 + $0x2a4] sm:$0xff] }
 0x163   :  { %5172 = vst.msk [vmem:[%s14007_s15 + $0x304] sm:$0xff] %vm841_vm12, %v2898_v17  ;;  %165 = vrot.lane.b32.xlu1 %v163_v18, %s5841_s26  ;;  %4546 = vst.msk [vmem:[%s14006_s14 + $0xac] sm:$0xff] %vm841_vm12, %v1840_v19 }
 0x164   :  { %2988 = vrot.lane.b32.xlu0 %v5185_v16, %s5842_s19 }
 0x166   :  { %v2902_v21 = vpop.permute.xlu0 %2901  ;;  %v1844_v23 = vpop.permute.xlu1 %1843  ;;  %v5189_v24 = vld [vmem:[%s14007_s15 + $0x31c] sm:$0xff]  ;;  %v5186_v37 = vld [vmem:[%s14007_s15 + $0x2d4] sm:$0xff] }
 0x167   :  { %5174 = vst.msk [vmem:[%s14007_s15 + $0x334] sm:$0xff] %vm841_vm12, %v2902_v21  ;;  %248 = vrot.lane.b32.xlu1 %v241_v22, %s5839_s18  ;;  %4548 = vst.msk [vmem:[%s14006_s14 + $0xdc] sm:$0xff] %vm841_vm12, %v1844_v23 }
 0x168   :  { %2992 = vrot.lane.b32.xlu0 %v5187_v20, %s5842_s19 }
 0x16a   :  { %v1842_v25 = vpop.permute.xlu0 %1841  ;;  %v1848_v27 = vpop.permute.xlu1 %1847  ;;  %v4562_v28 = vld [vmem:[%s14006_s14 + $0xac] sm:$0xff]  ;;  %v5188_v39 = vld [vmem:[%s14007_s15 + $0x304] sm:$0xff] }
 0x16b   :  { %4547 = vst.msk [vmem:[%s14006_s14 + $0xc4] sm:$0xff] %vm841_vm12, %v1842_v25  ;;  %415 = vrot.lane.b32.xlu1 %v408_v26, %s5843_s30  ;;  %4550 = vst.msk [vmem:[%s14006_s14 + $0x10c] sm:$0xff] %vm841_vm12, %v1848_v27 }
 0x16c   :  { %2996 = vrot.lane.b32.xlu0 %v5189_v24, %s5842_s19 }
 0x16e   :  { %v1846_v48 = vpop.permute.xlu0 %1845  ;;  %v1856_v50 = vpop.permute.xlu1 %1855  ;;  %v4564_v52 = vld [vmem:[%s14006_s14 + $0xdc] sm:$0xff]  ;;  %v5190_v41 = vld [vmem:[%s14007_s15 + $0x334] sm:$0xff] }
 0x16f   :  { %4549 = vst.msk [vmem:[%s14006_s14 + $0xf4] sm:$0xff] %vm841_vm12, %v1846_v48  ;;  %577 = vrot.lane.b32.xlu1 %v570_v49, %s5841_s26  ;;  %4554 = vst.msk [vmem:[%s14006_s14 + $0x2a4] sm:$0xff] %vm841_vm12, %v1856_v50 }
 0x170   :  { %1936 = vrot.lane.b32.xlu0 %v4562_v28, %s5839_s18 }
 0x172   :  { %v1850_v53 = vpop.permute.xlu0 %1849  ;;  %v1860_v54 = vpop.permute.xlu1 %1859  ;;  %v4566_v56 = vld [vmem:[%s14006_s14 + $0x10c] sm:$0xff]  ;;  %v4563_v43 = vld [vmem:[%s14006_s14 + $0xc4] sm:$0xff] }
 0x173   :  { %4551 = vst.msk [vmem:[%s14006_s14 + $0x124] sm:$0xff] %vm841_vm12, %v1850_v53  ;;  %986 = vrot.lane.b32.xlu1 %v3979_v51, %s5839_s18  ;;  %4556 = vst.msk [vmem:[%s14006_s14 + $0x2d4] sm:$0xff] %vm841_vm12, %v1860_v54 }
 0x174   :  { %1940 = vrot.lane.b32.xlu0 %v4564_v52, %s5839_s18 }
 0x176   :  { %v1858_v57 = vpop.permute.xlu0 %1857  ;;  %v1864_v58 = vpop.permute.xlu1 %1863  ;;  %v4570_v60 = vld [vmem:[%s14006_s14 + $0x2a4] sm:$0xff]  ;;  %v4565_v45 = vld [vmem:[%s14006_s14 + $0xf4] sm:$0xff] }
 0x177   :  { %4555 = vst.msk [vmem:[%s14006_s14 + $0x2bc] sm:$0xff] %vm841_vm12, %v1858_v57  ;;  %990 = vrot.lane.b32.xlu1 %v3981_v55, %s5839_s18  ;;  %4558 = vst.msk [vmem:[%s14006_s14 + $0x304] sm:$0xff] %vm841_vm12, %v1864_v58 }
 0x178   :  { %1944 = vrot.lane.b32.xlu0 %v4566_v56, %s5839_s18 }
 0x17a   :  { %v1862_v61 = vpop.permute.xlu0 %1861  ;;  %v1949_v62 = vpop.permute.xlu1 %1948  ;;  %v4572_v0 = vld [vmem:[%s14006_s14 + $0x2d4] sm:$0xff]  ;;  %v4567_v47 = vld [vmem:[%s14006_s14 + $0x124] sm:$0xff] }
 0x17b   :  { %4557 = vst.msk [vmem:[%s14006_s14 + $0x2ec] sm:$0xff] %vm841_vm12, %v1862_v61  ;;  %994 = vrot.lane.b32.xlu1 %v3983_v59, %s5839_s18 }
 0x17c   :  { %4584 = vst.msk [vmem:[%s14006_s14 + $0x13c] sm:$0xff] %vm236_vm14, %v1949_v62  ;;  %1952 = vrot.lane.b32.xlu0 %v4570_v60, %s5839_s18 }
 0x17e   :  { %v1866_v1 = vpop.permute.xlu0 %1865  ;;  %v1965_v2 = vpop.permute.xlu1 %1964  ;;  %v4574_v4 = vld [vmem:[%s14006_s14 + $0x304] sm:$0xff]  ;;  %v4571_v15 = vld [vmem:[%s14006_s14 + $0x2bc] sm:$0xff] }
 0x17f   :  { %4559 = vst.msk [vmem:[%s14006_s14 + $0x31c] sm:$0xff] %vm841_vm12, %v1866_v1  ;;  %998 = vrot.lane.b32.xlu1 %v3985_v63, %s5839_s18  ;;  %vm113_vm12 = vcmask 166048  }
 0x180   :  { %4592 = vst.msk [vmem:[%s14006_s14 + $0x334] sm:$0xff] %vm236_vm14, %v1965_v2  ;;  %1956 = vrot.lane.b32.xlu0 %v4572_v0, %s5839_s18 }
 0x182   :  { %v1935_v5 = vpop.permute.xlu0 %1934  ;;  %v2971_v6 = vpop.permute.xlu1 %2970  ;;  %v4573_v17 = vld [vmem:[%s14006_s14 + $0x2ec] sm:$0xff] }
 0x183   :  { %4577 = vst.msk [vmem:[%s14006_s14 + $0x94] sm:$0xff] %vm236_vm14, %v1935_v5  ;;  %1002 = vrot.lane.b32.xlu1 %v3987_v3, %s5839_s18  ;;  %5192 = vst.msk [vmem:[%s14007_s15 + $0xac] sm:$0xff] %vm236_vm14, %v2971_v6  ;;  %v4600_v8 = vld [vmem:[%s14006_s14 + $0x13c] sm:$0xff] }
 0x184   :  { %1960 = vrot.lane.b32.xlu0 %v4574_v4, %s5839_s18 }
 0x186   :  { %v1951_v9 = vpop.permute.xlu0 %1950  ;;  %v4575_v19 = vld [vmem:[%s14006_s14 + $0x31c] sm:$0xff] }
 0x187   :  { %4585 = vst.msk [vmem:[%s14006_s14 + $0x28c] sm:$0xff] %vm236_vm14, %v1951_v9  ;;  %1006 = vrot.lane.b32.xlu1 %v3989_v7, %s5839_s18  ;;  %v4608_v11 = vld [vmem:[%s14006_s14 + $0x334] sm:$0xff] }
 0x188   :  { %2044 = vrot.lane.b32.xlu0 %v4600_v8, %s5843_s30 }
 0x18a   :  { %v2969_v12 = vpop.permute.xlu0 %2968  ;;  %v5208_v29 = vld [vmem:[%s14007_s15 + $0xac] sm:$0xff]  ;;  %v4593_v21 = vld [vmem:[%s14006_s14 + $0x94] sm:$0xff] }
 0x18b   :  { %5191 = vst.msk [vmem:[%s14007_s15 + $0x94] sm:$0xff] %vm236_vm14, %v2969_v12  ;;  %1010 = vrot.lane.b32.xlu1 %v3991_v10, %s5839_s18 }
 0x18c   :  { %2060 = vrot.lane.b32.xlu0 %v4608_v11, %s5843_s30 }
 0x18e   :  { %v2973_v30 = vpop.permute.xlu0 %2972  ;;  %v4601_v23 = vld [vmem:[%s14006_s14 + $0x28c] sm:$0xff] }
 0x18f   :  { %5193 = vst.msk [vmem:[%s14007_s15 + $0xc4] sm:$0xff] %vm236_vm14, %v2973_v30  ;;  %1014 = vrot.lane.b32.xlu1 %v3993_v14, %s5839_s18 }
 0x190   :  { %3066 = vrot.lane.b32.xlu0 %v5208_v29, %s5842_s19 }
 0x192   :  { %v247_v32 = vpop.permute.xlu0 %246  ;;  %v5207_v25 = vld [vmem:[%s14007_s15 + $0x94] sm:$0xff] }
 0x193   :  { %256 = vst.msk [vmem:[%s14001_s9 + $0x4] sm:$0xff] %vm255_vm15, %v247_v32  ;;  %2978 = vrot.lane.b32.xlu1 %v5180_v31, %s5842_s19 }
 0x196   :  { %v251_v34 = vpop.permute.xlu0 %250  ;;  %v5209_v28 = vld [vmem:[%s14007_s15 + $0xc4] sm:$0xff] }
 0x197   :  { %258 = vst.msk [vmem:[%s14001_s9 + $0x34] sm:$0xff] %vm255_vm15, %v251_v34  ;;  %2982 = vrot.lane.b32.xlu1 %v5182_v33, %s5842_s19 }
 0x19a   :  { %v414_v36 = vpop.permute.xlu0 %413  ;;  %v259_v58 = vld [vmem:[%s14001_s9 + $0x4] sm:$0xff] }
 0x19b   :  { %422 = vst.msk [vmem:[%s14002_s10 + $0x4] sm:$0xff] %vm255_vm15, %v414_v36  ;;  %2986 = vrot.lane.b32.xlu1 %v5184_v35, %s5842_s19 }
 0x19e   :  { %v418_v38 = vpop.permute.xlu0 %417  ;;  %v261_v61 = vld [vmem:[%s14001_s9 + $0x34] sm:$0xff] }
 0x19f   :  { %424 = vst.msk [vmem:[%s14002_s10 + $0x34] sm:$0xff] %vm255_vm15, %v418_v38  ;;  %2990 = vrot.lane.b32.xlu1 %v5186_v37, %s5842_s19 }
 0x1a2   :  { %v576_v40 = vpop.permute.xlu0 %575  ;;  %v425_v0 = vld [vmem:[%s14002_s10 + $0x4] sm:$0xff] }
 0x1a3   :  { %584 = vst.msk [vmem:[%s14003_s11 + $0x4] sm:$0xff] %vm255_vm15, %v576_v40  ;;  %2994 = vrot.lane.b32.xlu1 %v5188_v39, %s5842_s19 }
 0x1a6   :  { %v580_v42 = vpop.permute.xlu0 %579  ;;  %v427_v3 = vld [vmem:[%s14002_s10 + $0x34] sm:$0xff] }
 0x1a7   :  { %586 = vst.msk [vmem:[%s14003_s11 + $0x34] sm:$0xff] %vm255_vm15, %v580_v42  ;;  %2998 = vrot.lane.b32.xlu1 %v5190_v41, %s5842_s19 }
 0x1aa   :  { %v989_v44 = vpop.permute.xlu0 %988  ;;  %v587_v6 = vld [vmem:[%s14003_s11 + $0x4] sm:$0xff] }
 0x1ab   :  { %3996 = vst.msk [vmem:[%s14005_s13 + $0xac] sm:$0xff] %vm255_vm15, %v989_v44  ;;  %1938 = vrot.lane.b32.xlu1 %v4563_v43, %s5839_s18 }
 0x1ae   :  { %v993_v46 = vpop.permute.xlu0 %992  ;;  %v589_v9 = vld [vmem:[%s14003_s11 + $0x34] sm:$0xff] }
 0x1af   :  { %3998 = vst.msk [vmem:[%s14005_s13 + $0xdc] sm:$0xff] %vm255_vm15, %v993_v46  ;;  %1942 = vrot.lane.b32.xlu1 %v4565_v45, %s5839_s18 }
 0x1b2   :  { %v997_v13 = vpop.permute.xlu0 %996 }
 0x1b3   :  { %4000 = vst.msk [vmem:[%s14005_s13 + $0x10c] sm:$0xff] %vm255_vm15, %v997_v13  ;;  %1946 = vrot.lane.b32.xlu1 %v4567_v47, %s5839_s18 }
 0x1b6   :  { %v1001_v16 = vpop.permute.xlu0 %1000 }
 0x1b7   :  { %4002 = vst.msk [vmem:[%s14005_s13 + $0x13c] sm:$0xff] %vm255_vm15, %v1001_v16  ;;  %1954 = vrot.lane.b32.xlu1 %v4571_v15, %s5839_s18 }
 0x1ba   :  { %v1005_v18 = vpop.permute.xlu0 %1004 }
 0x1bb   :  { %4004 = vst.msk [vmem:[%s14005_s13 + $0x2a4] sm:$0xff] %vm255_vm15, %v1005_v18  ;;  %1958 = vrot.lane.b32.xlu1 %v4573_v17, %s5839_s18 }
 0x1be   :  { %v1009_v20 = vpop.permute.xlu0 %1008 }
 0x1bf   :  { %4006 = vst.msk [vmem:[%s14005_s13 + $0x2d4] sm:$0xff] %vm255_vm15, %v1009_v20  ;;  %1962 = vrot.lane.b32.xlu1 %v4575_v19, %s5839_s18 }
 0x1c2   :  { %v1013_v22 = vpop.permute.xlu0 %1012 }
 0x1c3   :  { %4008 = vst.msk [vmem:[%s14005_s13 + $0x304] sm:$0xff] %vm255_vm15, %v1013_v22  ;;  %2030 = vrot.lane.b32.xlu1 %v4593_v21, %s5843_s30 }
 0x1c6   :  { %v1017_v24 = vpop.permute.xlu0 %1016 }
 0x1c7   :  { %4010 = vst.msk [vmem:[%s14005_s13 + $0x334] sm:$0xff] %vm255_vm15, %v1017_v24  ;;  %2046 = vrot.lane.b32.xlu1 %v4601_v23, %s5843_s30 }
 0x1c9   :  { %v2975_v26 = vpop.permute.xlu1 %2974 }
 0x1ca   :  { %5194 = vst.msk [vmem:[%s14007_s15 + $0xdc] sm:$0xff] %vm236_vm14, %v2975_v26  ;;  %v2977_v27 = vpop.permute.xlu0 %2976 }
 0x1cb   :  { %5195 = vst.msk [vmem:[%s14007_s15 + $0xf4] sm:$0xff] %vm236_vm14, %v2977_v27  ;;  %3064 = vrot.lane.b32.xlu1 %v5207_v25, %s5842_s19 }
 0x1cd   :  { %v90_v48 = vpop.permute.xlu1 %89 }
 0x1ce   :  { %93 = vst.msk [vmem:[%s13997_s5] sm:$0x7] %vm92_vm0, %v90_v48  ;;  %v2981_v49 = vpop.permute.xlu0 %2980 }
 0x1cf   :  { %5197 = vst.msk [vmem:[%s14007_s15 + $0x124] sm:$0xff] %vm236_vm14, %v2981_v49  ;;  %3068 = vrot.lane.b32.xlu1 %v5209_v28, %s5842_s19 }
 0x1d1   :  { %v130_v50 = vpop.permute.xlu1 %129  ;;  %v5210_v51 = vld [vmem:[%s14007_s15 + $0xdc] sm:$0xff] }
 0x1d2   :  { %132 = vst.msk [vmem:[%s13998_s6] sm:$0x7] %vm92_vm0, %v130_v50  ;;  %3070 = vrot.lane.b32.xlu0 %v5210_v51, %s5842_s19  ;;  %v5211_v52 = vld [vmem:[%s14007_s15 + $0xf4] sm:$0xff]  ;;  %v2985_v53 = vpop.permute.xlu0 %2984 }
 0x1d3   :  { %3072 = vrot.lane.b32.xlu1 %v5211_v52, %s5842_s19  ;;  %5199 = vst.msk [vmem:[%s14007_s15 + $0x28c] sm:$0xff] %vm236_vm14, %v2985_v53  ;;  %v4012_v53 = vld [vmem:[%s14005_s13 + $0xac] sm:$0xff] }
 0x1d5   :  { %v166_v54 = vpop.permute.xlu1 %165  ;;  %v94_v16 = vld [vmem:[%s13997_s5] sm:$0x7] }
 0x1d6   :  { %168 = vst.msk [vmem:[%s13999_s7] sm:$0x7] %vm92_vm0, %v166_v54  ;;  %v5213_v55 = vld [vmem:[%s14007_s15 + $0x124] sm:$0xff]  ;;  %v2989_v56 = vpop.permute.xlu0 %2988 }
 0x1d7   :  { %3076 = vrot.lane.b32.xlu1 %v5213_v55, %s5842_s19  ;;  %5201 = vst.msk [vmem:[%s14007_s15 + $0x2bc] sm:$0xff] %vm236_vm14, %v2989_v56  ;;  %v4014_v56 = vld [vmem:[%s14005_s13 + $0xdc] sm:$0xff] }
 0x1d9   :  { %v249_v57 = vpop.permute.xlu1 %248  ;;  %v133_v19 = vld [vmem:[%s13998_s6] sm:$0x7] }
 0x1da   :  { %257 = vst.msk [vmem:[%s14001_s9 + $0x1c] sm:$0xff] %vm255_vm15, %v249_v57  ;;  %v2993_v59 = vpop.permute.xlu0 %2992  ;;  %v5215_v13 = vld [vmem:[%s14007_s15 + $0x28c] sm:$0xff] }
 0x1db   :  { %265 = vrot.lane.b32.xlu1 %v259_v58, %s5838_s28  ;;  %5203 = vst.msk [vmem:[%s14007_s15 + $0x2ec] sm:$0xff] %vm236_vm14, %v2993_v59  ;;  %v4016_v59 = vld [vmem:[%s14005_s13 + $0x10c] sm:$0xff] }
 0x1dd   :  { %v416_v60 = vpop.permute.xlu1 %415  ;;  %v169_v22 = vld [vmem:[%s13999_s7] sm:$0x7] }
 0x1de   :  { %423 = vst.msk [vmem:[%s14002_s10 + $0x1c] sm:$0xff] %vm255_vm15, %v416_v60  ;;  %v2997_v62 = vpop.permute.xlu0 %2996  ;;  %v5217_v17 = vld [vmem:[%s14007_s15 + $0x2bc] sm:$0xff] }
 0x1df   :  { %269 = vrot.lane.b32.xlu1 %v261_v61, %s5838_s28  ;;  %5205 = vst.msk [vmem:[%s14007_s15 + $0x31c] sm:$0xff] %vm236_vm14, %v2997_v62  ;;  %v4018_v62 = vld [vmem:[%s14005_s13 + $0x13c] sm:$0xff] }
 0x1e1   :  { %v578_v63 = vpop.permute.xlu1 %577  ;;  %v260_v25 = vld [vmem:[%s14001_s9 + $0x1c] sm:$0xff] }
 0x1e2   :  { %585 = vst.msk [vmem:[%s14003_s11 + $0x1c] sm:$0xff] %vm255_vm15, %v578_v63  ;;  %v1937_v1 = vpop.permute.xlu0 %1936  ;;  %v5219_v20 = vld [vmem:[%s14007_s15 + $0x2ec] sm:$0xff] }
 0x1e3   :  { %431 = vrot.lane.b32.xlu1 %v425_v0, %s5844_s24  ;;  %4578 = vst.msk [vmem:[%s14006_s14 + $0xac] sm:$0xff] %vm236_vm14, %v1937_v1  ;;  %v4020_v0 = vld [vmem:[%s14005_s13 + $0x2a4] sm:$0xff] }
 0x1e5   :  { %v987_v2 = vpop.permute.xlu1 %986  ;;  %v426_v28 = vld [vmem:[%s14002_s10 + $0x1c] sm:$0xff] }
 0x1e6   :  { %3995 = vst.msk [vmem:[%s14005_s13 + $0x94] sm:$0xff] %vm255_vm15, %v987_v2  ;;  %v1941_v4 = vpop.permute.xlu0 %1940  ;;  %v5221_v23 = vld [vmem:[%s14007_s15 + $0x31c] sm:$0xff] }
 0x1e7   :  { %435 = vrot.lane.b32.xlu1 %v427_v3, %s5844_s24  ;;  %4580 = vst.msk [vmem:[%s14006_s14 + $0xdc] sm:$0xff] %vm236_vm14, %v1941_v4  ;;  %v4022_v3 = vld [vmem:[%s14005_s13 + $0x2d4] sm:$0xff] }
 0x1e9   :  { %v991_v5 = vpop.permute.xlu1 %990  ;;  %v588_v50 = vld [vmem:[%s14003_s11 + $0x1c] sm:$0xff] }
 0x1ea   :  { %3997 = vst.msk [vmem:[%s14005_s13 + $0xc4] sm:$0xff] %vm255_vm15, %v991_v5  ;;  %v1945_v7 = vpop.permute.xlu0 %1944  ;;  %v4594_v26 = vld [vmem:[%s14006_s14 + $0xac] sm:$0xff] }
 0x1eb   :  { %593 = vrot.lane.b32.xlu1 %v587_v6, %s5845_s0  ;;  %4582 = vst.msk [vmem:[%s14006_s14 + $0x10c] sm:$0xff] %vm236_vm14, %v1945_v7  ;;  %v4024_v6 = vld [vmem:[%s14005_s13 + $0x304] sm:$0xff] }
 0x1ed   :  { %v995_v8 = vpop.permute.xlu1 %994  ;;  %v4011_v12 = vld [vmem:[%s14005_s13 + $0x94] sm:$0xff] }
 0x1ee   :  { %3999 = vst.msk [vmem:[%s14005_s13 + $0xf4] sm:$0xff] %vm255_vm15, %v995_v8  ;;  %v1953_v10 = vpop.permute.xlu0 %1952  ;;  %v4596_v48 = vld [vmem:[%s14006_s14 + $0xdc] sm:$0xff] }
 0x1ef   :  { %597 = vrot.lane.b32.xlu1 %v589_v9, %s5845_s0  ;;  %4586 = vst.msk [vmem:[%s14006_s14 + $0x2a4] sm:$0xff] %vm236_vm14, %v1953_v10  ;;  %v4026_v10 = vld [vmem:[%s14005_s13 + $0x334] sm:$0xff] }
 0x1f1   :  { %v999_v11 = vpop.permute.xlu1 %998  ;;  %v4013_v30 = vld [vmem:[%s14005_s13 + $0xc4] sm:$0xff] }
 0x1f2   :  { %4001 = vst.msk [vmem:[%s14005_s13 + $0x124] sm:$0xff] %vm255_vm15, %v999_v11  ;;  %v1957_v14 = vpop.permute.xlu0 %1956  ;;  %v4598_v51 = vld [vmem:[%s14006_s14 + $0x10c] sm:$0xff] }
 0x1f3   :  { %1082 = vrot.lane.b32.xlu1 %v4011_v12, %s5838_s28  ;;  %4588 = vst.msk [vmem:[%s14006_s14 + $0x2d4] sm:$0xff] %vm236_vm14, %v1957_v14 }
 0x1f5   :  { %v1003_v29 = vpop.permute.xlu1 %1002  ;;  %v4015_v33 = vld [vmem:[%s14005_s13 + $0xf4] sm:$0xff] }
 0x1f6   :  { %4003 = vst.msk [vmem:[%s14005_s13 + $0x28c] sm:$0xff] %vm255_vm15, %v1003_v29  ;;  %v1961_v31 = vpop.permute.xlu0 %1960  ;;  %v4602_v54 = vld [vmem:[%s14006_s14 + $0x2a4] sm:$0xff] }
 0x1f7   :  { %1086 = vrot.lane.b32.xlu1 %v4013_v30, %s5838_s28  ;;  %4590 = vst.msk [vmem:[%s14006_s14 + $0x304] sm:$0xff] %vm236_vm14, %v1961_v31 }
 0x1f9   :  { %v1007_v32 = vpop.permute.xlu1 %1006  ;;  %v4017_v36 = vld [vmem:[%s14005_s13 + $0x124] sm:$0xff] }
 0x1fa   :  { %4005 = vst.msk [vmem:[%s14005_s13 + $0x2bc] sm:$0xff] %vm255_vm15, %v1007_v32  ;;  %v2045_v34 = vpop.permute.xlu0 %2044  ;;  %v4604_v57 = vld [vmem:[%s14006_s14 + $0x2d4] sm:$0xff] }
 0x1fb   :  { %1090 = vrot.lane.b32.xlu1 %v4015_v33, %s5838_s28  ;;  %4616 = vst.msk [vmem:[%s14006_s14 + $0x13c] sm:$0xff] %vm255_vm15, %v2045_v34 }
 0x1fd   :  { %v1011_v35 = vpop.permute.xlu1 %1010  ;;  %v4019_v39 = vld [vmem:[%s14005_s13 + $0x28c] sm:$0xff] }
 0x1fe   :  { %4007 = vst.msk [vmem:[%s14005_s13 + $0x2ec] sm:$0xff] %vm255_vm15, %v1011_v35  ;;  %v2061_v37 = vpop.permute.xlu0 %2060  ;;  %v4606_v60 = vld [vmem:[%s14006_s14 + $0x304] sm:$0xff] }
 0x1ff   :  { %1094 = vrot.lane.b32.xlu1 %v4017_v36, %s5838_s28  ;;  %4624 = vst.msk [vmem:[%s14006_s14 + $0x334] sm:$0xff] %vm255_vm15, %v2061_v37 }
 0x201   :  { %v1015_v38 = vpop.permute.xlu1 %1014  ;;  %v4021_v42 = vld [vmem:[%s14005_s13 + $0x2bc] sm:$0xff] }
 0x202   :  { %4009 = vst.msk [vmem:[%s14005_s13 + $0x31c] sm:$0xff] %vm255_vm15, %v1015_v38  ;;  %v3067_v40 = vpop.permute.xlu0 %3066  ;;  %v4632_v1 = vld [vmem:[%s14006_s14 + $0x13c] sm:$0xff] }
 0x203   :  { %1098 = vrot.lane.b32.xlu1 %v4019_v39, %s5838_s28  ;;  %5224 = vst.msk [vmem:[%s14007_s15 + $0xac] sm:$0xff] %vm255_vm15, %v3067_v40 }
 0x205   :  { %v2979_v41 = vpop.permute.xlu1 %2978  ;;  %v4023_v44 = vld [vmem:[%s14005_s13 + $0x2ec] sm:$0xff] }
 0x206   :  { %5196 = vst.msk [vmem:[%s14007_s15 + $0x10c] sm:$0xff] %vm236_vm14, %v2979_v41  ;;  %v4640_v4 = vld [vmem:[%s14006_s14 + $0x334] sm:$0xff] }
 0x207   :  { %1102 = vrot.lane.b32.xlu1 %v4021_v42, %s5838_s28 }
 0x209   :  { %v2983_v43 = vpop.permute.xlu1 %2982  ;;  %v4025_v47 = vld [vmem:[%s14005_s13 + $0x31c] sm:$0xff] }
 0x20a   :  { %5198 = vst.msk [vmem:[%s14007_s15 + $0x13c] sm:$0xff] %vm236_vm14, %v2983_v43  ;;  %v5240_v7 = vld [vmem:[%s14007_s15 + $0xac] sm:$0xff] }
 0x20b   :  { %1106 = vrot.lane.b32.xlu1 %v4023_v44, %s5838_s28 }
 0x20d   :  { %v2987_v45 = vpop.permute.xlu1 %2986  ;;  %v5212_v46 = vld [vmem:[%s14007_s15 + $0x10c] sm:$0xff] }
 0x20e   :  { %5200 = vst.msk [vmem:[%s14007_s15 + $0x2a4] sm:$0xff] %vm236_vm14, %v2987_v45  ;;  %3074 = vrot.lane.b32.xlu0 %v5212_v46, %s5842_s19 }
 0x20f   :  { %1110 = vrot.lane.b32.xlu1 %v4025_v47, %s5838_s28 }
 0x211   :  { %v2991_v15 = vpop.permute.xlu1 %2990  ;;  %v5214_v11 = vld [vmem:[%s14007_s15 + $0x13c] sm:$0xff] }
 0x212   :  { %5202 = vst.msk [vmem:[%s14007_s15 + $0x2d4] sm:$0xff] %vm236_vm14, %v2991_v15  ;;  %96 = vrot.lane.b32.xlu0 %v94_v16, %s5838_s28 }
 0x213   :  { %3080 = vrot.lane.b32.xlu1 %v5215_v13, %s5842_s19 }
 0x215   :  { %v2995_v18 = vpop.permute.xlu1 %2994  ;;  %v5216_v14 = vld [vmem:[%s14007_s15 + $0x2a4] sm:$0xff] }
 0x216   :  { %5204 = vst.msk [vmem:[%s14007_s15 + $0x304] sm:$0xff] %vm236_vm14, %v2995_v18  ;;  %135 = vrot.lane.b32.xlu0 %v133_v19, %s5844_s24 }
 0x217   :  { %3084 = vrot.lane.b32.xlu1 %v5217_v17, %s5842_s19 }
 0x219   :  { %v2999_v21 = vpop.permute.xlu1 %2998  ;;  %v5218_v31 = vld [vmem:[%s14007_s15 + $0x2d4] sm:$0xff] }
 0x21a   :  { %5206 = vst.msk [vmem:[%s14007_s15 + $0x334] sm:$0xff] %vm236_vm14, %v2999_v21  ;;  %171 = vrot.lane.b32.xlu0 %v169_v22, %s5845_s0 }
 0x21b   :  { %3088 = vrot.lane.b32.xlu1 %v5219_v20, %s5842_s19 }
 0x21d   :  { %v1939_v24 = vpop.permute.xlu1 %1938  ;;  %v5220_v33 = vld [vmem:[%s14007_s15 + $0x304] sm:$0xff] }
 0x21e   :  { %4579 = vst.msk [vmem:[%s14006_s14 + $0xc4] sm:$0xff] %vm236_vm14, %v1939_v24  ;;  %267 = vrot.lane.b32.xlu0 %v260_v25, %s5838_s28 }
 0x21f   :  { %3092 = vrot.lane.b32.xlu1 %v5221_v23, %s5842_s19 }
 0x221   :  { %v1943_v27 = vpop.permute.xlu1 %1942  ;;  %v5222_v35 = vld [vmem:[%s14007_s15 + $0x334] sm:$0xff] }
 0x222   :  { %4581 = vst.msk [vmem:[%s14006_s14 + $0xf4] sm:$0xff] %vm236_vm14, %v1943_v27  ;;  %433 = vrot.lane.b32.xlu0 %v426_v28, %s5844_s24 }
 0x223   :  { %2032 = vrot.lane.b32.xlu1 %v4594_v26, %s5843_s30 }
 0x225   :  { %v1947_v49 = vpop.permute.xlu1 %1946  ;;  %v4595_v37 = vld [vmem:[%s14006_s14 + $0xc4] sm:$0xff] }
 0x226   :  { %4583 = vst.msk [vmem:[%s14006_s14 + $0x124] sm:$0xff] %vm236_vm14, %v1947_v49  ;;  %595 = vrot.lane.b32.xlu0 %v588_v50, %s5845_s0 }
 0x227   :  { %2036 = vrot.lane.b32.xlu1 %v4596_v48, %s5843_s30 }
 0x229   :  { %v1955_v52 = vpop.permute.xlu1 %1954  ;;  %v4597_v39 = vld [vmem:[%s14006_s14 + $0xf4] sm:$0xff] }
 0x22a   :  { %4587 = vst.msk [vmem:[%s14006_s14 + $0x2bc] sm:$0xff] %vm236_vm14, %v1955_v52  ;;  %1084 = vrot.lane.b32.xlu0 %v4012_v53, %s5838_s28 }
 0x22b   :  { %2040 = vrot.lane.b32.xlu1 %v4598_v51, %s5843_s30 }
 0x22d   :  { %v1959_v55 = vpop.permute.xlu1 %1958  ;;  %v4599_v41 = vld [vmem:[%s14006_s14 + $0x124] sm:$0xff] }
 0x22e   :  { %4589 = vst.msk [vmem:[%s14006_s14 + $0x2ec] sm:$0xff] %vm236_vm14, %v1959_v55  ;;  %1088 = vrot.lane.b32.xlu0 %v4014_v56, %s5838_s28 }
 0x22f   :  { %2048 = vrot.lane.b32.xlu1 %v4602_v54, %s5843_s30 }
 0x231   :  { %v1963_v58 = vpop.permute.xlu1 %1962  ;;  %v4603_v43 = vld [vmem:[%s14006_s14 + $0x2bc] sm:$0xff] }
 0x232   :  { %4591 = vst.msk [vmem:[%s14006_s14 + $0x31c] sm:$0xff] %vm236_vm14, %v1963_v58  ;;  %1092 = vrot.lane.b32.xlu0 %v4016_v59, %s5838_s28 }
 0x233   :  { %2052 = vrot.lane.b32.xlu1 %v4604_v57, %s5843_s30 }
 0x235   :  { %v2031_v61 = vpop.permute.xlu1 %2030  ;;  %v4605_v45 = vld [vmem:[%s14006_s14 + $0x2ec] sm:$0xff] }
 0x236   :  { %4609 = vst.msk [vmem:[%s14006_s14 + $0x94] sm:$0xff] %vm255_vm15, %v2031_v61  ;;  %1096 = vrot.lane.b32.xlu0 %v4018_v62, %s5838_s28 }
 0x237   :  { %2056 = vrot.lane.b32.xlu1 %v4606_v60, %s5843_s30 }
 0x239   :  { %v2047_v63 = vpop.permute.xlu1 %2046  ;;  %v4607_v47 = vld [vmem:[%s14006_s14 + $0x31c] sm:$0xff] }
 0x23a   :  { %4617 = vst.msk [vmem:[%s14006_s14 + $0x28c] sm:$0xff] %vm255_vm15, %v2047_v63  ;;  %1100 = vrot.lane.b32.xlu0 %v4020_v0, %s5838_s28 }
 0x23b   :  { %2140 = vrot.lane.b32.xlu1 %v4632_v1, %s5844_s24 }
 0x23d   :  { %v3065_v2 = vpop.permute.xlu1 %3064  ;;  %v4625_v16 = vld [vmem:[%s14006_s14 + $0x94] sm:$0xff] }
 0x23e   :  { %5223 = vst.msk [vmem:[%s14007_s15 + $0x94] sm:$0xff] %vm255_vm15, %v3065_v2  ;;  %1104 = vrot.lane.b32.xlu0 %v4022_v3, %s5838_s28 }
 0x23f   :  { %2156 = vrot.lane.b32.xlu1 %v4640_v4, %s5844_s24 }
 0x241   :  { %v3069_v5 = vpop.permute.xlu1 %3068  ;;  %v4633_v18 = vld [vmem:[%s14006_s14 + $0x28c] sm:$0xff] }
 0x242   :  { %5225 = vst.msk [vmem:[%s14007_s15 + $0xc4] sm:$0xff] %vm255_vm15, %v3069_v5  ;;  %1108 = vrot.lane.b32.xlu0 %v4024_v6, %s5838_s28 }
 0x243   :  { %3162 = vrot.lane.b32.xlu1 %v5240_v7, %s5835_s22 }
 0x244   :  { %v3071_v8 = vpop.permute.xlu0 %3070 }
 0x245   :  { %5226 = vst.msk [vmem:[%s14007_s15 + $0xdc] sm:$0xff] %vm255_vm15, %v3071_v8  ;;  %v3073_v9 = vpop.permute.xlu1 %3072  ;;  %v5239_v20 = vld [vmem:[%s14007_s15 + $0x94] sm:$0xff] }
 0x246   :  { %5227 = vst.msk [vmem:[%s14007_s15 + $0xf4] sm:$0xff] %vm255_vm15, %v3073_v9  ;;  %1112 = vrot.lane.b32.xlu0 %v4026_v10, %s5838_s28 }
 0x249   :  { %v3077_v12 = vpop.permute.xlu1 %3076  ;;  %v5241_v23 = vld [vmem:[%s14007_s15 + $0xc4] sm:$0xff] }
 0x24a   :  { %5229 = vst.msk [vmem:[%s14007_s15 + $0x124] sm:$0xff] %vm255_vm15, %v3077_v12  ;;  %3078 = vrot.lane.b32.xlu0 %v5214_v11, %s5842_s19 }
 0x24c   :  { %v5242_v29 = vld [vmem:[%s14007_s15 + $0xdc] sm:$0xff] }
 0x24d   :  { %v266_v30 = vpop.permute.xlu1 %265  ;;  %3166 = vrot.lane.b32.xlu1 %v5242_v29, %s5835_s22  ;;  %v5243_v24 = vld [vmem:[%s14007_s15 + $0xf4] sm:$0xff] }
 0x24e   :  { %275 = vst.msk [vmem:[%s14001_s9 + $0x4] sm:$0xff] %vm274_vm1, %v266_v30  ;;  %3082 = vrot.lane.b32.xlu0 %v5216_v14, %s5842_s19 }
 0x251   :  { %v270_v32 = vpop.permute.xlu1 %269  ;;  %v5245_v27 = vld [vmem:[%s14007_s15 + $0x124] sm:$0xff] }
 0x252   :  { %277 = vst.msk [vmem:[%s14001_s9 + $0x34] sm:$0xff] %vm274_vm1, %v270_v32  ;;  %3086 = vrot.lane.b32.xlu0 %v5218_v31, %s5842_s19 }
 0x255   :  { %v432_v34 = vpop.permute.xlu1 %431  ;;  %v278_v52 = vld [vmem:[%s14001_s9 + $0x4] sm:$0xff] }
 0x256   :  { %440 = vst.msk [vmem:[%s14002_s10 + $0x4] sm:$0xff] %vm274_vm1, %v432_v34  ;;  %3090 = vrot.lane.b32.xlu0 %v5220_v33, %s5842_s19 }
 0x259   :  { %v436_v36 = vpop.permute.xlu1 %435  ;;  %v280_v55 = vld [vmem:[%s14001_s9 + $0x34] sm:$0xff] }
 0x25a   :  { %442 = vst.msk [vmem:[%s14002_s10 + $0x34] sm:$0xff] %vm274_vm1, %v436_v36  ;;  %3094 = vrot.lane.b32.xlu0 %v5222_v35, %s5842_s19 }
 0x25d   :  { %v594_v38 = vpop.permute.xlu1 %593  ;;  %v443_v58 = vld [vmem:[%s14002_s10 + $0x4] sm:$0xff] }
 0x25e   :  { %602 = vst.msk [vmem:[%s14003_s11 + $0x4] sm:$0xff] %vm274_vm1, %v594_v38  ;;  %2034 = vrot.lane.b32.xlu0 %v4595_v37, %s5843_s30 }
 0x261   :  { %v598_v40 = vpop.permute.xlu1 %597  ;;  %v445_v61 = vld [vmem:[%s14002_s10 + $0x34] sm:$0xff] }
 0x262   :  { %604 = vst.msk [vmem:[%s14003_s11 + $0x34] sm:$0xff] %vm274_vm1, %v598_v40  ;;  %2038 = vrot.lane.b32.xlu0 %v4597_v39, %s5843_s30 }
 0x265   :  { %v1083_v42 = vpop.permute.xlu1 %1082  ;;  %v605_v0 = vld [vmem:[%s14003_s11 + $0x4] sm:$0xff] }
 0x266   :  { %4027 = vst.msk [vmem:[%s14005_s13 + $0x94] sm:$0xff] %vm1130_vm2, %v1083_v42  ;;  %2042 = vrot.lane.b32.xlu0 %v4599_v41, %s5843_s30 }
 0x269   :  { %v1087_v44 = vpop.permute.xlu1 %1086  ;;  %v607_v3 = vld [vmem:[%s14003_s11 + $0x34] sm:$0xff] }
 0x26a   :  { %4029 = vst.msk [vmem:[%s14005_s13 + $0xc4] sm:$0xff] %vm1130_vm2, %v1087_v44  ;;  %2050 = vrot.lane.b32.xlu0 %v4603_v43, %s5843_s30 }
 0x26d   :  { %v1091_v46 = vpop.permute.xlu1 %1090 }
 0x26e   :  { %4031 = vst.msk [vmem:[%s14005_s13 + $0xf4] sm:$0xff] %vm1130_vm2, %v1091_v46  ;;  %2054 = vrot.lane.b32.xlu0 %v4605_v45, %s5843_s30 }
 0x271   :  { %v1095_v13 = vpop.permute.xlu1 %1094 }
 0x272   :  { %4033 = vst.msk [vmem:[%s14005_s13 + $0x124] sm:$0xff] %vm1130_vm2, %v1095_v13  ;;  %2058 = vrot.lane.b32.xlu0 %v4607_v47, %s5843_s30 }
 0x275   :  { %v1099_v15 = vpop.permute.xlu1 %1098 }
 0x276   :  { %4035 = vst.msk [vmem:[%s14005_s13 + $0x28c] sm:$0xff] %vm1130_vm2, %v1099_v15  ;;  %2126 = vrot.lane.b32.xlu0 %v4625_v16, %s5844_s24 }
 0x279   :  { %v1103_v17 = vpop.permute.xlu1 %1102 }
 0x27a   :  { %4037 = vst.msk [vmem:[%s14005_s13 + $0x2bc] sm:$0xff] %vm1130_vm2, %v1103_v17  ;;  %2142 = vrot.lane.b32.xlu0 %v4633_v18, %s5844_s24 }
 0x27d   :  { %v1107_v19 = vpop.permute.xlu1 %1106 }
 0x27e   :  { %4039 = vst.msk [vmem:[%s14005_s13 + $0x2ec] sm:$0xff] %vm1130_vm2, %v1107_v19  ;;  %3160 = vrot.lane.b32.xlu0 %v5239_v20, %s5835_s22 }
 0x280   :  { %v3075_v21 = vpop.permute.xlu0 %3074 }
 0x281   :  { %5228 = vst.msk [vmem:[%s14007_s15 + $0x10c] sm:$0xff] %vm255_vm15, %v3075_v21  ;;  %v1111_v22 = vpop.permute.xlu1 %1110 }
 0x282   :  { %4041 = vst.msk [vmem:[%s14005_s13 + $0x31c] sm:$0xff] %vm1130_vm2, %v1111_v22  ;;  %3164 = vrot.lane.b32.xlu0 %v5241_v23, %s5835_s22 }
 0x284   :  { %v97_v25 = vpop.permute.xlu0 %96 }
 0x285   :  { %100 = vst.msk [vmem:[%s13997_s5] sm:$0x7] %vm99_vm3, %v97_v25  ;;  %v3081_v26 = vpop.permute.xlu1 %3080 }
 0x286   :  { %5231 = vst.msk [vmem:[%s14007_s15 + $0x28c] sm:$0xff] %vm255_vm15, %v3081_v26  ;;  %3168 = vrot.lane.b32.xlu0 %v5243_v24, %s5835_s22 }
 0x288   :  { %v136_v28 = vpop.permute.xlu0 %135  ;;  %v5244_v48 = vld [vmem:[%s14007_s15 + $0x10c] sm:$0xff] }
 0x289   :  { %138 = vst.msk [vmem:[%s13998_s6] sm:$0x7] %vm99_vm3, %v136_v28  ;;  %v3085_v49 = vpop.permute.xlu1 %3084  ;;  %3170 = vrot.lane.b32.xlu1 %v5244_v48, %s5835_s22  ;;  %v4043_v48 = vld [vmem:[%s14005_s13 + $0x94] sm:$0xff] }
 0x28a   :  { %5233 = vst.msk [vmem:[%s14007_s15 + $0x2bc] sm:$0xff] %vm255_vm15, %v3085_v49  ;;  %3172 = vrot.lane.b32.xlu0 %v5245_v27, %s5835_s22 }
 0x28c   :  { %v172_v50 = vpop.permute.xlu0 %171  ;;  %v101_v45 = vld [vmem:[%s13997_s5] sm:$0x7] }
 0x28d   :  { %174 = vst.msk [vmem:[%s13999_s7] sm:$0x7] %vm99_vm3, %v172_v50  ;;  %v3089_v51 = vpop.permute.xlu1 %3088  ;;  %v5247_v43 = vld [vmem:[%s14007_s15 + $0x28c] sm:$0xff] }
 0x28e   :  { %5235 = vst.msk [vmem:[%s14007_s15 + $0x2ec] sm:$0xff] %vm255_vm15, %v3089_v51  ;;  %284 = vrot.lane.b32.xlu0 %v278_v52, %s5846_s25  ;;  %v4045_v51 = vld [vmem:[%s14005_s13 + $0xc4] sm:$0xff] }
 0x290   :  { %v268_v53 = vpop.permute.xlu0 %267  ;;  %v139_v13 = vld [vmem:[%s13998_s6] sm:$0x7] }
 0x291   :  { %276 = vst.msk [vmem:[%s14001_s9 + $0x1c] sm:$0xff] %vm274_vm1, %v268_v53  ;;  %v3093_v54 = vpop.permute.xlu1 %3092  ;;  %v5249_v46 = vld [vmem:[%s14007_s15 + $0x2bc] sm:$0xff] }
 0x292   :  { %5237 = vst.msk [vmem:[%s14007_s15 + $0x31c] sm:$0xff] %vm255_vm15, %v3093_v54  ;;  %288 = vrot.lane.b32.xlu0 %v280_v55, %s5846_s25  ;;  %v4047_v54 = vld [vmem:[%s14005_s13 + $0xf4] sm:$0xff] }
 0x294   :  { %v434_v56 = vpop.permute.xlu0 %433  ;;  %v175_v17 = vld [vmem:[%s13999_s7] sm:$0x7] }
 0x295   :  { %441 = vst.msk [vmem:[%s14002_s10 + $0x1c] sm:$0xff] %vm274_vm1, %v434_v56  ;;  %v2033_v57 = vpop.permute.xlu1 %2032  ;;  %v5251_v15 = vld [vmem:[%s14007_s15 + $0x2ec] sm:$0xff] }
 0x296   :  { %4610 = vst.msk [vmem:[%s14006_s14 + $0xac] sm:$0xff] %vm255_vm15, %v2033_v57  ;;  %449 = vrot.lane.b32.xlu0 %v443_v58, %s5838_s28  ;;  %v4049_v57 = vld [vmem:[%s14005_s13 + $0x124] sm:$0xff] }
 0x298   :  { %v596_v59 = vpop.permute.xlu0 %595  ;;  %v279_v20 = vld [vmem:[%s14001_s9 + $0x1c] sm:$0xff] }
 0x299   :  { %603 = vst.msk [vmem:[%s14003_s11 + $0x1c] sm:$0xff] %vm274_vm1, %v596_v59  ;;  %v2037_v60 = vpop.permute.xlu1 %2036  ;;  %v5253_v18 = vld [vmem:[%s14007_s15 + $0x31c] sm:$0xff] }
 0x29a   :  { %4612 = vst.msk [vmem:[%s14006_s14 + $0xdc] sm:$0xff] %vm255_vm15, %v2037_v60  ;;  %453 = vrot.lane.b32.xlu0 %v445_v61, %s5838_s28  ;;  %v4051_v60 = vld [vmem:[%s14005_s13 + $0x28c] sm:$0xff] }
 0x29c   :  { %v1085_v62 = vpop.permute.xlu0 %1084  ;;  %v444_v23 = vld [vmem:[%s14002_s10 + $0x1c] sm:$0xff] }
 0x29d   :  { %4028 = vst.msk [vmem:[%s14005_s13 + $0xac] sm:$0xff] %vm1130_vm2, %v1085_v62  ;;  %v2041_v63 = vpop.permute.xlu1 %2040  ;;  %v4626_v21 = vld [vmem:[%s14006_s14 + $0xac] sm:$0xff] }
 0x29e   :  { %4614 = vst.msk [vmem:[%s14006_s14 + $0x10c] sm:$0xff] %vm255_vm15, %v2041_v63  ;;  %611 = vrot.lane.b32.xlu0 %v605_v0, %s5845_s0  ;;  %v4053_v63 = vld [vmem:[%s14005_s13 + $0x2bc] sm:$0xff] }
 0x2a0   :  { %v1089_v1 = vpop.permute.xlu0 %1088  ;;  %v606_v26 = vld [vmem:[%s14003_s11 + $0x1c] sm:$0xff] }
 0x2a1   :  { %4030 = vst.msk [vmem:[%s14005_s13 + $0xdc] sm:$0xff] %vm1130_vm2, %v1089_v1  ;;  %v2049_v2 = vpop.permute.xlu1 %2048  ;;  %v4628_v24 = vld [vmem:[%s14006_s14 + $0xdc] sm:$0xff] }
 0x2a2   :  { %4618 = vst.msk [vmem:[%s14006_s14 + $0x2a4] sm:$0xff] %vm255_vm15, %v2049_v2  ;;  %615 = vrot.lane.b32.xlu0 %v607_v3, %s5845_s0  ;;  %v4055_v2 = vld [vmem:[%s14005_s13 + $0x2ec] sm:$0xff] }
 0x2a4   :  { %v1093_v4 = vpop.permute.xlu0 %1092  ;;  %v4044_v5 = vld [vmem:[%s14005_s13 + $0xac] sm:$0xff] }
 0x2a5   :  { %4032 = vst.msk [vmem:[%s14005_s13 + $0x10c] sm:$0xff] %vm1130_vm2, %v1093_v4  ;;  %v2053_v6 = vpop.permute.xlu1 %2052  ;;  %v4630_v27 = vld [vmem:[%s14006_s14 + $0x10c] sm:$0xff] }
 0x2a6   :  { %4620 = vst.msk [vmem:[%s14006_s14 + $0x2d4] sm:$0xff] %vm255_vm15, %v2053_v6  ;;  %1181 = vrot.lane.b32.xlu0 %v4044_v5, %s5846_s25  ;;  %v4057_v6 = vld [vmem:[%s14005_s13 + $0x31c] sm:$0xff] }
 0x2a8   :  { %v1097_v7 = vpop.permute.xlu0 %1096  ;;  %v4046_v8 = vld [vmem:[%s14005_s13 + $0xdc] sm:$0xff] }
 0x2a9   :  { %4034 = vst.msk [vmem:[%s14005_s13 + $0x13c] sm:$0xff] %vm1130_vm2, %v1097_v7  ;;  %v2057_v9 = vpop.permute.xlu1 %2056  ;;  %v4634_v49 = vld [vmem:[%s14006_s14 + $0x2a4] sm:$0xff] }
 0x2aa   :  { %4622 = vst.msk [vmem:[%s14006_s14 + $0x304] sm:$0xff] %vm255_vm15, %v2057_v9  ;;  %1185 = vrot.lane.b32.xlu0 %v4046_v8, %s5846_s25 }
 0x2ac   :  { %v1101_v10 = vpop.permute.xlu0 %1100  ;;  %v4048_v11 = vld [vmem:[%s14005_s13 + $0x10c] sm:$0xff] }
 0x2ad   :  { %4036 = vst.msk [vmem:[%s14005_s13 + $0x2a4] sm:$0xff] %vm1130_vm2, %v1101_v10  ;;  %v2141_v12 = vpop.permute.xlu1 %2140  ;;  %v4636_v52 = vld [vmem:[%s14006_s14 + $0x2d4] sm:$0xff] }
 0x2ae   :  { %4648 = vst.msk [vmem:[%s14006_s14 + $0x13c] sm:$0xff] %vm1130_vm2, %v2141_v12  ;;  %1189 = vrot.lane.b32.xlu0 %v4048_v11, %s5846_s25 }
 0x2b0   :  { %v1105_v14 = vpop.permute.xlu0 %1104  ;;  %v4050_v29 = vld [vmem:[%s14005_s13 + $0x13c] sm:$0xff] }
 0x2b1   :  { %4038 = vst.msk [vmem:[%s14005_s13 + $0x2d4] sm:$0xff] %vm1130_vm2, %v1105_v14  ;;  %v2157_v30 = vpop.permute.xlu1 %2156  ;;  %v4638_v55 = vld [vmem:[%s14006_s14 + $0x304] sm:$0xff] }
 0x2b2   :  { %4656 = vst.msk [vmem:[%s14006_s14 + $0x334] sm:$0xff] %vm1130_vm2, %v2157_v30  ;;  %1193 = vrot.lane.b32.xlu0 %v4050_v29, %s5846_s25 }
 0x2b4   :  { %v1109_v31 = vpop.permute.xlu0 %1108  ;;  %v4052_v32 = vld [vmem:[%s14005_s13 + $0x2a4] sm:$0xff] }
 0x2b5   :  { %4040 = vst.msk [vmem:[%s14005_s13 + $0x304] sm:$0xff] %vm1130_vm2, %v1109_v31  ;;  %v3163_v33 = vpop.permute.xlu1 %3162  ;;  %v4664_v58 = vld [vmem:[%s14006_s14 + $0x13c] sm:$0xff] }
 0x2b6   :  { %5256 = vst.msk [vmem:[%s14007_s15 + $0xac] sm:$0xff] %vm1130_vm2, %v3163_v33  ;;  %1197 = vrot.lane.b32.xlu0 %v4052_v32, %s5846_s25 }
 0x2b8   :  { %v1113_v34 = vpop.permute.xlu0 %1112  ;;  %v4054_v35 = vld [vmem:[%s14005_s13 + $0x2d4] sm:$0xff] }
 0x2b9   :  { %4042 = vst.msk [vmem:[%s14005_s13 + $0x334] sm:$0xff] %vm1130_vm2, %v1113_v34  ;;  %v4672_v61 = vld [vmem:[%s14006_s14 + $0x334] sm:$0xff] }
 0x2ba   :  { %1201 = vrot.lane.b32.xlu0 %v4054_v35, %s5846_s25 }
 0x2bc   :  { %v3079_v36 = vpop.permute.xlu0 %3078  ;;  %v4056_v37 = vld [vmem:[%s14005_s13 + $0x304] sm:$0xff] }
 0x2bd   :  { %5230 = vst.msk [vmem:[%s14007_s15 + $0x13c] sm:$0xff] %vm255_vm15, %v3079_v36  ;;  %v5272_v0 = vld [vmem:[%s14007_s15 + $0xac] sm:$0xff] }
 0x2be   :  { %1205 = vrot.lane.b32.xlu0 %v4056_v37, %s5846_s25 }
 0x2bf   :  { %v3167_v38 = vpop.permute.xlu1 %3166 }
 0x2c0   :  { %5258 = vst.msk [vmem:[%s14007_s15 + $0xdc] sm:$0xff] %vm1130_vm2, %v3167_v38  ;;  %v3083_v39 = vpop.permute.xlu0 %3082  ;;  %v4058_v40 = vld [vmem:[%s14005_s13 + $0x334] sm:$0xff] }
 0x2c1   :  { %5232 = vst.msk [vmem:[%s14007_s15 + $0x2a4] sm:$0xff] %vm255_vm15, %v3083_v39 }
 0x2c2   :  { %1209 = vrot.lane.b32.xlu0 %v4058_v40, %s5846_s25 }
 0x2c4   :  { %v3087_v41 = vpop.permute.xlu0 %3086  ;;  %v5246_v42 = vld [vmem:[%s14007_s15 + $0x13c] sm:$0xff] }
 0x2c5   :  { %5234 = vst.msk [vmem:[%s14007_s15 + $0x2d4] sm:$0xff] %vm255_vm15, %v3087_v41  ;;  %3174 = vrot.lane.b32.xlu1 %v5246_v42, %s5835_s22 }
 0x2c6   :  { %3176 = vrot.lane.b32.xlu0 %v5247_v43, %s5835_s22 }
 0x2c7   :  { %v5274_v3 = vld [vmem:[%s14007_s15 + $0xdc] sm:$0xff] }
 0x2c8   :  { %v3091_v44 = vpop.permute.xlu0 %3090  ;;  %v5248_v8 = vld [vmem:[%s14007_s15 + $0x2a4] sm:$0xff] }
 0x2c9   :  { %5236 = vst.msk [vmem:[%s14007_s15 + $0x304] sm:$0xff] %vm255_vm15, %v3091_v44  ;;  %103 = vrot.lane.b32.xlu1 %v101_v45, %s5846_s25 }
 0x2ca   :  { %3180 = vrot.lane.b32.xlu0 %v5249_v46, %s5835_s22 }
 0x2cc   :  { %v3095_v47 = vpop.permute.xlu0 %3094  ;;  %v5250_v11 = vld [vmem:[%s14007_s15 + $0x2d4] sm:$0xff] }
 0x2cd   :  { %5238 = vst.msk [vmem:[%s14007_s15 + $0x334] sm:$0xff] %vm255_vm15, %v3095_v47  ;;  %141 = vrot.lane.b32.xlu1 %v139_v13, %s5838_s28 }
 0x2ce   :  { %3184 = vrot.lane.b32.xlu0 %v5251_v15, %s5835_s22 }
 0x2d0   :  { %v2035_v16 = vpop.permute.xlu0 %2034  ;;  %v5252_v14 = vld [vmem:[%s14007_s15 + $0x304] sm:$0xff] }
 0x2d1   :  { %4611 = vst.msk [vmem:[%s14006_s14 + $0xc4] sm:$0xff] %vm255_vm15, %v2035_v16  ;;  %177 = vrot.lane.b32.xlu1 %v175_v17, %s5845_s0 }
 0x2d2   :  { %3188 = vrot.lane.b32.xlu0 %v5253_v18, %s5835_s22 }
 0x2d4   :  { %v2039_v19 = vpop.permute.xlu0 %2038  ;;  %v5254_v30 = vld [vmem:[%s14007_s15 + $0x334] sm:$0xff] }
 0x2d5   :  { %4613 = vst.msk [vmem:[%s14006_s14 + $0xf4] sm:$0xff] %vm255_vm15, %v2039_v19  ;;  %286 = vrot.lane.b32.xlu1 %v279_v20, %s5846_s25 }
 0x2d6   :  { %2128 = vrot.lane.b32.xlu0 %v4626_v21, %s5844_s24 }
 0x2d8   :  { %v2043_v22 = vpop.permute.xlu0 %2042  ;;  %v4627_v32 = vld [vmem:[%s14006_s14 + $0xc4] sm:$0xff] }
 0x2d9   :  { %4615 = vst.msk [vmem:[%s14006_s14 + $0x124] sm:$0xff] %vm255_vm15, %v2043_v22  ;;  %451 = vrot.lane.b32.xlu1 %v444_v23, %s5838_s28 }
 0x2da   :  { %2132 = vrot.lane.b32.xlu0 %v4628_v24, %s5844_s24 }
 0x2dc   :  { %v2051_v25 = vpop.permute.xlu0 %2050  ;;  %v4629_v34 = vld [vmem:[%s14006_s14 + $0xf4] sm:$0xff] }
 0x2dd   :  { %4619 = vst.msk [vmem:[%s14006_s14 + $0x2bc] sm:$0xff] %vm255_vm15, %v2051_v25  ;;  %613 = vrot.lane.b32.xlu1 %v606_v26, %s5845_s0 }
 0x2de   :  { %2136 = vrot.lane.b32.xlu0 %v4630_v27, %s5844_s24 }
 0x2e0   :  { %v2055_v28 = vpop.permute.xlu0 %2054  ;;  %v4631_v36 = vld [vmem:[%s14006_s14 + $0x124] sm:$0xff] }
 0x2e1   :  { %4621 = vst.msk [vmem:[%s14006_s14 + $0x2ec] sm:$0xff] %vm255_vm15, %v2055_v28  ;;  %1179 = vrot.lane.b32.xlu1 %v4043_v48, %s5846_s25 }
 0x2e2   :  { %2144 = vrot.lane.b32.xlu0 %v4634_v49, %s5844_s24 }
 0x2e4   :  { %v2059_v50 = vpop.permute.xlu0 %2058  ;;  %v4635_v38 = vld [vmem:[%s14006_s14 + $0x2bc] sm:$0xff] }
 0x2e5   :  { %4623 = vst.msk [vmem:[%s14006_s14 + $0x31c] sm:$0xff] %vm255_vm15, %v2059_v50  ;;  %1183 = vrot.lane.b32.xlu1 %v4045_v51, %s5846_s25 }
 0x2e6   :  { %2148 = vrot.lane.b32.xlu0 %v4636_v52, %s5844_s24 }
 0x2e8   :  { %v2127_v53 = vpop.permute.xlu0 %2126  ;;  %v4637_v40 = vld [vmem:[%s14006_s14 + $0x2ec] sm:$0xff] }
 0x2e9   :  { %4641 = vst.msk [vmem:[%s14006_s14 + $0x94] sm:$0xff] %vm1130_vm2, %v2127_v53  ;;  %1187 = vrot.lane.b32.xlu1 %v4047_v54, %s5846_s25 }
 0x2ea   :  { %2152 = vrot.lane.b32.xlu0 %v4638_v55, %s5844_s24 }
 0x2ec   :  { %v2143_v56 = vpop.permute.xlu0 %2142  ;;  %v4639_v42 = vld [vmem:[%s14006_s14 + $0x31c] sm:$0xff] }
 0x2ed   :  { %4649 = vst.msk [vmem:[%s14006_s14 + $0x28c] sm:$0xff] %vm1130_vm2, %v2143_v56  ;;  %1191 = vrot.lane.b32.xlu1 %v4049_v57, %s5846_s25 }
 0x2ee   :  { %2236 = vrot.lane.b32.xlu0 %v4664_v58, %s5838_s28 }
 0x2f0   :  { %v3161_v59 = vpop.permute.xlu0 %3160  ;;  %v4657_v44 = vld [vmem:[%s14006_s14 + $0x94] sm:$0xff] }
 0x2f1   :  { %5255 = vst.msk [vmem:[%s14007_s15 + $0x94] sm:$0xff] %vm1130_vm2, %v3161_v59  ;;  %1195 = vrot.lane.b32.xlu1 %v4051_v60, %s5846_s25 }
 0x2f2   :  { %2252 = vrot.lane.b32.xlu0 %v4672_v61, %s5838_s28 }
 0x2f4   :  { %v3165_v62 = vpop.permute.xlu0 %3164  ;;  %v4665_v46 = vld [vmem:[%s14006_s14 + $0x28c] sm:$0xff] }
 0x2f5   :  { %5257 = vst.msk [vmem:[%s14007_s15 + $0xc4] sm:$0xff] %vm1130_vm2, %v3165_v62  ;;  %1199 = vrot.lane.b32.xlu1 %v4053_v63, %s5846_s25 }
 0x2f6   :  { %3258 = vrot.lane.b32.xlu0 %v5272_v0, %s5835_s22 }
 0x2f8   :  { %v3169_v1 = vpop.permute.xlu0 %3168  ;;  %v5271_v13 = vld [vmem:[%s14007_s15 + $0x94] sm:$0xff] }
 0x2f9   :  { %5259 = vst.msk [vmem:[%s14007_s15 + $0xf4] sm:$0xff] %vm1130_vm2, %v3169_v1  ;;  %1203 = vrot.lane.b32.xlu1 %v4055_v2, %s5846_s25 }
 0x2fa   :  { %3262 = vrot.lane.b32.xlu0 %v5274_v3, %s5835_s22 }
 0x2fb   :  { %v3171_v4 = vpop.permute.xlu1 %3170 }
 0x2fc   :  { %5260 = vst.msk [vmem:[%s14007_s15 + $0x10c] sm:$0xff] %vm1130_vm2, %v3171_v4  ;;  %v3173_v5 = vpop.permute.xlu0 %3172  ;;  %v5273_v16 = vld [vmem:[%s14007_s15 + $0xc4] sm:$0xff] }
 0x2fd   :  { %5261 = vst.msk [vmem:[%s14007_s15 + $0x124] sm:$0xff] %vm1130_vm2, %v3173_v5  ;;  %1207 = vrot.lane.b32.xlu1 %v4057_v6, %s5846_s25 }
 0x300   :  { %v285_v7 = vpop.permute.xlu0 %284  ;;  %v5275_v19 = vld [vmem:[%s14007_s15 + $0xf4] sm:$0xff] }
 0x301   :  { %294 = vst.msk [vmem:[%s14001_s9 + $0x4] sm:$0xff] %vm293_vm4, %v285_v7  ;;  %3178 = vrot.lane.b32.xlu1 %v5248_v8, %s5835_s22 }
 0x303   :  { %v5276_v9 = vld [vmem:[%s14007_s15 + $0x10c] sm:$0xff] }
 0x304   :  { %3266 = vrot.lane.b32.xlu0 %v5276_v9, %s5835_s22  ;;  %v289_v10 = vpop.permute.xlu0 %288  ;;  %v5277_v22 = vld [vmem:[%s14007_s15 + $0x124] sm:$0xff] }
 0x305   :  { %296 = vst.msk [vmem:[%s14001_s9 + $0x34] sm:$0xff] %vm293_vm4, %v289_v10  ;;  %3182 = vrot.lane.b32.xlu1 %v5250_v11, %s5835_s22 }
 0x308   :  { %v450_v12 = vpop.permute.xlu0 %449  ;;  %v297_v57 = vld [vmem:[%s14001_s9 + $0x4] sm:$0xff] }
 0x309   :  { %458 = vst.msk [vmem:[%s14002_s10 + $0x4] sm:$0xff] %vm293_vm4, %v450_v12  ;;  %3186 = vrot.lane.b32.xlu1 %v5252_v14, %s5835_s22 }
 0x30c   :  { %v454_v29 = vpop.permute.xlu0 %453  ;;  %v299_v60 = vld [vmem:[%s14001_s9 + $0x34] sm:$0xff] }
 0x30d   :  { %460 = vst.msk [vmem:[%s14002_s10 + $0x34] sm:$0xff] %vm293_vm4, %v454_v29  ;;  %3190 = vrot.lane.b32.xlu1 %v5254_v30, %s5835_s22 }
 0x310   :  { %v612_v31 = vpop.permute.xlu0 %611  ;;  %v461_v63 = vld [vmem:[%s14002_s10 + $0x4] sm:$0xff] }
 0x311   :  { %620 = vst.msk [vmem:[%s14003_s11 + $0x4] sm:$0xff] %vm293_vm4, %v612_v31  ;;  %2130 = vrot.lane.b32.xlu1 %v4627_v32, %s5844_s24 }
 0x314   :  { %v616_v33 = vpop.permute.xlu0 %615  ;;  %v463_v2 = vld [vmem:[%s14002_s10 + $0x34] sm:$0xff] }
 0x315   :  { %622 = vst.msk [vmem:[%s14003_s11 + $0x34] sm:$0xff] %vm293_vm4, %v616_v33  ;;  %2134 = vrot.lane.b32.xlu1 %v4629_v34, %s5844_s24 }
 0x318   :  { %v1182_v35 = vpop.permute.xlu0 %1181  ;;  %v623_v5 = vld [vmem:[%s14003_s11 + $0x4] sm:$0xff] }
 0x319   :  { %4060 = vst.msk [vmem:[%s14005_s13 + $0xac] sm:$0xff] %vm1227_vm5, %v1182_v35  ;;  %2138 = vrot.lane.b32.xlu1 %v4631_v36, %s5844_s24 }
 0x31c   :  { %v1186_v37 = vpop.permute.xlu0 %1185  ;;  %v625_v8 = vld [vmem:[%s14003_s11 + $0x34] sm:$0xff] }
 0x31d   :  { %4062 = vst.msk [vmem:[%s14005_s13 + $0xdc] sm:$0xff] %vm1227_vm5, %v1186_v37  ;;  %2146 = vrot.lane.b32.xlu1 %v4635_v38, %s5844_s24 }
 0x320   :  { %v1190_v39 = vpop.permute.xlu0 %1189 }
 0x321   :  { %4064 = vst.msk [vmem:[%s14005_s13 + $0x10c] sm:$0xff] %vm1227_vm5, %v1190_v39  ;;  %2150 = vrot.lane.b32.xlu1 %v4637_v40, %s5844_s24 }
 0x324   :  { %v1194_v41 = vpop.permute.xlu0 %1193 }
 0x325   :  { %4066 = vst.msk [vmem:[%s14005_s13 + $0x13c] sm:$0xff] %vm1227_vm5, %v1194_v41  ;;  %2154 = vrot.lane.b32.xlu1 %v4639_v42, %s5844_s24 }
 0x328   :  { %v1198_v43 = vpop.permute.xlu0 %1197 }
 0x329   :  { %4068 = vst.msk [vmem:[%s14005_s13 + $0x2a4] sm:$0xff] %vm1227_vm5, %v1198_v43  ;;  %2222 = vrot.lane.b32.xlu1 %v4657_v44, %s5838_s28 }
 0x32c   :  { %v1202_v45 = vpop.permute.xlu0 %1201 }
 0x32d   :  { %4070 = vst.msk [vmem:[%s14005_s13 + $0x2d4] sm:$0xff] %vm1227_vm5, %v1202_v45  ;;  %2238 = vrot.lane.b32.xlu1 %v4665_v46, %s5838_s28 }
 0x330   :  { %v1206_v47 = vpop.permute.xlu0 %1205 }
 0x331   :  { %4072 = vst.msk [vmem:[%s14005_s13 + $0x304] sm:$0xff] %vm1227_vm5, %v1206_v47  ;;  %3256 = vrot.lane.b32.xlu1 %v5271_v13, %s5835_s22 }
 0x334   :  { %v1210_v15 = vpop.permute.xlu0 %1209 }
 0x335   :  { %4074 = vst.msk [vmem:[%s14005_s13 + $0x334] sm:$0xff] %vm1227_vm5, %v1210_v15  ;;  %3260 = vrot.lane.b32.xlu1 %v5273_v16, %s5835_s22 }
 0x337   :  { %v3175_v17 = vpop.permute.xlu1 %3174 }
 0x338   :  { %5262 = vst.msk [vmem:[%s14007_s15 + $0x13c] sm:$0xff] %vm1130_vm2, %v3175_v17  ;;  %v3177_v18 = vpop.permute.xlu0 %3176 }
 0x339   :  { %5263 = vst.msk [vmem:[%s14007_s15 + $0x28c] sm:$0xff] %vm1130_vm2, %v3177_v18  ;;  %3264 = vrot.lane.b32.xlu1 %v5275_v19, %s5835_s22 }
 0x33b   :  { %v104_v20 = vpop.permute.xlu1 %103 }
 0x33c   :  { %107 = vst.msk [vmem:[%s13997_s5] sm:$0x7] %vm106_vm6, %v104_v20  ;;  %v3181_v21 = vpop.permute.xlu0 %3180 }
 0x33d   :  { %5265 = vst.msk [vmem:[%s14007_s15 + $0x2bc] sm:$0xff] %vm1130_vm2, %v3181_v21  ;;  %3268 = vrot.lane.b32.xlu1 %v5277_v22, %s5835_s22 }
 0x33f   :  { %v142_v23 = vpop.permute.xlu1 %141  ;;  %v5278_v24 = vld [vmem:[%s14007_s15 + $0x13c] sm:$0xff] }
 0x340   :  { %144 = vst.msk [vmem:[%s13998_s6] sm:$0x7] %vm106_vm6, %v142_v23  ;;  %3270 = vrot.lane.b32.xlu0 %v5278_v24, %s5835_s22  ;;  %v3185_v25 = vpop.permute.xlu0 %3184  ;;  %v5279_v26 = vld [vmem:[%s14007_s15 + $0x28c] sm:$0xff] }
 0x341   :  { %5267 = vst.msk [vmem:[%s14007_s15 + $0x2ec] sm:$0xff] %vm1130_vm2, %v3185_v25  ;;  %3272 = vrot.lane.b32.xlu1 %v5279_v26, %s5835_s22 }
 0x343   :  { %v178_v27 = vpop.permute.xlu1 %177  ;;  %v108_v47 = vld [vmem:[%s13997_s5] sm:$0x7] }
 0x344   :  { %180 = vst.msk [vmem:[%s13999_s7] sm:$0x7] %vm106_vm6, %v178_v27  ;;  %v3189_v28 = vpop.permute.xlu0 %3188  ;;  %v5281_v48 = vld [vmem:[%s14007_s15 + $0x2bc] sm:$0xff] }
 0x345   :  { %5269 = vst.msk [vmem:[%s14007_s15 + $0x31c] sm:$0xff] %vm1130_vm2, %v3189_v28  ;;  %3276 = vrot.lane.b32.xlu1 %v5281_v48, %s5835_s22 }
 0x347   :  { %v287_v49 = vpop.permute.xlu1 %286  ;;  %v145_v16 = vld [vmem:[%s13998_s6] sm:$0x7] }
 0x348   :  { %295 = vst.msk [vmem:[%s14001_s9 + $0x1c] sm:$0xff] %vm293_vm4, %v287_v49  ;;  %v2129_v50 = vpop.permute.xlu0 %2128  ;;  %v5283_v51 = vld [vmem:[%s14007_s15 + $0x2ec] sm:$0xff] }
 0x349   :  { %4642 = vst.msk [vmem:[%s14006_s14 + $0xac] sm:$0xff] %vm1130_vm2, %v2129_v50  ;;  %3280 = vrot.lane.b32.xlu1 %v5283_v51, %s5835_s22  ;;  %v4076_v50 = vld [vmem:[%s14005_s13 + $0xac] sm:$0xff] }
 0x34b   :  { %v452_v52 = vpop.permute.xlu1 %451  ;;  %v181_v19 = vld [vmem:[%s13999_s7] sm:$0x7] }
 0x34c   :  { %459 = vst.msk [vmem:[%s14002_s10 + $0x1c] sm:$0xff] %vm293_vm4, %v452_v52  ;;  %v2133_v53 = vpop.permute.xlu0 %2132  ;;  %v5285_v54 = vld [vmem:[%s14007_s15 + $0x31c] sm:$0xff] }
 0x34d   :  { %4644 = vst.msk [vmem:[%s14006_s14 + $0xdc] sm:$0xff] %vm1130_vm2, %v2133_v53  ;;  %3284 = vrot.lane.b32.xlu1 %v5285_v54, %s5835_s22  ;;  %v4078_v53 = vld [vmem:[%s14005_s13 + $0xdc] sm:$0xff] }
 0x34f   :  { %v614_v55 = vpop.permute.xlu1 %613  ;;  %v298_v22 = vld [vmem:[%s14001_s9 + $0x1c] sm:$0xff] }
 0x350   :  { %621 = vst.msk [vmem:[%s14003_s11 + $0x1c] sm:$0xff] %vm293_vm4, %v614_v55  ;;  %v2137_v56 = vpop.permute.xlu0 %2136  ;;  %v4658_v39 = vld [vmem:[%s14006_s14 + $0xac] sm:$0xff] }
 0x351   :  { %4646 = vst.msk [vmem:[%s14006_s14 + $0x10c] sm:$0xff] %vm1130_vm2, %v2137_v56  ;;  %303 = vrot.lane.b32.xlu1 %v297_v57, %s5847_s29  ;;  %v4080_v56 = vld [vmem:[%s14005_s13 + $0x10c] sm:$0xff] }
 0x353   :  { %v1180_v58 = vpop.permute.xlu1 %1179  ;;  %v462_v25 = vld [vmem:[%s14002_s10 + $0x1c] sm:$0xff] }
 0x354   :  { %4059 = vst.msk [vmem:[%s14005_s13 + $0x94] sm:$0xff] %vm1227_vm5, %v1180_v58  ;;  %v2145_v59 = vpop.permute.xlu0 %2144  ;;  %v4660_v42 = vld [vmem:[%s14006_s14 + $0xdc] sm:$0xff] }
 0x355   :  { %4650 = vst.msk [vmem:[%s14006_s14 + $0x2a4] sm:$0xff] %vm1130_vm2, %v2145_v59  ;;  %307 = vrot.lane.b32.xlu1 %v299_v60, %s5847_s29  ;;  %v4082_v59 = vld [vmem:[%s14005_s13 + $0x13c] sm:$0xff] }
 0x357   :  { %v1184_v61 = vpop.permute.xlu1 %1183  ;;  %v624_v28 = vld [vmem:[%s14003_s11 + $0x1c] sm:$0xff] }
 0x358   :  { %4061 = vst.msk [vmem:[%s14005_s13 + $0xc4] sm:$0xff] %vm1227_vm5, %v1184_v61  ;;  %v2149_v62 = vpop.permute.xlu0 %2148  ;;  %v4662_v45 = vld [vmem:[%s14006_s14 + $0x10c] sm:$0xff] }
 0x359   :  { %4652 = vst.msk [vmem:[%s14006_s14 + $0x2d4] sm:$0xff] %vm1130_vm2, %v2149_v62  ;;  %467 = vrot.lane.b32.xlu1 %v461_v63, %s5848_s1  ;;  %v4084_v62 = vld [vmem:[%s14005_s13 + $0x2a4] sm:$0xff] }
 0x35b   :  { %v1188_v0 = vpop.permute.xlu1 %1187  ;;  %v4075_v11 = vld [vmem:[%s14005_s13 + $0x94] sm:$0xff] }
 0x35c   :  { %4063 = vst.msk [vmem:[%s14005_s13 + $0xf4] sm:$0xff] %vm1227_vm5, %v1188_v0  ;;  %v2153_v1 = vpop.permute.xlu0 %2152  ;;  %v4666_v13 = vld [vmem:[%s14006_s14 + $0x2a4] sm:$0xff] }
 0x35d   :  { %4654 = vst.msk [vmem:[%s14006_s14 + $0x304] sm:$0xff] %vm1130_vm2, %v2153_v1  ;;  %471 = vrot.lane.b32.xlu1 %v463_v2, %s5848_s1 }
 0x35f   :  { %v1192_v3 = vpop.permute.xlu1 %1191  ;;  %v4077_v29 = vld [vmem:[%s14005_s13 + $0xc4] sm:$0xff] }
 0x360   :  { %4065 = vst.msk [vmem:[%s14005_s13 + $0x124] sm:$0xff] %vm1227_vm5, %v1192_v3  ;;  %v2237_v4 = vpop.permute.xlu0 %2236  ;;  %v4668_v17 = vld [vmem:[%s14006_s14 + $0x2d4] sm:$0xff] }
 0x361   :  { %4680 = vst.msk [vmem:[%s14006_s14 + $0x13c] sm:$0xff] %vm1227_vm5, %v2237_v4  ;;  %629 = vrot.lane.b32.xlu1 %v623_v5, %s5845_s0 }
 0x363   :  { %v1196_v6 = vpop.permute.xlu1 %1195  ;;  %v4079_v31 = vld [vmem:[%s14005_s13 + $0xf4] sm:$0xff] }
 0x364   :  { %4067 = vst.msk [vmem:[%s14005_s13 + $0x28c] sm:$0xff] %vm1227_vm5, %v1196_v6  ;;  %v2253_v7 = vpop.permute.xlu0 %2252  ;;  %v4670_v20 = vld [vmem:[%s14006_s14 + $0x304] sm:$0xff] }
 0x365   :  { %4688 = vst.msk [vmem:[%s14006_s14 + $0x334] sm:$0xff] %vm1227_vm5, %v2253_v7  ;;  %633 = vrot.lane.b32.xlu1 %v625_v8, %s5845_s0 }
 0x367   :  { %v1200_v9 = vpop.permute.xlu1 %1199  ;;  %v4081_v33 = vld [vmem:[%s14005_s13 + $0x124] sm:$0xff] }
 0x368   :  { %4069 = vst.msk [vmem:[%s14005_s13 + $0x2bc] sm:$0xff] %vm1227_vm5, %v1200_v9  ;;  %v3259_v10 = vpop.permute.xlu0 %3258  ;;  %v4696_v51 = vld [vmem:[%s14006_s14 + $0x13c] sm:$0xff] }
 0x369   :  { %5288 = vst.msk [vmem:[%s14007_s15 + $0xac] sm:$0xff] %vm1227_vm5, %v3259_v10  ;;  %1276 = vrot.lane.b32.xlu1 %v4075_v11, %s5847_s29 }
 0x36b   :  { %v1204_v12 = vpop.permute.xlu1 %1203  ;;  %v4083_v36 = vld [vmem:[%s14005_s13 + $0x28c] sm:$0xff] }
 0x36c   :  { %4071 = vst.msk [vmem:[%s14005_s13 + $0x2ec] sm:$0xff] %vm1227_vm5, %v1204_v12  ;;  %v3263_v14 = vpop.permute.xlu0 %3262  ;;  %v4704_v54 = vld [vmem:[%s14006_s14 + $0x334] sm:$0xff] }
 0x36d   :  { %5290 = vst.msk [vmem:[%s14007_s15 + $0xdc] sm:$0xff] %vm1227_vm5, %v3263_v14  ;;  %1280 = vrot.lane.b32.xlu1 %v4077_v29, %s5847_s29 }
 0x36f   :  { %v1208_v30 = vpop.permute.xlu1 %1207  ;;  %v4085_v23 = vld [vmem:[%s14005_s13 + $0x2bc] sm:$0xff] }
 0x370   :  { %4073 = vst.msk [vmem:[%s14005_s13 + $0x31c] sm:$0xff] %vm1227_vm5, %v1208_v30  ;;  %v5304_v57 = vld [vmem:[%s14007_s15 + $0xac] sm:$0xff] }
 0x371   :  { %1284 = vrot.lane.b32.xlu1 %v4079_v31, %s5847_s29 }
 0x373   :  { %v3179_v32 = vpop.permute.xlu1 %3178  ;;  %v4087_v26 = vld [vmem:[%s14005_s13 + $0x2ec] sm:$0xff] }
 0x374   :  { %5264 = vst.msk [vmem:[%s14007_s15 + $0x2a4] sm:$0xff] %vm1130_vm2, %v3179_v32  ;;  %v5306_v60 = vld [vmem:[%s14007_s15 + $0xdc] sm:$0xff] }
 0x375   :  { %1288 = vrot.lane.b32.xlu1 %v4081_v33, %s5847_s29 }
 0x376   :  { %v3267_v34 = vpop.permute.xlu0 %3266 }
 0x377   :  { %5292 = vst.msk [vmem:[%s14007_s15 + $0x10c] sm:$0xff] %vm1227_vm5, %v3267_v34  ;;  %v3183_v35 = vpop.permute.xlu1 %3182  ;;  %v4089_v48 = vld [vmem:[%s14005_s13 + $0x31c] sm:$0xff] }
 0x378   :  { %5266 = vst.msk [vmem:[%s14007_s15 + $0x2d4] sm:$0xff] %vm1130_vm2, %v3183_v35 }
 0x379   :  { %1292 = vrot.lane.b32.xlu1 %v4083_v36, %s5847_s29 }
 0x37b   :  { %v3187_v37 = vpop.permute.xlu1 %3186  ;;  %v5280_v38 = vld [vmem:[%s14007_s15 + $0x2a4] sm:$0xff] }
 0x37c   :  { %5268 = vst.msk [vmem:[%s14007_s15 + $0x304] sm:$0xff] %vm1130_vm2, %v3187_v37  ;;  %3274 = vrot.lane.b32.xlu0 %v5280_v38, %s5835_s22 }
 0x37d   :  { %2224 = vrot.lane.b32.xlu1 %v4658_v39, %s5838_s28 }
 0x37e   :  { %v5308_v63 = vld [vmem:[%s14007_s15 + $0x10c] sm:$0xff] }
 0x37f   :  { %v3191_v40 = vpop.permute.xlu1 %3190  ;;  %v5282_v41 = vld [vmem:[%s14007_s15 + $0x2d4] sm:$0xff] }
 0x380   :  { %5270 = vst.msk [vmem:[%s14007_s15 + $0x334] sm:$0xff] %vm1130_vm2, %v3191_v40  ;;  %3278 = vrot.lane.b32.xlu0 %v5282_v41, %s5835_s22  ;;  %v4086_v40 = vld [vmem:[%s14005_s13 + $0x2d4] sm:$0xff] }
 0x381   :  { %2228 = vrot.lane.b32.xlu1 %v4660_v42, %s5838_s28 }
 0x383   :  { %v2131_v43 = vpop.permute.xlu1 %2130  ;;  %v5284_v44 = vld [vmem:[%s14007_s15 + $0x304] sm:$0xff] }
 0x384   :  { %4643 = vst.msk [vmem:[%s14006_s14 + $0xc4] sm:$0xff] %vm1130_vm2, %v2131_v43  ;;  %3282 = vrot.lane.b32.xlu0 %v5284_v44, %s5835_s22 }
 0x385   :  { %2232 = vrot.lane.b32.xlu1 %v4662_v45, %s5838_s28 }
 0x387   :  { %v2135_v46 = vpop.permute.xlu1 %2134  ;;  %v5286_v2 = vld [vmem:[%s14007_s15 + $0x334] sm:$0xff] }
 0x388   :  { %4645 = vst.msk [vmem:[%s14006_s14 + $0xf4] sm:$0xff] %vm1130_vm2, %v2135_v46  ;;  %110 = vrot.lane.b32.xlu0 %v108_v47, %s5847_s29 }
 0x389   :  { %2240 = vrot.lane.b32.xlu1 %v4666_v13, %s5838_s28 }
 0x38b   :  { %v2139_v15 = vpop.permute.xlu1 %2138  ;;  %v4659_v4 = vld [vmem:[%s14006_s14 + $0xc4] sm:$0xff] }
 0x38c   :  { %4647 = vst.msk [vmem:[%s14006_s14 + $0x124] sm:$0xff] %vm1130_vm2, %v2139_v15  ;;  %147 = vrot.lane.b32.xlu0 %v145_v16, %s5848_s1 }
 0x38d   :  { %2244 = vrot.lane.b32.xlu1 %v4668_v17, %s5838_s28  ;;  %v4088_v17 = vld [vmem:[%s14005_s13 + $0x304] sm:$0xff] }
 0x38f   :  { %v2147_v18 = vpop.permute.xlu1 %2146  ;;  %v4661_v7 = vld [vmem:[%s14006_s14 + $0xf4] sm:$0xff] }
 0x390   :  { %4651 = vst.msk [vmem:[%s14006_s14 + $0x2bc] sm:$0xff] %vm1130_vm2, %v2147_v18  ;;  %183 = vrot.lane.b32.xlu0 %v181_v19, %s5845_s0 }
 0x391   :  { %2248 = vrot.lane.b32.xlu1 %v4670_v20, %s5838_s28 }
 0x393   :  { %v2151_v21 = vpop.permute.xlu1 %2150  ;;  %v4663_v9 = vld [vmem:[%s14006_s14 + $0x124] sm:$0xff] }
 0x394   :  { %4653 = vst.msk [vmem:[%s14006_s14 + $0x2ec] sm:$0xff] %vm1130_vm2, %v2151_v21  ;;  %305 = vrot.lane.b32.xlu0 %v298_v22, %s5847_s29 }
 0x395   :  { %1296 = vrot.lane.b32.xlu1 %v4085_v23, %s5847_s29 }
 0x397   :  { %v2155_v24 = vpop.permute.xlu1 %2154  ;;  %v4667_v11 = vld [vmem:[%s14006_s14 + $0x2bc] sm:$0xff] }
 0x398   :  { %4655 = vst.msk [vmem:[%s14006_s14 + $0x31c] sm:$0xff] %vm1130_vm2, %v2155_v24  ;;  %469 = vrot.lane.b32.xlu0 %v462_v25, %s5848_s1 }
 0x399   :  { %1300 = vrot.lane.b32.xlu1 %v4087_v26, %s5847_s29 }
 0x39b   :  { %v2223_v27 = vpop.permute.xlu1 %2222  ;;  %v4669_v14 = vld [vmem:[%s14006_s14 + $0x2ec] sm:$0xff] }
 0x39c   :  { %4673 = vst.msk [vmem:[%s14006_s14 + $0x94] sm:$0xff] %vm1227_vm5, %v2223_v27  ;;  %631 = vrot.lane.b32.xlu0 %v624_v28, %s5845_s0 }
 0x39d   :  { %1304 = vrot.lane.b32.xlu1 %v4089_v48, %s5847_s29 }
 0x39f   :  { %v2239_v49 = vpop.permute.xlu1 %2238  ;;  %v4671_v29 = vld [vmem:[%s14006_s14 + $0x31c] sm:$0xff] }
 0x3a0   :  { %4681 = vst.msk [vmem:[%s14006_s14 + $0x28c] sm:$0xff] %vm1227_vm5, %v2239_v49  ;;  %1278 = vrot.lane.b32.xlu0 %v4076_v50, %s5847_s29 }
 0x3a1   :  { %2332 = vrot.lane.b32.xlu1 %v4696_v51, %s5848_s1 }
 0x3a3   :  { %v3257_v52 = vpop.permute.xlu1 %3256  ;;  %v4689_v28 = vld [vmem:[%s14006_s14 + $0x94] sm:$0xff] }
 0x3a4   :  { %5287 = vst.msk [vmem:[%s14007_s15 + $0x94] sm:$0xff] %vm1227_vm5, %v3257_v52  ;;  %1282 = vrot.lane.b32.xlu0 %v4078_v53, %s5847_s29 }
 0x3a5   :  { %2348 = vrot.lane.b32.xlu1 %v4704_v54, %s5848_s1 }
 0x3a7   :  { %v3261_v55 = vpop.permute.xlu1 %3260 }
 0x3a8   :  { %5289 = vst.msk [vmem:[%s14007_s15 + $0xc4] sm:$0xff] %vm1227_vm5, %v3261_v55  ;;  %1286 = vrot.lane.b32.xlu0 %v4080_v56, %s5847_s29 }
 0x3a9   :  { %3354 = vrot.lane.b32.xlu1 %v5304_v57, %s5835_s22 }
 0x3ab   :  { %v3265_v58 = vpop.permute.xlu1 %3264 }
 0x3ac   :  { %5291 = vst.msk [vmem:[%s14007_s15 + $0xf4] sm:$0xff] %vm1227_vm5, %v3265_v58  ;;  %1290 = vrot.lane.b32.xlu0 %v4082_v59, %s5847_s29  ;;  %v4697_v58 = vld [vmem:[%s14006_s14 + $0x28c] sm:$0xff] }
 0x3ad   :  { %3358 = vrot.lane.b32.xlu1 %v5306_v60, %s5835_s22 }
 0x3af   :  { %v3269_v61 = vpop.permute.xlu1 %3268 }
 0x3b0   :  { %5293 = vst.msk [vmem:[%s14007_s15 + $0x124] sm:$0xff] %vm1227_vm5, %v3269_v61  ;;  %1294 = vrot.lane.b32.xlu0 %v4084_v62, %s5847_s29 }
 0x3b1   :  { %3362 = vrot.lane.b32.xlu1 %v5308_v63, %s5835_s22 }
 0x3b2   :  { %v3271_v0 = vpop.permute.xlu0 %3270 }
 0x3b3   :  { %5294 = vst.msk [vmem:[%s14007_s15 + $0x13c] sm:$0xff] %vm1227_vm5, %v3271_v0  ;;  %v3273_v1 = vpop.permute.xlu1 %3272 }
 0x3b4   :  { %5295 = vst.msk [vmem:[%s14007_s15 + $0x28c] sm:$0xff] %vm1227_vm5, %v3273_v1  ;;  %3286 = vrot.lane.b32.xlu0 %v5286_v2, %s5835_s22 }
 0x3b7   :  { %v3277_v3 = vpop.permute.xlu1 %3276 }
 0x3b8   :  { %5297 = vst.msk [vmem:[%s14007_s15 + $0x2bc] sm:$0xff] %vm1227_vm5, %v3277_v3  ;;  %2226 = vrot.lane.b32.xlu0 %v4659_v4, %s5838_s28 }
 0x3ba   :  { %v5310_v5 = vld [vmem:[%s14007_s15 + $0x13c] sm:$0xff] }
 0x3bb   :  { %v3281_v6 = vpop.permute.xlu1 %3280  ;;  %3366 = vrot.lane.b32.xlu1 %v5310_v5, %s5835_s22  ;;  %v5303_v5 = vld [vmem:[%s14007_s15 + $0x94] sm:$0xff] }
 0x3bc   :  { %5299 = vst.msk [vmem:[%s14007_s15 + $0x2ec] sm:$0xff] %vm1227_vm5, %v3281_v6  ;;  %2230 = vrot.lane.b32.xlu0 %v4661_v7, %s5838_s28 }
 0x3bf   :  { %v3285_v8 = vpop.permute.xlu1 %3284 }
 0x3c0   :  { %5301 = vst.msk [vmem:[%s14007_s15 + $0x31c] sm:$0xff] %vm1227_vm5, %v3285_v8  ;;  %2234 = vrot.lane.b32.xlu0 %v4663_v9, %s5838_s28 }
 0x3c3   :  { %v304_v10 = vpop.permute.xlu1 %303 }
 0x3c4   :  { %313 = vst.msk [vmem:[%s14001_s9 + $0x4] sm:$0xff] %vm312_vm7, %v304_v10  ;;  %2242 = vrot.lane.b32.xlu0 %v4667_v11, %s5838_s28 }
 0x3c7   :  { %v308_v12 = vpop.permute.xlu1 %307 }
 0x3c8   :  { %315 = vst.msk [vmem:[%s14001_s9 + $0x34] sm:$0xff] %vm312_vm7, %v308_v12  ;;  %2246 = vrot.lane.b32.xlu0 %v4669_v14, %s5838_s28 }
 0x3cb   :  { %v316_v30 = vld [vmem:[%s14001_s9 + $0x8] sm:$0x1]  ;;  %v323_v31 = vld [vmem:[%s14001_s9 + $0x7] sm:$0x1]  ;;  %v329_v32 = vld [vmem:[%s14001_s9 + $0x6] sm:$0x1]  ;;  %v468_v33 = vpop.permute.xlu1 %467 }
 0x3cc   :  { %320 = vst.msk [vmem:[%s14001_s9] sm:$0x1] %vm319_vm8, %v316_v30  ;;  %326 = vst.msk [vmem:[%s14001_s9 + $0x1] sm:$0x1] %vm319_vm8, %v323_v31  ;;  %v335_v34 = vld [vmem:[%s14001_s9 + $0x5] sm:$0x1]  ;;  %2250 = vrot.lane.b32.xlu0 %v4671_v29, %s5838_s28 }
 0x3cd   :  { %332 = vst.msk [vmem:[%s14001_s9 + $0x2] sm:$0x1] %vm319_vm8, %v329_v32  ;;  %v341_v35 = vld [vmem:[%s14001_s9 + $0xa] sm:$0x1]  ;;  %v347_v36 = vld [vmem:[%s14001_s9 + $0x9] sm:$0x1] }
 0x3ce   :  { %476 = vst.msk [vmem:[%s14002_s10 + $0x4] sm:$0xff] %vm312_vm7, %v468_v33  ;;  %v353_v37 = vld [vmem:[%s14001_s9 + $0x8] sm:$0x1]  ;;  %v359_v38 = vld [vmem:[%s14001_s9 + $0x7] sm:$0x1] }
 0x3cf   :  { %338 = vst.msk [vmem:[%s14001_s9 + $0x3] sm:$0x1] %vm319_vm8, %v335_v34  ;;  %344 = vst.msk [vmem:[%s14001_s9 + $0xc] sm:$0x1] %vm319_vm8, %v341_v35  ;;  %v365_v39 = vld [vmem:[%s14001_s9 + $0x6] sm:$0x1]  ;;  %v472_v44 = vpop.permute.xlu1 %471 }
 0x3d0   :  { %350 = vst.msk [vmem:[%s14001_s9 + $0xd] sm:$0x1] %vm319_vm8, %v347_v36  ;;  %356 = vst.msk [vmem:[%s14001_s9 + $0xe] sm:$0x1] %vm319_vm8, %v353_v37  ;;  %v318_v41 = vld [vmem:[%s14001_s9 + $0x38] sm:$0x1]  ;;  %1298 = vrot.lane.b32.xlu0 %v4086_v40, %s5847_s29 }
 0x3d1   :  { %362 = vst.msk [vmem:[%s14001_s9 + $0xf] sm:$0x1] %vm319_vm8, %v359_v38  ;;  %368 = vst.msk [vmem:[%s14001_s9 + $0x10] sm:$0x1] %vm319_vm8, %v365_v39  ;;  %v325_v42 = vld [vmem:[%s14001_s9 + $0x37] sm:$0x1] }
 0x3d2   :  { %v331_v43 = vld [vmem:[%s14001_s9 + $0x36] sm:$0x1]  ;;  %322 = vst.msk [vmem:[%s14001_s9 + $0x30] sm:$0x1] %vm319_vm8, %v318_v41  ;;  %328 = vst.msk [vmem:[%s14001_s9 + $0x31] sm:$0x1] %vm319_vm8, %v325_v42 }
 0x3d3   :  { %334 = vst.msk [vmem:[%s14001_s9 + $0x32] sm:$0x1] %vm319_vm8, %v331_v43  ;;  %v337_v45 = vld [vmem:[%s14001_s9 + $0x35] sm:$0x1]  ;;  %v343_v46 = vld [vmem:[%s14001_s9 + $0x3a] sm:$0x1]  ;;  %v630_v21 = vpop.permute.xlu1 %629 }
 0x3d4   :  { %v349_v47 = vld [vmem:[%s14001_s9 + $0x39] sm:$0x1]  ;;  %478 = vst.msk [vmem:[%s14002_s10 + $0x34] sm:$0xff] %vm312_vm7, %v472_v44  ;;  %v355_v13 = vld [vmem:[%s14001_s9 + $0x38] sm:$0x1]  ;;  %638 = vst.msk [vmem:[%s14003_s11 + $0x4] sm:$0xff] %vm312_vm7, %v630_v21 }
 0x3d5   :  { %340 = vst.msk [vmem:[%s14001_s9 + $0x33] sm:$0x1] %vm319_vm8, %v337_v45  ;;  %346 = vst.msk [vmem:[%s14001_s9 + $0x3c] sm:$0x1] %vm319_vm8, %v343_v46  ;;  %v361_v15 = vld [vmem:[%s14001_s9 + $0x37] sm:$0x1]  ;;  %1302 = vrot.lane.b32.xlu0 %v4088_v17, %s5847_s29 }
 0x3d6   :  { %352 = vst.msk [vmem:[%s14001_s9 + $0x3d] sm:$0x1] %vm319_vm8, %v349_v47  ;;  %v367_v16 = vld [vmem:[%s14001_s9 + $0x36] sm:$0x1]  ;;  %358 = vst.msk [vmem:[%s14001_s9 + $0x3e] sm:$0x1] %vm319_vm8, %v355_v13 }
 0x3d7   :  { %364 = vst.msk [vmem:[%s14001_s9 + $0x3f] sm:$0x1] %vm319_vm8, %v361_v15  ;;  %370 = vst.msk [vmem:[%s14001_s9 + $0x40] sm:$0x1] %vm319_vm8, %v367_v16  ;;  %v479_v18 = vld [vmem:[%s14002_s10 + $0x4] sm:$0x1]  ;;  %v634_v51 = vpop.permute.xlu1 %633 }
 0x3d8   :  { %v485_v19 = vld [vmem:[%s14002_s10 + $0x4] sm:$0x1]  ;;  %482 = vst.msk [vmem:[%s14002_s10] sm:$0x1] %vm319_vm8, %v479_v18  ;;  %v503_v23 = vld [vmem:[%s14002_s10 + $0xb] sm:$0x1] }
 0x3d9   :  { %v491_v20 = vld [vmem:[%s14002_s10 + $0x4] sm:$0x1]  ;;  %488 = vst.msk [vmem:[%s14002_s10 + $0x1] sm:$0x1] %vm319_vm8, %v485_v19  ;;  %v509_v24 = vld [vmem:[%s14002_s10 + $0xb] sm:$0x1]  ;;  %2318 = vrot.lane.b32.xlu0 %v4689_v28, %s5848_s1 }
 0x3da   :  { %494 = vst.msk [vmem:[%s14002_s10 + $0x2] sm:$0x1] %vm319_vm8, %v491_v20  ;;  %v497_v22 = vld [vmem:[%s14002_s10 + $0x4] sm:$0x1]  ;;  %506 = vst.msk [vmem:[%s14002_s10 + $0xc] sm:$0x1] %vm319_vm8, %v503_v23 }
 0x3db   :  { %500 = vst.msk [vmem:[%s14002_s10 + $0x3] sm:$0x1] %vm319_vm8, %v497_v22  ;;  %512 = vst.msk [vmem:[%s14002_s10 + $0xd] sm:$0x1] %vm319_vm8, %v509_v24  ;;  %v515_v25 = vld [vmem:[%s14002_s10 + $0xb] sm:$0x1]  ;;  %v1277_v62 = vpop.permute.xlu1 %1276 }
 0x3dc   :  { %v521_v26 = vld [vmem:[%s14002_s10 + $0xb] sm:$0x1]  ;;  %518 = vst.msk [vmem:[%s14002_s10 + $0xe] sm:$0x1] %vm319_vm8, %v515_v25  ;;  %v481_v48 = vld [vmem:[%s14002_s10 + $0x34] sm:$0x1] }
 0x3dd   :  { %v527_v27 = vld [vmem:[%s14002_s10 + $0xb] sm:$0x1]  ;;  %524 = vst.msk [vmem:[%s14002_s10 + $0xf] sm:$0x1] %vm319_vm8, %v521_v26  ;;  %v487_v49 = vld [vmem:[%s14002_s10 + $0x34] sm:$0x1]  ;;  %2334 = vrot.lane.b32.xlu0 %v4697_v58, %s5848_s1 }
 0x3de   :  { %530 = vst.msk [vmem:[%s14002_s10 + $0x10] sm:$0x1] %vm319_vm8, %v527_v27  ;;  %v493_v50 = vld [vmem:[%s14002_s10 + $0x34] sm:$0x1]  ;;  %484 = vst.msk [vmem:[%s14002_s10 + $0x30] sm:$0x1] %vm319_vm8, %v481_v48 }
 0x3df   :  { %490 = vst.msk [vmem:[%s14002_s10 + $0x31] sm:$0x1] %vm319_vm8, %v487_v49  ;;  %496 = vst.msk [vmem:[%s14002_s10 + $0x32] sm:$0x1] %vm319_vm8, %v493_v50  ;;  %v499_v52 = vld [vmem:[%s14002_s10 + $0x34] sm:$0x1]  ;;  %v1281_v9 = vpop.permute.xlu1 %1280 }
 0x3e0   :  { %v505_v53 = vld [vmem:[%s14002_s10 + $0x3b] sm:$0x1]  ;;  %640 = vst.msk [vmem:[%s14003_s11 + $0x34] sm:$0xff] %vm312_vm7, %v634_v51  ;;  %v641_v59 = vld [vmem:[%s14003_s11 + $0x8] sm:$0x1]  ;;  %v5311_v49 = vld [vmem:[%s14007_s15 + $0x28c] sm:$0xff] }
 0x3e1   :  { %v511_v54 = vld [vmem:[%s14002_s10 + $0x3b] sm:$0x1]  ;;  %502 = vst.msk [vmem:[%s14002_s10 + $0x33] sm:$0x1] %vm319_vm8, %v499_v52  ;;  %508 = vst.msk [vmem:[%s14002_s10 + $0x3c] sm:$0x1] %vm319_vm8, %v505_v53  ;;  %3352 = vrot.lane.b32.xlu0 %v5303_v5, %s5835_s22 }
 0x3e2   :  { %514 = vst.msk [vmem:[%s14002_s10 + $0x3d] sm:$0x1] %vm319_vm8, %v511_v54  ;;  %v517_v55 = vld [vmem:[%s14002_s10 + $0x3b] sm:$0x1]  ;;  %v647_v60 = vld [vmem:[%s14003_s11 + $0x9] sm:$0x1] }
 0x3e3   :  { %v523_v56 = vld [vmem:[%s14002_s10 + $0x3b] sm:$0x1]  ;;  %520 = vst.msk [vmem:[%s14002_s10 + $0x3e] sm:$0x1] %vm319_vm8, %v517_v55  ;;  %v653_v61 = vld [vmem:[%s14003_s11 + $0xa] sm:$0x1]  ;;  %v1285_v35 = vpop.permute.xlu1 %1284 }
 0x3e4   :  { %v529_v57 = vld [vmem:[%s14002_s10 + $0x3b] sm:$0x1]  ;;  %526 = vst.msk [vmem:[%s14002_s10 + $0x3f] sm:$0x1] %vm319_vm8, %v523_v56  ;;  %644 = vst.msk [vmem:[%s14003_s11] sm:$0x1] %vm319_vm8, %v641_v59 }
 0x3e5   :  { %532 = vst.msk [vmem:[%s14002_s10 + $0x40] sm:$0x1] %vm319_vm8, %v529_v57  ;;  %650 = vst.msk [vmem:[%s14003_s11 + $0x1] sm:$0x1] %vm319_vm8, %v647_v60  ;;  %v659_v63 = vld [vmem:[%s14003_s11 + $0xb] sm:$0x1] }
 0x3e6   :  { %656 = vst.msk [vmem:[%s14003_s11 + $0x2] sm:$0x1] %vm319_vm8, %v653_v61  ;;  %v665_v0 = vld [vmem:[%s14003_s11 + $0x4] sm:$0x1]  ;;  %v671_v1 = vld [vmem:[%s14003_s11 + $0x5] sm:$0x1] }
 0x3e7   :  { %4091 = vst.msk [vmem:[%s14005_s13 + $0x94] sm:$0xff] %vm1324_vm9, %v1277_v62  ;;  %v677_v2 = vld [vmem:[%s14003_s11 + $0x6] sm:$0x1]  ;;  %v683_v3 = vld [vmem:[%s14003_s11 + $0x7] sm:$0x1]  ;;  %4093 = vst.msk [vmem:[%s14005_s13 + $0xc4] sm:$0xff] %vm1324_vm9, %v1281_v9  ;;  %v1289_v46 = vpop.permute.xlu1 %1288 }
 0x3e8   :  { %662 = vst.msk [vmem:[%s14003_s11 + $0x3] sm:$0x1] %vm319_vm8, %v659_v63  ;;  %668 = vst.msk [vmem:[%s14003_s11 + $0xc] sm:$0x1] %vm319_vm8, %v665_v0  ;;  %v689_v4 = vld [vmem:[%s14003_s11 + $0x8] sm:$0x1] }
 0x3e9   :  { %674 = vst.msk [vmem:[%s14003_s11 + $0xd] sm:$0x1] %vm319_vm8, %v671_v1  ;;  %680 = vst.msk [vmem:[%s14003_s11 + $0xe] sm:$0x1] %vm319_vm8, %v677_v2  ;;  %v643_v6 = vld [vmem:[%s14003_s11 + $0x38] sm:$0x1] }
 0x3ea   :  { %686 = vst.msk [vmem:[%s14003_s11 + $0xf] sm:$0x1] %vm319_vm8, %v683_v3  ;;  %692 = vst.msk [vmem:[%s14003_s11 + $0x10] sm:$0x1] %vm319_vm8, %v689_v4  ;;  %v649_v7 = vld [vmem:[%s14003_s11 + $0x39] sm:$0x1] }
 0x3eb   :  { %v655_v8 = vld [vmem:[%s14003_s11 + $0x3a] sm:$0x1]  ;;  %646 = vst.msk [vmem:[%s14003_s11 + $0x30] sm:$0x1] %vm319_vm8, %v643_v6  ;;  %652 = vst.msk [vmem:[%s14003_s11 + $0x31] sm:$0x1] %vm319_vm8, %v649_v7  ;;  %v1293_v23 = vpop.permute.xlu1 %1292 }
 0x3ec   :  { %658 = vst.msk [vmem:[%s14003_s11 + $0x32] sm:$0x1] %vm319_vm8, %v655_v8  ;;  %v661_v10 = vld [vmem:[%s14003_s11 + $0x3b] sm:$0x1]  ;;  %v667_v11 = vld [vmem:[%s14003_s11 + $0x34] sm:$0x1] }
 0x3ed   :  { %v673_v12 = vld [vmem:[%s14003_s11 + $0x35] sm:$0x1]  ;;  %664 = vst.msk [vmem:[%s14003_s11 + $0x33] sm:$0x1] %vm319_vm8, %v661_v10  ;;  %670 = vst.msk [vmem:[%s14003_s11 + $0x3c] sm:$0x1] %vm319_vm8, %v667_v11 }
 0x3ee   :  { %676 = vst.msk [vmem:[%s14003_s11 + $0x3d] sm:$0x1] %vm319_vm8, %v673_v12  ;;  %v679_v14 = vld [vmem:[%s14003_s11 + $0x36] sm:$0x1]  ;;  %v685_v29 = vld [vmem:[%s14003_s11 + $0x37] sm:$0x1]  ;;  %v3275_v53 = vpop.permute.xlu0 %3274 }
 0x3ef   :  { %v691_v30 = vld [vmem:[%s14003_s11 + $0x38] sm:$0x1]  ;;  %682 = vst.msk [vmem:[%s14003_s11 + $0x3e] sm:$0x1] %vm319_vm8, %v679_v14  ;;  %688 = vst.msk [vmem:[%s14003_s11 + $0x3f] sm:$0x1] %vm319_vm8, %v685_v29  ;;  %v2225_v57 = vpop.permute.xlu1 %2224 }
 0x3f0   :  { %694 = vst.msk [vmem:[%s14003_s11 + $0x40] sm:$0x1] %vm319_vm8, %v691_v30  ;;  %v5305_v31 = vld [vmem:[%s14007_s15 + $0xc4] sm:$0xff]  ;;  %v4107_v32 = vld [vmem:[%s14005_s13 + $0x98] sm:$0x1]  ;;  %v5313_v0 = vld [vmem:[%s14007_s15 + $0x2bc] sm:$0xff] }
 0x3f1   :  { %v4139_v33 = vld [vmem:[%s14005_s13 + $0x97] sm:$0x1]  ;;  %v4171_v34 = vld [vmem:[%s14005_s13 + $0x96] sm:$0x1]  ;;  %4123 = vst.msk [vmem:[%s14005_s13 + $0x90] sm:$0x1] %vm1357_vm10, %v4107_v32  ;;  %3356 = vrot.lane.b32.xlu0 %v5305_v31, %s5835_s22 }
 0x3f2   :  { %4155 = vst.msk [vmem:[%s14005_s13 + $0x91] sm:$0x1] %vm1357_vm10, %v4139_v33  ;;  %4187 = vst.msk [vmem:[%s14005_s13 + $0x92] sm:$0x1] %vm1357_vm10, %v4171_v34  ;;  %v4203_v36 = vld [vmem:[%s14005_s13 + $0x95] sm:$0x1]  ;;  %v3279_v4 = vpop.permute.xlu0 %3278 }
 0x3f3   :  { %v4235_v37 = vld [vmem:[%s14005_s13 + $0x9a] sm:$0x1]  ;;  %v4267_v38 = vld [vmem:[%s14005_s13 + $0x99] sm:$0x1]  ;;  %4095 = vst.msk [vmem:[%s14005_s13 + $0xf4] sm:$0xff] %vm1324_vm9, %v1285_v35  ;;  %4097 = vst.msk [vmem:[%s14005_s13 + $0x124] sm:$0xff] %vm1324_vm9, %v1289_v46  ;;  %v2229_v8 = vpop.permute.xlu1 %2228 }
 0x3f4   :  { %4219 = vst.msk [vmem:[%s14005_s13 + $0x93] sm:$0x1] %vm1357_vm10, %v4203_v36  ;;  %4251 = vst.msk [vmem:[%s14005_s13 + $0x9c] sm:$0x1] %vm1357_vm10, %v4235_v37  ;;  %v4299_v39 = vld [vmem:[%s14005_s13 + $0x98] sm:$0x1] }
 0x3f5   :  { %4283 = vst.msk [vmem:[%s14005_s13 + $0x9d] sm:$0x1] %vm1357_vm10, %v4267_v38  ;;  %v4331_v40 = vld [vmem:[%s14005_s13 + $0x97] sm:$0x1]  ;;  %v4363_v41 = vld [vmem:[%s14005_s13 + $0x96] sm:$0x1] }
 0x3f6   :  { %4315 = vst.msk [vmem:[%s14005_s13 + $0x9e] sm:$0x1] %vm1357_vm10, %v4299_v39  ;;  %4347 = vst.msk [vmem:[%s14005_s13 + $0x9f] sm:$0x1] %vm1357_vm10, %v4331_v40  ;;  %v5307_v42 = vld [vmem:[%s14007_s15 + $0xf4] sm:$0xff]  ;;  %v5309_v19 = vld [vmem:[%s14007_s15 + $0x124] sm:$0xff]  ;;  %v3283_v34 = vpop.permute.xlu0 %3282 }
 0x3f7   :  { %4379 = vst.msk [vmem:[%s14005_s13 + $0xa0] sm:$0x1] %vm1357_vm10, %v4363_v41  ;;  %v4109_v43 = vld [vmem:[%s14005_s13 + $0xc8] sm:$0x1]  ;;  %v4141_v44 = vld [vmem:[%s14005_s13 + $0xc7] sm:$0x1]  ;;  %3360 = vrot.lane.b32.xlu0 %v5307_v42, %s5835_s22  ;;  %v2233_v37 = vpop.permute.xlu1 %2232 }
 0x3f8   :  { %v4173_v45 = vld [vmem:[%s14005_s13 + $0xc6] sm:$0x1]  ;;  %4125 = vst.msk [vmem:[%s14005_s13 + $0xc0] sm:$0x1] %vm1357_vm10, %v4109_v43  ;;  %4157 = vst.msk [vmem:[%s14005_s13 + $0xc1] sm:$0x1] %vm1357_vm10, %v4141_v44 }
 0x3f9   :  { %4189 = vst.msk [vmem:[%s14005_s13 + $0xc2] sm:$0x1] %vm1357_vm10, %v4173_v45  ;;  %v4205_v47 = vld [vmem:[%s14005_s13 + $0xc5] sm:$0x1]  ;;  %v4237_v13 = vld [vmem:[%s14005_s13 + $0xca] sm:$0x1] }
 0x3fa   :  { %v4269_v15 = vld [vmem:[%s14005_s13 + $0xc9] sm:$0x1]  ;;  %4221 = vst.msk [vmem:[%s14005_s13 + $0xc3] sm:$0x1] %vm1357_vm10, %v4205_v47  ;;  %4253 = vst.msk [vmem:[%s14005_s13 + $0xcc] sm:$0x1] %vm1357_vm10, %v4237_v13  ;;  %v111_v41 = vpop.permute.xlu0 %110 }
 0x3fb   :  { %4285 = vst.msk [vmem:[%s14005_s13 + $0xcd] sm:$0x1] %vm1357_vm10, %v4269_v15  ;;  %v4301_v16 = vld [vmem:[%s14005_s13 + $0xc8] sm:$0x1]  ;;  %v4333_v17 = vld [vmem:[%s14005_s13 + $0xc7] sm:$0x1]  ;;  %3364 = vrot.lane.b32.xlu0 %v5309_v19, %s5835_s22  ;;  %v2241_v45 = vpop.permute.xlu1 %2240 }
 0x3fc   :  { %v4365_v18 = vld [vmem:[%s14005_s13 + $0xc6] sm:$0x1]  ;;  %4317 = vst.msk [vmem:[%s14005_s13 + $0xce] sm:$0x1] %vm1357_vm10, %v4301_v16  ;;  %4349 = vst.msk [vmem:[%s14005_s13 + $0xcf] sm:$0x1] %vm1357_vm10, %v4333_v17 }
 0x3fd   :  { %4381 = vst.msk [vmem:[%s14005_s13 + $0xd0] sm:$0x1] %vm1357_vm10, %v4365_v18  ;;  %v4111_v20 = vld [vmem:[%s14005_s13 + $0xf8] sm:$0x1]  ;;  %v4143_v21 = vld [vmem:[%s14005_s13 + $0xf7] sm:$0x1] }
 0x3fe   :  { %v4175_v22 = vld [vmem:[%s14005_s13 + $0xf6] sm:$0x1]  ;;  %4127 = vst.msk [vmem:[%s14005_s13 + $0xf0] sm:$0x1] %vm1357_vm10, %v4111_v20  ;;  %4159 = vst.msk [vmem:[%s14005_s13 + $0xf1] sm:$0x1] %vm1357_vm10, %v4143_v21  ;;  %v148_v13 = vpop.permute.xlu0 %147 }
 0x3ff   :  { %v4533_v24 = vld [vmem:[%s14005_s13 + $0x90] sm:$0xff]  ;;  %4191 = vst.msk [vmem:[%s14005_s13 + $0xf2] sm:$0x1] %vm1357_vm10, %v4175_v22  ;;  %v4239_v26 = vld [vmem:[%s14005_s13 + $0xfa] sm:$0x1]  ;;  %3368 = vrot.lane.b32.xlu0 %v5311_v49, %s5835_s22  ;;  %v2245_v18 = vpop.permute.xlu1 %2244 }
 0x400   :  { %v4207_v25 = vld [vmem:[%s14005_s13 + $0xf5] sm:$0x1]  ;;  %4099 = vst.msk [vmem:[%s14005_s13 + $0x28c] sm:$0xff] %vm1324_vm9, %v1293_v23  ;;  %v4534_v27 = vld [vmem:[%s14005_s13 + $0x98] sm:$0xff]  ;;  %v4535_v28 = vld [vmem:[%s14005_s13 + $0xa0] sm:$0x1] }
 0x401   :  { %4539 = vst.msk [vmem:[%s14005_s13 + $0x1e0] sm:$0xff] %vm1637_vm11, %v4533_v24  ;;  %v4271_v48 = vld [vmem:[%s14005_s13 + $0xf9] sm:$0x1]  ;;  %4540 = vst.msk [vmem:[%s14005_s13 + $0x1e8] sm:$0xff] %vm1637_vm11, %v4534_v27  ;;  %v4303_v50 = vld [vmem:[%s14005_s13 + $0xf8] sm:$0x1] }
 0x402   :  { %4223 = vst.msk [vmem:[%s14005_s13 + $0xf3] sm:$0x1] %vm1357_vm10, %v4207_v25  ;;  %4255 = vst.msk [vmem:[%s14005_s13 + $0xfc] sm:$0x1] %vm1357_vm10, %v4239_v26  ;;  %v4335_v51 = vld [vmem:[%s14005_s13 + $0xf7] sm:$0x1]  ;;  %v184_v20 = vpop.permute.xlu0 %183 }
 0x403   :  { %4541 = vst.msk [vmem:[%s14005_s13 + $0x1f0] sm:$0x1] %vm1357_vm10, %v4535_v28  ;;  %4287 = vst.msk [vmem:[%s14005_s13 + $0xfd] sm:$0x1] %vm1357_vm10, %v4271_v48  ;;  %v4367_v52 = vld [vmem:[%s14005_s13 + $0xf6] sm:$0x1]  ;;  %3372 = vrot.lane.b32.xlu0 %v5313_v0, %s5835_s22  ;;  %v2249_v21 = vpop.permute.xlu1 %2248 }
 0x404   :  { %4319 = vst.msk [vmem:[%s14005_s13 + $0xfe] sm:$0x1] %vm1357_vm10, %v4303_v50  ;;  %4351 = vst.msk [vmem:[%s14005_s13 + $0xff] sm:$0x1] %vm1357_vm10, %v4335_v51  ;;  %v4113_v54 = vld [vmem:[%s14005_s13 + $0x128] sm:$0x1] }
 0x405   :  { %4383 = vst.msk [vmem:[%s14005_s13 + $0x100] sm:$0x1] %vm1357_vm10, %v4367_v52  ;;  %v4145_v55 = vld [vmem:[%s14005_s13 + $0x127] sm:$0x1]  ;;  %v4177_v56 = vld [vmem:[%s14005_s13 + $0x126] sm:$0x1] }
 0x406   :  { %5296 = vst.msk [vmem:[%s14007_s15 + $0x2a4] sm:$0xff] %vm1227_vm5, %v3275_v53  ;;  %v4437_v58 = vld [vmem:[%s14005_s13 + $0xc0] sm:$0xff]  ;;  %v4241_v60 = vld [vmem:[%s14005_s13 + $0x12a] sm:$0x1]  ;;  %4674 = vst.msk [vmem:[%s14006_s14 + $0xac] sm:$0xff] %vm1227_vm5, %v2225_v57  ;;  %v306_v22 = vpop.permute.xlu0 %305 }
 0x407   :  { %4129 = vst.msk [vmem:[%s14005_s13 + $0x120] sm:$0x1] %vm1357_vm10, %v4113_v54  ;;  %4161 = vst.msk [vmem:[%s14005_s13 + $0x121] sm:$0x1] %vm1357_vm10, %v4145_v55  ;;  %v4209_v59 = vld [vmem:[%s14005_s13 + $0x125] sm:$0x1]  ;;  %v1297_v23 = vpop.permute.xlu1 %1296 }
 0x408   :  { %4193 = vst.msk [vmem:[%s14005_s13 + $0x122] sm:$0x1] %vm1357_vm10, %v4177_v56  ;;  %v4438_v61 = vld [vmem:[%s14005_s13 + $0xc8] sm:$0xff]  ;;  %v4439_v62 = vld [vmem:[%s14005_s13 + $0xd0] sm:$0x1]  ;;  %v5317_v46 = vld [vmem:[%s14007_s15 + $0x31c] sm:$0xff] }
 0x409   :  { %4443 = vst.msk [vmem:[%s14005_s13 + $0x60] sm:$0xff] %vm1637_vm11, %v4437_v58  ;;  %v4511_v63 = vld [vmem:[%s14005_s13 + $0xd0] sm:$0x1]  ;;  %4515 = vst.msk [vmem:[%s14005_s13 + $0x1b0] sm:$0xff] %vm1637_vm11, %v4437_v58  ;;  %v4273_v1 = vld [vmem:[%s14005_s13 + $0x129] sm:$0x1] }
 0x40a   :  { %4225 = vst.msk [vmem:[%s14005_s13 + $0x123] sm:$0x1] %vm1357_vm10, %v4209_v59  ;;  %4257 = vst.msk [vmem:[%s14005_s13 + $0x12c] sm:$0x1] %vm1357_vm10, %v4241_v60  ;;  %v4305_v2 = vld [vmem:[%s14005_s13 + $0x128] sm:$0x1]  ;;  %v470_v24 = vpop.permute.xlu0 %469 }
 0x40b   :  { %4444 = vst.msk [vmem:[%s14005_s13 + $0x68] sm:$0xff] %vm1637_vm11, %v4438_v61  ;;  %4516 = vst.msk [vmem:[%s14005_s13 + $0x1b8] sm:$0xff] %vm1637_vm11, %v4438_v61  ;;  %v4337_v3 = vld [vmem:[%s14005_s13 + $0x127] sm:$0x1]  ;;  %v4369_v5 = vld [vmem:[%s14005_s13 + $0x126] sm:$0x1]  ;;  %v1301_v25 = vpop.permute.xlu1 %1300 }
 0x40c   :  { %4445 = vst.msk [vmem:[%s14005_s13 + $0x70] sm:$0x1] %vm1357_vm10, %v4439_v62  ;;  %4517 = vst.msk [vmem:[%s14005_s13 + $0x1c0] sm:$0x1] %vm1357_vm10, %v4511_v63  ;;  %v4115_v6 = vld [vmem:[%s14005_s13 + $0x290] sm:$0x1] }
 0x40d   :  { %4289 = vst.msk [vmem:[%s14005_s13 + $0x12d] sm:$0x1] %vm1357_vm10, %v4273_v1  ;;  %4321 = vst.msk [vmem:[%s14005_s13 + $0x12e] sm:$0x1] %vm1357_vm10, %v4305_v2  ;;  %v4147_v7 = vld [vmem:[%s14005_s13 + $0x28f] sm:$0x1] }
 0x40e   :  { %4353 = vst.msk [vmem:[%s14005_s13 + $0x12f] sm:$0x1] %vm1357_vm10, %v4337_v3  ;;  %v4413_v9 = vld [vmem:[%s14005_s13 + $0xf0] sm:$0xff]  ;;  %4385 = vst.msk [vmem:[%s14005_s13 + $0x130] sm:$0x1] %vm1357_vm10, %v4369_v5  ;;  %v4414_v31 = vld [vmem:[%s14005_s13 + $0xf8] sm:$0xff]  ;;  %v632_v48 = vpop.permute.xlu0 %631 }
 0x40f   :  { %5298 = vst.msk [vmem:[%s14007_s15 + $0x2d4] sm:$0xff] %vm1227_vm5, %v3279_v4  ;;  %v4179_v10 = vld [vmem:[%s14005_s13 + $0x28e] sm:$0x1]  ;;  %v4211_v11 = vld [vmem:[%s14005_s13 + $0x28d] sm:$0x1]  ;;  %4676 = vst.msk [vmem:[%s14006_s14 + $0xdc] sm:$0xff] %vm1227_vm5, %v2229_v8  ;;  %v1305_v52 = vpop.permute.xlu1 %1304 }
 0x410   :  { %4131 = vst.msk [vmem:[%s14005_s13 + $0x288] sm:$0x1] %vm1357_vm10, %v4115_v6  ;;  %4163 = vst.msk [vmem:[%s14005_s13 + $0x289] sm:$0x1] %vm1357_vm10, %v4147_v7  ;;  %v4243_v12 = vld [vmem:[%s14005_s13 + $0x292] sm:$0x1] }
 0x411   :  { %4419 = vst.msk [vmem:[%s14005_s13 + $0x30] sm:$0xff] %vm1637_vm11, %v4413_v9  ;;  %4491 = vst.msk [vmem:[%s14005_s13 + $0x180] sm:$0xff] %vm1637_vm11, %v4413_v9  ;;  %v4275_v14 = vld [vmem:[%s14005_s13 + $0x291] sm:$0x1]  ;;  %v4307_v29 = vld [vmem:[%s14005_s13 + $0x290] sm:$0x1] }
 0x412   :  { %4195 = vst.msk [vmem:[%s14005_s13 + $0x28a] sm:$0x1] %vm1357_vm10, %v4179_v10  ;;  %4227 = vst.msk [vmem:[%s14005_s13 + $0x28b] sm:$0x1] %vm1357_vm10, %v4211_v11  ;;  %v5315_v30 = vld [vmem:[%s14007_s15 + $0x2ec] sm:$0xff]  ;;  %v5312_v38 = vld [vmem:[%s14007_s15 + $0x2a4] sm:$0xff]  ;;  %v1279_v62 = vpop.permute.xlu0 %1278 }
 0x413   :  { %v4415_v32 = vld [vmem:[%s14005_s13 + $0x100] sm:$0x1]  ;;  %4259 = vst.msk [vmem:[%s14005_s13 + $0x294] sm:$0x1] %vm1357_vm10, %v4243_v12  ;;  %4291 = vst.msk [vmem:[%s14005_s13 + $0x295] sm:$0x1] %vm1357_vm10, %v4275_v14  ;;  %3370 = vrot.lane.b32.xlu1 %v5312_v38, %s5835_s22  ;;  %v2333_v2 = vpop.permute.xlu1 %2332 }
 0x414   :  { %v4487_v33 = vld [vmem:[%s14005_s13 + $0x100] sm:$0x1]  ;;  %4323 = vst.msk [vmem:[%s14005_s13 + $0x296] sm:$0x1] %vm1357_vm10, %v4307_v29  ;;  %4421 = vst.msk [vmem:[%s14005_s13 + $0x40] sm:$0x1] %vm1357_vm10, %v4415_v32  ;;  %3376 = vrot.lane.b32.xlu0 %v5315_v30, %s5835_s22 }
 0x415   :  { %4420 = vst.msk [vmem:[%s14005_s13 + $0x38] sm:$0xff] %vm1637_vm11, %v4414_v31  ;;  %4492 = vst.msk [vmem:[%s14005_s13 + $0x188] sm:$0xff] %vm1637_vm11, %v4414_v31  ;;  %v4339_v35 = vld [vmem:[%s14005_s13 + $0x28f] sm:$0x1]  ;;  %v4371_v36 = vld [vmem:[%s14005_s13 + $0x28e] sm:$0x1] }
 0x416   :  { %4493 = vst.msk [vmem:[%s14005_s13 + $0x190] sm:$0x1] %vm1357_vm10, %v4487_v33  ;;  %v4395_v39 = vld [vmem:[%s14005_s13 + $0x120] sm:$0xff]  ;;  %4355 = vst.msk [vmem:[%s14005_s13 + $0x297] sm:$0x1] %vm1357_vm10, %v4339_v35  ;;  %v4396_v40 = vld [vmem:[%s14005_s13 + $0x128] sm:$0xff]  ;;  %v1283_v12 = vpop.permute.xlu0 %1282 }
 0x417   :  { %5300 = vst.msk [vmem:[%s14007_s15 + $0x304] sm:$0xff] %vm1227_vm5, %v3283_v34  ;;  %4678 = vst.msk [vmem:[%s14006_s14 + $0x10c] sm:$0xff] %vm1227_vm5, %v2233_v37  ;;  %v5314_v42 = vld [vmem:[%s14007_s15 + $0x2d4] sm:$0xff]  ;;  %v4397_v43 = vld [vmem:[%s14005_s13 + $0x130] sm:$0x1]  ;;  %v2349_v31 = vpop.permute.xlu1 %2348 }
 0x418   :  { %4387 = vst.msk [vmem:[%s14005_s13 + $0x298] sm:$0x1] %vm1357_vm10, %v4371_v36  ;;  %v4463_v44 = vld [vmem:[%s14005_s13 + $0x130] sm:$0x1]  ;;  %1640 = vst.msk [vmem:[%s14005_s13 + $0x10] sm:$0x1] %vm1357_vm10, %v4397_v43  ;;  %3374 = vrot.lane.b32.xlu1 %v5314_v42, %s5835_s22 }
 0x419   :  { %1638 = vst.msk [vmem:[%s14005_s13] sm:$0xff] %vm1637_vm11, %v4395_v39  ;;  %4467 = vst.msk [vmem:[%s14005_s13 + $0x150] sm:$0xff] %vm1637_vm11, %v4395_v39  ;;  %v4536_v47 = vld [vmem:[%s14005_s13 + $0x288] sm:$0xff]  ;;  %3380 = vrot.lane.b32.xlu0 %v5317_v46, %s5835_s22 }
 0x41a   :  { %1639 = vst.msk [vmem:[%s14005_s13 + $0x8] sm:$0xff] %vm1637_vm11, %v4396_v40  ;;  %4468 = vst.msk [vmem:[%s14005_s13 + $0x158] sm:$0xff] %vm1637_vm11, %v4396_v40  ;;  %v4090_v19 = vld [vmem:[%s14005_s13 + $0x334] sm:$0xff] }
 0x41b   :  { %114 = vst.msk [vmem:[%s13997_s5] sm:$0x7] %vm113_vm12, %v111_v41  ;;  %150 = vst.msk [vmem:[%s13998_s6] sm:$0x7] %vm113_vm12, %v148_v13  ;;  %v1287_v41 = vpop.permute.xlu0 %1286 }
 0x41c   :  { %4469 = vst.msk [vmem:[%s14005_s13 + $0x160] sm:$0x1] %vm1357_vm10, %v4463_v44 }
 0x41d   :  { %4682 = vst.msk [vmem:[%s14006_s14 + $0x2a4] sm:$0xff] %vm1227_vm5, %v2241_v45  ;;  %v4537_v16 = vld [vmem:[%s14005_s13 + $0x290] sm:$0xff]  ;;  %4684 = vst.msk [vmem:[%s14006_s14 + $0x2d4] sm:$0xff] %vm1227_vm5, %v2245_v18  ;;  %1306 = vrot.lane.b32.xlu0 %v4090_v19, %s5847_s29  ;;  %v3355_v45 = vpop.permute.xlu1 %3354 }
 0x41e   :  { %4542 = vst.msk [vmem:[%s14005_s13 + $0x3d8] sm:$0xff] %vm1637_vm11, %v4536_v47  ;;  %v5316_v15 = vld [vmem:[%s14007_s15 + $0x304] sm:$0xff]  ;;  %4543 = vst.msk [vmem:[%s14005_s13 + $0x3e0] sm:$0xff] %vm1637_vm11, %v4537_v16 }
 0x41f   :  { %v4538_v17 = vld [vmem:[%s14005_s13 + $0x298] sm:$0x1]  ;;  %3378 = vrot.lane.b32.xlu1 %v5316_v15, %s5835_s22  ;;  %186 = vst.msk [vmem:[%s13999_s7] sm:$0x7] %vm113_vm12, %v184_v20 }
 0x420   :  { %4544 = vst.msk [vmem:[%s14005_s13 + $0x3e8] sm:$0x1] %vm1357_vm10, %v4538_v17 }
 0x421   :  { %4686 = vst.msk [vmem:[%s14006_s14 + $0x304] sm:$0xff] %vm1227_vm5, %v2249_v21  ;;  %v1291_v21 = vpop.permute.xlu0 %1290 }
 0x422   :  { %314 = vst.msk [vmem:[%s14001_s9 + $0x1c] sm:$0xff] %vm312_vm7, %v306_v22  ;;  %477 = vst.msk [vmem:[%s14002_s10 + $0x1c] sm:$0xff] %vm312_vm7, %v470_v24 }
 0x423   :  { %4101 = vst.msk [vmem:[%s14005_s13 + $0x2bc] sm:$0xff] %vm1324_vm9, %v1297_v23  ;;  %4103 = vst.msk [vmem:[%s14005_s13 + $0x2ec] sm:$0xff] %vm1324_vm9, %v1301_v25  ;;  %v3359_v25 = vpop.permute.xlu1 %3358 }
 0x424   :  { %639 = vst.msk [vmem:[%s14003_s11 + $0x1c] sm:$0xff] %vm312_vm7, %v632_v48 }
 0x425   :  { %4105 = vst.msk [vmem:[%s14005_s13 + $0x31c] sm:$0xff] %vm1324_vm9, %v1305_v52  ;;  %4092 = vst.msk [vmem:[%s14005_s13 + $0xac] sm:$0xff] %vm1324_vm9, %v1279_v62 }
 0x426   :  { %4712 = vst.msk [vmem:[%s14006_s14 + $0x13c] sm:$0xff] %vm1324_vm9, %v2333_v2  ;;  %4094 = vst.msk [vmem:[%s14005_s13 + $0xdc] sm:$0xff] %vm1324_vm9, %v1283_v12 }
 0x427   :  { %4720 = vst.msk [vmem:[%s14006_s14 + $0x334] sm:$0xff] %vm1324_vm9, %v2349_v31  ;;  %4096 = vst.msk [vmem:[%s14005_s13 + $0x10c] sm:$0xff] %vm1324_vm9, %v1287_v41 }
 0x428   :  { %5320 = vst.msk [vmem:[%s14007_s15 + $0xac] sm:$0xff] %vm1324_vm9, %v3355_v45  ;;  %4098 = vst.msk [vmem:[%s14005_s13 + $0x13c] sm:$0xff] %vm1324_vm9, %v1291_v21 }
 0x429   :  { %v317_v26 = vld [vmem:[%s14001_s9 + $0x20] sm:$0x1]  ;;  %v324_v27 = vld [vmem:[%s14001_s9 + $0x1f] sm:$0x1]  ;;  %v330_v28 = vld [vmem:[%s14001_s9 + $0x1e] sm:$0x1] }
 0x42a   :  { %321 = vst.msk [vmem:[%s14001_s9 + $0x18] sm:$0x1] %vm319_vm8, %v317_v26  ;;  %327 = vst.msk [vmem:[%s14001_s9 + $0x19] sm:$0x1] %vm319_vm8, %v324_v27  ;;  %v336_v49 = vld [vmem:[%s14001_s9 + $0x1d] sm:$0x1] }
 0x42b   :  { %333 = vst.msk [vmem:[%s14001_s9 + $0x1a] sm:$0x1] %vm319_vm8, %v330_v28  ;;  %v342_v50 = vld [vmem:[%s14001_s9 + $0x22] sm:$0x1]  ;;  %v348_v51 = vld [vmem:[%s14001_s9 + $0x21] sm:$0x1] }
 0x42c   :  { %339 = vst.msk [vmem:[%s14001_s9 + $0x1b] sm:$0x1] %vm319_vm8, %v336_v49  ;;  %345 = vst.msk [vmem:[%s14001_s9 + $0x24] sm:$0x1] %vm319_vm8, %v342_v50  ;;  %v354_v53 = vld [vmem:[%s14001_s9 + $0x20] sm:$0x1] }
 0x42d   :  { %351 = vst.msk [vmem:[%s14001_s9 + $0x25] sm:$0x1] %vm319_vm8, %v348_v51  ;;  %v360_v54 = vld [vmem:[%s14001_s9 + $0x1f] sm:$0x1]  ;;  %v366_v55 = vld [vmem:[%s14001_s9 + $0x1e] sm:$0x1] }
 0x42e   :  { %357 = vst.msk [vmem:[%s14001_s9 + $0x26] sm:$0x1] %vm319_vm8, %v354_v53  ;;  %363 = vst.msk [vmem:[%s14001_s9 + $0x27] sm:$0x1] %vm319_vm8, %v360_v54  ;;  %v4117_v56 = vld [vmem:[%s14005_s13 + $0x2c0] sm:$0x1]  ;;  %v1295_v54 = vpop.permute.xlu0 %1294 }
 0x42f   :  { %369 = vst.msk [vmem:[%s14001_s9 + $0x28] sm:$0x1] %vm319_vm8, %v366_v55  ;;  %v4149_v57 = vld [vmem:[%s14005_s13 + $0x2bf] sm:$0x1]  ;;  %v4181_v58 = vld [vmem:[%s14005_s13 + $0x2be] sm:$0x1] }
 0x430   :  { %4133 = vst.msk [vmem:[%s14005_s13 + $0x2b8] sm:$0x1] %vm1357_vm10, %v4117_v56  ;;  %4165 = vst.msk [vmem:[%s14005_s13 + $0x2b9] sm:$0x1] %vm1357_vm10, %v4149_v57  ;;  %v4213_v59 = vld [vmem:[%s14005_s13 + $0x2bd] sm:$0x1] }
 0x431   :  { %4197 = vst.msk [vmem:[%s14005_s13 + $0x2ba] sm:$0x1] %vm1357_vm10, %v4181_v58  ;;  %v4245_v60 = vld [vmem:[%s14005_s13 + $0x2c2] sm:$0x1]  ;;  %v4277_v61 = vld [vmem:[%s14005_s13 + $0x2c1] sm:$0x1]  ;;  %v3363_v58 = vpop.permute.xlu1 %3362 }
 0x432   :  { %4229 = vst.msk [vmem:[%s14005_s13 + $0x2bb] sm:$0x1] %vm1357_vm10, %v4213_v59  ;;  %4261 = vst.msk [vmem:[%s14005_s13 + $0x2c4] sm:$0x1] %vm1357_vm10, %v4245_v60  ;;  %v4309_v63 = vld [vmem:[%s14005_s13 + $0x2c0] sm:$0x1] }
 0x433   :  { %4293 = vst.msk [vmem:[%s14005_s13 + $0x2c5] sm:$0x1] %vm1357_vm10, %v4277_v61  ;;  %v4341_v0 = vld [vmem:[%s14005_s13 + $0x2bf] sm:$0x1]  ;;  %v4373_v1 = vld [vmem:[%s14005_s13 + $0x2be] sm:$0x1] }
 0x434   :  { %4325 = vst.msk [vmem:[%s14005_s13 + $0x2c6] sm:$0x1] %vm1357_vm10, %v4309_v63  ;;  %4357 = vst.msk [vmem:[%s14005_s13 + $0x2c7] sm:$0x1] %vm1357_vm10, %v4341_v0  ;;  %v480_v3 = vld [vmem:[%s14002_s10 + $0x1c] sm:$0x1] }
 0x435   :  { %4389 = vst.msk [vmem:[%s14005_s13 + $0x2c8] sm:$0x1] %vm1357_vm10, %v4373_v1  ;;  %v486_v4 = vld [vmem:[%s14002_s10 + $0x1c] sm:$0x1]  ;;  %v504_v7 = vld [vmem:[%s14002_s10 + $0x23] sm:$0x1] }
 0x436   :  { %v492_v5 = vld [vmem:[%s14002_s10 + $0x1c] sm:$0x1]  ;;  %483 = vst.msk [vmem:[%s14002_s10 + $0x18] sm:$0x1] %vm319_vm8, %v480_v3  ;;  %489 = vst.msk [vmem:[%s14002_s10 + $0x19] sm:$0x1] %vm319_vm8, %v486_v4  ;;  %v3287_v4 = vpop.permute.xlu0 %3286 }
 0x437   :  { %495 = vst.msk [vmem:[%s14002_s10 + $0x1a] sm:$0x1] %vm319_vm8, %v492_v5  ;;  %v498_v6 = vld [vmem:[%s14002_s10 + $0x1c] sm:$0x1]  ;;  %v510_v8 = vld [vmem:[%s14002_s10 + $0x23] sm:$0x1] }
 0x438   :  { %501 = vst.msk [vmem:[%s14002_s10 + $0x1b] sm:$0x1] %vm319_vm8, %v498_v6  ;;  %507 = vst.msk [vmem:[%s14002_s10 + $0x24] sm:$0x1] %vm319_vm8, %v504_v7  ;;  %v516_v9 = vld [vmem:[%s14002_s10 + $0x23] sm:$0x1] }
 0x439   :  { %513 = vst.msk [vmem:[%s14002_s10 + $0x25] sm:$0x1] %vm319_vm8, %v510_v8  ;;  %v522_v10 = vld [vmem:[%s14002_s10 + $0x23] sm:$0x1]  ;;  %519 = vst.msk [vmem:[%s14002_s10 + $0x26] sm:$0x1] %vm319_vm8, %v516_v9 }
 0x43a   :  { %v528_v11 = vld [vmem:[%s14002_s10 + $0x23] sm:$0x1]  ;;  %525 = vst.msk [vmem:[%s14002_s10 + $0x27] sm:$0x1] %vm319_vm8, %v522_v10  ;;  %v4119_v14 = vld [vmem:[%s14005_s13 + $0x2f0] sm:$0x1] }
 0x43b   :  { %531 = vst.msk [vmem:[%s14002_s10 + $0x28] sm:$0x1] %vm319_vm8, %v528_v11  ;;  %v4151_v29 = vld [vmem:[%s14005_s13 + $0x2ef] sm:$0x1]  ;;  %v4183_v30 = vld [vmem:[%s14005_s13 + $0x2ee] sm:$0x1] }
 0x43c   :  { %4135 = vst.msk [vmem:[%s14005_s13 + $0x2e8] sm:$0x1] %vm1357_vm10, %v4119_v14  ;;  %4167 = vst.msk [vmem:[%s14005_s13 + $0x2e9] sm:$0x1] %vm1357_vm10, %v4151_v29  ;;  %v4215_v32 = vld [vmem:[%s14005_s13 + $0x2ed] sm:$0x1] }
 0x43d   :  { %4199 = vst.msk [vmem:[%s14005_s13 + $0x2ea] sm:$0x1] %vm1357_vm10, %v4183_v30  ;;  %v4247_v33 = vld [vmem:[%s14005_s13 + $0x2f2] sm:$0x1]  ;;  %v4279_v34 = vld [vmem:[%s14005_s13 + $0x2f1] sm:$0x1] }
 0x43e   :  { %4231 = vst.msk [vmem:[%s14005_s13 + $0x2eb] sm:$0x1] %vm1357_vm10, %v4215_v32  ;;  %4263 = vst.msk [vmem:[%s14005_s13 + $0x2f4] sm:$0x1] %vm1357_vm10, %v4247_v33  ;;  %v4311_v35 = vld [vmem:[%s14005_s13 + $0x2f0] sm:$0x1]  ;;  %v2227_v32 = vpop.permute.xlu0 %2226 }
 0x43f   :  { %4295 = vst.msk [vmem:[%s14005_s13 + $0x2f5] sm:$0x1] %vm1357_vm10, %v4279_v34  ;;  %v4343_v36 = vld [vmem:[%s14005_s13 + $0x2ef] sm:$0x1]  ;;  %v4375_v37 = vld [vmem:[%s14005_s13 + $0x2ee] sm:$0x1] }
 0x440   :  { %v4440_v38 = vld [vmem:[%s14005_s13 + $0x2b8] sm:$0xff]  ;;  %4327 = vst.msk [vmem:[%s14005_s13 + $0x2f6] sm:$0x1] %vm1357_vm10, %v4311_v35  ;;  %4359 = vst.msk [vmem:[%s14005_s13 + $0x2f7] sm:$0x1] %vm1357_vm10, %v4343_v36  ;;  %v4441_v42 = vld [vmem:[%s14005_s13 + $0x2c0] sm:$0xff] }
 0x441   :  { %4391 = vst.msk [vmem:[%s14005_s13 + $0x2f8] sm:$0x1] %vm1357_vm10, %v4375_v37  ;;  %v642_v39 = vld [vmem:[%s14003_s11 + $0x20] sm:$0x1]  ;;  %v648_v40 = vld [vmem:[%s14003_s11 + $0x21] sm:$0x1] }
 0x442   :  { %v4442_v43 = vld [vmem:[%s14005_s13 + $0x2c8] sm:$0x1]  ;;  %4446 = vst.msk [vmem:[%s14005_s13 + $0x258] sm:$0xff] %vm1637_vm11, %v4440_v38  ;;  %4518 = vst.msk [vmem:[%s14005_s13 + $0x3a8] sm:$0xff] %vm1637_vm11, %v4440_v38  ;;  %v654_v46 = vld [vmem:[%s14003_s11 + $0x22] sm:$0x1] }
 0x443   :  { %v4514_v44 = vld [vmem:[%s14005_s13 + $0x2c8] sm:$0x1]  ;;  %645 = vst.msk [vmem:[%s14003_s11 + $0x18] sm:$0x1] %vm319_vm8, %v642_v39  ;;  %651 = vst.msk [vmem:[%s14003_s11 + $0x19] sm:$0x1] %vm319_vm8, %v648_v40 }
 0x444   :  { %4447 = vst.msk [vmem:[%s14005_s13 + $0x260] sm:$0xff] %vm1637_vm11, %v4441_v42  ;;  %4519 = vst.msk [vmem:[%s14005_s13 + $0x3b0] sm:$0xff] %vm1637_vm11, %v4441_v42  ;;  %v660_v47 = vld [vmem:[%s14003_s11 + $0x23] sm:$0x1]  ;;  %v666_v13 = vld [vmem:[%s14003_s11 + $0x1c] sm:$0x1]  ;;  %v3367_v42 = vpop.permute.xlu1 %3366 }
 0x445   :  { %4448 = vst.msk [vmem:[%s14005_s13 + $0x268] sm:$0x1] %vm1357_vm10, %v4442_v43  ;;  %4520 = vst.msk [vmem:[%s14005_s13 + $0x3b8] sm:$0x1] %vm1357_vm10, %v4514_v44  ;;  %v672_v15 = vld [vmem:[%s14003_s11 + $0x1d] sm:$0x1] }
 0x446   :  { %657 = vst.msk [vmem:[%s14003_s11 + $0x1a] sm:$0x1] %vm319_vm8, %v654_v46  ;;  %663 = vst.msk [vmem:[%s14003_s11 + $0x1b] sm:$0x1] %vm319_vm8, %v660_v47  ;;  %v678_v16 = vld [vmem:[%s14003_s11 + $0x1e] sm:$0x1]  ;;  %v2231_v46 = vpop.permute.xlu0 %2230 }
 0x447   :  { %669 = vst.msk [vmem:[%s14003_s11 + $0x24] sm:$0x1] %vm319_vm8, %v666_v13  ;;  %v684_v17 = vld [vmem:[%s14003_s11 + $0x1f] sm:$0x1]  ;;  %675 = vst.msk [vmem:[%s14003_s11 + $0x25] sm:$0x1] %vm319_vm8, %v672_v15 }
 0x448   :  { %681 = vst.msk [vmem:[%s14003_s11 + $0x26] sm:$0x1] %vm319_vm8, %v678_v16  ;;  %687 = vst.msk [vmem:[%s14003_s11 + $0x27] sm:$0x1] %vm319_vm8, %v684_v17  ;;  %v690_v18 = vld [vmem:[%s14003_s11 + $0x20] sm:$0x1] }
 0x449   :  { %v4121_v19 = vld [vmem:[%s14005_s13 + $0x320] sm:$0x1]  ;;  %v4153_v20 = vld [vmem:[%s14005_s13 + $0x31f] sm:$0x1]  ;;  %693 = vst.msk [vmem:[%s14003_s11 + $0x28] sm:$0x1] %vm319_vm8, %v690_v18 }
 0x44a   :  { %4137 = vst.msk [vmem:[%s14005_s13 + $0x318] sm:$0x1] %vm1357_vm10, %v4121_v19  ;;  %4169 = vst.msk [vmem:[%s14005_s13 + $0x319] sm:$0x1] %vm1357_vm10, %v4153_v20  ;;  %v4185_v22 = vld [vmem:[%s14005_s13 + $0x31e] sm:$0x1] }
 0x44b   :  { %v4217_v23 = vld [vmem:[%s14005_s13 + $0x31d] sm:$0x1]  ;;  %v4249_v24 = vld [vmem:[%s14005_s13 + $0x322] sm:$0x1]  ;;  %v4416_v26 = vld [vmem:[%s14005_s13 + $0x2e8] sm:$0xff]  ;;  %5322 = vst.msk [vmem:[%s14007_s15 + $0xdc] sm:$0xff] %vm1324_vm9, %v3359_v25  ;;  %v2235_v25 = vpop.permute.xlu0 %2234 }
 0x44c   :  { %4201 = vst.msk [vmem:[%s14005_s13 + $0x31a] sm:$0x1] %vm1357_vm10, %v4185_v22  ;;  %4233 = vst.msk [vmem:[%s14005_s13 + $0x31b] sm:$0x1] %vm1357_vm10, %v4217_v23  ;;  %v4281_v27 = vld [vmem:[%s14005_s13 + $0x321] sm:$0x1] }
 0x44d   :  { %4265 = vst.msk [vmem:[%s14005_s13 + $0x324] sm:$0x1] %vm1357_vm10, %v4249_v24  ;;  %v4313_v28 = vld [vmem:[%s14005_s13 + $0x320] sm:$0x1]  ;;  %v4417_v48 = vld [vmem:[%s14005_s13 + $0x2f0] sm:$0xff] }
 0x44e   :  { %v4418_v49 = vld [vmem:[%s14005_s13 + $0x2f8] sm:$0x1]  ;;  %4422 = vst.msk [vmem:[%s14005_s13 + $0x228] sm:$0xff] %vm1637_vm11, %v4416_v26  ;;  %4494 = vst.msk [vmem:[%s14005_s13 + $0x378] sm:$0xff] %vm1637_vm11, %v4416_v26  ;;  %v4345_v51 = vld [vmem:[%s14005_s13 + $0x31f] sm:$0x1] }
 0x44f   :  { %v4490_v50 = vld [vmem:[%s14005_s13 + $0x2f8] sm:$0x1]  ;;  %4297 = vst.msk [vmem:[%s14005_s13 + $0x325] sm:$0x1] %vm1357_vm10, %v4281_v27  ;;  %4329 = vst.msk [vmem:[%s14005_s13 + $0x326] sm:$0x1] %vm1357_vm10, %v4313_v28 }
 0x450   :  { %4423 = vst.msk [vmem:[%s14005_s13 + $0x230] sm:$0xff] %vm1637_vm11, %v4417_v48  ;;  %4495 = vst.msk [vmem:[%s14005_s13 + $0x380] sm:$0xff] %vm1637_vm11, %v4417_v48  ;;  %v4377_v52 = vld [vmem:[%s14005_s13 + $0x31e] sm:$0x1]  ;;  %v4108_v53 = vld [vmem:[%s14005_s13 + $0xb0] sm:$0x1] }
 0x451   :  { %4424 = vst.msk [vmem:[%s14005_s13 + $0x238] sm:$0x1] %vm1357_vm10, %v4418_v49  ;;  %4496 = vst.msk [vmem:[%s14005_s13 + $0x388] sm:$0x1] %vm1357_vm10, %v4490_v50  ;;  %v4140_v55 = vld [vmem:[%s14005_s13 + $0xaf] sm:$0x1] }
 0x452   :  { %4361 = vst.msk [vmem:[%s14005_s13 + $0x327] sm:$0x1] %vm1357_vm10, %v4345_v51  ;;  %4393 = vst.msk [vmem:[%s14005_s13 + $0x328] sm:$0x1] %vm1357_vm10, %v4377_v52  ;;  %v4172_v56 = vld [vmem:[%s14005_s13 + $0xae] sm:$0x1] }
 0x453   :  { %4124 = vst.msk [vmem:[%s14005_s13 + $0xa8] sm:$0x1] %vm1357_vm10, %v4108_v53  ;;  %v4204_v57 = vld [vmem:[%s14005_s13 + $0xad] sm:$0x1]  ;;  %4156 = vst.msk [vmem:[%s14005_s13 + $0xa9] sm:$0x1] %vm1357_vm10, %v4140_v55 }
 0x454   :  { %4100 = vst.msk [vmem:[%s14005_s13 + $0x2a4] sm:$0xff] %vm1324_vm9, %v1295_v54  ;;  %v4236_v59 = vld [vmem:[%s14005_s13 + $0xb2] sm:$0x1]  ;;  %v4268_v60 = vld [vmem:[%s14005_s13 + $0xb1] sm:$0x1]  ;;  %5324 = vst.msk [vmem:[%s14007_s15 + $0x10c] sm:$0xff] %vm1324_vm9, %v3363_v58 }
 0x455   :  { %4188 = vst.msk [vmem:[%s14005_s13 + $0xaa] sm:$0x1] %vm1357_vm10, %v4172_v56  ;;  %4220 = vst.msk [vmem:[%s14005_s13 + $0xab] sm:$0x1] %vm1357_vm10, %v4204_v57  ;;  %v4300_v61 = vld [vmem:[%s14005_s13 + $0xb0] sm:$0x1]  ;;  %v2243_v57 = vpop.permute.xlu0 %2242 }
 0x456   :  { %4252 = vst.msk [vmem:[%s14005_s13 + $0xb4] sm:$0x1] %vm1357_vm10, %v4236_v59  ;;  %4284 = vst.msk [vmem:[%s14005_s13 + $0xb5] sm:$0x1] %vm1357_vm10, %v4268_v60  ;;  %v4332_v62 = vld [vmem:[%s14005_s13 + $0xaf] sm:$0x1] }
 0x457   :  { %4316 = vst.msk [vmem:[%s14005_s13 + $0xb6] sm:$0x1] %vm1357_vm10, %v4300_v61  ;;  %v4364_v63 = vld [vmem:[%s14005_s13 + $0xae] sm:$0x1]  ;;  %v4728_v0 = vld [vmem:[%s14006_s14 + $0x13c] sm:$0x1] }
 0x458   :  { %4348 = vst.msk [vmem:[%s14005_s13 + $0xb7] sm:$0x1] %vm1357_vm10, %v4332_v62  ;;  %4380 = vst.msk [vmem:[%s14005_s13 + $0xb8] sm:$0x1] %vm1357_vm10, %v4364_v63  ;;  %v4760_v1 = vld [vmem:[%s14006_s14 + $0x13c] sm:$0x1] }
 0x459   :  { %4744 = vst.msk [vmem:[%s14006_s14 + $0x138] sm:$0x1] %vm1357_vm10, %v4728_v0  ;;  %v4792_v2 = vld [vmem:[%s14006_s14 + $0x13c] sm:$0x1]  ;;  %4776 = vst.msk [vmem:[%s14006_s14 + $0x139] sm:$0x1] %vm1357_vm10, %v4760_v1 }
 0x45a   :  { %v4824_v3 = vld [vmem:[%s14006_s14 + $0x13c] sm:$0x1]  ;;  %4808 = vst.msk [vmem:[%s14006_s14 + $0x13a] sm:$0x1] %vm1357_vm10, %v4792_v2  ;;  %v4856_v6 = vld [vmem:[%s14006_s14 + $0x143] sm:$0x1] }
 0x45b   :  { %v4398_v5 = vld [vmem:[%s14005_s13 + $0x318] sm:$0xff]  ;;  %4840 = vst.msk [vmem:[%s14006_s14 + $0x13b] sm:$0x1] %vm1357_vm10, %v4824_v3  ;;  %v4888_v7 = vld [vmem:[%s14006_s14 + $0x143] sm:$0x1] }
 0x45c   :  { %5302 = vst.msk [vmem:[%s14007_s15 + $0x334] sm:$0xff] %vm1227_vm5, %v3287_v4  ;;  %v4920_v8 = vld [vmem:[%s14006_s14 + $0x143] sm:$0x1]  ;;  %v4110_v11 = vld [vmem:[%s14005_s13 + $0xe0] sm:$0x1]  ;;  %v4449_v33 = vld [vmem:[%s14005_s13 + $0xa8] sm:$0xff] }
 0x45d   :  { %1641 = vst.msk [vmem:[%s14005_s13 + $0x1f8] sm:$0xff] %vm1637_vm11, %v4398_v5  ;;  %4470 = vst.msk [vmem:[%s14005_s13 + $0x348] sm:$0xff] %vm1637_vm11, %v4398_v5  ;;  %v4952_v9 = vld [vmem:[%s14006_s14 + $0x143] sm:$0x1]  ;;  %v4142_v12 = vld [vmem:[%s14005_s13 + $0xdf] sm:$0x1] }
 0x45e   :  { %4872 = vst.msk [vmem:[%s14006_s14 + $0x144] sm:$0x1] %vm1357_vm10, %v4856_v6  ;;  %4904 = vst.msk [vmem:[%s14006_s14 + $0x145] sm:$0x1] %vm1357_vm10, %v4888_v7  ;;  %v4984_v10 = vld [vmem:[%s14006_s14 + $0x143] sm:$0x1]  ;;  %v2247_v6 = vpop.permute.xlu0 %2246 }
 0x45f   :  { %4936 = vst.msk [vmem:[%s14006_s14 + $0x146] sm:$0x1] %vm1357_vm10, %v4920_v8  ;;  %4968 = vst.msk [vmem:[%s14006_s14 + $0x147] sm:$0x1] %vm1357_vm10, %v4952_v9  ;;  %v4174_v14 = vld [vmem:[%s14005_s13 + $0xde] sm:$0x1] }
 0x460   :  { %5000 = vst.msk [vmem:[%s14006_s14 + $0x148] sm:$0x1] %vm1357_vm10, %v4984_v10  ;;  %v4399_v29 = vld [vmem:[%s14005_s13 + $0x320] sm:$0xff]  ;;  %v4400_v30 = vld [vmem:[%s14005_s13 + $0x328] sm:$0x1]  ;;  %v4450_v39 = vld [vmem:[%s14005_s13 + $0xb0] sm:$0xff] }
 0x461   :  { %v4466_v31 = vld [vmem:[%s14005_s13 + $0x328] sm:$0x1]  ;;  %4126 = vst.msk [vmem:[%s14005_s13 + $0xd8] sm:$0x1] %vm1357_vm10, %v4110_v11  ;;  %4158 = vst.msk [vmem:[%s14005_s13 + $0xd9] sm:$0x1] %vm1357_vm10, %v4142_v12 }
 0x462   :  { %4190 = vst.msk [vmem:[%s14005_s13 + $0xda] sm:$0x1] %vm1357_vm10, %v4174_v14  ;;  %1643 = vst.msk [vmem:[%s14005_s13 + $0x208] sm:$0x1] %vm1357_vm10, %v4400_v30  ;;  %v4206_v34 = vld [vmem:[%s14005_s13 + $0xdd] sm:$0x1] }
 0x463   :  { %1642 = vst.msk [vmem:[%s14005_s13 + $0x200] sm:$0xff] %vm1637_vm11, %v4399_v29  ;;  %4471 = vst.msk [vmem:[%s14005_s13 + $0x350] sm:$0xff] %vm1637_vm11, %v4399_v29  ;;  %v4238_v35 = vld [vmem:[%s14005_s13 + $0xe2] sm:$0x1]  ;;  %v4270_v36 = vld [vmem:[%s14005_s13 + $0xe1] sm:$0x1] }
 0x464   :  { %4472 = vst.msk [vmem:[%s14005_s13 + $0x358] sm:$0x1] %vm1357_vm10, %v4466_v31  ;;  %4222 = vst.msk [vmem:[%s14005_s13 + $0xdb] sm:$0x1] %vm1357_vm10, %v4206_v34  ;;  %v4302_v37 = vld [vmem:[%s14005_s13 + $0xe0] sm:$0x1]  ;;  %v2251_v34 = vpop.permute.xlu0 %2250 }
 0x465   :  { %4675 = vst.msk [vmem:[%s14006_s14 + $0xc4] sm:$0xff] %vm1227_vm5, %v2227_v32  ;;  %v4334_v38 = vld [vmem:[%s14005_s13 + $0xdf] sm:$0x1]  ;;  %v4451_v40 = vld [vmem:[%s14005_s13 + $0xb8] sm:$0x1]  ;;  %4677 = vst.msk [vmem:[%s14006_s14 + $0xf4] sm:$0xff] %vm1227_vm5, %v2231_v46 }
 0x466   :  { %4455 = vst.msk [vmem:[%s14005_s13 + $0x78] sm:$0xff] %vm1637_vm11, %v4449_v33  ;;  %4527 = vst.msk [vmem:[%s14005_s13 + $0x1c8] sm:$0xff] %vm1637_vm11, %v4449_v33  ;;  %v4523_v41 = vld [vmem:[%s14005_s13 + $0xb8] sm:$0x1]  ;;  %v4366_v44 = vld [vmem:[%s14005_s13 + $0xde] sm:$0x1] }
 0x467   :  { %4254 = vst.msk [vmem:[%s14005_s13 + $0xe4] sm:$0x1] %vm1357_vm10, %v4238_v35  ;;  %4286 = vst.msk [vmem:[%s14005_s13 + $0xe5] sm:$0x1] %vm1357_vm10, %v4270_v36  ;;  %v5075_v43 = vld [vmem:[%s14006_s14 + $0x138] sm:$0xff]  ;;  %v5076_v16 = vld [vmem:[%s14006_s14 + $0x140] sm:$0xff] }
 0x468   :  { %4318 = vst.msk [vmem:[%s14005_s13 + $0xe6] sm:$0x1] %vm1357_vm10, %v4302_v37  ;;  %4350 = vst.msk [vmem:[%s14005_s13 + $0xe7] sm:$0x1] %vm1357_vm10, %v4334_v38  ;;  %v4736_v45 = vld [vmem:[%s14006_s14 + $0x334] sm:$0x1] }
 0x469   :  { %4456 = vst.msk [vmem:[%s14005_s13 + $0x80] sm:$0xff] %vm1637_vm11, %v4450_v39  ;;  %4528 = vst.msk [vmem:[%s14005_s13 + $0x1d0] sm:$0xff] %vm1637_vm11, %v4450_v39  ;;  %v4768_v47 = vld [vmem:[%s14006_s14 + $0x334] sm:$0x1]  ;;  %v5077_v17 = vld [vmem:[%s14006_s14 + $0x148] sm:$0x1] }
 0x46a   :  { %4457 = vst.msk [vmem:[%s14005_s13 + $0x88] sm:$0x1] %vm1357_vm10, %v4451_v40  ;;  %4529 = vst.msk [vmem:[%s14005_s13 + $0x1d8] sm:$0x1] %vm1357_vm10, %v4523_v41  ;;  %v4800_v13 = vld [vmem:[%s14006_s14 + $0x334] sm:$0x1] }
 0x46b   :  { %5326 = vst.msk [vmem:[%s14007_s15 + $0x13c] sm:$0xff] %vm1324_vm9, %v3367_v42  ;;  %v4832_v15 = vld [vmem:[%s14006_s14 + $0x334] sm:$0x1]  ;;  %v5089_v18 = vld [vmem:[%s14006_s14 + $0x148] sm:$0x1]  ;;  %v4425_v26 = vld [vmem:[%s14005_s13 + $0xd8] sm:$0xff] }
 0x46c   :  { %5081 = vst.msk [vmem:[%s14006_s14 + $0x150] sm:$0xff] %vm1637_vm11, %v5075_v43  ;;  %5093 = vst.msk [vmem:[%s14006_s14 + $0x168] sm:$0xff] %vm1637_vm11, %v5075_v43  ;;  %v5101_v19 = vld [vmem:[%s14006_s14 + $0x148] sm:$0x1]  ;;  %v4864_v24 = vld [vmem:[%s14006_s14 + $0x33b] sm:$0x1] }
 0x46d   :  { %5105 = vst.msk [vmem:[%s14006_s14 + $0x180] sm:$0xff] %vm1637_vm11, %v5075_v43  ;;  %5117 = vst.msk [vmem:[%s14006_s14 + $0x198] sm:$0xff] %vm1637_vm11, %v5075_v43  ;;  %v5113_v20 = vld [vmem:[%s14006_s14 + $0x148] sm:$0x1]  ;;  %v4896_v27 = vld [vmem:[%s14006_s14 + $0x33b] sm:$0x1] }
 0x46e   :  { %5129 = vst.msk [vmem:[%s14006_s14 + $0x1b0] sm:$0xff] %vm1637_vm11, %v5075_v43  ;;  %5141 = vst.msk [vmem:[%s14006_s14 + $0x1c8] sm:$0xff] %vm1637_vm11, %v5075_v43  ;;  %v5125_v21 = vld [vmem:[%s14006_s14 + $0x148] sm:$0x1]  ;;  %v4928_v28 = vld [vmem:[%s14006_s14 + $0x33b] sm:$0x1] }
 0x46f   :  { %5153 = vst.msk [vmem:[%s14006_s14 + $0x1e0] sm:$0xff] %vm1637_vm11, %v5075_v43  ;;  %5082 = vst.msk [vmem:[%s14006_s14 + $0x158] sm:$0xff] %vm1637_vm11, %v5076_v16  ;;  %v5137_v22 = vld [vmem:[%s14006_s14 + $0x148] sm:$0x1]  ;;  %v4426_v48 = vld [vmem:[%s14005_s13 + $0xe0] sm:$0xff] }
 0x470   :  { %4382 = vst.msk [vmem:[%s14005_s13 + $0xe8] sm:$0x1] %vm1357_vm10, %v4366_v44  ;;  %4752 = vst.msk [vmem:[%s14006_s14 + $0x330] sm:$0x1] %vm1357_vm10, %v4736_v45  ;;  %v5149_v23 = vld [vmem:[%s14006_s14 + $0x148] sm:$0x1] }
 0x471   :  { %4784 = vst.msk [vmem:[%s14006_s14 + $0x331] sm:$0x1] %vm1357_vm10, %v4768_v47  ;;  %4816 = vst.msk [vmem:[%s14006_s14 + $0x332] sm:$0x1] %vm1357_vm10, %v4800_v13  ;;  %v4960_v49 = vld [vmem:[%s14006_s14 + $0x33b] sm:$0x1]  ;;  %v1299_v47 = vpop.permute.xlu0 %1298 }
 0x472   :  { %4848 = vst.msk [vmem:[%s14006_s14 + $0x333] sm:$0x1] %vm1357_vm10, %v4832_v15  ;;  %5083 = vst.msk [vmem:[%s14006_s14 + $0x160] sm:$0x1] %vm1357_vm10, %v5077_v17  ;;  %v4992_v50 = vld [vmem:[%s14006_s14 + $0x33b] sm:$0x1] }
 0x473   :  { %5094 = vst.msk [vmem:[%s14006_s14 + $0x170] sm:$0xff] %vm1637_vm11, %v5076_v16  ;;  %5106 = vst.msk [vmem:[%s14006_s14 + $0x188] sm:$0xff] %vm1637_vm11, %v5076_v16  ;;  %v4112_v51 = vld [vmem:[%s14005_s13 + $0x110] sm:$0x1]  ;;  %v4144_v52 = vld [vmem:[%s14005_s13 + $0x10f] sm:$0x1] }
 0x474   :  { %5095 = vst.msk [vmem:[%s14006_s14 + $0x178] sm:$0x1] %vm1357_vm10, %v5089_v18  ;;  %5107 = vst.msk [vmem:[%s14006_s14 + $0x190] sm:$0x1] %vm1357_vm10, %v5101_v19  ;;  %v4176_v53 = vld [vmem:[%s14005_s13 + $0x10e] sm:$0x1] }
 0x475   :  { %5118 = vst.msk [vmem:[%s14006_s14 + $0x1a0] sm:$0xff] %vm1637_vm11, %v5076_v16  ;;  %5130 = vst.msk [vmem:[%s14006_s14 + $0x1b8] sm:$0xff] %vm1637_vm11, %v5076_v16  ;;  %v4208_v56 = vld [vmem:[%s14005_s13 + $0x10d] sm:$0x1]  ;;  %v4240_v59 = vld [vmem:[%s14005_s13 + $0x112] sm:$0x1] }
 0x476   :  { %5142 = vst.msk [vmem:[%s14006_s14 + $0x1d0] sm:$0xff] %vm1637_vm11, %v5076_v16  ;;  %5154 = vst.msk [vmem:[%s14006_s14 + $0x1e8] sm:$0xff] %vm1637_vm11, %v5076_v16  ;;  %v4272_v60 = vld [vmem:[%s14005_s13 + $0x111] sm:$0x1]  ;;  %v4304_v61 = vld [vmem:[%s14005_s13 + $0x110] sm:$0x1] }
 0x477   :  { %5119 = vst.msk [vmem:[%s14006_s14 + $0x1a8] sm:$0x1] %vm1357_vm10, %v5113_v20  ;;  %5131 = vst.msk [vmem:[%s14006_s14 + $0x1c0] sm:$0x1] %vm1357_vm10, %v5125_v21  ;;  %v4427_v54 = vld [vmem:[%s14005_s13 + $0xe8] sm:$0x1] }
 0x478   :  { %5143 = vst.msk [vmem:[%s14006_s14 + $0x1d8] sm:$0x1] %vm1357_vm10, %v5137_v22  ;;  %5155 = vst.msk [vmem:[%s14006_s14 + $0x1f0] sm:$0x1] %vm1357_vm10, %v5149_v23  ;;  %v4499_v55 = vld [vmem:[%s14005_s13 + $0xe8] sm:$0x1] }
 0x479   :  { %4880 = vst.msk [vmem:[%s14006_s14 + $0x33c] sm:$0x1] %vm1357_vm10, %v4864_v24  ;;  %4912 = vst.msk [vmem:[%s14006_s14 + $0x33d] sm:$0x1] %vm1357_vm10, %v4896_v27  ;;  %v5078_v58 = vld [vmem:[%s14006_s14 + $0x330] sm:$0xff] }
 0x47a   :  { %4679 = vst.msk [vmem:[%s14006_s14 + $0x124] sm:$0xff] %vm1227_vm5, %v2235_v25  ;;  %4683 = vst.msk [vmem:[%s14006_s14 + $0x2bc] sm:$0xff] %vm1227_vm5, %v2243_v57  ;;  %v4336_v62 = vld [vmem:[%s14005_s13 + $0x10f] sm:$0x1]  ;;  %v4368_v63 = vld [vmem:[%s14005_s13 + $0x10e] sm:$0x1] }
 0x47b   :  { %4431 = vst.msk [vmem:[%s14005_s13 + $0x48] sm:$0xff] %vm1637_vm11, %v4425_v26  ;;  %4503 = vst.msk [vmem:[%s14005_s13 + $0x198] sm:$0xff] %vm1637_vm11, %v4425_v26  ;;  %v5336_v0 = vld [vmem:[%s14007_s15 + $0xb0] sm:$0x1]  ;;  %v5368_v1 = vld [vmem:[%s14007_s15 + $0xb1] sm:$0x1]  ;;  %v1303_v26 = vpop.permute.xlu0 %1302 }
 0x47c   :  { %4944 = vst.msk [vmem:[%s14006_s14 + $0x33e] sm:$0x1] %vm1357_vm10, %v4928_v28  ;;  %4976 = vst.msk [vmem:[%s14006_s14 + $0x33f] sm:$0x1] %vm1357_vm10, %v4960_v49  ;;  %v5400_v2 = vld [vmem:[%s14007_s15 + $0xb2] sm:$0x1] }
 0x47d   :  { %4432 = vst.msk [vmem:[%s14005_s13 + $0x50] sm:$0xff] %vm1637_vm11, %v4426_v48  ;;  %4504 = vst.msk [vmem:[%s14005_s13 + $0x1a0] sm:$0xff] %vm1637_vm11, %v4426_v48  ;;  %v5432_v3 = vld [vmem:[%s14007_s15 + $0xb3] sm:$0x1]  ;;  %v5464_v4 = vld [vmem:[%s14007_s15 + $0xac] sm:$0x1] }
 0x47e   :  { %5008 = vst.msk [vmem:[%s14006_s14 + $0x340] sm:$0x1] %vm1357_vm10, %v4992_v50  ;;  %4128 = vst.msk [vmem:[%s14005_s13 + $0x108] sm:$0x1] %vm1357_vm10, %v4112_v51  ;;  %v5496_v5 = vld [vmem:[%s14007_s15 + $0xad] sm:$0x1] }
 0x47f   :  { %4160 = vst.msk [vmem:[%s14005_s13 + $0x109] sm:$0x1] %vm1357_vm10, %v4144_v52  ;;  %4192 = vst.msk [vmem:[%s14005_s13 + $0x10a] sm:$0x1] %vm1357_vm10, %v4176_v53  ;;  %v5528_v7 = vld [vmem:[%s14007_s15 + $0xae] sm:$0x1] }
 0x480   :  { %4433 = vst.msk [vmem:[%s14005_s13 + $0x58] sm:$0x1] %vm1357_vm10, %v4427_v54  ;;  %4505 = vst.msk [vmem:[%s14005_s13 + $0x1a8] sm:$0x1] %vm1357_vm10, %v4499_v55  ;;  %v5560_v8 = vld [vmem:[%s14007_s15 + $0xaf] sm:$0x1] }
 0x481   :  { %4224 = vst.msk [vmem:[%s14005_s13 + $0x10b] sm:$0x1] %vm1357_vm10, %v4208_v56  ;;  %4256 = vst.msk [vmem:[%s14005_s13 + $0x114] sm:$0x1] %vm1357_vm10, %v4240_v59  ;;  %v5592_v9 = vld [vmem:[%s14007_s15 + $0xb0] sm:$0x1] }
 0x482   :  { %5084 = vst.msk [vmem:[%s14006_s14 + $0x348] sm:$0xff] %vm1637_vm11, %v5078_v58  ;;  %5096 = vst.msk [vmem:[%s14006_s14 + $0x360] sm:$0xff] %vm1637_vm11, %v5078_v58  ;;  %v4114_v35 = vld [vmem:[%s14005_s13 + $0x140] sm:$0x1]  ;;  %v4146_v36 = vld [vmem:[%s14005_s13 + $0x13f] sm:$0x1] }
 0x483   :  { %5108 = vst.msk [vmem:[%s14006_s14 + $0x378] sm:$0xff] %vm1637_vm11, %v5078_v58  ;;  %5120 = vst.msk [vmem:[%s14006_s14 + $0x390] sm:$0xff] %vm1637_vm11, %v5078_v58  ;;  %v5079_v10 = vld [vmem:[%s14006_s14 + $0x338] sm:$0xff]  ;;  %v4242_v42 = vld [vmem:[%s14005_s13 + $0x142] sm:$0x1] }
 0x484   :  { %5132 = vst.msk [vmem:[%s14006_s14 + $0x3a8] sm:$0xff] %vm1637_vm11, %v5078_v58  ;;  %5144 = vst.msk [vmem:[%s14006_s14 + $0x3c0] sm:$0xff] %vm1637_vm11, %v5078_v58  ;;  %v4178_v37 = vld [vmem:[%s14005_s13 + $0x13e] sm:$0x1]  ;;  %v4210_v41 = vld [vmem:[%s14005_s13 + $0x13d] sm:$0x1] }
 0x485   :  { %5156 = vst.msk [vmem:[%s14006_s14 + $0x3d8] sm:$0xff] %vm1637_vm11, %v5078_v58  ;;  %v5080_v11 = vld [vmem:[%s14006_s14 + $0x340] sm:$0x1]  ;;  %5085 = vst.msk [vmem:[%s14006_s14 + $0x350] sm:$0xff] %vm1637_vm11, %v5079_v10  ;;  %v4274_v43 = vld [vmem:[%s14005_s13 + $0x141] sm:$0x1]  ;;  %v2319_v58 = vpop.permute.xlu0 %2318 }
 0x486   :  { %4288 = vst.msk [vmem:[%s14005_s13 + $0x115] sm:$0x1] %vm1357_vm10, %v4272_v60  ;;  %4320 = vst.msk [vmem:[%s14005_s13 + $0x116] sm:$0x1] %vm1357_vm10, %v4304_v61  ;;  %v5092_v12 = vld [vmem:[%s14006_s14 + $0x340] sm:$0x1] }
 0x487   :  { %4352 = vst.msk [vmem:[%s14005_s13 + $0x117] sm:$0x1] %vm1357_vm10, %v4336_v62  ;;  %4384 = vst.msk [vmem:[%s14005_s13 + $0x118] sm:$0x1] %vm1357_vm10, %v4368_v63  ;;  %v5104_v14 = vld [vmem:[%s14006_s14 + $0x340] sm:$0x1] }
 0x488   :  { %5352 = vst.msk [vmem:[%s14007_s15 + $0xa8] sm:$0x1] %vm1357_vm10, %v5336_v0  ;;  %5384 = vst.msk [vmem:[%s14007_s15 + $0xa9] sm:$0x1] %vm1357_vm10, %v5368_v1  ;;  %v5116_v29 = vld [vmem:[%s14006_s14 + $0x340] sm:$0x1] }
 0x489   :  { %5416 = vst.msk [vmem:[%s14007_s15 + $0xaa] sm:$0x1] %vm1357_vm10, %v5400_v2  ;;  %5448 = vst.msk [vmem:[%s14007_s15 + $0xab] sm:$0x1] %vm1357_vm10, %v5432_v3  ;;  %v5128_v30 = vld [vmem:[%s14006_s14 + $0x340] sm:$0x1] }
 0x48a   :  { %5480 = vst.msk [vmem:[%s14007_s15 + $0xb4] sm:$0x1] %vm1357_vm10, %v5464_v4  ;;  %5512 = vst.msk [vmem:[%s14007_s15 + $0xb5] sm:$0x1] %vm1357_vm10, %v5496_v5  ;;  %v5140_v31 = vld [vmem:[%s14006_s14 + $0x340] sm:$0x1] }
 0x48b   :  { %4685 = vst.msk [vmem:[%s14006_s14 + $0x2ec] sm:$0xff] %vm1227_vm5, %v2247_v6  ;;  %v5152_v32 = vld [vmem:[%s14006_s14 + $0x340] sm:$0x1]  ;;  %v4401_v33 = vld [vmem:[%s14005_s13 + $0x108] sm:$0xff]  ;;  %4687 = vst.msk [vmem:[%s14006_s14 + $0x31c] sm:$0xff] %vm1227_vm5, %v2251_v34 }
 0x48c   :  { %5544 = vst.msk [vmem:[%s14007_s15 + $0xb6] sm:$0x1] %vm1357_vm10, %v5528_v7  ;;  %5576 = vst.msk [vmem:[%s14007_s15 + $0xb7] sm:$0x1] %vm1357_vm10, %v5560_v8  ;;  %v4306_v45 = vld [vmem:[%s14005_s13 + $0x140] sm:$0x1]  ;;  %v2335_v7 = vpop.permute.xlu0 %2334 }
 0x48d   :  { %5608 = vst.msk [vmem:[%s14007_s15 + $0xb8] sm:$0x1] %vm1357_vm10, %v5592_v9  ;;  %5086 = vst.msk [vmem:[%s14006_s14 + $0x358] sm:$0x1] %vm1357_vm10, %v5080_v11  ;;  %v4338_v46 = vld [vmem:[%s14005_s13 + $0x13f] sm:$0x1] }
 0x48e   :  { %5097 = vst.msk [vmem:[%s14006_s14 + $0x368] sm:$0xff] %vm1637_vm11, %v5079_v10  ;;  %5109 = vst.msk [vmem:[%s14006_s14 + $0x380] sm:$0xff] %vm1637_vm11, %v5079_v10  ;;  %v4402_v38 = vld [vmem:[%s14005_s13 + $0x110] sm:$0xff]  ;;  %v4403_v39 = vld [vmem:[%s14005_s13 + $0x118] sm:$0x1] }
 0x48f   :  { %5098 = vst.msk [vmem:[%s14006_s14 + $0x370] sm:$0x1] %vm1357_vm10, %v5092_v12  ;;  %5110 = vst.msk [vmem:[%s14006_s14 + $0x388] sm:$0x1] %vm1357_vm10, %v5104_v14  ;;  %v4475_v40 = vld [vmem:[%s14005_s13 + $0x118] sm:$0x1] }
 0x490   :  { %5121 = vst.msk [vmem:[%s14006_s14 + $0x398] sm:$0xff] %vm1637_vm11, %v5079_v10  ;;  %5133 = vst.msk [vmem:[%s14006_s14 + $0x3b0] sm:$0xff] %vm1637_vm11, %v5079_v10  ;;  %v5701_v44 = vld [vmem:[%s14007_s15 + $0xa8] sm:$0xff]  ;;  %v4370_v16 = vld [vmem:[%s14005_s13 + $0x13e] sm:$0x1] }
 0x491   :  { %5145 = vst.msk [vmem:[%s14006_s14 + $0x3c8] sm:$0xff] %vm1637_vm11, %v5079_v10  ;;  %5157 = vst.msk [vmem:[%s14006_s14 + $0x3e0] sm:$0xff] %vm1637_vm11, %v5079_v10  ;;  %v5338_v17 = vld [vmem:[%s14007_s15 + $0xe0] sm:$0x1]  ;;  %v5370_v18 = vld [vmem:[%s14007_s15 + $0xe1] sm:$0x1] }
 0x492   :  { %5122 = vst.msk [vmem:[%s14006_s14 + $0x3a0] sm:$0x1] %vm1357_vm10, %v5116_v29  ;;  %5134 = vst.msk [vmem:[%s14006_s14 + $0x3b8] sm:$0x1] %vm1357_vm10, %v5128_v30  ;;  %v5402_v19 = vld [vmem:[%s14007_s15 + $0xe2] sm:$0x1] }
 0x493   :  { %5146 = vst.msk [vmem:[%s14006_s14 + $0x3d0] sm:$0x1] %vm1357_vm10, %v5140_v31  ;;  %5158 = vst.msk [vmem:[%s14006_s14 + $0x3e8] sm:$0x1] %vm1357_vm10, %v5152_v32  ;;  %v5702_v13 = vld [vmem:[%s14007_s15 + $0xb0] sm:$0xff] }
 0x494   :  { %4407 = vst.msk [vmem:[%s14005_s13 + $0x18] sm:$0xff] %vm1637_vm11, %v4401_v33  ;;  %4479 = vst.msk [vmem:[%s14005_s13 + $0x168] sm:$0xff] %vm1637_vm11, %v4401_v33  ;;  %v5703_v15 = vld [vmem:[%s14007_s15 + $0xb8] sm:$0x1]  ;;  %v5434_v20 = vld [vmem:[%s14007_s15 + $0xe3] sm:$0x1] }
 0x495   :  { %4130 = vst.msk [vmem:[%s14005_s13 + $0x138] sm:$0x1] %vm1357_vm10, %v4114_v35  ;;  %4162 = vst.msk [vmem:[%s14005_s13 + $0x139] sm:$0x1] %vm1357_vm10, %v4146_v36  ;;  %v5466_v21 = vld [vmem:[%s14007_s15 + $0xdc] sm:$0x1]  ;;  %v3353_v35 = vpop.permute.xlu0 %3352 }
 0x496   :  { %4194 = vst.msk [vmem:[%s14005_s13 + $0x13a] sm:$0x1] %vm1357_vm10, %v4178_v37  ;;  %4409 = vst.msk [vmem:[%s14005_s13 + $0x28] sm:$0x1] %vm1357_vm10, %v4403_v39  ;;  %v5498_v22 = vld [vmem:[%s14007_s15 + $0xdd] sm:$0x1] }
 0x497   :  { %4408 = vst.msk [vmem:[%s14005_s13 + $0x20] sm:$0xff] %vm1637_vm11, %v4402_v38  ;;  %4480 = vst.msk [vmem:[%s14005_s13 + $0x170] sm:$0xff] %vm1637_vm11, %v4402_v38  ;;  %v5530_v23 = vld [vmem:[%s14007_s15 + $0xde] sm:$0x1]  ;;  %v5562_v24 = vld [vmem:[%s14007_s15 + $0xdf] sm:$0x1] }
 0x498   :  { %4481 = vst.msk [vmem:[%s14005_s13 + $0x178] sm:$0x1] %vm1357_vm10, %v4475_v40  ;;  %4226 = vst.msk [vmem:[%s14005_s13 + $0x13b] sm:$0x1] %vm1357_vm10, %v4210_v41  ;;  %v5594_v25 = vld [vmem:[%s14007_s15 + $0xe0] sm:$0x1] }
 0x499   :  { %4258 = vst.msk [vmem:[%s14005_s13 + $0x144] sm:$0x1] %vm1357_vm10, %v4242_v42  ;;  %4290 = vst.msk [vmem:[%s14005_s13 + $0x145] sm:$0x1] %vm1357_vm10, %v4274_v43  ;;  %v4116_v27 = vld [vmem:[%s14005_s13 + $0x2a8] sm:$0x1] }
 0x49a   :  { %5707 = vst.msk [vmem:[%s14007_s15 + $0x168] sm:$0xff] %vm1637_vm11, %v5701_v44  ;;  %5708 = vst.msk [vmem:[%s14007_s15 + $0x170] sm:$0xff] %vm1637_vm11, %v5702_v13  ;;  %v4148_v28 = vld [vmem:[%s14005_s13 + $0x2a7] sm:$0x1]  ;;  %v4180_v48 = vld [vmem:[%s14005_s13 + $0x2a6] sm:$0x1] }
 0x49b   :  { %4322 = vst.msk [vmem:[%s14005_s13 + $0x146] sm:$0x1] %vm1357_vm10, %v4306_v45  ;;  %4354 = vst.msk [vmem:[%s14005_s13 + $0x147] sm:$0x1] %vm1357_vm10, %v4338_v46  ;;  %v4212_v49 = vld [vmem:[%s14005_s13 + $0x2a5] sm:$0x1] }
 0x49c   :  { %4102 = vst.msk [vmem:[%s14005_s13 + $0x2d4] sm:$0xff] %vm1324_vm9, %v1299_v47  ;;  %4104 = vst.msk [vmem:[%s14005_s13 + $0x304] sm:$0xff] %vm1324_vm9, %v1303_v26  ;;  %v4244_v50 = vld [vmem:[%s14005_s13 + $0x2aa] sm:$0x1]  ;;  %v4276_v51 = vld [vmem:[%s14005_s13 + $0x2a9] sm:$0x1]  ;;  %v3357_v47 = vpop.permute.xlu0 %3356 }
 0x49d   :  { %5709 = vst.msk [vmem:[%s14007_s15 + $0x178] sm:$0x1] %vm1357_vm10, %v5703_v15  ;;  %4386 = vst.msk [vmem:[%s14005_s13 + $0x148] sm:$0x1] %vm1357_vm10, %v4370_v16  ;;  %v4308_v52 = vld [vmem:[%s14005_s13 + $0x2a8] sm:$0x1] }
 0x49e   :  { %5354 = vst.msk [vmem:[%s14007_s15 + $0xd8] sm:$0x1] %vm1357_vm10, %v5338_v17  ;;  %5386 = vst.msk [vmem:[%s14007_s15 + $0xd9] sm:$0x1] %vm1357_vm10, %v5370_v18  ;;  %v4340_v53 = vld [vmem:[%s14005_s13 + $0x2a7] sm:$0x1] }
 0x49f   :  { %5418 = vst.msk [vmem:[%s14007_s15 + $0xda] sm:$0x1] %vm1357_vm10, %v5402_v19  ;;  %5450 = vst.msk [vmem:[%s14007_s15 + $0xdb] sm:$0x1] %vm1357_vm10, %v5434_v20  ;;  %v4372_v54 = vld [vmem:[%s14005_s13 + $0x2a6] sm:$0x1] }
 0x4a0   :  { %5482 = vst.msk [vmem:[%s14007_s15 + $0xe4] sm:$0x1] %vm1357_vm10, %v5466_v21  ;;  %5514 = vst.msk [vmem:[%s14007_s15 + $0xe5] sm:$0x1] %vm1357_vm10, %v5498_v22  ;;  %v5340_v55 = vld [vmem:[%s14007_s15 + $0x110] sm:$0x1] }
 0x4a1   :  { %5546 = vst.msk [vmem:[%s14007_s15 + $0xe6] sm:$0x1] %vm1357_vm10, %v5530_v23  ;;  %5578 = vst.msk [vmem:[%s14007_s15 + $0xe7] sm:$0x1] %vm1357_vm10, %v5562_v24  ;;  %v5372_v56 = vld [vmem:[%s14007_s15 + $0x111] sm:$0x1] }
 0x4a2   :  { %5610 = vst.msk [vmem:[%s14007_s15 + $0xe8] sm:$0x1] %vm1357_vm10, %v5594_v25  ;;  %4132 = vst.msk [vmem:[%s14005_s13 + $0x2a0] sm:$0x1] %vm1357_vm10, %v4116_v27  ;;  %v5404_v57 = vld [vmem:[%s14007_s15 + $0x112] sm:$0x1]  ;;  %v3361_v27 = vpop.permute.xlu0 %3360 }
 0x4a3   :  { %4164 = vst.msk [vmem:[%s14005_s13 + $0x2a1] sm:$0x1] %vm1357_vm10, %v4148_v28  ;;  %4196 = vst.msk [vmem:[%s14005_s13 + $0x2a2] sm:$0x1] %vm1357_vm10, %v4180_v48  ;;  %v5436_v59 = vld [vmem:[%s14007_s15 + $0x113] sm:$0x1] }
 0x4a4   :  { %4228 = vst.msk [vmem:[%s14005_s13 + $0x2a3] sm:$0x1] %vm1357_vm10, %v4212_v49  ;;  %4260 = vst.msk [vmem:[%s14005_s13 + $0x2ac] sm:$0x1] %vm1357_vm10, %v4244_v50  ;;  %v5468_v60 = vld [vmem:[%s14007_s15 + $0x10c] sm:$0x1] }
 0x4a5   :  { %4292 = vst.msk [vmem:[%s14005_s13 + $0x2ad] sm:$0x1] %vm1357_vm10, %v4276_v51  ;;  %4324 = vst.msk [vmem:[%s14005_s13 + $0x2ae] sm:$0x1] %vm1357_vm10, %v4308_v52  ;;  %v5500_v61 = vld [vmem:[%s14007_s15 + $0x10d] sm:$0x1] }
 0x4a6   :  { %4356 = vst.msk [vmem:[%s14005_s13 + $0x2af] sm:$0x1] %vm1357_vm10, %v4340_v53  ;;  %4388 = vst.msk [vmem:[%s14005_s13 + $0x2b0] sm:$0x1] %vm1357_vm10, %v4372_v54  ;;  %v5532_v62 = vld [vmem:[%s14007_s15 + $0x10e] sm:$0x1] }
 0x4a7   :  { %5356 = vst.msk [vmem:[%s14007_s15 + $0x108] sm:$0x1] %vm1357_vm10, %v5340_v55  ;;  %5388 = vst.msk [vmem:[%s14007_s15 + $0x109] sm:$0x1] %vm1357_vm10, %v5372_v56  ;;  %v5564_v63 = vld [vmem:[%s14007_s15 + $0x10f] sm:$0x1] }
 0x4a8   :  { %5420 = vst.msk [vmem:[%s14007_s15 + $0x10a] sm:$0x1] %vm1357_vm10, %v5404_v57  ;;  %5452 = vst.msk [vmem:[%s14007_s15 + $0x10b] sm:$0x1] %vm1357_vm10, %v5436_v59  ;;  %v5596_v0 = vld [vmem:[%s14007_s15 + $0x110] sm:$0x1] }
 0x4a9   :  { %4705 = vst.msk [vmem:[%s14006_s14 + $0x94] sm:$0xff] %vm1324_vm9, %v2319_v58  ;;  %v5629_v1 = vld [vmem:[%s14007_s15 + $0xd8] sm:$0xff]  ;;  %v5342_v2 = vld [vmem:[%s14007_s15 + $0x140] sm:$0x1]  ;;  %v5374_v3 = vld [vmem:[%s14007_s15 + $0x141] sm:$0x1] }
 0x4aa   :  { %5484 = vst.msk [vmem:[%s14007_s15 + $0x114] sm:$0x1] %vm1357_vm10, %v5468_v60  ;;  %5516 = vst.msk [vmem:[%s14007_s15 + $0x115] sm:$0x1] %vm1357_vm10, %v5500_v61  ;;  %v5630_v4 = vld [vmem:[%s14007_s15 + $0xe0] sm:$0xff]  ;;  %v5318_v34 = vld [vmem:[%s14007_s15 + $0x334] sm:$0xff]  ;;  %v3365_v60 = vpop.permute.xlu0 %3364 }
 0x4ab   :  { %5548 = vst.msk [vmem:[%s14007_s15 + $0x116] sm:$0x1] %vm1357_vm10, %v5532_v62  ;;  %5580 = vst.msk [vmem:[%s14007_s15 + $0x117] sm:$0x1] %vm1357_vm10, %v5564_v63  ;;  %v5631_v5 = vld [vmem:[%s14007_s15 + $0xe8] sm:$0x1]  ;;  %3382 = vrot.lane.b32.xlu1 %v5318_v34, %s5835_s22 }
 0x4ac   :  { %5612 = vst.msk [vmem:[%s14007_s15 + $0x118] sm:$0x1] %vm1357_vm10, %v5596_v0  ;;  %v5727_v6 = vld [vmem:[%s14007_s15 + $0xe8] sm:$0x1]  ;;  %5358 = vst.msk [vmem:[%s14007_s15 + $0x138] sm:$0x1] %vm1357_vm10, %v5342_v2 }
 0x4ad   :  { %5635 = vst.msk [vmem:[%s14007_s15 + $0x18] sm:$0xff] %vm1637_vm11, %v5629_v1  ;;  %5731 = vst.msk [vmem:[%s14007_s15 + $0x198] sm:$0xff] %vm1637_vm11, %v5629_v1  ;;  %v5406_v8 = vld [vmem:[%s14007_s15 + $0x142] sm:$0x1]  ;;  %v5438_v9 = vld [vmem:[%s14007_s15 + $0x143] sm:$0x1] }
 0x4ae   :  { %5390 = vst.msk [vmem:[%s14007_s15 + $0x139] sm:$0x1] %vm1357_vm10, %v5374_v3  ;;  %5637 = vst.msk [vmem:[%s14007_s15 + $0x28] sm:$0x1] %vm1357_vm10, %v5631_v5  ;;  %v5470_v10 = vld [vmem:[%s14007_s15 + $0x13c] sm:$0x1] }
 0x4af   :  { %5636 = vst.msk [vmem:[%s14007_s15 + $0x20] sm:$0xff] %vm1637_vm11, %v5630_v4  ;;  %5732 = vst.msk [vmem:[%s14007_s15 + $0x1a0] sm:$0xff] %vm1637_vm11, %v5630_v4  ;;  %v4452_v11 = vld [vmem:[%s14005_s13 + $0x2a0] sm:$0xff]  ;;  %v5502_v12 = vld [vmem:[%s14007_s15 + $0x13d] sm:$0x1] }
 0x4b0   :  { %5733 = vst.msk [vmem:[%s14007_s15 + $0x1a8] sm:$0x1] %vm1357_vm10, %v5727_v6  ;;  %5422 = vst.msk [vmem:[%s14007_s15 + $0x13a] sm:$0x1] %vm1357_vm10, %v5406_v8  ;;  %v5534_v14 = vld [vmem:[%s14007_s15 + $0x13e] sm:$0x1] }
 0x4b1   :  { %4713 = vst.msk [vmem:[%s14006_s14 + $0x28c] sm:$0xff] %vm1324_vm9, %v2335_v7  ;;  %v4453_v29 = vld [vmem:[%s14005_s13 + $0x2a8] sm:$0xff]  ;;  %v4454_v30 = vld [vmem:[%s14005_s13 + $0x2b0] sm:$0x1]  ;;  %v5566_v32 = vld [vmem:[%s14007_s15 + $0x13f] sm:$0x1] }
 0x4b2   :  { %5454 = vst.msk [vmem:[%s14007_s15 + $0x13b] sm:$0x1] %vm1357_vm10, %v5438_v9  ;;  %5486 = vst.msk [vmem:[%s14007_s15 + $0x144] sm:$0x1] %vm1357_vm10, %v5470_v10  ;;  %v4526_v31 = vld [vmem:[%s14005_s13 + $0x2b0] sm:$0x1] }
 0x4b3   :  { %4458 = vst.msk [vmem:[%s14005_s13 + $0x270] sm:$0xff] %vm1637_vm11, %v4452_v11  ;;  %4530 = vst.msk [vmem:[%s14005_s13 + $0x3c0] sm:$0xff] %vm1637_vm11, %v4452_v11  ;;  %v5598_v33 = vld [vmem:[%s14007_s15 + $0x140] sm:$0x1]  ;;  %v5653_v36 = vld [vmem:[%s14007_s15 + $0x108] sm:$0xff]  ;;  %v3369_v11 = vpop.permute.xlu0 %3368 }
 0x4b4   :  { %5518 = vst.msk [vmem:[%s14007_s15 + $0x145] sm:$0x1] %vm1357_vm10, %v5502_v12  ;;  %5550 = vst.msk [vmem:[%s14007_s15 + $0x146] sm:$0x1] %vm1357_vm10, %v5534_v14  ;;  %v4691_v37 = vld [vmem:[%s14006_s14 + $0xc4] sm:$0xff]  ;;  %v5654_v38 = vld [vmem:[%s14007_s15 + $0x110] sm:$0xff] }
 0x4b5   :  { %4459 = vst.msk [vmem:[%s14005_s13 + $0x278] sm:$0xff] %vm1637_vm11, %v4453_v29  ;;  %4531 = vst.msk [vmem:[%s14005_s13 + $0x3c8] sm:$0xff] %vm1637_vm11, %v4453_v29  ;;  %v5655_v39 = vld [vmem:[%s14007_s15 + $0x118] sm:$0x1]  ;;  %2322 = vrot.lane.b32.xlu0 %v4691_v37, %s5848_s1 }
 0x4b6   :  { %4460 = vst.msk [vmem:[%s14005_s13 + $0x280] sm:$0x1] %vm1357_vm10, %v4454_v30  ;;  %4532 = vst.msk [vmem:[%s14005_s13 + $0x3d0] sm:$0x1] %vm1357_vm10, %v4526_v31  ;;  %v5751_v40 = vld [vmem:[%s14007_s15 + $0x118] sm:$0x1] }
 0x4b7   :  { %5582 = vst.msk [vmem:[%s14007_s15 + $0x147] sm:$0x1] %vm1357_vm10, %v5566_v32  ;;  %5614 = vst.msk [vmem:[%s14007_s15 + $0x148] sm:$0x1] %vm1357_vm10, %v5598_v33  ;;  %v4690_v41 = vld [vmem:[%s14006_s14 + $0xac] sm:$0xff]  ;;  %v4693_v42 = vld [vmem:[%s14006_s14 + $0xf4] sm:$0xff] }
 0x4b8   :  { %5319 = vst.msk [vmem:[%s14007_s15 + $0x94] sm:$0xff] %vm1324_vm9, %v3353_v35  ;;  %v4118_v43 = vld [vmem:[%s14005_s13 + $0x2d8] sm:$0x1]  ;;  %v4150_v44 = vld [vmem:[%s14005_s13 + $0x2d7] sm:$0x1]  ;;  %2320 = vrot.lane.b32.xlu1 %v4690_v41, %s5848_s1  ;;  %v3373_v41 = vpop.permute.xlu0 %3372 }
 0x4b9   :  { %5659 = vst.msk [vmem:[%s14007_s15 + $0x48] sm:$0xff] %vm1637_vm11, %v5653_v36  ;;  %5755 = vst.msk [vmem:[%s14007_s15 + $0x1c8] sm:$0xff] %vm1637_vm11, %v5653_v36  ;;  %v4182_v45 = vld [vmem:[%s14005_s13 + $0x2d6] sm:$0x1]  ;;  %v4214_v46 = vld [vmem:[%s14005_s13 + $0x2d5] sm:$0x1] }
 0x4ba   :  { %5660 = vst.msk [vmem:[%s14007_s15 + $0x50] sm:$0xff] %vm1637_vm11, %v5654_v38  ;;  %5756 = vst.msk [vmem:[%s14007_s15 + $0x1d0] sm:$0xff] %vm1637_vm11, %v5654_v38  ;;  %v5677_v13 = vld [vmem:[%s14007_s15 + $0x138] sm:$0xff]  ;;  %2326 = vrot.lane.b32.xlu0 %v4693_v42, %s5848_s1 }
 0x4bb   :  { %5661 = vst.msk [vmem:[%s14007_s15 + $0x58] sm:$0x1] %vm1357_vm10, %v5655_v39  ;;  %5757 = vst.msk [vmem:[%s14007_s15 + $0x1d8] sm:$0x1] %vm1357_vm10, %v5751_v40  ;;  %v4246_v15 = vld [vmem:[%s14005_s13 + $0x2da] sm:$0x1] }
 0x4bc   :  { %4134 = vst.msk [vmem:[%s14005_s13 + $0x2d0] sm:$0x1] %vm1357_vm10, %v4118_v43  ;;  %4166 = vst.msk [vmem:[%s14005_s13 + $0x2d1] sm:$0x1] %vm1357_vm10, %v4150_v44  ;;  %v4278_v16 = vld [vmem:[%s14005_s13 + $0x2d9] sm:$0x1] }
 0x4bd   :  { %4198 = vst.msk [vmem:[%s14005_s13 + $0x2d2] sm:$0x1] %vm1357_vm10, %v4182_v45  ;;  %4230 = vst.msk [vmem:[%s14005_s13 + $0x2d3] sm:$0x1] %vm1357_vm10, %v4214_v46  ;;  %v4692_v17 = vld [vmem:[%s14006_s14 + $0xdc] sm:$0xff]  ;;  %v4695_v21 = vld [vmem:[%s14006_s14 + $0x124] sm:$0xff] }
 0x4be   :  { %5321 = vst.msk [vmem:[%s14007_s15 + $0xc4] sm:$0xff] %vm1324_vm9, %v3357_v47  ;;  %v4310_v18 = vld [vmem:[%s14005_s13 + $0x2d8] sm:$0x1]  ;;  %v4342_v19 = vld [vmem:[%s14005_s13 + $0x2d7] sm:$0x1]  ;;  %v5678_v24 = vld [vmem:[%s14007_s15 + $0x140] sm:$0xff] }
 0x4bf   :  { %5683 = vst.msk [vmem:[%s14007_s15 + $0x78] sm:$0xff] %vm1637_vm11, %v5677_v13  ;;  %v4374_v20 = vld [vmem:[%s14005_s13 + $0x2d6] sm:$0x1]  ;;  %v4120_v22 = vld [vmem:[%s14005_s13 + $0x308] sm:$0x1]  ;;  %5684 = vst.msk [vmem:[%s14007_s15 + $0x80] sm:$0xff] %vm1637_vm11, %v5678_v24 }
 0x4c0   :  { %4262 = vst.msk [vmem:[%s14005_s13 + $0x2dc] sm:$0x1] %vm1357_vm10, %v4246_v15  ;;  %4294 = vst.msk [vmem:[%s14005_s13 + $0x2dd] sm:$0x1] %vm1357_vm10, %v4278_v16  ;;  %v4152_v23 = vld [vmem:[%s14005_s13 + $0x307] sm:$0x1]  ;;  %2324 = vrot.lane.b32.xlu1 %v4692_v17, %s5848_s1 }
 0x4c1   :  { %4326 = vst.msk [vmem:[%s14005_s13 + $0x2de] sm:$0x1] %vm1357_vm10, %v4310_v18  ;;  %4358 = vst.msk [vmem:[%s14005_s13 + $0x2df] sm:$0x1] %vm1357_vm10, %v4342_v19  ;;  %v5679_v25 = vld [vmem:[%s14007_s15 + $0x148] sm:$0x1]  ;;  %2330 = vrot.lane.b32.xlu0 %v4695_v21, %s5848_s1  ;;  %v3371_v21 = vpop.permute.xlu1 %3370 }
 0x4c2   :  { %4390 = vst.msk [vmem:[%s14005_s13 + $0x2e0] sm:$0x1] %vm1357_vm10, %v4374_v20  ;;  %4136 = vst.msk [vmem:[%s14005_s13 + $0x300] sm:$0x1] %vm1357_vm10, %v4120_v22  ;;  %v4184_v26 = vld [vmem:[%s14005_s13 + $0x306] sm:$0x1]  ;;  %v3377_v22 = vpop.permute.xlu0 %3376 }
 0x4c3   :  { %4168 = vst.msk [vmem:[%s14005_s13 + $0x301] sm:$0x1] %vm1357_vm10, %v4152_v23  ;;  %5685 = vst.msk [vmem:[%s14007_s15 + $0x88] sm:$0x1] %vm1357_vm10, %v5679_v25  ;;  %v4216_v28 = vld [vmem:[%s14005_s13 + $0x305] sm:$0x1] }
 0x4c4   :  { %4200 = vst.msk [vmem:[%s14005_s13 + $0x302] sm:$0x1] %vm1357_vm10, %v4184_v26  ;;  %v4248_v48 = vld [vmem:[%s14005_s13 + $0x30a] sm:$0x1]  ;;  %v4280_v49 = vld [vmem:[%s14005_s13 + $0x309] sm:$0x1] }
 0x4c5   :  { %5323 = vst.msk [vmem:[%s14007_s15 + $0xf4] sm:$0xff] %vm1324_vm9, %v3361_v27  ;;  %v4694_v50 = vld [vmem:[%s14006_s14 + $0x10c] sm:$0xff]  ;;  %v4312_v51 = vld [vmem:[%s14005_s13 + $0x308] sm:$0x1]  ;;  %v4344_v52 = vld [vmem:[%s14005_s13 + $0x307] sm:$0x1] }
 0x4c6   :  { %4232 = vst.msk [vmem:[%s14005_s13 + $0x303] sm:$0x1] %vm1357_vm10, %v4216_v28  ;;  %4264 = vst.msk [vmem:[%s14005_s13 + $0x30c] sm:$0x1] %vm1357_vm10, %v4248_v48  ;;  %v4376_v53 = vld [vmem:[%s14005_s13 + $0x306] sm:$0x1]  ;;  %2328 = vrot.lane.b32.xlu1 %v4694_v50, %s5848_s1 }
 0x4c7   :  { %4296 = vst.msk [vmem:[%s14005_s13 + $0x30d] sm:$0x1] %vm1357_vm10, %v4280_v49  ;;  %v4699_v54 = vld [vmem:[%s14006_s14 + $0x2bc] sm:$0xff]  ;;  %4328 = vst.msk [vmem:[%s14005_s13 + $0x30e] sm:$0x1] %vm1357_vm10, %v4312_v51  ;;  %v4428_v57 = vld [vmem:[%s14005_s13 + $0x2d0] sm:$0xff] }
 0x4c8   :  { %4360 = vst.msk [vmem:[%s14005_s13 + $0x30f] sm:$0x1] %vm1357_vm10, %v4344_v52  ;;  %4392 = vst.msk [vmem:[%s14005_s13 + $0x310] sm:$0x1] %vm1357_vm10, %v4376_v53  ;;  %v4721_v55 = vld [vmem:[%s14006_s14 + $0x94] sm:$0x1]  ;;  %2338 = vrot.lane.b32.xlu0 %v4699_v54, %s5848_s1  ;;  %v3375_v54 = vpop.permute.xlu1 %3374 }
 0x4c9   :  { %v4753_v56 = vld [vmem:[%s14006_s14 + $0x94] sm:$0x1]  ;;  %4737 = vst.msk [vmem:[%s14006_s14 + $0x90] sm:$0x1] %vm1357_vm10, %v4721_v55  ;;  %v4701_v61 = vld [vmem:[%s14006_s14 + $0x2ec] sm:$0xff]  ;;  %v4698_v1 = vld [vmem:[%s14006_s14 + $0x2a4] sm:$0xff]  ;;  %v3381_v55 = vpop.permute.xlu0 %3380 }
 0x4ca   :  { %4769 = vst.msk [vmem:[%s14006_s14 + $0x91] sm:$0x1] %vm1357_vm10, %v4753_v56  ;;  %v4785_v58 = vld [vmem:[%s14006_s14 + $0x94] sm:$0x1]  ;;  %v4849_v62 = vld [vmem:[%s14006_s14 + $0x9b] sm:$0x1]  ;;  %2336 = vrot.lane.b32.xlu1 %v4698_v1, %s5848_s1 }
 0x4cb   :  { %v4817_v59 = vld [vmem:[%s14006_s14 + $0x94] sm:$0x1]  ;;  %4434 = vst.msk [vmem:[%s14005_s13 + $0x240] sm:$0xff] %vm1637_vm11, %v4428_v57  ;;  %4506 = vst.msk [vmem:[%s14005_s13 + $0x390] sm:$0xff] %vm1637_vm11, %v4428_v57  ;;  %v4881_v63 = vld [vmem:[%s14006_s14 + $0x9b] sm:$0x1] }
 0x4cc   :  { %4801 = vst.msk [vmem:[%s14006_s14 + $0x92] sm:$0x1] %vm1357_vm10, %v4785_v58  ;;  %4833 = vst.msk [vmem:[%s14006_s14 + $0x93] sm:$0x1] %vm1357_vm10, %v4817_v59  ;;  %v4913_v0 = vld [vmem:[%s14006_s14 + $0x9b] sm:$0x1]  ;;  %2342 = vrot.lane.b32.xlu0 %v4701_v61, %s5848_s1 }
 0x4cd   :  { %5325 = vst.msk [vmem:[%s14007_s15 + $0x124] sm:$0xff] %vm1324_vm9, %v3365_v60  ;;  %v4429_v2 = vld [vmem:[%s14005_s13 + $0x2d8] sm:$0xff]  ;;  %v4430_v3 = vld [vmem:[%s14005_s13 + $0x2e0] sm:$0x1]  ;;  %v4729_v7 = vld [vmem:[%s14006_s14 + $0x28c] sm:$0x1] }
 0x4ce   :  { %v4502_v4 = vld [vmem:[%s14005_s13 + $0x2e0] sm:$0x1]  ;;  %4865 = vst.msk [vmem:[%s14006_s14 + $0x9c] sm:$0x1] %vm1357_vm10, %v4849_v62  ;;  %4897 = vst.msk [vmem:[%s14006_s14 + $0x9d] sm:$0x1] %vm1357_vm10, %v4881_v63 }
 0x4cf   :  { %4929 = vst.msk [vmem:[%s14006_s14 + $0x9e] sm:$0x1] %vm1357_vm10, %v4913_v0  ;;  %4436 = vst.msk [vmem:[%s14005_s13 + $0x250] sm:$0x1] %vm1357_vm10, %v4430_v3  ;;  %v4945_v5 = vld [vmem:[%s14006_s14 + $0x9b] sm:$0x1] }
 0x4d0   :  { %4435 = vst.msk [vmem:[%s14005_s13 + $0x248] sm:$0xff] %vm1637_vm11, %v4429_v2  ;;  %4507 = vst.msk [vmem:[%s14005_s13 + $0x398] sm:$0xff] %vm1637_vm11, %v4429_v2  ;;  %v4977_v6 = vld [vmem:[%s14006_s14 + $0x9b] sm:$0x1]  ;;  %v4761_v8 = vld [vmem:[%s14006_s14 + $0x28c] sm:$0x1] }
 0x4d1   :  { %4508 = vst.msk [vmem:[%s14005_s13 + $0x3a0] sm:$0x1] %vm1357_vm10, %v4502_v4  ;;  %4961 = vst.msk [vmem:[%s14006_s14 + $0x9f] sm:$0x1] %vm1357_vm10, %v4945_v5  ;;  %v4793_v9 = vld [vmem:[%s14006_s14 + $0x28c] sm:$0x1]  ;;  %v3379_v4 = vpop.permute.xlu1 %3378  ;;  %v1307_v5 = vpop.permute.xlu0 %1306 }
 0x4d2   :  { %4993 = vst.msk [vmem:[%s14006_s14 + $0xa0] sm:$0x1] %vm1357_vm10, %v4977_v6  ;;  %4745 = vst.msk [vmem:[%s14006_s14 + $0x288] sm:$0x1] %vm1357_vm10, %v4729_v7  ;;  %v4825_v10 = vld [vmem:[%s14006_s14 + $0x28c] sm:$0x1] }
 0x4d3   :  { %v4404_v12 = vld [vmem:[%s14005_s13 + $0x300] sm:$0xff]  ;;  %4777 = vst.msk [vmem:[%s14006_s14 + $0x289] sm:$0x1] %vm1357_vm10, %v4761_v8  ;;  %4809 = vst.msk [vmem:[%s14006_s14 + $0x28a] sm:$0x1] %vm1357_vm10, %v4793_v9  ;;  %v4700_v31 = vld [vmem:[%s14006_s14 + $0x2d4] sm:$0xff] }
 0x4d4   :  { %v4703_v14 = vld [vmem:[%s14006_s14 + $0x31c] sm:$0xff]  ;;  %4841 = vst.msk [vmem:[%s14006_s14 + $0x28b] sm:$0x1] %vm1357_vm10, %v4825_v10  ;;  %v4857_v29 = vld [vmem:[%s14006_s14 + $0x293] sm:$0x1]  ;;  %v4405_v32 = vld [vmem:[%s14005_s13 + $0x308] sm:$0xff] }
 0x4d5   :  { %v4889_v30 = vld [vmem:[%s14006_s14 + $0x293] sm:$0x1]  ;;  %5327 = vst.msk [vmem:[%s14007_s15 + $0x28c] sm:$0xff] %vm1324_vm9, %v3369_v11  ;;  %v4406_v33 = vld [vmem:[%s14005_s13 + $0x310] sm:$0x1]  ;;  %2340 = vrot.lane.b32.xlu1 %v4700_v31, %s5848_s1 }
 0x4d6   :  { %4410 = vst.msk [vmem:[%s14005_s13 + $0x210] sm:$0xff] %vm1637_vm11, %v4404_v12  ;;  %v4478_v34 = vld [vmem:[%s14005_s13 + $0x310] sm:$0x1]  ;;  %4482 = vst.msk [vmem:[%s14005_s13 + $0x360] sm:$0xff] %vm1637_vm11, %v4404_v12  ;;  %v4921_v35 = vld [vmem:[%s14006_s14 + $0x293] sm:$0x1] }
 0x4d7   :  { %4873 = vst.msk [vmem:[%s14006_s14 + $0x294] sm:$0x1] %vm1357_vm10, %v4857_v29  ;;  %4905 = vst.msk [vmem:[%s14006_s14 + $0x295] sm:$0x1] %vm1357_vm10, %v4889_v30  ;;  %v4953_v36 = vld [vmem:[%s14006_s14 + $0x293] sm:$0x1]  ;;  %2346 = vrot.lane.b32.xlu0 %v4703_v14, %s5848_s1 }
 0x4d8   :  { %4411 = vst.msk [vmem:[%s14005_s13 + $0x218] sm:$0xff] %vm1637_vm11, %v4405_v32  ;;  %4483 = vst.msk [vmem:[%s14005_s13 + $0x368] sm:$0xff] %vm1637_vm11, %v4405_v32  ;;  %v4985_v37 = vld [vmem:[%s14006_s14 + $0x293] sm:$0x1]  ;;  %v5335_v39 = vld [vmem:[%s14007_s15 + $0x98] sm:$0x1] }
 0x4d9   :  { %4412 = vst.msk [vmem:[%s14005_s13 + $0x220] sm:$0x1] %vm1357_vm10, %v4406_v33  ;;  %4484 = vst.msk [vmem:[%s14005_s13 + $0x370] sm:$0x1] %vm1357_vm10, %v4478_v34  ;;  %v5009_v38 = vld [vmem:[%s14006_s14 + $0x90] sm:$0xff]  ;;  %v4702_v45 = vld [vmem:[%s14006_s14 + $0x304] sm:$0xff] }
 0x4da   :  { %4937 = vst.msk [vmem:[%s14006_s14 + $0x296] sm:$0x1] %vm1357_vm10, %v4921_v35  ;;  %4969 = vst.msk [vmem:[%s14006_s14 + $0x297] sm:$0x1] %vm1357_vm10, %v4953_v36  ;;  %v5367_v40 = vld [vmem:[%s14007_s15 + $0x99] sm:$0x1]  ;;  %2344 = vrot.lane.b32.xlu1 %v4702_v45, %s5848_s1 }
 0x4db   :  { %5001 = vst.msk [vmem:[%s14006_s14 + $0x298] sm:$0x1] %vm1357_vm10, %v4985_v37  ;;  %5351 = vst.msk [vmem:[%s14007_s15 + $0x90] sm:$0x1] %vm1357_vm10, %v5335_v39  ;;  %v5399_v42 = vld [vmem:[%s14007_s15 + $0x9a] sm:$0x1] }
 0x4dc   :  { %2676 = vst.msk [vmem:[%s14006_s14] sm:$0xff] %vm1637_vm11, %v5009_v38  ;;  %5021 = vst.msk [vmem:[%s14006_s14 + $0x18] sm:$0xff] %vm1637_vm11, %v5009_v38  ;;  %v5431_v43 = vld [vmem:[%s14007_s15 + $0x9b] sm:$0x1]  ;;  %v5463_v44 = vld [vmem:[%s14007_s15 + $0x94] sm:$0x1] }
 0x4dd   :  { %5033 = vst.msk [vmem:[%s14006_s14 + $0x30] sm:$0xff] %vm1637_vm11, %v5009_v38  ;;  %5045 = vst.msk [vmem:[%s14006_s14 + $0x48] sm:$0xff] %vm1637_vm11, %v5009_v38  ;;  %v5495_v46 = vld [vmem:[%s14007_s15 + $0x95] sm:$0x1]  ;;  %v5527_v47 = vld [vmem:[%s14007_s15 + $0x96] sm:$0x1] }
 0x4de   :  { %5057 = vst.msk [vmem:[%s14006_s14 + $0x60] sm:$0xff] %vm1637_vm11, %v5009_v38  ;;  %5069 = vst.msk [vmem:[%s14006_s14 + $0x78] sm:$0xff] %vm1637_vm11, %v5009_v38  ;;  %v5559_v13 = vld [vmem:[%s14007_s15 + $0x97] sm:$0x1]  ;;  %v5010_v15 = vld [vmem:[%s14006_s14 + $0x98] sm:$0xff] }
 0x4df   :  { %5383 = vst.msk [vmem:[%s14007_s15 + $0x91] sm:$0x1] %vm1357_vm10, %v5367_v40  ;;  %5415 = vst.msk [vmem:[%s14007_s15 + $0x92] sm:$0x1] %vm1357_vm10, %v5399_v42  ;;  %v5011_v16 = vld [vmem:[%s14006_s14 + $0xa0] sm:$0x1] }
 0x4e0   :  { %5329 = vst.msk [vmem:[%s14007_s15 + $0x2bc] sm:$0xff] %vm1324_vm9, %v3373_v41  ;;  %v5017_v17 = vld [vmem:[%s14006_s14 + $0xa0] sm:$0x1]  ;;  %v5012_v24 = vld [vmem:[%s14006_s14 + $0x288] sm:$0xff]  ;;  %v5591_v25 = vld [vmem:[%s14007_s15 + $0x98] sm:$0x1] }
 0x4e1   :  { %5447 = vst.msk [vmem:[%s14007_s15 + $0x93] sm:$0x1] %vm1357_vm10, %v5431_v43  ;;  %5479 = vst.msk [vmem:[%s14007_s15 + $0x9c] sm:$0x1] %vm1357_vm10, %v5463_v44  ;;  %v5029_v18 = vld [vmem:[%s14006_s14 + $0xa0] sm:$0x1] }
 0x4e2   :  { %5511 = vst.msk [vmem:[%s14007_s15 + $0x9d] sm:$0x1] %vm1357_vm10, %v5495_v46  ;;  %5543 = vst.msk [vmem:[%s14007_s15 + $0x9e] sm:$0x1] %vm1357_vm10, %v5527_v47  ;;  %v5041_v19 = vld [vmem:[%s14006_s14 + $0xa0] sm:$0x1] }
 0x4e3   :  { %5575 = vst.msk [vmem:[%s14007_s15 + $0x9f] sm:$0x1] %vm1357_vm10, %v5559_v13  ;;  %2678 = vst.msk [vmem:[%s14006_s14 + $0x10] sm:$0x1] %vm1357_vm10, %v5011_v16  ;;  %v5053_v20 = vld [vmem:[%s14006_s14 + $0xa0] sm:$0x1] }
 0x4e4   :  { %2677 = vst.msk [vmem:[%s14006_s14 + $0x8] sm:$0xff] %vm1637_vm11, %v5010_v15  ;;  %5022 = vst.msk [vmem:[%s14006_s14 + $0x20] sm:$0xff] %vm1637_vm11, %v5010_v15  ;;  %v5065_v23 = vld [vmem:[%s14006_s14 + $0xa0] sm:$0x1]  ;;  %v5337_v26 = vld [vmem:[%s14007_s15 + $0xc8] sm:$0x1] }
 0x4e5   :  { %5023 = vst.msk [vmem:[%s14006_s14 + $0x28] sm:$0x1] %vm1357_vm10, %v5017_v17  ;;  %5035 = vst.msk [vmem:[%s14006_s14 + $0x40] sm:$0x1] %vm1357_vm10, %v5029_v18  ;;  %v5369_v27 = vld [vmem:[%s14007_s15 + $0xc9] sm:$0x1] }
 0x4e6   :  { %5034 = vst.msk [vmem:[%s14006_s14 + $0x38] sm:$0xff] %vm1637_vm11, %v5010_v15  ;;  %5046 = vst.msk [vmem:[%s14006_s14 + $0x50] sm:$0xff] %vm1637_vm11, %v5010_v15  ;;  %v5401_v28 = vld [vmem:[%s14007_s15 + $0xca] sm:$0x1]  ;;  %v5013_v48 = vld [vmem:[%s14006_s14 + $0x290] sm:$0xff] }
 0x4e7   :  { %5058 = vst.msk [vmem:[%s14006_s14 + $0x68] sm:$0xff] %vm1637_vm11, %v5010_v15  ;;  %5070 = vst.msk [vmem:[%s14006_s14 + $0x80] sm:$0xff] %vm1637_vm11, %v5010_v15  ;;  %v5014_v49 = vld [vmem:[%s14006_s14 + $0x298] sm:$0x1]  ;;  %v5433_v58 = vld [vmem:[%s14007_s15 + $0xcb] sm:$0x1] }
 0x4e8   :  { %5047 = vst.msk [vmem:[%s14006_s14 + $0x58] sm:$0x1] %vm1357_vm10, %v5041_v19  ;;  %5059 = vst.msk [vmem:[%s14006_s14 + $0x70] sm:$0x1] %vm1357_vm10, %v5053_v20  ;;  %v5020_v50 = vld [vmem:[%s14006_s14 + $0x298] sm:$0x1] }
 0x4e9   :  { %5328 = vst.msk [vmem:[%s14007_s15 + $0x2a4] sm:$0xff] %vm1324_vm9, %v3371_v21  ;;  %5331 = vst.msk [vmem:[%s14007_s15 + $0x2ec] sm:$0xff] %vm1324_vm9, %v3377_v22  ;;  %v5032_v51 = vld [vmem:[%s14006_s14 + $0x298] sm:$0x1]  ;;  %v5689_v57 = vld [vmem:[%s14007_s15 + $0x90] sm:$0xff] }
 0x4ea   :  { %5071 = vst.msk [vmem:[%s14006_s14 + $0x88] sm:$0x1] %vm1357_vm10, %v5065_v23  ;;  %5607 = vst.msk [vmem:[%s14007_s15 + $0xa0] sm:$0x1] %vm1357_vm10, %v5591_v25  ;;  %v5044_v52 = vld [vmem:[%s14006_s14 + $0x298] sm:$0x1] }
 0x4eb   :  { %2679 = vst.msk [vmem:[%s14006_s14 + $0x1f8] sm:$0xff] %vm1637_vm11, %v5012_v24  ;;  %5024 = vst.msk [vmem:[%s14006_s14 + $0x210] sm:$0xff] %vm1637_vm11, %v5012_v24  ;;  %v5056_v53 = vld [vmem:[%s14006_s14 + $0x298] sm:$0x1]  ;;  %v5465_v60 = vld [vmem:[%s14007_s15 + $0xc4] sm:$0x1] }
 0x4ec   :  { %5036 = vst.msk [vmem:[%s14006_s14 + $0x228] sm:$0xff] %vm1637_vm11, %v5012_v24  ;;  %5048 = vst.msk [vmem:[%s14006_s14 + $0x240] sm:$0xff] %vm1637_vm11, %v5012_v24  ;;  %v5068_v56 = vld [vmem:[%s14006_s14 + $0x298] sm:$0x1]  ;;  %v5497_v61 = vld [vmem:[%s14007_s15 + $0xc5] sm:$0x1] }
 0x4ed   :  { %5060 = vst.msk [vmem:[%s14006_s14 + $0x258] sm:$0xff] %vm1637_vm11, %v5012_v24  ;;  %5072 = vst.msk [vmem:[%s14006_s14 + $0x270] sm:$0xff] %vm1637_vm11, %v5012_v24  ;;  %v5690_v59 = vld [vmem:[%s14007_s15 + $0x98] sm:$0xff]  ;;  %v5529_v62 = vld [vmem:[%s14007_s15 + $0xc6] sm:$0x1] }
 0x4ee   :  { %5353 = vst.msk [vmem:[%s14007_s15 + $0xc0] sm:$0x1] %vm1357_vm10, %v5337_v26  ;;  %5385 = vst.msk [vmem:[%s14007_s15 + $0xc1] sm:$0x1] %vm1357_vm10, %v5369_v27  ;;  %v5561_v63 = vld [vmem:[%s14007_s15 + $0xc7] sm:$0x1] }
 0x4ef   :  { %5417 = vst.msk [vmem:[%s14007_s15 + $0xc2] sm:$0x1] %vm1357_vm10, %v5401_v28  ;;  %2681 = vst.msk [vmem:[%s14006_s14 + $0x208] sm:$0x1] %vm1357_vm10, %v5014_v49  ;;  %v5593_v0 = vld [vmem:[%s14007_s15 + $0xc8] sm:$0x1] }
 0x4f0   :  { %2680 = vst.msk [vmem:[%s14006_s14 + $0x200] sm:$0xff] %vm1637_vm11, %v5013_v48  ;;  %5025 = vst.msk [vmem:[%s14006_s14 + $0x218] sm:$0xff] %vm1637_vm11, %v5013_v48  ;;  %v5339_v1 = vld [vmem:[%s14007_s15 + $0xf8] sm:$0x1]  ;;  %v5371_v2 = vld [vmem:[%s14007_s15 + $0xf9] sm:$0x1] }
 0x4f1   :  { %5026 = vst.msk [vmem:[%s14006_s14 + $0x220] sm:$0x1] %vm1357_vm10, %v5020_v50  ;;  %5038 = vst.msk [vmem:[%s14006_s14 + $0x238] sm:$0x1] %vm1357_vm10, %v5032_v51  ;;  %v5403_v3 = vld [vmem:[%s14007_s15 + $0xfa] sm:$0x1] }
 0x4f2   :  { %5037 = vst.msk [vmem:[%s14006_s14 + $0x230] sm:$0xff] %vm1637_vm11, %v5013_v48  ;;  %5049 = vst.msk [vmem:[%s14006_s14 + $0x248] sm:$0xff] %vm1637_vm11, %v5013_v48  ;;  %v5691_v6 = vld [vmem:[%s14007_s15 + $0xa0] sm:$0x1]  ;;  %v5435_v7 = vld [vmem:[%s14007_s15 + $0xfb] sm:$0x1] }
 0x4f3   :  { %5061 = vst.msk [vmem:[%s14006_s14 + $0x260] sm:$0xff] %vm1637_vm11, %v5013_v48  ;;  %5073 = vst.msk [vmem:[%s14006_s14 + $0x278] sm:$0xff] %vm1637_vm11, %v5013_v48  ;;  %v5467_v8 = vld [vmem:[%s14007_s15 + $0xf4] sm:$0x1]  ;;  %v5499_v9 = vld [vmem:[%s14007_s15 + $0xf5] sm:$0x1] }
 0x4f4   :  { %5050 = vst.msk [vmem:[%s14006_s14 + $0x250] sm:$0x1] %vm1357_vm10, %v5044_v52  ;;  %5062 = vst.msk [vmem:[%s14006_s14 + $0x268] sm:$0x1] %vm1357_vm10, %v5056_v53  ;;  %v5531_v10 = vld [vmem:[%s14007_s15 + $0xf6] sm:$0x1] }
 0x4f5   :  { %5330 = vst.msk [vmem:[%s14007_s15 + $0x2d4] sm:$0xff] %vm1324_vm9, %v3375_v54  ;;  %5333 = vst.msk [vmem:[%s14007_s15 + $0x31c] sm:$0xff] %vm1324_vm9, %v3381_v55  ;;  %v5563_v11 = vld [vmem:[%s14007_s15 + $0xf7] sm:$0x1]  ;;  %v5595_v12 = vld [vmem:[%s14007_s15 + $0xf8] sm:$0x1] }
 0x4f6   :  { %5074 = vst.msk [vmem:[%s14006_s14 + $0x280] sm:$0x1] %vm1357_vm10, %v5068_v56  ;;  %5449 = vst.msk [vmem:[%s14007_s15 + $0xc3] sm:$0x1] %vm1357_vm10, %v5433_v58  ;;  %v5341_v14 = vld [vmem:[%s14007_s15 + $0x128] sm:$0x1] }
 0x4f7   :  { %5695 = vst.msk [vmem:[%s14007_s15 + $0x150] sm:$0xff] %vm1637_vm11, %v5689_v57  ;;  %5696 = vst.msk [vmem:[%s14007_s15 + $0x158] sm:$0xff] %vm1637_vm11, %v5690_v59  ;;  %v5373_v29 = vld [vmem:[%s14007_s15 + $0x129] sm:$0x1]  ;;  %v5405_v30 = vld [vmem:[%s14007_s15 + $0x12a] sm:$0x1] }
 0x4f8   :  { %5481 = vst.msk [vmem:[%s14007_s15 + $0xcc] sm:$0x1] %vm1357_vm10, %v5465_v60  ;;  %5513 = vst.msk [vmem:[%s14007_s15 + $0xcd] sm:$0x1] %vm1357_vm10, %v5497_v61  ;;  %v5437_v31 = vld [vmem:[%s14007_s15 + $0x12b] sm:$0x1] }
 0x4f9   :  { %5545 = vst.msk [vmem:[%s14007_s15 + $0xce] sm:$0x1] %vm1357_vm10, %v5529_v62  ;;  %5577 = vst.msk [vmem:[%s14007_s15 + $0xcf] sm:$0x1] %vm1357_vm10, %v5561_v63  ;;  %v5469_v32 = vld [vmem:[%s14007_s15 + $0x124] sm:$0x1] }
 0x4fa   :  { %5609 = vst.msk [vmem:[%s14007_s15 + $0xd0] sm:$0x1] %vm1357_vm10, %v5593_v0  ;;  %5355 = vst.msk [vmem:[%s14007_s15 + $0xf0] sm:$0x1] %vm1357_vm10, %v5339_v1  ;;  %v5501_v34 = vld [vmem:[%s14007_s15 + $0x125] sm:$0x1] }
 0x4fb   :  { %5387 = vst.msk [vmem:[%s14007_s15 + $0xf1] sm:$0x1] %vm1357_vm10, %v5371_v2  ;;  %5419 = vst.msk [vmem:[%s14007_s15 + $0xf2] sm:$0x1] %vm1357_vm10, %v5403_v3  ;;  %v5533_v35 = vld [vmem:[%s14007_s15 + $0x126] sm:$0x1] }
 0x4fc   :  { %5332 = vst.msk [vmem:[%s14007_s15 + $0x304] sm:$0xff] %vm1324_vm9, %v3379_v4  ;;  %4106 = vst.msk [vmem:[%s14005_s13 + $0x334] sm:$0xff] %vm1324_vm9, %v1307_v5  ;;  %v5565_v36 = vld [vmem:[%s14007_s15 + $0x127] sm:$0x1]  ;;  %v5597_v37 = vld [vmem:[%s14007_s15 + $0x128] sm:$0x1] }
 0x4fd   :  { %5697 = vst.msk [vmem:[%s14007_s15 + $0x160] sm:$0x1] %vm1357_vm10, %v5691_v6  ;;  %5451 = vst.msk [vmem:[%s14007_s15 + $0xf3] sm:$0x1] %vm1357_vm10, %v5435_v7  ;;  %v5623_v33 = vld [vmem:[%s14007_s15 + $0xc0] sm:$0xff] }
 0x4fe   :  { %5483 = vst.msk [vmem:[%s14007_s15 + $0xfc] sm:$0x1] %vm1357_vm10, %v5467_v8  ;;  %5515 = vst.msk [vmem:[%s14007_s15 + $0xfd] sm:$0x1] %vm1357_vm10, %v5499_v9  ;;  %v5343_v38 = vld [vmem:[%s14007_s15 + $0x290] sm:$0x1] }
 0x4ff   :  { %5547 = vst.msk [vmem:[%s14007_s15 + $0xfe] sm:$0x1] %vm1357_vm10, %v5531_v10  ;;  %5579 = vst.msk [vmem:[%s14007_s15 + $0xff] sm:$0x1] %vm1357_vm10, %v5563_v11  ;;  %v5375_v42 = vld [vmem:[%s14007_s15 + $0x291] sm:$0x1] }
 0x500   :  { %5611 = vst.msk [vmem:[%s14007_s15 + $0x100] sm:$0x1] %vm1357_vm10, %v5595_v12  ;;  %5357 = vst.msk [vmem:[%s14007_s15 + $0x120] sm:$0x1] %vm1357_vm10, %v5341_v14  ;;  %v5624_v39 = vld [vmem:[%s14007_s15 + $0xc8] sm:$0xff] }
 0x501   :  { %5389 = vst.msk [vmem:[%s14007_s15 + $0x121] sm:$0x1] %vm1357_vm10, %v5373_v29  ;;  %5421 = vst.msk [vmem:[%s14007_s15 + $0x122] sm:$0x1] %vm1357_vm10, %v5405_v30  ;;  %v5625_v40 = vld [vmem:[%s14007_s15 + $0xd0] sm:$0x1] }
 0x502   :  { %5453 = vst.msk [vmem:[%s14007_s15 + $0x123] sm:$0x1] %vm1357_vm10, %v5437_v31  ;;  %5485 = vst.msk [vmem:[%s14007_s15 + $0x12c] sm:$0x1] %vm1357_vm10, %v5469_v32  ;;  %v5715_v41 = vld [vmem:[%s14007_s15 + $0xd0] sm:$0x1] }
 0x503   :  { %3711 = vst.msk [vmem:[%s14007_s15] sm:$0xff] %vm1637_vm11, %v5623_v33  ;;  %5719 = vst.msk [vmem:[%s14007_s15 + $0x180] sm:$0xff] %vm1637_vm11, %v5623_v33  ;;  %v5407_v43 = vld [vmem:[%s14007_s15 + $0x292] sm:$0x1]  ;;  %v5439_v44 = vld [vmem:[%s14007_s15 + $0x293] sm:$0x1] }
 0x504   :  { %5517 = vst.msk [vmem:[%s14007_s15 + $0x12d] sm:$0x1] %vm1357_vm10, %v5501_v34  ;;  %5549 = vst.msk [vmem:[%s14007_s15 + $0x12e] sm:$0x1] %vm1357_vm10, %v5533_v35  ;;  %v5641_v45 = vld [vmem:[%s14007_s15 + $0xf0] sm:$0xff] }
 0x505   :  { %5581 = vst.msk [vmem:[%s14007_s15 + $0x12f] sm:$0x1] %vm1357_vm10, %v5565_v36  ;;  %5613 = vst.msk [vmem:[%s14007_s15 + $0x130] sm:$0x1] %vm1357_vm10, %v5597_v37  ;;  %v5471_v46 = vld [vmem:[%s14007_s15 + $0x28c] sm:$0x1] }
 0x506   :  { %5359 = vst.msk [vmem:[%s14007_s15 + $0x288] sm:$0x1] %vm1357_vm10, %v5343_v38  ;;  %3713 = vst.msk [vmem:[%s14007_s15 + $0x10] sm:$0x1] %vm1357_vm10, %v5625_v40  ;;  %v5503_v47 = vld [vmem:[%s14007_s15 + $0x28d] sm:$0x1] }
 0x507   :  { %3712 = vst.msk [vmem:[%s14007_s15 + $0x8] sm:$0xff] %vm1637_vm11, %v5624_v39  ;;  %5720 = vst.msk [vmem:[%s14007_s15 + $0x188] sm:$0xff] %vm1637_vm11, %v5624_v39  ;;  %v5642_v13 = vld [vmem:[%s14007_s15 + $0xf8] sm:$0xff]  ;;  %v5535_v15 = vld [vmem:[%s14007_s15 + $0x28e] sm:$0x1] }
 0x508   :  { %5721 = vst.msk [vmem:[%s14007_s15 + $0x190] sm:$0x1] %vm1357_vm10, %v5715_v41  ;;  %5391 = vst.msk [vmem:[%s14007_s15 + $0x289] sm:$0x1] %vm1357_vm10, %v5375_v42  ;;  %v5567_v16 = vld [vmem:[%s14007_s15 + $0x28f] sm:$0x1] }
 0x509   :  { %5423 = vst.msk [vmem:[%s14007_s15 + $0x28a] sm:$0x1] %vm1357_vm10, %v5407_v43  ;;  %5455 = vst.msk [vmem:[%s14007_s15 + $0x28b] sm:$0x1] %vm1357_vm10, %v5439_v44  ;;  %v5643_v17 = vld [vmem:[%s14007_s15 + $0x100] sm:$0x1] }
 0x50a   :  { %5647 = vst.msk [vmem:[%s14007_s15 + $0x30] sm:$0xff] %vm1637_vm11, %v5641_v45  ;;  %5743 = vst.msk [vmem:[%s14007_s15 + $0x1b0] sm:$0xff] %vm1637_vm11, %v5641_v45  ;;  %v5739_v18 = vld [vmem:[%s14007_s15 + $0x100] sm:$0x1]  ;;  %v5599_v19 = vld [vmem:[%s14007_s15 + $0x290] sm:$0x1] }
 0x50b   :  { %5487 = vst.msk [vmem:[%s14007_s15 + $0x294] sm:$0x1] %vm1357_vm10, %v5471_v46  ;;  %5519 = vst.msk [vmem:[%s14007_s15 + $0x295] sm:$0x1] %vm1357_vm10, %v5503_v47  ;;  %v5665_v20 = vld [vmem:[%s14007_s15 + $0x120] sm:$0xff] }
 0x50c   :  { %5648 = vst.msk [vmem:[%s14007_s15 + $0x38] sm:$0xff] %vm1637_vm11, %v5642_v13  ;;  %5744 = vst.msk [vmem:[%s14007_s15 + $0x1b8] sm:$0xff] %vm1637_vm11, %v5642_v13  ;;  %v5345_v21 = vld [vmem:[%s14007_s15 + $0x2c0] sm:$0x1]  ;;  %v5377_v22 = vld [vmem:[%s14007_s15 + $0x2c1] sm:$0x1] }
 0x50d   :  { %5551 = vst.msk [vmem:[%s14007_s15 + $0x296] sm:$0x1] %vm1357_vm10, %v5535_v15  ;;  %5583 = vst.msk [vmem:[%s14007_s15 + $0x297] sm:$0x1] %vm1357_vm10, %v5567_v16  ;;  %v5409_v23 = vld [vmem:[%s14007_s15 + $0x2c2] sm:$0x1] }
 0x50e   :  { %5649 = vst.msk [vmem:[%s14007_s15 + $0x40] sm:$0x1] %vm1357_vm10, %v5643_v17  ;;  %5745 = vst.msk [vmem:[%s14007_s15 + $0x1c0] sm:$0x1] %vm1357_vm10, %v5739_v18  ;;  %v5441_v24 = vld [vmem:[%s14007_s15 + $0x2c3] sm:$0x1] }
 0x50f   :  { %5615 = vst.msk [vmem:[%s14007_s15 + $0x298] sm:$0x1] %vm1357_vm10, %v5599_v19  ;;  %5361 = vst.msk [vmem:[%s14007_s15 + $0x2b8] sm:$0x1] %vm1357_vm10, %v5345_v21  ;;  %v5473_v25 = vld [vmem:[%s14007_s15 + $0x2bc] sm:$0x1] }
 0x510   :  { %5671 = vst.msk [vmem:[%s14007_s15 + $0x60] sm:$0xff] %vm1637_vm11, %v5665_v20  ;;  %5767 = vst.msk [vmem:[%s14007_s15 + $0x1e0] sm:$0xff] %vm1637_vm11, %v5665_v20  ;;  %v5666_v26 = vld [vmem:[%s14007_s15 + $0x128] sm:$0xff]  ;;  %v5667_v27 = vld [vmem:[%s14007_s15 + $0x130] sm:$0x1] }
 0x511   :  { %5393 = vst.msk [vmem:[%s14007_s15 + $0x2b9] sm:$0x1] %vm1357_vm10, %v5377_v22  ;;  %v5763_v28 = vld [vmem:[%s14007_s15 + $0x130] sm:$0x1]  ;;  %5425 = vst.msk [vmem:[%s14007_s15 + $0x2ba] sm:$0x1] %vm1357_vm10, %v5409_v23 }
 0x512   :  { %5457 = vst.msk [vmem:[%s14007_s15 + $0x2bb] sm:$0x1] %vm1357_vm10, %v5441_v24  ;;  %5489 = vst.msk [vmem:[%s14007_s15 + $0x2c4] sm:$0x1] %vm1357_vm10, %v5473_v25  ;;  %v5505_v48 = vld [vmem:[%s14007_s15 + $0x2bd] sm:$0x1] }
 0x513   :  { %5672 = vst.msk [vmem:[%s14007_s15 + $0x68] sm:$0xff] %vm1637_vm11, %v5666_v26  ;;  %5768 = vst.msk [vmem:[%s14007_s15 + $0x1e8] sm:$0xff] %vm1637_vm11, %v5666_v26  ;;  %v5537_v49 = vld [vmem:[%s14007_s15 + $0x2be] sm:$0x1]  ;;  %v5569_v50 = vld [vmem:[%s14007_s15 + $0x2bf] sm:$0x1] }
 0x514   :  { %5673 = vst.msk [vmem:[%s14007_s15 + $0x70] sm:$0x1] %vm1357_vm10, %v5667_v27  ;;  %5769 = vst.msk [vmem:[%s14007_s15 + $0x1f0] sm:$0x1] %vm1357_vm10, %v5763_v28  ;;  %v5692_v51 = vld [vmem:[%s14007_s15 + $0x288] sm:$0xff]  ;;  %v5693_v57 = vld [vmem:[%s14007_s15 + $0x290] sm:$0xff] }
 0x515   :  { %5521 = vst.msk [vmem:[%s14007_s15 + $0x2c5] sm:$0x1] %vm1357_vm10, %v5505_v48  ;;  %5553 = vst.msk [vmem:[%s14007_s15 + $0x2c6] sm:$0x1] %vm1357_vm10, %v5537_v49  ;;  %v5601_v52 = vld [vmem:[%s14007_s15 + $0x2c0] sm:$0x1] }
 0x516   :  { %5585 = vst.msk [vmem:[%s14007_s15 + $0x2c7] sm:$0x1] %vm1357_vm10, %v5569_v50  ;;  %v5344_v53 = vld [vmem:[%s14007_s15 + $0x2a8] sm:$0x1]  ;;  %5617 = vst.msk [vmem:[%s14007_s15 + $0x2c8] sm:$0x1] %vm1357_vm10, %v5601_v52 }
 0x517   :  { %5698 = vst.msk [vmem:[%s14007_s15 + $0x348] sm:$0xff] %vm1637_vm11, %v5692_v51  ;;  %v5376_v54 = vld [vmem:[%s14007_s15 + $0x2a9] sm:$0x1]  ;;  %v5408_v55 = vld [vmem:[%s14007_s15 + $0x2aa] sm:$0x1]  ;;  %5699 = vst.msk [vmem:[%s14007_s15 + $0x350] sm:$0xff] %vm1637_vm11, %v5693_v57 }
 0x518   :  { %5360 = vst.msk [vmem:[%s14007_s15 + $0x2a0] sm:$0x1] %vm1357_vm10, %v5344_v53  ;;  %v5440_v56 = vld [vmem:[%s14007_s15 + $0x2ab] sm:$0x1]  ;;  %5392 = vst.msk [vmem:[%s14007_s15 + $0x2a1] sm:$0x1] %vm1357_vm10, %v5376_v54 }
 0x519   :  { %5424 = vst.msk [vmem:[%s14007_s15 + $0x2a2] sm:$0x1] %vm1357_vm10, %v5408_v55  ;;  %5456 = vst.msk [vmem:[%s14007_s15 + $0x2a3] sm:$0x1] %vm1357_vm10, %v5440_v56  ;;  %v5472_v58 = vld [vmem:[%s14007_s15 + $0x2a4] sm:$0x1] }
 0x51a   :  { %v5504_v59 = vld [vmem:[%s14007_s15 + $0x2a5] sm:$0x1]  ;;  %v5694_v60 = vld [vmem:[%s14007_s15 + $0x298] sm:$0x1]  ;;  %5488 = vst.msk [vmem:[%s14007_s15 + $0x2ac] sm:$0x1] %vm1357_vm10, %v5472_v58 }
 0x51b   :  { %5520 = vst.msk [vmem:[%s14007_s15 + $0x2ad] sm:$0x1] %vm1357_vm10, %v5504_v59  ;;  %v5536_v61 = vld [vmem:[%s14007_s15 + $0x2a6] sm:$0x1]  ;;  %v5568_v62 = vld [vmem:[%s14007_s15 + $0x2a7] sm:$0x1] }
 0x51c   :  { %5700 = vst.msk [vmem:[%s14007_s15 + $0x358] sm:$0x1] %vm1357_vm10, %v5694_v60  ;;  %5552 = vst.msk [vmem:[%s14007_s15 + $0x2ae] sm:$0x1] %vm1357_vm10, %v5536_v61  ;;  %v5600_v63 = vld [vmem:[%s14007_s15 + $0x2a8] sm:$0x1] }
 0x51d   :  { %5584 = vst.msk [vmem:[%s14007_s15 + $0x2af] sm:$0x1] %vm1357_vm10, %v5568_v62  ;;  %v5347_v0 = vld [vmem:[%s14007_s15 + $0x2f0] sm:$0x1]  ;;  %v5379_v1 = vld [vmem:[%s14007_s15 + $0x2f1] sm:$0x1] }
 0x51e   :  { %v5626_v2 = vld [vmem:[%s14007_s15 + $0x2b8] sm:$0xff]  ;;  %5616 = vst.msk [vmem:[%s14007_s15 + $0x2b0] sm:$0x1] %vm1357_vm10, %v5600_v63  ;;  %5363 = vst.msk [vmem:[%s14007_s15 + $0x2e8] sm:$0x1] %vm1357_vm10, %v5347_v0  ;;  %v5627_v8 = vld [vmem:[%s14007_s15 + $0x2c0] sm:$0xff] }
 0x51f   :  { %5395 = vst.msk [vmem:[%s14007_s15 + $0x2e9] sm:$0x1] %vm1357_vm10, %v5379_v1  ;;  %v5411_v3 = vld [vmem:[%s14007_s15 + $0x2f2] sm:$0x1]  ;;  %v5443_v4 = vld [vmem:[%s14007_s15 + $0x2f3] sm:$0x1] }
 0x520   :  { %3714 = vst.msk [vmem:[%s14007_s15 + $0x1f8] sm:$0xff] %vm1637_vm11, %v5626_v2  ;;  %5722 = vst.msk [vmem:[%s14007_s15 + $0x378] sm:$0xff] %vm1637_vm11, %v5626_v2  ;;  %v5475_v5 = vld [vmem:[%s14007_s15 + $0x2ec] sm:$0x1]  ;;  %v5507_v6 = vld [vmem:[%s14007_s15 + $0x2ed] sm:$0x1] }
 0x521   :  { %5427 = vst.msk [vmem:[%s14007_s15 + $0x2ea] sm:$0x1] %vm1357_vm10, %v5411_v3  ;;  %5459 = vst.msk [vmem:[%s14007_s15 + $0x2eb] sm:$0x1] %vm1357_vm10, %v5443_v4  ;;  %v5539_v7 = vld [vmem:[%s14007_s15 + $0x2ee] sm:$0x1]  ;;  %v3383_v4 = vpop.permute.xlu1 %3382 }
 0x522   :  { %5491 = vst.msk [vmem:[%s14007_s15 + $0x2f4] sm:$0x1] %vm1357_vm10, %v5475_v5  ;;  %5523 = vst.msk [vmem:[%s14007_s15 + $0x2f5] sm:$0x1] %vm1357_vm10, %v5507_v6  ;;  %v5571_v9 = vld [vmem:[%s14007_s15 + $0x2ef] sm:$0x1] }
 0x523   :  { %5555 = vst.msk [vmem:[%s14007_s15 + $0x2f6] sm:$0x1] %vm1357_vm10, %v5539_v7  ;;  %v5603_v10 = vld [vmem:[%s14007_s15 + $0x2f0] sm:$0x1]  ;;  %v5628_v11 = vld [vmem:[%s14007_s15 + $0x2c8] sm:$0x1] }
 0x524   :  { %3715 = vst.msk [vmem:[%s14007_s15 + $0x200] sm:$0xff] %vm1637_vm11, %v5627_v8  ;;  %v5718_v12 = vld [vmem:[%s14007_s15 + $0x2c8] sm:$0x1]  ;;  %5723 = vst.msk [vmem:[%s14007_s15 + $0x380] sm:$0xff] %vm1637_vm11, %v5627_v8  ;;  %v5346_v14 = vld [vmem:[%s14007_s15 + $0x2d8] sm:$0x1] }
 0x525   :  { %5587 = vst.msk [vmem:[%s14007_s15 + $0x2f7] sm:$0x1] %vm1357_vm10, %v5571_v9  ;;  %5619 = vst.msk [vmem:[%s14007_s15 + $0x2f8] sm:$0x1] %vm1357_vm10, %v5603_v10  ;;  %v5704_v29 = vld [vmem:[%s14007_s15 + $0x2a0] sm:$0xff]  ;;  %v5705_v35 = vld [vmem:[%s14007_s15 + $0x2a8] sm:$0xff] }
 0x526   :  { %3716 = vst.msk [vmem:[%s14007_s15 + $0x208] sm:$0x1] %vm1357_vm10, %v5628_v11  ;;  %5724 = vst.msk [vmem:[%s14007_s15 + $0x388] sm:$0x1] %vm1357_vm10, %v5718_v12  ;;  %v5378_v30 = vld [vmem:[%s14007_s15 + $0x2d9] sm:$0x1] }
 0x527   :  { %5362 = vst.msk [vmem:[%s14007_s15 + $0x2d0] sm:$0x1] %vm1357_vm10, %v5346_v14  ;;  %v5410_v31 = vld [vmem:[%s14007_s15 + $0x2da] sm:$0x1]  ;;  %5394 = vst.msk [vmem:[%s14007_s15 + $0x2d1] sm:$0x1] %vm1357_vm10, %v5378_v30  ;;  %v2323_v5 = vpop.permute.xlu0 %2322 }
 0x528   :  { %5710 = vst.msk [vmem:[%s14007_s15 + $0x360] sm:$0xff] %vm1637_vm11, %v5704_v29  ;;  %v5442_v32 = vld [vmem:[%s14007_s15 + $0x2db] sm:$0x1]  ;;  %v5474_v33 = vld [vmem:[%s14007_s15 + $0x2d4] sm:$0x1]  ;;  %5711 = vst.msk [vmem:[%s14007_s15 + $0x368] sm:$0xff] %vm1637_vm11, %v5705_v35 }
 0x529   :  { %5426 = vst.msk [vmem:[%s14007_s15 + $0x2d2] sm:$0x1] %vm1357_vm10, %v5410_v31  ;;  %v5506_v34 = vld [vmem:[%s14007_s15 + $0x2d5] sm:$0x1]  ;;  %5458 = vst.msk [vmem:[%s14007_s15 + $0x2d3] sm:$0x1] %vm1357_vm10, %v5442_v32 }
 0x52a   :  { %5490 = vst.msk [vmem:[%s14007_s15 + $0x2dc] sm:$0x1] %vm1357_vm10, %v5474_v33  ;;  %5522 = vst.msk [vmem:[%s14007_s15 + $0x2dd] sm:$0x1] %vm1357_vm10, %v5506_v34  ;;  %v5538_v36 = vld [vmem:[%s14007_s15 + $0x2d6] sm:$0x1]  ;;  %v2321_v6 = vpop.permute.xlu1 %2320 }
 0x52b   :  { %v5570_v37 = vld [vmem:[%s14007_s15 + $0x2d7] sm:$0x1]  ;;  %v5706_v38 = vld [vmem:[%s14007_s15 + $0x2b0] sm:$0x1]  ;;  %5554 = vst.msk [vmem:[%s14007_s15 + $0x2de] sm:$0x1] %vm1357_vm10, %v5538_v36 }
 0x52c   :  { %5586 = vst.msk [vmem:[%s14007_s15 + $0x2df] sm:$0x1] %vm1357_vm10, %v5570_v37  ;;  %v5602_v39 = vld [vmem:[%s14007_s15 + $0x2d8] sm:$0x1]  ;;  %v5349_v40 = vld [vmem:[%s14007_s15 + $0x320] sm:$0x1]  ;;  %v2327_v7 = vpop.permute.xlu0 %2326 }
 0x52d   :  { %5712 = vst.msk [vmem:[%s14007_s15 + $0x370] sm:$0x1] %vm1357_vm10, %v5706_v38  ;;  %v5644_v41 = vld [vmem:[%s14007_s15 + $0x2e8] sm:$0xff]  ;;  %5618 = vst.msk [vmem:[%s14007_s15 + $0x2e0] sm:$0x1] %vm1357_vm10, %v5602_v39  ;;  %v5645_v47 = vld [vmem:[%s14007_s15 + $0x2f0] sm:$0xff] }
 0x52e   :  { %5365 = vst.msk [vmem:[%s14007_s15 + $0x318] sm:$0x1] %vm1357_vm10, %v5349_v40  ;;  %v5381_v42 = vld [vmem:[%s14007_s15 + $0x321] sm:$0x1]  ;;  %v5413_v43 = vld [vmem:[%s14007_s15 + $0x322] sm:$0x1] }
 0x52f   :  { %5650 = vst.msk [vmem:[%s14007_s15 + $0x228] sm:$0xff] %vm1637_vm11, %v5644_v41  ;;  %5746 = vst.msk [vmem:[%s14007_s15 + $0x3a8] sm:$0xff] %vm1637_vm11, %v5644_v41  ;;  %v5445_v44 = vld [vmem:[%s14007_s15 + $0x323] sm:$0x1]  ;;  %v5477_v45 = vld [vmem:[%s14007_s15 + $0x31c] sm:$0x1] }
 0x530   :  { %5397 = vst.msk [vmem:[%s14007_s15 + $0x319] sm:$0x1] %vm1357_vm10, %v5381_v42  ;;  %5429 = vst.msk [vmem:[%s14007_s15 + $0x31a] sm:$0x1] %vm1357_vm10, %v5413_v43  ;;  %v5509_v46 = vld [vmem:[%s14007_s15 + $0x31d] sm:$0x1] }
 0x531   :  { %v5646_v13 = vld [vmem:[%s14007_s15 + $0x2f8] sm:$0x1]  ;;  %5461 = vst.msk [vmem:[%s14007_s15 + $0x31b] sm:$0x1] %vm1357_vm10, %v5445_v44  ;;  %5493 = vst.msk [vmem:[%s14007_s15 + $0x324] sm:$0x1] %vm1357_vm10, %v5477_v45 }
 0x532   :  { %v5742_v15 = vld [vmem:[%s14007_s15 + $0x2f8] sm:$0x1]  ;;  %5525 = vst.msk [vmem:[%s14007_s15 + $0x325] sm:$0x1] %vm1357_vm10, %v5509_v46  ;;  %5652 = vst.msk [vmem:[%s14007_s15 + $0x238] sm:$0x1] %vm1357_vm10, %v5646_v13  ;;  %v2325_v11 = vpop.permute.xlu1 %2324 }
 0x533   :  { %5651 = vst.msk [vmem:[%s14007_s15 + $0x230] sm:$0xff] %vm1637_vm11, %v5645_v47  ;;  %5747 = vst.msk [vmem:[%s14007_s15 + $0x3b0] sm:$0xff] %vm1637_vm11, %v5645_v47  ;;  %v5541_v16 = vld [vmem:[%s14007_s15 + $0x31e] sm:$0x1]  ;;  %v5573_v17 = vld [vmem:[%s14007_s15 + $0x31f] sm:$0x1]  ;;  %v2331_v30 = vpop.permute.xlu0 %2330 }
 0x534   :  { %5748 = vst.msk [vmem:[%s14007_s15 + $0x3b8] sm:$0x1] %vm1357_vm10, %v5742_v15  ;;  %v5605_v18 = vld [vmem:[%s14007_s15 + $0x320] sm:$0x1]  ;;  %5557 = vst.msk [vmem:[%s14007_s15 + $0x326] sm:$0x1] %vm1357_vm10, %v5541_v16 }
 0x535   :  { %5589 = vst.msk [vmem:[%s14007_s15 + $0x327] sm:$0x1] %vm1357_vm10, %v5573_v17  ;;  %5621 = vst.msk [vmem:[%s14007_s15 + $0x328] sm:$0x1] %vm1357_vm10, %v5605_v18  ;;  %v5348_v19 = vld [vmem:[%s14007_s15 + $0x308] sm:$0x1] }
 0x536   :  { %v5380_v20 = vld [vmem:[%s14007_s15 + $0x309] sm:$0x1]  ;;  %v5412_v21 = vld [vmem:[%s14007_s15 + $0x30a] sm:$0x1]  ;;  %v5632_v22 = vld [vmem:[%s14007_s15 + $0x2d0] sm:$0xff]  ;;  %5334 = vst.msk [vmem:[%s14007_s15 + $0x334] sm:$0xff] %vm1324_vm9, %v3383_v4 }
 0x537   :  { %5364 = vst.msk [vmem:[%s14007_s15 + $0x300] sm:$0x1] %vm1357_vm10, %v5348_v19  ;;  %5396 = vst.msk [vmem:[%s14007_s15 + $0x301] sm:$0x1] %vm1357_vm10, %v5380_v20  ;;  %v5444_v23 = vld [vmem:[%s14007_s15 + $0x30b] sm:$0x1] }
 0x538   :  { %5428 = vst.msk [vmem:[%s14007_s15 + $0x302] sm:$0x1] %vm1357_vm10, %v5412_v21  ;;  %v5476_v24 = vld [vmem:[%s14007_s15 + $0x304] sm:$0x1]  ;;  %v5633_v25 = vld [vmem:[%s14007_s15 + $0x2d8] sm:$0xff]  ;;  %v2329_v40 = vpop.permute.xlu1 %2328 }
 0x539   :  { %5638 = vst.msk [vmem:[%s14007_s15 + $0x210] sm:$0xff] %vm1637_vm11, %v5632_v22  ;;  %5734 = vst.msk [vmem:[%s14007_s15 + $0x390] sm:$0xff] %vm1637_vm11, %v5632_v22  ;;  %v5508_v26 = vld [vmem:[%s14007_s15 + $0x305] sm:$0x1]  ;;  %v5540_v27 = vld [vmem:[%s14007_s15 + $0x306] sm:$0x1] }
 0x53a   :  { %5460 = vst.msk [vmem:[%s14007_s15 + $0x303] sm:$0x1] %vm1357_vm10, %v5444_v23  ;;  %5492 = vst.msk [vmem:[%s14007_s15 + $0x30c] sm:$0x1] %vm1357_vm10, %v5476_v24  ;;  %v5634_v28 = vld [vmem:[%s14007_s15 + $0x2e0] sm:$0x1]  ;;  %v2339_v44 = vpop.permute.xlu0 %2338 }
 0x53b   :  { %5639 = vst.msk [vmem:[%s14007_s15 + $0x218] sm:$0xff] %vm1637_vm11, %v5633_v25  ;;  %v5730_v48 = vld [vmem:[%s14007_s15 + $0x2e0] sm:$0x1]  ;;  %5735 = vst.msk [vmem:[%s14007_s15 + $0x398] sm:$0xff] %vm1637_vm11, %v5633_v25  ;;  %v5572_v49 = vld [vmem:[%s14007_s15 + $0x307] sm:$0x1] }
 0x53c   :  { %5524 = vst.msk [vmem:[%s14007_s15 + $0x30d] sm:$0x1] %vm1357_vm10, %v5508_v26  ;;  %5556 = vst.msk [vmem:[%s14007_s15 + $0x30e] sm:$0x1] %vm1357_vm10, %v5540_v27  ;;  %v5604_v50 = vld [vmem:[%s14007_s15 + $0x308] sm:$0x1]  ;;  %v2337_v20 = vpop.permute.xlu1 %2336 }
 0x53d   :  { %5640 = vst.msk [vmem:[%s14007_s15 + $0x220] sm:$0x1] %vm1357_vm10, %v5634_v28  ;;  %5736 = vst.msk [vmem:[%s14007_s15 + $0x3a0] sm:$0x1] %vm1357_vm10, %v5730_v48  ;;  %v4122_v51 = vld [vmem:[%s14005_s13 + $0x338] sm:$0x1] }
 0x53e   :  { %5588 = vst.msk [vmem:[%s14007_s15 + $0x30f] sm:$0x1] %vm1357_vm10, %v5572_v49  ;;  %v4154_v52 = vld [vmem:[%s14005_s13 + $0x337] sm:$0x1]  ;;  %v5668_v53 = vld [vmem:[%s14007_s15 + $0x318] sm:$0xff]  ;;  %v5669_v59 = vld [vmem:[%s14007_s15 + $0x320] sm:$0xff]  ;;  %v2343_v24 = vpop.permute.xlu0 %2342 }
 0x53f   :  { %5620 = vst.msk [vmem:[%s14007_s15 + $0x310] sm:$0x1] %vm1357_vm10, %v5604_v50  ;;  %4138 = vst.msk [vmem:[%s14005_s13 + $0x330] sm:$0x1] %vm1357_vm10, %v4122_v51  ;;  %v4186_v54 = vld [vmem:[%s14005_s13 + $0x336] sm:$0x1] }
 0x540   :  { %4170 = vst.msk [vmem:[%s14005_s13 + $0x331] sm:$0x1] %vm1357_vm10, %v4154_v52  ;;  %v4218_v55 = vld [vmem:[%s14005_s13 + $0x335] sm:$0x1]  ;;  %4202 = vst.msk [vmem:[%s14005_s13 + $0x332] sm:$0x1] %vm1357_vm10, %v4186_v54 }
 0x541   :  { %5674 = vst.msk [vmem:[%s14007_s15 + $0x258] sm:$0xff] %vm1637_vm11, %v5668_v53  ;;  %5770 = vst.msk [vmem:[%s14007_s15 + $0x3d8] sm:$0xff] %vm1637_vm11, %v5668_v53  ;;  %v4250_v56 = vld [vmem:[%s14005_s13 + $0x33a] sm:$0x1]  ;;  %v4282_v57 = vld [vmem:[%s14005_s13 + $0x339] sm:$0x1] }
 0x542   :  { %4234 = vst.msk [vmem:[%s14005_s13 + $0x333] sm:$0x1] %vm1357_vm10, %v4218_v55  ;;  %v4314_v58 = vld [vmem:[%s14005_s13 + $0x338] sm:$0x1]  ;;  %v5670_v60 = vld [vmem:[%s14007_s15 + $0x328] sm:$0x1] }
 0x543   :  { %v5766_v61 = vld [vmem:[%s14007_s15 + $0x328] sm:$0x1]  ;;  %4266 = vst.msk [vmem:[%s14005_s13 + $0x33c] sm:$0x1] %vm1357_vm10, %v4250_v56  ;;  %4298 = vst.msk [vmem:[%s14005_s13 + $0x33d] sm:$0x1] %vm1357_vm10, %v4282_v57 }
 0x544   :  { %4330 = vst.msk [vmem:[%s14005_s13 + $0x33e] sm:$0x1] %vm1357_vm10, %v4314_v58  ;;  %5676 = vst.msk [vmem:[%s14007_s15 + $0x268] sm:$0x1] %vm1357_vm10, %v5670_v60  ;;  %v4346_v62 = vld [vmem:[%s14005_s13 + $0x337] sm:$0x1] }
 0x545   :  { %5675 = vst.msk [vmem:[%s14007_s15 + $0x260] sm:$0xff] %vm1637_vm11, %v5669_v59  ;;  %5771 = vst.msk [vmem:[%s14007_s15 + $0x3e0] sm:$0xff] %vm1637_vm11, %v5669_v59  ;;  %v4378_v63 = vld [vmem:[%s14005_s13 + $0x336] sm:$0x1]  ;;  %v5656_v0 = vld [vmem:[%s14007_s15 + $0x300] sm:$0xff] }
 0x546   :  { %5772 = vst.msk [vmem:[%s14007_s15 + $0x3e8] sm:$0x1] %vm1357_vm10, %v5766_v61  ;;  %4362 = vst.msk [vmem:[%s14005_s13 + $0x33f] sm:$0x1] %vm1357_vm10, %v4346_v62  ;;  %v5657_v1 = vld [vmem:[%s14007_s15 + $0x308] sm:$0xff] }
 0x547   :  { %4394 = vst.msk [vmem:[%s14005_s13 + $0x340] sm:$0x1] %vm1357_vm10, %v4378_v63  ;;  %v5658_v2 = vld [vmem:[%s14007_s15 + $0x310] sm:$0x1]  ;;  %v5350_v8 = vld [vmem:[%s14007_s15 + $0x338] sm:$0x1]  ;;  %v2341_v53 = vpop.permute.xlu1 %2340 }
 0x548   :  { %5662 = vst.msk [vmem:[%s14007_s15 + $0x240] sm:$0xff] %vm1637_vm11, %v5656_v0  ;;  %5758 = vst.msk [vmem:[%s14007_s15 + $0x3c0] sm:$0xff] %vm1637_vm11, %v5656_v0  ;;  %v5754_v3 = vld [vmem:[%s14007_s15 + $0x310] sm:$0x1]  ;;  %v5382_v9 = vld [vmem:[%s14007_s15 + $0x339] sm:$0x1] }
 0x549   :  { %5663 = vst.msk [vmem:[%s14007_s15 + $0x248] sm:$0xff] %vm1637_vm11, %v5657_v1  ;;  %5759 = vst.msk [vmem:[%s14007_s15 + $0x3c8] sm:$0xff] %vm1637_vm11, %v5657_v1  ;;  %v5414_v10 = vld [vmem:[%s14007_s15 + $0x33a] sm:$0x1]  ;;  %v5446_v12 = vld [vmem:[%s14007_s15 + $0x33b] sm:$0x1]  ;;  %v2347_v57 = vpop.permute.xlu0 %2346 }
 0x54a   :  { %5664 = vst.msk [vmem:[%s14007_s15 + $0x250] sm:$0x1] %vm1357_vm10, %v5658_v2  ;;  %5760 = vst.msk [vmem:[%s14007_s15 + $0x3d0] sm:$0x1] %vm1357_vm10, %v5754_v3  ;;  %v5478_v14 = vld [vmem:[%s14007_s15 + $0x334] sm:$0x1] }
 0x54b   :  { %4707 = vst.msk [vmem:[%s14006_s14 + $0xc4] sm:$0xff] %vm1324_vm9, %v2323_v5  ;;  %4706 = vst.msk [vmem:[%s14006_s14 + $0xac] sm:$0xff] %vm1324_vm9, %v2321_v6  ;;  %v5510_v29 = vld [vmem:[%s14007_s15 + $0x335] sm:$0x1]  ;;  %v5542_v31 = vld [vmem:[%s14007_s15 + $0x336] sm:$0x1] }
 0x54c   :  { %4709 = vst.msk [vmem:[%s14006_s14 + $0xf4] sm:$0xff] %vm1324_vm9, %v2327_v7  ;;  %4708 = vst.msk [vmem:[%s14006_s14 + $0xdc] sm:$0xff] %vm1324_vm9, %v2325_v11  ;;  %v5574_v32 = vld [vmem:[%s14007_s15 + $0x337] sm:$0x1]  ;;  %v5606_v33 = vld [vmem:[%s14007_s15 + $0x338] sm:$0x1]  ;;  %v2345_v3 = vpop.permute.xlu1 %2344 }
 0x54d   :  { %5366 = vst.msk [vmem:[%s14007_s15 + $0x330] sm:$0x1] %vm1357_vm10, %v5350_v8  ;;  %5398 = vst.msk [vmem:[%s14007_s15 + $0x331] sm:$0x1] %vm1357_vm10, %v5382_v9 }
 0x54e   :  { %5430 = vst.msk [vmem:[%s14007_s15 + $0x332] sm:$0x1] %vm1357_vm10, %v5414_v10  ;;  %5462 = vst.msk [vmem:[%s14007_s15 + $0x333] sm:$0x1] %vm1357_vm10, %v5446_v12 }
 0x54f   :  { %5494 = vst.msk [vmem:[%s14007_s15 + $0x33c] sm:$0x1] %vm1357_vm10, %v5478_v14  ;;  %5526 = vst.msk [vmem:[%s14007_s15 + $0x33d] sm:$0x1] %vm1357_vm10, %v5510_v29 }
 0x550   :  { %4711 = vst.msk [vmem:[%s14006_s14 + $0x124] sm:$0xff] %vm1324_vm9, %v2331_v30  ;;  %4710 = vst.msk [vmem:[%s14006_s14 + $0x10c] sm:$0xff] %vm1324_vm9, %v2329_v40 }
 0x551   :  { %5558 = vst.msk [vmem:[%s14007_s15 + $0x33e] sm:$0x1] %vm1357_vm10, %v5542_v31  ;;  %5590 = vst.msk [vmem:[%s14007_s15 + $0x33f] sm:$0x1] %vm1357_vm10, %v5574_v32 }
 0x552   :  { %5622 = vst.msk [vmem:[%s14007_s15 + $0x340] sm:$0x1] %vm1357_vm10, %v5606_v33  ;;  %v4723_v34 = vld [vmem:[%s14006_s14 + $0xc4] sm:$0x1]  ;;  %v4722_v37 = vld [vmem:[%s14006_s14 + $0xac] sm:$0x1] }
 0x553   :  { %v4755_v35 = vld [vmem:[%s14006_s14 + $0xc4] sm:$0x1]  ;;  %v4754_v38 = vld [vmem:[%s14006_s14 + $0xac] sm:$0x1]  ;;  %4739 = vst.msk [vmem:[%s14006_s14 + $0xc0] sm:$0x1] %vm1357_vm10, %v4723_v34 }
 0x554   :  { %v4787_v36 = vld [vmem:[%s14006_s14 + $0xc4] sm:$0x1]  ;;  %v4786_v39 = vld [vmem:[%s14006_s14 + $0xac] sm:$0x1]  ;;  %4771 = vst.msk [vmem:[%s14006_s14 + $0xc1] sm:$0x1] %vm1357_vm10, %v4755_v35 }
 0x555   :  { %4803 = vst.msk [vmem:[%s14006_s14 + $0xc2] sm:$0x1] %vm1357_vm10, %v4787_v36  ;;  %4738 = vst.msk [vmem:[%s14006_s14 + $0xa8] sm:$0x1] %vm1357_vm10, %v4722_v37  ;;  %v4818_v41 = vld [vmem:[%s14006_s14 + $0xac] sm:$0x1] }
 0x556   :  { %4770 = vst.msk [vmem:[%s14006_s14 + $0xa9] sm:$0x1] %vm1357_vm10, %v4754_v38  ;;  %4802 = vst.msk [vmem:[%s14006_s14 + $0xaa] sm:$0x1] %vm1357_vm10, %v4786_v39  ;;  %v4850_v42 = vld [vmem:[%s14006_s14 + $0xb3] sm:$0x1] }
 0x557   :  { %v4882_v43 = vld [vmem:[%s14006_s14 + $0xb3] sm:$0x1]  ;;  %4834 = vst.msk [vmem:[%s14006_s14 + $0xab] sm:$0x1] %vm1357_vm10, %v4818_v41  ;;  %4866 = vst.msk [vmem:[%s14006_s14 + $0xb4] sm:$0x1] %vm1357_vm10, %v4850_v42 }
 0x558   :  { %4898 = vst.msk [vmem:[%s14006_s14 + $0xb5] sm:$0x1] %vm1357_vm10, %v4882_v43  ;;  %v4914_v45 = vld [vmem:[%s14006_s14 + $0xb3] sm:$0x1]  ;;  %v4819_v13 = vld [vmem:[%s14006_s14 + $0xc4] sm:$0x1] }
 0x559   :  { %v4946_v46 = vld [vmem:[%s14006_s14 + $0xb3] sm:$0x1]  ;;  %4715 = vst.msk [vmem:[%s14006_s14 + $0x2bc] sm:$0xff] %vm1324_vm9, %v2339_v44  ;;  %v4851_v15 = vld [vmem:[%s14006_s14 + $0xcb] sm:$0x1]  ;;  %4714 = vst.msk [vmem:[%s14006_s14 + $0x2a4] sm:$0xff] %vm1324_vm9, %v2337_v20 }
 0x55a   :  { %v4978_v47 = vld [vmem:[%s14006_s14 + $0xb3] sm:$0x1]  ;;  %4930 = vst.msk [vmem:[%s14006_s14 + $0xb6] sm:$0x1] %vm1357_vm10, %v4914_v45  ;;  %4962 = vst.msk [vmem:[%s14006_s14 + $0xb7] sm:$0x1] %vm1357_vm10, %v4946_v46 }
 0x55b   :  { %4994 = vst.msk [vmem:[%s14006_s14 + $0xb8] sm:$0x1] %vm1357_vm10, %v4978_v47  ;;  %v4883_v16 = vld [vmem:[%s14006_s14 + $0xcb] sm:$0x1]  ;;  %4835 = vst.msk [vmem:[%s14006_s14 + $0xc3] sm:$0x1] %vm1357_vm10, %v4819_v13 }
 0x55c   :  { %4867 = vst.msk [vmem:[%s14006_s14 + $0xcc] sm:$0x1] %vm1357_vm10, %v4851_v15  ;;  %4899 = vst.msk [vmem:[%s14006_s14 + $0xcd] sm:$0x1] %vm1357_vm10, %v4883_v16  ;;  %v4915_v17 = vld [vmem:[%s14006_s14 + $0xcb] sm:$0x1] }
 0x55d   :  { %v4947_v18 = vld [vmem:[%s14006_s14 + $0xcb] sm:$0x1]  ;;  %v5680_v21 = vld [vmem:[%s14007_s15 + $0x330] sm:$0xff]  ;;  %4931 = vst.msk [vmem:[%s14006_s14 + $0xce] sm:$0x1] %vm1357_vm10, %v4915_v17  ;;  %v5681_v25 = vld [vmem:[%s14007_s15 + $0x338] sm:$0xff] }
 0x55e   :  { %v4979_v19 = vld [vmem:[%s14006_s14 + $0xcb] sm:$0x1]  ;;  %4963 = vst.msk [vmem:[%s14006_s14 + $0xcf] sm:$0x1] %vm1357_vm10, %v4947_v18  ;;  %v4724_v22 = vld [vmem:[%s14006_s14 + $0xdc] sm:$0x1] }
 0x55f   :  { %4995 = vst.msk [vmem:[%s14006_s14 + $0xd0] sm:$0x1] %vm1357_vm10, %v4979_v19  ;;  %v4756_v23 = vld [vmem:[%s14006_s14 + $0xdc] sm:$0x1]  ;;  %v5682_v26 = vld [vmem:[%s14007_s15 + $0x340] sm:$0x1] }
 0x560   :  { %5686 = vst.msk [vmem:[%s14007_s15 + $0x270] sm:$0xff] %vm1637_vm11, %v5680_v21  ;;  %v4788_v27 = vld [vmem:[%s14006_s14 + $0xdc] sm:$0x1]  ;;  %5687 = vst.msk [vmem:[%s14007_s15 + $0x278] sm:$0xff] %vm1637_vm11, %v5681_v25  ;;  %v4852_v48 = vld [vmem:[%s14006_s14 + $0xe3] sm:$0x1] }
 0x561   :  { %4740 = vst.msk [vmem:[%s14006_s14 + $0xd8] sm:$0x1] %vm1357_vm10, %v4724_v22  ;;  %4772 = vst.msk [vmem:[%s14006_s14 + $0xd9] sm:$0x1] %vm1357_vm10, %v4756_v23  ;;  %v4820_v28 = vld [vmem:[%s14006_s14 + $0xdc] sm:$0x1] }
 0x562   :  { %4717 = vst.msk [vmem:[%s14006_s14 + $0x2ec] sm:$0xff] %vm1324_vm9, %v2343_v24  ;;  %v4884_v49 = vld [vmem:[%s14006_s14 + $0xe3] sm:$0x1]  ;;  %v4725_v54 = vld [vmem:[%s14006_s14 + $0xf4] sm:$0x1]  ;;  %4716 = vst.msk [vmem:[%s14006_s14 + $0x2d4] sm:$0xff] %vm1324_vm9, %v2341_v53 }
 0x563   :  { %5688 = vst.msk [vmem:[%s14007_s15 + $0x280] sm:$0x1] %vm1357_vm10, %v5682_v26  ;;  %4804 = vst.msk [vmem:[%s14006_s14 + $0xda] sm:$0x1] %vm1357_vm10, %v4788_v27  ;;  %v4916_v50 = vld [vmem:[%s14006_s14 + $0xe3] sm:$0x1] }
 0x564   :  { %4836 = vst.msk [vmem:[%s14006_s14 + $0xdb] sm:$0x1] %vm1357_vm10, %v4820_v28  ;;  %4868 = vst.msk [vmem:[%s14006_s14 + $0xe4] sm:$0x1] %vm1357_vm10, %v4852_v48  ;;  %v4948_v51 = vld [vmem:[%s14006_s14 + $0xe3] sm:$0x1] }
 0x565   :  { %4900 = vst.msk [vmem:[%s14006_s14 + $0xe5] sm:$0x1] %vm1357_vm10, %v4884_v49  ;;  %v4980_v52 = vld [vmem:[%s14006_s14 + $0xe3] sm:$0x1]  ;;  %4932 = vst.msk [vmem:[%s14006_s14 + $0xe6] sm:$0x1] %vm1357_vm10, %v4916_v50 }
 0x566   :  { %4964 = vst.msk [vmem:[%s14006_s14 + $0xe7] sm:$0x1] %vm1357_vm10, %v4948_v51  ;;  %4996 = vst.msk [vmem:[%s14006_s14 + $0xe8] sm:$0x1] %vm1357_vm10, %v4980_v52  ;;  %v4757_v55 = vld [vmem:[%s14006_s14 + $0xf4] sm:$0x1] }
 0x567   :  { %v4789_v56 = vld [vmem:[%s14006_s14 + $0xf4] sm:$0x1]  ;;  %4741 = vst.msk [vmem:[%s14006_s14 + $0xf0] sm:$0x1] %vm1357_vm10, %v4725_v54  ;;  %4773 = vst.msk [vmem:[%s14006_s14 + $0xf1] sm:$0x1] %vm1357_vm10, %v4757_v55 }
 0x568   :  { %4805 = vst.msk [vmem:[%s14006_s14 + $0xf2] sm:$0x1] %vm1357_vm10, %v4789_v56  ;;  %v4821_v58 = vld [vmem:[%s14006_s14 + $0xf4] sm:$0x1]  ;;  %v4853_v59 = vld [vmem:[%s14006_s14 + $0xfb] sm:$0x1] }
 0x569   :  { %v4885_v60 = vld [vmem:[%s14006_s14 + $0xfb] sm:$0x1]  ;;  %4719 = vst.msk [vmem:[%s14006_s14 + $0x31c] sm:$0xff] %vm1324_vm9, %v2347_v57  ;;  %v4726_v0 = vld [vmem:[%s14006_s14 + $0x10c] sm:$0x1]  ;;  %4718 = vst.msk [vmem:[%s14006_s14 + $0x304] sm:$0xff] %vm1324_vm9, %v2345_v3 }
 0x56a   :  { %4837 = vst.msk [vmem:[%s14006_s14 + $0xf3] sm:$0x1] %vm1357_vm10, %v4821_v58  ;;  %4869 = vst.msk [vmem:[%s14006_s14 + $0xfc] sm:$0x1] %vm1357_vm10, %v4853_v59  ;;  %v4917_v61 = vld [vmem:[%s14006_s14 + $0xfb] sm:$0x1] }
 0x56b   :  { %4901 = vst.msk [vmem:[%s14006_s14 + $0xfd] sm:$0x1] %vm1357_vm10, %v4885_v60  ;;  %v4949_v62 = vld [vmem:[%s14006_s14 + $0xfb] sm:$0x1]  ;;  %4933 = vst.msk [vmem:[%s14006_s14 + $0xfe] sm:$0x1] %vm1357_vm10, %v4917_v61 }
 0x56c   :  { %v4981_v63 = vld [vmem:[%s14006_s14 + $0xfb] sm:$0x1]  ;;  %4965 = vst.msk [vmem:[%s14006_s14 + $0xff] sm:$0x1] %vm1357_vm10, %v4949_v62  ;;  %v4758_v1 = vld [vmem:[%s14006_s14 + $0x10c] sm:$0x1] }
 0x56d   :  { %4997 = vst.msk [vmem:[%s14006_s14 + $0x100] sm:$0x1] %vm1357_vm10, %v4981_v63  ;;  %v4790_v2 = vld [vmem:[%s14006_s14 + $0x10c] sm:$0x1]  ;;  %4742 = vst.msk [vmem:[%s14006_s14 + $0x108] sm:$0x1] %vm1357_vm10, %v4726_v0 }
 0x56e   :  { %4774 = vst.msk [vmem:[%s14006_s14 + $0x109] sm:$0x1] %vm1357_vm10, %v4758_v1  ;;  %4806 = vst.msk [vmem:[%s14006_s14 + $0x10a] sm:$0x1] %vm1357_vm10, %v4790_v2  ;;  %v4822_v4 = vld [vmem:[%s14006_s14 + $0x10c] sm:$0x1] }
 0x56f   :  { %v4854_v5 = vld [vmem:[%s14006_s14 + $0x113] sm:$0x1]  ;;  %4838 = vst.msk [vmem:[%s14006_s14 + $0x10b] sm:$0x1] %vm1357_vm10, %v4822_v4  ;;  %v4727_v10 = vld [vmem:[%s14006_s14 + $0x124] sm:$0x1] }
 0x570   :  { %v4886_v6 = vld [vmem:[%s14006_s14 + $0x113] sm:$0x1]  ;;  %4870 = vst.msk [vmem:[%s14006_s14 + $0x114] sm:$0x1] %vm1357_vm10, %v4854_v5  ;;  %v4759_v11 = vld [vmem:[%s14006_s14 + $0x124] sm:$0x1] }
 0x571   :  { %4902 = vst.msk [vmem:[%s14006_s14 + $0x115] sm:$0x1] %vm1357_vm10, %v4886_v6  ;;  %v4918_v7 = vld [vmem:[%s14006_s14 + $0x113] sm:$0x1]  ;;  %v4791_v12 = vld [vmem:[%s14006_s14 + $0x124] sm:$0x1] }
 0x572   :  { %v4950_v8 = vld [vmem:[%s14006_s14 + $0x113] sm:$0x1]  ;;  %4934 = vst.msk [vmem:[%s14006_s14 + $0x116] sm:$0x1] %vm1357_vm10, %v4918_v7  ;;  %4743 = vst.msk [vmem:[%s14006_s14 + $0x120] sm:$0x1] %vm1357_vm10, %v4727_v10 }
 0x573   :  { %v4982_v9 = vld [vmem:[%s14006_s14 + $0x113] sm:$0x1]  ;;  %4966 = vst.msk [vmem:[%s14006_s14 + $0x117] sm:$0x1] %vm1357_vm10, %v4950_v8  ;;  %4775 = vst.msk [vmem:[%s14006_s14 + $0x121] sm:$0x1] %vm1357_vm10, %v4759_v11 }
 0x574   :  { %4998 = vst.msk [vmem:[%s14006_s14 + $0x118] sm:$0x1] %vm1357_vm10, %v4982_v9  ;;  %4807 = vst.msk [vmem:[%s14006_s14 + $0x122] sm:$0x1] %vm1357_vm10, %v4791_v12  ;;  %v4823_v14 = vld [vmem:[%s14006_s14 + $0x124] sm:$0x1] }
 0x575   :  { %v4855_v29 = vld [vmem:[%s14006_s14 + $0x12b] sm:$0x1]  ;;  %4839 = vst.msk [vmem:[%s14006_s14 + $0x123] sm:$0x1] %vm1357_vm10, %v4823_v14  ;;  %v4730_v34 = vld [vmem:[%s14006_s14 + $0x2a4] sm:$0x1] }
 0x576   :  { %v4887_v30 = vld [vmem:[%s14006_s14 + $0x12b] sm:$0x1]  ;;  %4871 = vst.msk [vmem:[%s14006_s14 + $0x12c] sm:$0x1] %vm1357_vm10, %v4855_v29  ;;  %v4762_v35 = vld [vmem:[%s14006_s14 + $0x2a4] sm:$0x1] }
 0x577   :  { %4903 = vst.msk [vmem:[%s14006_s14 + $0x12d] sm:$0x1] %vm1357_vm10, %v4887_v30  ;;  %v4919_v31 = vld [vmem:[%s14006_s14 + $0x12b] sm:$0x1]  ;;  %v4794_v36 = vld [vmem:[%s14006_s14 + $0x2a4] sm:$0x1] }
 0x578   :  { %v4951_v32 = vld [vmem:[%s14006_s14 + $0x12b] sm:$0x1]  ;;  %4935 = vst.msk [vmem:[%s14006_s14 + $0x12e] sm:$0x1] %vm1357_vm10, %v4919_v31  ;;  %4746 = vst.msk [vmem:[%s14006_s14 + $0x2a0] sm:$0x1] %vm1357_vm10, %v4730_v34 }
 0x579   :  { %v4983_v33 = vld [vmem:[%s14006_s14 + $0x12b] sm:$0x1]  ;;  %4967 = vst.msk [vmem:[%s14006_s14 + $0x12f] sm:$0x1] %vm1357_vm10, %v4951_v32  ;;  %4778 = vst.msk [vmem:[%s14006_s14 + $0x2a1] sm:$0x1] %vm1357_vm10, %v4762_v35 }
 0x57a   :  { %4999 = vst.msk [vmem:[%s14006_s14 + $0x130] sm:$0x1] %vm1357_vm10, %v4983_v33  ;;  %4810 = vst.msk [vmem:[%s14006_s14 + $0x2a2] sm:$0x1] %vm1357_vm10, %v4794_v36  ;;  %v4826_v37 = vld [vmem:[%s14006_s14 + $0x2a4] sm:$0x1] }
 0x57b   :  { %v4858_v38 = vld [vmem:[%s14006_s14 + $0x2ab] sm:$0x1]  ;;  %4842 = vst.msk [vmem:[%s14006_s14 + $0x2a3] sm:$0x1] %vm1357_vm10, %v4826_v37  ;;  %v4731_v43 = vld [vmem:[%s14006_s14 + $0x2bc] sm:$0x1] }
 0x57c   :  { %v4890_v39 = vld [vmem:[%s14006_s14 + $0x2ab] sm:$0x1]  ;;  %4874 = vst.msk [vmem:[%s14006_s14 + $0x2ac] sm:$0x1] %vm1357_vm10, %v4858_v38  ;;  %v4763_v44 = vld [vmem:[%s14006_s14 + $0x2bc] sm:$0x1] }
 0x57d   :  { %4906 = vst.msk [vmem:[%s14006_s14 + $0x2ad] sm:$0x1] %vm1357_vm10, %v4890_v39  ;;  %v4922_v40 = vld [vmem:[%s14006_s14 + $0x2ab] sm:$0x1]  ;;  %v4795_v45 = vld [vmem:[%s14006_s14 + $0x2bc] sm:$0x1] }
 0x57e   :  { %v4954_v41 = vld [vmem:[%s14006_s14 + $0x2ab] sm:$0x1]  ;;  %4938 = vst.msk [vmem:[%s14006_s14 + $0x2ae] sm:$0x1] %vm1357_vm10, %v4922_v40  ;;  %4747 = vst.msk [vmem:[%s14006_s14 + $0x2b8] sm:$0x1] %vm1357_vm10, %v4731_v43 }
 0x57f   :  { %v4986_v42 = vld [vmem:[%s14006_s14 + $0x2ab] sm:$0x1]  ;;  %4970 = vst.msk [vmem:[%s14006_s14 + $0x2af] sm:$0x1] %vm1357_vm10, %v4954_v41  ;;  %4779 = vst.msk [vmem:[%s14006_s14 + $0x2b9] sm:$0x1] %vm1357_vm10, %v4763_v44 }
 0x580   :  { %5002 = vst.msk [vmem:[%s14006_s14 + $0x2b0] sm:$0x1] %vm1357_vm10, %v4986_v42  ;;  %4811 = vst.msk [vmem:[%s14006_s14 + $0x2ba] sm:$0x1] %vm1357_vm10, %v4795_v45  ;;  %v4827_v46 = vld [vmem:[%s14006_s14 + $0x2bc] sm:$0x1] }
 0x581   :  { %v4859_v47 = vld [vmem:[%s14006_s14 + $0x2c3] sm:$0x1]  ;;  %4843 = vst.msk [vmem:[%s14006_s14 + $0x2bb] sm:$0x1] %vm1357_vm10, %v4827_v46  ;;  %v4732_v18 = vld [vmem:[%s14006_s14 + $0x2d4] sm:$0x1] }
 0x582   :  { %v4891_v13 = vld [vmem:[%s14006_s14 + $0x2c3] sm:$0x1]  ;;  %4875 = vst.msk [vmem:[%s14006_s14 + $0x2c4] sm:$0x1] %vm1357_vm10, %v4859_v47  ;;  %v4764_v19 = vld [vmem:[%s14006_s14 + $0x2d4] sm:$0x1] }
 0x583   :  { %4907 = vst.msk [vmem:[%s14006_s14 + $0x2c5] sm:$0x1] %vm1357_vm10, %v4891_v13  ;;  %v4923_v15 = vld [vmem:[%s14006_s14 + $0x2c3] sm:$0x1]  ;;  %v4796_v20 = vld [vmem:[%s14006_s14 + $0x2d4] sm:$0x1] }
 0x584   :  { %v4955_v16 = vld [vmem:[%s14006_s14 + $0x2c3] sm:$0x1]  ;;  %4939 = vst.msk [vmem:[%s14006_s14 + $0x2c6] sm:$0x1] %vm1357_vm10, %v4923_v15  ;;  %4748 = vst.msk [vmem:[%s14006_s14 + $0x2d0] sm:$0x1] %vm1357_vm10, %v4732_v18 }
 0x585   :  { %v4987_v17 = vld [vmem:[%s14006_s14 + $0x2c3] sm:$0x1]  ;;  %4971 = vst.msk [vmem:[%s14006_s14 + $0x2c7] sm:$0x1] %vm1357_vm10, %v4955_v16  ;;  %4780 = vst.msk [vmem:[%s14006_s14 + $0x2d1] sm:$0x1] %vm1357_vm10, %v4764_v19 }
 0x586   :  { %5003 = vst.msk [vmem:[%s14006_s14 + $0x2c8] sm:$0x1] %vm1357_vm10, %v4987_v17  ;;  %4812 = vst.msk [vmem:[%s14006_s14 + $0x2d2] sm:$0x1] %vm1357_vm10, %v4796_v20  ;;  %v4828_v21 = vld [vmem:[%s14006_s14 + $0x2d4] sm:$0x1] }
 0x587   :  { %v4860_v22 = vld [vmem:[%s14006_s14 + $0x2db] sm:$0x1]  ;;  %4844 = vst.msk [vmem:[%s14006_s14 + $0x2d3] sm:$0x1] %vm1357_vm10, %v4828_v21  ;;  %v4733_v27 = vld [vmem:[%s14006_s14 + $0x2ec] sm:$0x1] }
 0x588   :  { %v4892_v23 = vld [vmem:[%s14006_s14 + $0x2db] sm:$0x1]  ;;  %4876 = vst.msk [vmem:[%s14006_s14 + $0x2dc] sm:$0x1] %vm1357_vm10, %v4860_v22  ;;  %v4765_v28 = vld [vmem:[%s14006_s14 + $0x2ec] sm:$0x1] }
 0x589   :  { %4908 = vst.msk [vmem:[%s14006_s14 + $0x2dd] sm:$0x1] %vm1357_vm10, %v4892_v23  ;;  %v4924_v24 = vld [vmem:[%s14006_s14 + $0x2db] sm:$0x1]  ;;  %v4797_v48 = vld [vmem:[%s14006_s14 + $0x2ec] sm:$0x1] }
 0x58a   :  { %v4956_v25 = vld [vmem:[%s14006_s14 + $0x2db] sm:$0x1]  ;;  %4940 = vst.msk [vmem:[%s14006_s14 + $0x2de] sm:$0x1] %vm1357_vm10, %v4924_v24  ;;  %4749 = vst.msk [vmem:[%s14006_s14 + $0x2e8] sm:$0x1] %vm1357_vm10, %v4733_v27 }
 0x58b   :  { %v4988_v26 = vld [vmem:[%s14006_s14 + $0x2db] sm:$0x1]  ;;  %4972 = vst.msk [vmem:[%s14006_s14 + $0x2df] sm:$0x1] %vm1357_vm10, %v4956_v25  ;;  %4781 = vst.msk [vmem:[%s14006_s14 + $0x2e9] sm:$0x1] %vm1357_vm10, %v4765_v28 }
 0x58c   :  { %5004 = vst.msk [vmem:[%s14006_s14 + $0x2e0] sm:$0x1] %vm1357_vm10, %v4988_v26  ;;  %4813 = vst.msk [vmem:[%s14006_s14 + $0x2ea] sm:$0x1] %vm1357_vm10, %v4797_v48  ;;  %v4829_v49 = vld [vmem:[%s14006_s14 + $0x2ec] sm:$0x1] }
 0x58d   :  { %v4861_v50 = vld [vmem:[%s14006_s14 + $0x2f3] sm:$0x1]  ;;  %4845 = vst.msk [vmem:[%s14006_s14 + $0x2eb] sm:$0x1] %vm1357_vm10, %v4829_v49  ;;  %v4734_v55 = vld [vmem:[%s14006_s14 + $0x304] sm:$0x1] }
 0x58e   :  { %v4893_v51 = vld [vmem:[%s14006_s14 + $0x2f3] sm:$0x1]  ;;  %4877 = vst.msk [vmem:[%s14006_s14 + $0x2f4] sm:$0x1] %vm1357_vm10, %v4861_v50  ;;  %v4766_v56 = vld [vmem:[%s14006_s14 + $0x304] sm:$0x1] }
 0x58f   :  { %4909 = vst.msk [vmem:[%s14006_s14 + $0x2f5] sm:$0x1] %vm1357_vm10, %v4893_v51  ;;  %v4925_v52 = vld [vmem:[%s14006_s14 + $0x2f3] sm:$0x1]  ;;  %v4798_v57 = vld [vmem:[%s14006_s14 + $0x304] sm:$0x1] }
 0x590   :  { %v4957_v53 = vld [vmem:[%s14006_s14 + $0x2f3] sm:$0x1]  ;;  %4941 = vst.msk [vmem:[%s14006_s14 + $0x2f6] sm:$0x1] %vm1357_vm10, %v4925_v52  ;;  %4750 = vst.msk [vmem:[%s14006_s14 + $0x300] sm:$0x1] %vm1357_vm10, %v4734_v55 }
 0x591   :  { %v4989_v54 = vld [vmem:[%s14006_s14 + $0x2f3] sm:$0x1]  ;;  %4973 = vst.msk [vmem:[%s14006_s14 + $0x2f7] sm:$0x1] %vm1357_vm10, %v4957_v53  ;;  %4782 = vst.msk [vmem:[%s14006_s14 + $0x301] sm:$0x1] %vm1357_vm10, %v4766_v56 }
 0x592   :  { %5005 = vst.msk [vmem:[%s14006_s14 + $0x2f8] sm:$0x1] %vm1357_vm10, %v4989_v54  ;;  %4814 = vst.msk [vmem:[%s14006_s14 + $0x302] sm:$0x1] %vm1357_vm10, %v4798_v57  ;;  %v4830_v58 = vld [vmem:[%s14006_s14 + $0x304] sm:$0x1] }
 0x593   :  { %v4862_v59 = vld [vmem:[%s14006_s14 + $0x30b] sm:$0x1]  ;;  %4846 = vst.msk [vmem:[%s14006_s14 + $0x303] sm:$0x1] %vm1357_vm10, %v4830_v58  ;;  %v4735_v0 = vld [vmem:[%s14006_s14 + $0x31c] sm:$0x1] }
 0x594   :  { %v4894_v60 = vld [vmem:[%s14006_s14 + $0x30b] sm:$0x1]  ;;  %4878 = vst.msk [vmem:[%s14006_s14 + $0x30c] sm:$0x1] %vm1357_vm10, %v4862_v59  ;;  %v4767_v1 = vld [vmem:[%s14006_s14 + $0x31c] sm:$0x1] }
 0x595   :  { %4910 = vst.msk [vmem:[%s14006_s14 + $0x30d] sm:$0x1] %vm1357_vm10, %v4894_v60  ;;  %v4926_v61 = vld [vmem:[%s14006_s14 + $0x30b] sm:$0x1]  ;;  %v4799_v2 = vld [vmem:[%s14006_s14 + $0x31c] sm:$0x1] }
 0x596   :  { %v4958_v62 = vld [vmem:[%s14006_s14 + $0x30b] sm:$0x1]  ;;  %4942 = vst.msk [vmem:[%s14006_s14 + $0x30e] sm:$0x1] %vm1357_vm10, %v4926_v61  ;;  %4751 = vst.msk [vmem:[%s14006_s14 + $0x318] sm:$0x1] %vm1357_vm10, %v4735_v0 }
 0x597   :  { %v4990_v63 = vld [vmem:[%s14006_s14 + $0x30b] sm:$0x1]  ;;  %4974 = vst.msk [vmem:[%s14006_s14 + $0x30f] sm:$0x1] %vm1357_vm10, %v4958_v62  ;;  %4783 = vst.msk [vmem:[%s14006_s14 + $0x319] sm:$0x1] %vm1357_vm10, %v4767_v1 }
 0x598   :  { %5006 = vst.msk [vmem:[%s14006_s14 + $0x310] sm:$0x1] %vm1357_vm10, %v4990_v63  ;;  %4815 = vst.msk [vmem:[%s14006_s14 + $0x31a] sm:$0x1] %vm1357_vm10, %v4799_v2  ;;  %v4831_v3 = vld [vmem:[%s14006_s14 + $0x31c] sm:$0x1] }
 0x599   :  { %v4863_v4 = vld [vmem:[%s14006_s14 + $0x323] sm:$0x1]  ;;  %4847 = vst.msk [vmem:[%s14006_s14 + $0x31b] sm:$0x1] %vm1357_vm10, %v4831_v3 }
 0x59a   :  { %v4895_v5 = vld [vmem:[%s14006_s14 + $0x323] sm:$0x1]  ;;  %4879 = vst.msk [vmem:[%s14006_s14 + $0x324] sm:$0x1] %vm1357_vm10, %v4863_v4 }
 0x59b   :  { %4911 = vst.msk [vmem:[%s14006_s14 + $0x325] sm:$0x1] %vm1357_vm10, %v4895_v5  ;;  %v4927_v6 = vld [vmem:[%s14006_s14 + $0x323] sm:$0x1] }
 0x59c   :  { %v4959_v7 = vld [vmem:[%s14006_s14 + $0x323] sm:$0x1]  ;;  %4943 = vst.msk [vmem:[%s14006_s14 + $0x326] sm:$0x1] %vm1357_vm10, %v4927_v6 }
 0x59d   :  { %v4991_v8 = vld [vmem:[%s14006_s14 + $0x323] sm:$0x1]  ;;  %4975 = vst.msk [vmem:[%s14006_s14 + $0x327] sm:$0x1] %vm1357_vm10, %v4959_v7 }
 0x59e   :  { %5007 = vst.msk [vmem:[%s14006_s14 + $0x328] sm:$0x1] %vm1357_vm10, %v4991_v8 }
 0x59f   :  { %3927 = vsyncpa [#allocation3], 1 }
 0x5a0   :  { %3928 = vsyncpa [#allocation5], 1 }

</bundles_post_ra>
